<compile_context>
chip_gen: v6e
topology: v6e:2x2x1
jax: 0.10.0
libtpu: 0.0.40
codegen_flags: <defaults>
</compile_context>

<pallas_src>
import math
import functools

import jax
import jax.numpy as jnp
from jax.experimental import pallas as pl
from jax.experimental.pallas import tpu as pltpu


def _round_up(x, m):
    return ((x + m - 1) // m) * m


# ----------------------------------------------------------------------------
# Pallas kernels
# ----------------------------------------------------------------------------
def matmul_bias_kernel(x_ref, w_ref, b_ref, o_ref):
    """o = cast(x @ w + b).  x: (br, K) bf16, w: (K, G) bf16, b: (1, G) f32."""
    acc = jnp.dot(x_ref[...], w_ref[...], preferred_element_type=jnp.float32) + b_ref[...]
    o_ref[...] = acc.astype(o_ref.dtype)


def dual_matmul_bias_kernel(xa_ref, xb_ref, wa_ref, wb_ref, b_ref, o_ref):
    """o = cast(xa @ wa + xb @ wb + b).  Consumes the split (fwd/bwd) activation halves directly,
    so no concatenated activation tensor ever has to be materialized."""
    acc = jnp.dot(xa_ref[...], wa_ref[...], preferred_element_type=jnp.float32)
    acc = acc + jnp.dot(xb_ref[...], wb_ref[...], preferred_element_type=jnp.float32)
    o_ref[...] = (acc + b_ref[...]).astype(o_ref.dtype)


def lstm_chunk_kernel(lens_ref, gf_ref, gb_ref, whh_ref,
                      of_ref, ob_ref, hn_ref, cn_ref):
    """One chunk of Tc timesteps per grid iteration; BOTH directions interleaved in one body.
    grid = (time_chunk_idx,).  The backward chain's chunk is picked in reverse by the index_map
    and walked in reverse within the chunk with static indices.

    lens_ref: (B, 1) int32      sequence lengths (loaded once)
    gf_ref  : (Tc, B, 4Hp) bf16 fwd-direction precomputed gates (x@Wih + b)
    gb_ref  : (Tc, B, 4Hp) bf16 bwd-direction precomputed gates (time-reversed chunk)
    whh_ref : (2, Hp, 4Hp) bf16 recurrent weights [fwd, bwd]
    of_ref  : (Tc, B, Hp) bf16  fwd hidden outputs
    ob_ref  : (Tc, B, Hp) bf16  bwd hidden outputs
    hn_ref  : (2, B, Hp) f32    resident final hidden state [fwd, bwd]
    cn_ref  : (2, B, Hp) f32    resident final cell state   [fwd, bwd]
    """
    t = pl.program_id(0)
    nTc = pl.num_programs(0)
    Tc, B, FourH = gf_ref.shape
    H = FourH // 4          # this is the padded hidden size (multiple of 128)

    @pl.when(t == 0)
    def _():
        hn_ref[...] = jnp.zeros(hn_ref.shape, hn_ref.dtype)
        cn_ref[...] = jnp.zeros(cn_ref.shape, cn_ref.dtype)

    whh_f = whh_ref[0]                    # (Hp, 4Hp) bf16, loaded once per chunk
    whh_b = whh_ref[1]
    lens = lens_ref[...]                  # (B, 1) int32, loaded once

    h_f = hn_ref[0]                       # states carried in the resident output blocks
    c_f = cn_ref[0]
    h_b = hn_ref[1]
    c_b = cn_ref[1]

    t0_f = t * Tc                         # global time of this chunk's first step (forward)
    t0_b = (nTc - 1 - t) * Tc             # global time of the backward chunk's first step

    def cell(g_pre, h, c, whh, keep):
        # gate order (i, f, o, g): one contiguous sigmoid slab + one tanh slab; all slice
        # boundaries are multiples of 128 lanes because H is padded.
        gates = g_pre.astype(jnp.float32) + jnp.dot(
            h.astype(jnp.bfloat16), whh, preferred_element_type=jnp.float32)
        sig = jax.nn.sigmoid(gates[:, 0:3 * H])
        i_g = sig[:, 0:H]
        f_g = sig[:, H:2 * H]
        o_g = sig[:, 2 * H:3 * H]
        g_g = jnp.tanh(gates[:, 3 * H:4 * H])
        c_new = f_g * c + i_g * g_g
        h_new = o_g * jnp.tanh(c_new)
        h_u = jnp.where(keep, h_new, h)                       # freeze state after seq end
        c_u = jnp.where(keep, c_new, c)
        out = jnp.where(keep, h_new, jnp.zeros_like(h_new))   # padded positions -> 0
        return h_u, c_u, out

    # Static, fully-unrolled chunk loop; the two direction chains are independent, so the
    # scheduler interleaves their MXU / EUP work (2x ILP on single-TC v5e / v6e).
    # TODO(synk): for very large B*Hp, partially unroll (or shrink time_chunk) to bound vregs.
    for i in range(Tc):
        jf = i                 # forward walks the chunk 0 .. Tc-1
        jb = Tc - 1 - i        # backward walks the (already reversed) chunk Tc-1 .. 0
        keep_f = lens > (t0_f + jf)       # (B, 1) bool
        keep_b = lens > (t0_b + jb)
        h_f, c_f, o_f = cell(gf_ref[jf], h_f, c_f, whh_f, keep_f)
        h_b, c_b, o_b = cell(gb_ref[jb], h_b, c_b, whh_b, keep_b)
        of_ref[jf] = o_f.astype(of_ref.dtype)
        ob_ref[jb] = o_b.astype(ob_ref.dtype)

    hn_ref[0] = h_f
    cn_ref[0] = c_f
    hn_ref[1] = h_b
    cn_ref[1] = c_b


# ----------------------------------------------------------------------------
# Wrappers around pallas_call
# ----------------------------------------------------------------------------
def _pick_rows_block(Tp, B, target_rows=512):
    """Largest k dividing Tp with k*B <= target_rows -> row block that divides Tp*B exactly
    (no pad-then-slice copies of the big matmul operands/outputs)."""
    k = 1
    for cand in range(1, Tp + 1):
        if Tp % cand == 0 and cand * B <= target_rows:
            k = cand
    return k * B


def single_matmul(x, w, b, *, rows_block, out_dtype):
    """x: (N, K) bf16, w: (K, G) bf16, b: (1, G) f32 -> (N, G) out_dtype.  rows_block | N."""
    N, K = x.shape
    G = w.shape[-1]
    return pl.pallas_call(
        matmul_bias_kernel,
        out_shape=jax.ShapeDtypeStruct((N, G), out_dtype),
        grid_spec=pltpu.PrefetchScalarGridSpec(
            num_scalar_prefetch=0,
            grid=(N // rows_block,),
            in_specs=[
                pl.BlockSpec((rows_block, K), lambda r: (r, 0)),
                pl.BlockSpec((K, G), lambda r: (0, 0)),
                pl.BlockSpec((1, G), lambda r: (0, 0)),
            ],
            out_specs=pl.BlockSpec((rows_block, G), lambda r: (r, 0)),
        ),
        compiler_params=pltpu.CompilerParams(dimension_semantics=("parallel",)),
    )(x, w, b)


def dual_matmul(xa, xb, wa, wb, b, *, rows_block, out_dtype):
    """xa/xb: (N, K) bf16 (fwd/bwd halves), wa/wb: (K, G) bf16, b: (1, G) f32 -> (N, G)."""
    N, K = xa.shape
    G = wa.shape[-1]
    return pl.pallas_call(
        dual_matmul_bias_kernel,
        out_shape=jax.ShapeDtypeStruct((N, G), out_dtype),
        grid_spec=pltpu.PrefetchScalarGridSpec(
            num_scalar_prefetch=0,
            grid=(N // rows_block,),
            in_specs=[
                pl.BlockSpec((rows_block, K), lambda r: (r, 0)),
                pl.BlockSpec((rows_block, K), lambda r: (r, 0)),
                pl.BlockSpec((K, G), lambda r: (0, 0)),
                pl.BlockSpec((K, G), lambda r: (0, 0)),
                pl.BlockSpec((1, G), lambda r: (0, 0)),
            ],
            out_specs=pl.BlockSpec((rows_block, G), lambda r: (r, 0)),
        ),
        compiler_params=pltpu.CompilerParams(dimension_semantics=("parallel",)),
    )(xa, xb, wa, wb, b)


def lstm_bidir_layer(gates, lens, whh, *, time_chunk):
    """gates: (Tp, B, 8Hp) bf16 (cols [0:4Hp]=fwd, [4Hp:8Hp]=bwd).  lens: (B, 1) int32.
    whh: (2, Hp, 4Hp) bf16.  Returns (out_fwd (Tp,B,Hp) bf16, out_bwd (Tp,B,Hp) bf16,
    h_n (2,B,Hp) f32, c_n (2,B,Hp) f32)."""
    Tp, B, G8 = gates.shape
    FourH = G8 // 2
    Hp = FourH // 4
    Tc = time_chunk
    assert Tp % Tc == 0
    nTc = Tp // Tc

    out_shapes = (
        jax.ShapeDtypeStruct((Tp, B, Hp), jnp.bfloat16),   # fwd per-step hidden
        jax.ShapeDtypeStruct((Tp, B, Hp), jnp.bfloat16),   # bwd per-step hidden
        jax.ShapeDtypeStruct((2, B, Hp), jnp.float32),     # h_n [fwd, bwd]
        jax.ShapeDtypeStruct((2, B, Hp), jnp.float32),     # c_n [fwd, bwd]
    )

    # TODO(synk): on v7x the two directions could be split across the 2 TensorCores with
    # pl.core_map / CORE_PARALLEL; here we interleave them in one body (best for v5e/v6e).
    return pl.pallas_call(
        lstm_chunk_kernel,
        out_shape=out_shapes,
        grid_spec=pltpu.PrefetchScalarGridSpec(
            num_scalar_prefetch=0,
            grid=(nTc,),
            in_specs=[
                pl.BlockSpec((B, 1), lambda t: (0, 0)),                        # lengths (resident)
                pl.BlockSpec((Tc, B, FourH), lambda t: (t, 0, 0)),             # fwd gates chunk
                pl.BlockSpec((Tc, B, FourH), lambda t: (nTc - 1 - t, 0, 1)),   # bwd gates chunk
                pl.BlockSpec((2, Hp, FourH), lambda t: (0, 0, 0)),             # whh (resident)
            ],
            out_specs=[
                pl.BlockSpec((Tc, B, Hp), lambda t: (t, 0, 0)),
                pl.BlockSpec((Tc, B, Hp), lambda t: (nTc - 1 - t, 0, 0)),
                pl.BlockSpec((2, B, Hp), lambda t: (0, 0, 0)),                 # resident h_n acc
                pl.BlockSpec((2, B, Hp), lambda t: (0, 0, 0)),                 # resident c_n acc
            ],
        ),
        compiler_params=pltpu.CompilerParams(dimension_semantics=("arbitrary",)),
    )(lens, gates, gates, whh)


# ----------------------------------------------------------------------------
# Forward pass (plain-JAX glue: padding, one entry + one exit transpose, final slices)
# ----------------------------------------------------------------------------
@functools.partial(jax.jit, static_argnames=("n_layers", "output_size", "time_chunk"))
def base_encoder_forward(params, inputs, input_lengths, *, n_layers, output_size, time_chunk=16):
    """inputs: (B, T, H) float32 (batch_first, like the PyTorch module)."""
    assert inputs.ndim == 3
    B, T, H = inputs.shape
    Hp = params["whh_l0"].shape[1]          # padded hidden size (multiple of 128)
    Op = params["b_proj"].shape[-1]         # padded projection output size
    O = output_size

    B_pad = _round_up(B, 8)                 # fill f32 sublanes
    Tc = time_chunk
    Tp = _round_up(T, Tc)                   # whole chunks only

    # one transpose at entry -> time-major; pad batch / time / feature; bf16 for the MXU
    x = jnp.transpose(inputs, (1, 0, 2))
    x = jnp.pad(x, ((0, Tp - T), (0, B_pad - B), (0, Hp - H))).astype(jnp.bfloat16)

    # padded batch rows get length 0 -> always masked, outputs/states stay zero
    lens = jnp.pad(input_lengths.astype(jnp.int32), (0, B_pad - B))[:, None]   # (B_pad, 1)

    N = Tp * B_pad
    rows_block = _pick_rows_block(Tp, B_pad)

    out_f = out_b = None
    h_list, c_list = [], []
    for l in range(n_layers):
        if l == 0:
            gates2d = single_matmul(x.reshape(N, Hp), params["wih_l0"], params["b_l0"],
                                    rows_block=rows_block, out_dtype=jnp.bfloat16)
        else:
            gates2d = dual_matmul(out_f.reshape(N, Hp), out_b.reshape(N, Hp),
                                  params[f"wih_a_l{l}"], params[f"wih_b_l{l}"],
                                  params[f"b_l{l}"],
                                  rows_block=rows_block, out_dtype=jnp.bfloat16)
        gates = gates2d.reshape(Tp, B_pad, 8 * Hp)     # free reshape (contiguous merge/split)

        out_f, out_b, h_n, c_n = lstm_bidir_layer(gates, lens, params[f"whh_l{l}"],
                                                  time_chunk=Tc)
        h_list.append(h_n)                             # (2, B_pad, Hp): [fwd, bwd]
        c_list.append(c_n)
        # TODO(synk): inter-layer dropout (training mode) is skipped; this matches eval semantics.

    # lane-dense (Op % 128 == 0) projection on the split activation halves; slice afterwards
    logits2d = dual_matmul(out_f.reshape(N, Hp), out_b.reshape(N, Hp),
                           params["wproj_a"], params["wproj_b"], params["b_proj"],
                           rows_block=rows_block, out_dtype=jnp.float32)
    logits = jnp.transpose(logits2d.reshape(Tp, B_pad, Op)[:T, :B, :O], (1, 0, 2))   # (B, T, O)

    # NOTE: the PyTorch module returns `hidden` in length-sorted batch order (packing side
    # effect); we return it in the original batch order, layer-major [l0_f, l0_b, l1_f, ...].
    h_n = jnp.concatenate(h_list, axis=0)[:, :B, :H]   # (n_layers*2, B, H)
    c_n = jnp.concatenate(c_list, axis=0)[:, :B, :H]
    return logits, (h_n, c_n)


# ----------------------------------------------------------------------------
# Deterministic parameter init (shapes from nn.LSTM / nn.Linear in __init__), packed into the
# padded / fused kernel layout.  Loading a real PyTorch checkpoint requires the same gate-column
# remap (i,f,g,o)->(i,f,o,g), transposes and zero-padding applied here.
# ----------------------------------------------------------------------------
def _pack_gate_cols(w_pt, H, Hp):
    """PyTorch gate order (i,f,g,o) along the last axis (4H wide) -> kernel order (i,f,o,g),
    each gate slab zero-padded from H to Hp (-> 4Hp wide, gate boundaries on 128-lane tiles)."""
    i, f, g, o = jnp.split(w_pt, 4, axis=-1)
    pad = [(0, 0)] * (w_pt.ndim - 1) + [(0, Hp - H)]
    return jnp.concatenate([jnp.pad(p, pad) for p in (i, f, o, g)], axis=-1)


def _pad_rows(w, rows_p):
    return jnp.pad(w, ((0, rows_p - w.shape[0]), (0, 0)))


def init_params(key, hidden_size, output_size, n_layers, bidirectional=True):
    assert bidirectional, "BaseEncoder defaults to bidirectional=True"
    H, O = hidden_size, output_size
    Hp, Op = _round_up(H, 128), _round_up(O, 128)
    k = 1.0 / math.sqrt(H)
    params = {}
    keys = jax.random.split(key, n_layers * 8 + 2)
    idx = 0
    for l in range(n_layers):
        din = H if l == 0 else 2 * H
        wih_cols, whh_rows, b_cols = [], [], []
        for _ in range(2):                                   # fwd, bwd
            wih = jax.random.uniform(keys[idx], (din, 4 * H), jnp.float32, -k, k); idx += 1
            whh = jax.random.uniform(keys[idx], (H, 4 * H), jnp.float32, -k, k); idx += 1
            b_ih = jax.random.uniform(keys[idx], (4 * H,), jnp.float32, -k, k); idx += 1
            b_hh = jax.random.uniform(keys[idx], (4 * H,), jnp.float32, -k, k); idx += 1
            wih_cols.append(_pack_gate_cols(wih, H, Hp))                    # (din, 4Hp)
            whh_rows.append(_pad_rows(_pack_gate_cols(whh, H, Hp), Hp))     # (Hp, 4Hp)
            b_cols.append(_pack_gate_cols((b_ih + b_hh)[None, :], H, Hp))   # (1, 4Hp)
        wih_fused = jnp.concatenate(wih_cols, axis=-1)                      # (din, 8Hp)
        if l == 0:
            params[f"wih_l{l}"] = _pad_rows(wih_fused, Hp).astype(jnp.bfloat16)        # (Hp, 8Hp)
        else:
            params[f"wih_a_l{l}"] = _pad_rows(wih_fused[:H], Hp).astype(jnp.bfloat16)  # fwd half
            params[f"wih_b_l{l}"] = _pad_rows(wih_fused[H:], Hp).astype(jnp.bfloat16)  # bwd half
        params[f"whh_l{l}"] = jnp.stack(whh_rows, axis=0).astype(jnp.bfloat16)  # (2, Hp, 4Hp)
        params[f"b_l{l}"] = jnp.concatenate(b_cols, axis=-1)                    # (1, 8Hp) f32

    # output projection: nn.Linear(2H, O) with xavier_normal_ weight, default bias init
    fan_in, fan_out = 2 * H, O
    std = math.sqrt(2.0 / (fan_in + fan_out))
    w_proj = std * jax.random.normal(keys[idx], (fan_in, fan_out), jnp.float32); idx += 1
    kp = 1.0 / math.sqrt(fan_in)
    b_proj = jax.random.uniform(keys[idx], (fan_out,), jnp.float32, -kp, kp); idx += 1
    wpad = lambda w: jnp.pad(w, ((0, Hp - H), (0, Op - O))).astype(jnp.bfloat16)
    params["wproj_a"] = wpad(w_proj[:H])                                     # fwd-half rows
    params["wproj_b"] = wpad(w_proj[H:])                                     # bwd-half rows
    params["b_proj"] = jnp.pad(b_proj, (0, Op - O))[None, :]                 # (1, Op) f32
    return params


# ----------------------------------------------------------------------------
if __name__ == "__main__":
    hidden_size, output_size, n_layers = 32, 16, 2
    B, T = 2, 8

    key = jax.random.PRNGKey(0)
    kparam, kx = jax.random.split(key)
    params = init_params(kparam, hidden_size, output_size, n_layers, bidirectional=True)

    inputs = jax.random.normal(kx, (B, T, hidden_size), dtype=jnp.float32)
    input_lengths = jnp.array([8, 5], dtype=jnp.int32)

    logits, (h_n, c_n) = base_encoder_forward(params, inputs, input_lengths,
                                              n_layers=n_layers, output_size=output_size,
                                              time_chunk=8)
    jax.block_until_ready((logits, h_n, c_n))

    assert logits.shape == (B, T, output_size)
    assert h_n.shape == (n_layers * 2, B, hidden_size)
    assert c_n.shape == (n_layers * 2, B, hidden_size)
    assert bool(jnp.all(jnp.isfinite(logits)))
    assert bool(jnp.all(jnp.isfinite(h_n))) and bool(jnp.all(jnp.isfinite(c_n)))
    print("KERNEL_OK")
</pallas_src>

<mosaic_0001>
module attributes {stable_mosaic.version = 11 : i64} {
  func.func @matmul_bias_kernel(%arg0: i32, %arg1: memref<64x128xbf16, #tpu.memory_space<vmem>>, %arg2: memref<128x1024xbf16, #tpu.memory_space<vmem>>, %arg3: memref<1x1024xf32, #tpu.memory_space<vmem>>, %arg4: memref<64x1024xbf16, #tpu.memory_space<vmem>>) attributes {dimension_semantics = [#tpu.dimension_semantics<parallel>], iteration_bounds = array<i64: 1>, scalar_prefetch = 0 : i64, scratch_operands = 0 : i64, tpu.core_type = #tpu.core_type<tc>, window_params = [{transform_indices = @transform_0, window_bounds = array<i64: 64, 128>}, {pipeline_mode = #tpu.pipeline_mode<synchronous>, transform_indices = @transform_1, window_bounds = array<i64: 128, 1024>}, {pipeline_mode = #tpu.pipeline_mode<synchronous>, transform_indices = @transform_2, window_bounds = array<i64: 1, 1024>}, {transform_indices = @transform_3, window_bounds = array<i64: 64, 1024>}]} {
    %c0 = arith.constant 0 : index
    %c0_0 = arith.constant 0 : index
    %0 = vector.load %arg1[%c0, %c0_0] : memref<64x128xbf16, #tpu.memory_space<vmem>>, vector<64x128xbf16>
    %c0_1 = arith.constant 0 : index
    %c0_2 = arith.constant 0 : index
    %1 = vector.load %arg2[%c0_1, %c0_2] : memref<128x1024xbf16, #tpu.memory_space<vmem>>, vector<128x1024xbf16>
    %cst = arith.constant dense<0.000000e+00> : vector<64x1024xf32>
    %2 = tpu.matmul %0, %1, %cst {dimension_numbers = #tpu.dot_dimension_numbers<[1], [0], [0], [1], [0, 0, 1, 1], [], []>} : vector<64x128xbf16>, vector<128x1024xbf16>, vector<64x1024xf32> -> vector<64x1024xf32>
    %c0_3 = arith.constant 0 : index
    %c0_4 = arith.constant 0 : index
    %3 = vector.load %arg3[%c0_3, %c0_4] : memref<1x1024xf32, #tpu.memory_space<vmem>>, vector<1x1024xf32>
    %4 = vector.broadcast %3 : vector<1x1024xf32> to vector<64x1024xf32>
    %5 = arith.addf %2, %4 : vector<64x1024xf32>
    %6 = arith.truncf %5 : vector<64x1024xf32> to vector<64x1024xbf16>
    %c0_5 = arith.constant 0 : index
    %c0_6 = arith.constant 0 : index
    %7 = vector.load %arg4[%c0_5, %c0_6] : memref<64x1024xbf16, #tpu.memory_space<vmem>>, vector<64x1024xbf16>
    tpu.vector_store %arg4[%c0_5, %c0_6], %6 {strides = array<i32>} : memref<64x1024xbf16, #tpu.memory_space<vmem>>, vector<64x1024xbf16>,
    return
  }
  func.func @transform_0(%arg0: i32) -> (i32, i32) {
    %c0_i32 = arith.constant 0 : i32
    %c0_i32_0 = arith.constant 0 : i32
    return %arg0, %c0_i32 : i32, i32
  }
  func.func @transform_1(%arg0: i32) -> (i32, i32) {
    %c0_i32 = arith.constant 0 : i32
    %c0_i32_0 = arith.constant 0 : i32
    %c0_i32_1 = arith.constant 0 : i32
    return %c0_i32, %c0_i32_0 : i32, i32
  }
  func.func @transform_2(%arg0: i32) -> (i32, i32) {
    %c0_i32 = arith.constant 0 : i32
    %c0_i32_0 = arith.constant 0 : i32
    %c0_i32_1 = arith.constant 0 : i32
    return %c0_i32, %c0_i32_0 : i32, i32
  }
  func.func @transform_3(%arg0: i32) -> (i32, i32) {
    %c0_i32 = arith.constant 0 : i32
    %c0_i32_0 = arith.constant 0 : i32
    return %arg0, %c0_i32 : i32, i32
  }
}

module attributes {stable_mosaic.version = 11 : i64} {
  func.func @dual_matmul_bias_kernel(%arg0: i32, %arg1: memref<64x128xbf16, #tpu.memory_space<vmem>>, %arg2: memref<64x128xbf16, #tpu.memory_space<vmem>>, %arg3: memref<128x1024xbf16, #tpu.memory_space<vmem>>, %arg4: memref<128x1024xbf16, #tpu.memory_space<vmem>>, %arg5: memref<1x1024xf32, #tpu.memory_space<vmem>>, %arg6: memref<64x1024xbf16, #tpu.memory_space<vmem>>) attributes {dimension_semantics = [#tpu.dimension_semantics<parallel>], iteration_bounds = array<i64: 1>, scalar_prefetch = 0 : i64, scratch_operands = 0 : i64, tpu.core_type = #tpu.core_type<tc>, window_params = [{transform_indices = @transform_0, window_bounds = array<i64: 64, 128>}, {transform_indices = @transform_1, window_bounds = array<i64: 64, 128>}, {pipeline_mode = #tpu.pipeline_mode<synchronous>, transform_indices = @transform_2, window_bounds = array<i64: 128, 1024>}, {pipeline_mode = #tpu.pipeline_mode<synchronous>, transform_indices = @transform_3, window_bounds = array<i64: 128, 1024>}, {pipeline_mode = #tpu.pipeline_mode<synchronous>, transform_indices = @transform_4, window_bounds = array<i64: 1, 1024>}, {transform_indices = @transform_5, window_bounds = array<i64: 64, 1024>}]} {
    %c0 = arith.constant 0 : index
    %c0_0 = arith.constant 0 : index
    %0 = vector.load %arg1[%c0, %c0_0] : memref<64x128xbf16, #tpu.memory_space<vmem>>, vector<64x128xbf16>
    %c0_1 = arith.constant 0 : index
    %c0_2 = arith.constant 0 : index
    %1 = vector.load %arg3[%c0_1, %c0_2] : memref<128x1024xbf16, #tpu.memory_space<vmem>>, vector<128x1024xbf16>
    %cst = arith.constant dense<0.000000e+00> : vector<64x1024xf32>
    %2 = tpu.matmul %0, %1, %cst {dimension_numbers = #tpu.dot_dimension_numbers<[1], [0], [0], [1], [0, 0, 1, 1], [], []>} : vector<64x128xbf16>, vector<128x1024xbf16>, vector<64x1024xf32> -> vector<64x1024xf32>
    %c0_3 = arith.constant 0 : index
    %c0_4 = arith.constant 0 : index
    %3 = vector.load %arg2[%c0_3, %c0_4] : memref<64x128xbf16, #tpu.memory_space<vmem>>, vector<64x128xbf16>
    %c0_5 = arith.constant 0 : index
    %c0_6 = arith.constant 0 : index
    %4 = vector.load %arg4[%c0_5, %c0_6] : memref<128x1024xbf16, #tpu.memory_space<vmem>>, vector<128x1024xbf16>
    %cst_7 = arith.constant dense<0.000000e+00> : vector<64x1024xf32>
    %5 = tpu.matmul %3, %4, %cst_7 {dimension_numbers = #tpu.dot_dimension_numbers<[1], [0], [0], [1], [0, 0, 1, 1], [], []>} : vector<64x128xbf16>, vector<128x1024xbf16>, vector<64x1024xf32> -> vector<64x1024xf32>
    %6 = arith.addf %2, %5 : vector<64x1024xf32>
    %c0_8 = arith.constant 0 : index
    %c0_9 = arith.constant 0 : index
    %7 = vector.load %arg5[%c0_8, %c0_9] : memref<1x1024xf32, #tpu.memory_space<vmem>>, vector<1x1024xf32>
    %8 = vector.broadcast %7 : vector<1x1024xf32> to vector<64x1024xf32>
    %9 = arith.addf %6, %8 : vector<64x1024xf32>
    %10 = arith.truncf %9 : vector<64x1024xf32> to vector<64x1024xbf16>
    %c0_10 = arith.constant 0 : index
    %c0_11 = arith.constant 0 : index
    %11 = vector.load %arg6[%c0_10, %c0_11] : memref<64x1024xbf16, #tpu.memory_space<vmem>>, vector<64x1024xbf16>
    tpu.vector_store %arg6[%c0_10, %c0_11], %10 {strides = array<i32>} : memref<64x1024xbf16, #tpu.memory_space<vmem>>, vector<64x1024xbf16>,
    return
  }
  func.func @transform_0(%arg0: i32) -> (i32, i32) {
    %c0_i32 = arith.constant 0 : i32
    %c0_i32_0 = arith.constant 0 : i32
    return %arg0, %c0_i32 : i32, i32
  }
  func.func @transform_1(%arg0: i32) -> (i32, i32) {
    %c0_i32 = arith.constant 0 : i32
    %c0_i32_0 = arith.constant 0 : i32
    return %arg0, %c0_i32 : i32, i32
  }
  func.func @transform_2(%arg0: i32) -> (i32, i32) {
    %c0_i32 = arith.constant 0 : i32
    %c0_i32_0 = arith.constant 0 : i32
    %c0_i32_1 = arith.constant 0 : i32
    return %c0_i32, %c0_i32_0 : i32, i32
  }
  func.func @transform_3(%arg0: i32) -> (i32, i32) {
    %c0_i32 = arith.constant 0 : i32
    %c0_i32_0 = arith.constant 0 : i32
    %c0_i32_1 = arith.constant 0 : i32
    return %c0_i32, %c0_i32_0 : i32, i32
  }
  func.func @transform_4(%arg0: i32) -> (i32, i32) {
    %c0_i32 = arith.constant 0 : i32
    %c0_i32_0 = arith.constant 0 : i32
    %c0_i32_1 = arith.constant 0 : i32
    return %c0_i32, %c0_i32_0 : i32, i32
  }
  func.func @transform_5(%arg0: i32) -> (i32, i32) {
    %c0_i32 = arith.constant 0 : i32
    %c0_i32_0 = arith.constant 0 : i32
    return %arg0, %c0_i32 : i32, i32
  }
}

module attributes {stable_mosaic.version = 11 : i64} {
  func.func @lstm_chunk_kernel(%arg0: i32, %arg1: memref<8x1xi32, #tpu.memory_space<vmem>>, %arg2: memref<8x8x512xbf16, #tpu.memory_space<vmem>>, %arg3: memref<8x8x512xbf16, #tpu.memory_space<vmem>>, %arg4: memref<2x128x512xbf16, #tpu.memory_space<vmem>>, %arg5: memref<8x8x128xbf16, #tpu.memory_space<vmem>>, %arg6: memref<8x8x128xbf16, #tpu.memory_space<vmem>>, %arg7: memref<2x8x128xf32, #tpu.memory_space<vmem>>, %arg8: memref<2x8x128xf32, #tpu.memory_space<vmem>>) attributes {dimension_semantics = [#tpu.dimension_semantics<arbitrary>], iteration_bounds = array<i64: 1>, scalar_prefetch = 0 : i64, scratch_operands = 0 : i64, tpu.core_type = #tpu.core_type<tc>, window_params = [{pipeline_mode = #tpu.pipeline_mode<synchronous>, transform_indices = @transform_0, window_bounds = array<i64: 8, 1>}, {transform_indices = @transform_1, window_bounds = array<i64: 8, 8, 512>}, {transform_indices = @transform_2, window_bounds = array<i64: 8, 8, 512>}, {pipeline_mode = #tpu.pipeline_mode<synchronous>, transform_indices = @transform_3, window_bounds = array<i64: 2, 128, 512>}, {transform_indices = @transform_4, window_bounds = array<i64: 8, 8, 128>}, {transform_indices = @transform_5, window_bounds = array<i64: 8, 8, 128>}, {pipeline_mode = #tpu.pipeline_mode<synchronous>, transform_indices = @transform_6, window_bounds = array<i64: 2, 8, 128>}, {pipeline_mode = #tpu.pipeline_mode<synchronous>, transform_indices = @transform_7, window_bounds = array<i64: 2, 8, 128>}]} {
    %c0_i32 = arith.constant 0 : i32
    %0 = arith.cmpi eq, %arg0, %c0_i32 : i32
    %1 = arith.extui %0 : i1 to i32
    %c0_i32_0 = arith.constant 0 : i32
    %2 = arith.cmpi ne, %1, %c0_i32_0 : i32
    scf.if %2 {
      %cst_179 = arith.constant 0.000000e+00 : f32
      %655 = vector.broadcast %cst_179 : f32 to vector<2x8x128xf32>
      %c0_180 = arith.constant 0 : index
      %c0_181 = arith.constant 0 : index
      %c0_182 = arith.constant 0 : index
      %656 = vector.load %arg7[%c0_180, %c0_181, %c0_182] : memref<2x8x128xf32, #tpu.memory_space<vmem>>, vector<2x8x128xf32>
      tpu.vector_store %arg7[%c0_180, %c0_181, %c0_182], %655 {strides = array<i32>} : memref<2x8x128xf32, #tpu.memory_space<vmem>>, vector<2x8x128xf32>,
      %cst_183 = arith.constant 0.000000e+00 : f32
      %657 = vector.broadcast %cst_183 : f32 to vector<2x8x128xf32>
      %c0_184 = arith.constant 0 : index
      %c0_185 = arith.constant 0 : index
      %c0_186 = arith.constant 0 : index
      %658 = vector.load %arg8[%c0_184, %c0_185, %c0_186] : memref<2x8x128xf32, #tpu.memory_space<vmem>>, vector<2x8x128xf32>
      tpu.vector_store %arg8[%c0_184, %c0_185, %c0_186], %657 {strides = array<i32>} : memref<2x8x128xf32, #tpu.memory_space<vmem>>, vector<2x8x128xf32>,
    } else {
    }
    %c0 = arith.constant 0 : index
    %c0_1 = arith.constant 0 : index
    %c0_2 = arith.constant 0 : index
    %3 = vector.load %arg4[%c0, %c0_1, %c0_2] : memref<2x128x512xbf16, #tpu.memory_space<vmem>>, vector<1x128x512xbf16>
    %4 = vector.shape_cast %3 : vector<1x128x512xbf16> to vector<128x512xbf16>
    %c1 = arith.constant 1 : index
    %c0_3 = arith.constant 0 : index
    %c0_4 = arith.constant 0 : index
    %5 = vector.load %arg4[%c1, %c0_3, %c0_4] : memref<2x128x512xbf16, #tpu.memory_space<vmem>>, vector<1x128x512xbf16>
    %6 = vector.shape_cast %5 : vector<1x128x512xbf16> to vector<128x512xbf16>
    %c0_5 = arith.constant 0 : index
    %c0_6 = arith.constant 0 : index
    %7 = vector.load %arg1[%c0_5, %c0_6] : memref<8x1xi32, #tpu.memory_space<vmem>>, vector<8x1xi32>
    %c0_7 = arith.constant 0 : index
    %c0_8 = arith.constant 0 : index
    %c0_9 = arith.constant 0 : index
    %8 = vector.load %arg7[%c0_7, %c0_8, %c0_9] : memref<2x8x128xf32, #tpu.memory_space<vmem>>, vector<1x8x128xf32>
    %9 = vector.shape_cast %8 : vector<1x8x128xf32> to vector<8x128xf32>
    %c0_10 = arith.constant 0 : index
    %c0_11 = arith.constant 0 : index
    %c0_12 = arith.constant 0 : index
    %10 = vector.load %arg8[%c0_10, %c0_11, %c0_12] : memref<2x8x128xf32, #tpu.memory_space<vmem>>, vector<1x8x128xf32>
    %11 = vector.shape_cast %10 : vector<1x8x128xf32> to vector<8x128xf32>
    %c1_13 = arith.constant 1 : index
    %c0_14 = arith.constant 0 : index
    %c0_15 = arith.constant 0 : index
    %12 = vector.load %arg7[%c1_13, %c0_14, %c0_15] : memref<2x8x128xf32, #tpu.memory_space<vmem>>, vector<1x8x128xf32>
    %13 = vector.shape_cast %12 : vector<1x8x128xf32> to vector<8x128xf32>
    %c1_16 = arith.constant 1 : index
    %c0_17 = arith.constant 0 : index
    %c0_18 = arith.constant 0 : index
    %14 = vector.load %arg8[%c1_16, %c0_17, %c0_18] : memref<2x8x128xf32, #tpu.memory_space<vmem>>, vector<1x8x128xf32>
    %15 = vector.shape_cast %14 : vector<1x8x128xf32> to vector<8x128xf32>
    %c8_i32 = arith.constant 8 : i32
    %16 = arith.muli %arg0, %c8_i32 : i32
    %c0_i32_19 = arith.constant 0 : i32
    %17 = arith.subi %c0_i32_19, %arg0 : i32
    %c8_i32_20 = arith.constant 8 : i32
    %18 = arith.muli %17, %c8_i32_20 : i32
    %c0_i32_21 = arith.constant 0 : i32
    %19 = arith.addi %16, %c0_i32_21 : i32
    %20 = vector.broadcast %19 : i32 to vector<8x1xi32>
    %21 = arith.cmpi sgt, %7, %20 : vector<8x1xi32>
    %c7_i32 = arith.constant 7 : i32
    %22 = arith.addi %18, %c7_i32 : i32
    %23 = vector.broadcast %22 : i32 to vector<8x1xi32>
    %24 = arith.cmpi sgt, %7, %23 : vector<8x1xi32>
    %c0_22 = arith.constant 0 : index
    %c0_23 = arith.constant 0 : index
    %c0_24 = arith.constant 0 : index
    %25 = vector.load %arg2[%c0_22, %c0_23, %c0_24] : memref<8x8x512xbf16, #tpu.memory_space<vmem>>, vector<1x8x512xbf16>
    %26 = vector.shape_cast %25 : vector<1x8x512xbf16> to vector<8x512xbf16>
    %27 = arith.extf %26 : vector<8x512xbf16> to vector<8x512xf32>
    %28 = arith.truncf %9 : vector<8x128xf32> to vector<8x128xbf16>
    %cst = arith.constant dense<0.000000e+00> : vector<8x512xf32>
    %29 = tpu.matmul %28, %4, %cst {dimension_numbers = #tpu.dot_dimension_numbers<[1], [0], [0], [1], [0, 0, 1, 1], [], []>} : vector<8x128xbf16>, vector<128x512xbf16>, vector<8x512xf32> -> vector<8x512xf32>
    %30 = arith.addf %27, %29 : vector<8x512xf32>
    %31 = vector.extract_strided_slice %30 {offsets = [0, 0], sizes = [8, 384], strides = [1, 1]} : vector<8x512xf32> to vector<8x384xf32>
    %32 = arith.negf %31 : vector<8x384xf32>
    %33 = math.exp %32 : vector<8x384xf32>
    %cst_25 = arith.constant 1.000000e+00 : f32
    %34 = vector.broadcast %cst_25 : f32 to vector<8x384xf32>
    %35 = arith.addf %34, %33 : vector<8x384xf32>
    %36 = arith.divf %34, %35 : vector<8x384xf32>
    %37 = vector.extract_strided_slice %36 {offsets = [0, 0], sizes = [8, 128], strides = [1, 1]} : vector<8x384xf32> to vector<8x128xf32>
    %38 = vector.extract_strided_slice %36 {offsets = [0, 128], sizes = [8, 128], strides = [1, 1]} : vector<8x384xf32> to vector<8x128xf32>
    %39 = vector.extract_strided_slice %36 {offsets = [0, 256], sizes = [8, 128], strides = [1, 1]} : vector<8x384xf32> to vector<8x128xf32>
    %40 = vector.extract_strided_slice %30 {offsets = [0, 384], sizes = [8, 128], strides = [1, 1]} : vector<8x512xf32> to vector<8x128xf32>
    %41 = math.tanh %40 : vector<8x128xf32>
    %42 = arith.mulf %38, %11 : vector<8x128xf32>
    %43 = arith.mulf %37, %41 : vector<8x128xf32>
    %44 = arith.addf %42, %43 : vector<8x128xf32>
    %45 = math.tanh %44 : vector<8x128xf32>
    %46 = arith.mulf %39, %45 : vector<8x128xf32>
    %47 = vector.shape_cast %21 : vector<8x1xi1> to vector<8x1xi1>
    %48 = vector.broadcast %47 : vector<8x1xi1> to vector<8x128xi1>
    %49 = arith.select %48, %46, %9 : vector<8x128xi1>, vector<8x128xf32>
    %50 = vector.shape_cast %21 : vector<8x1xi1> to vector<8x1xi1>
    %51 = vector.broadcast %50 : vector<8x1xi1> to vector<8x128xi1>
    %52 = arith.select %51, %44, %11 : vector<8x128xi1>, vector<8x128xf32>
    %cst_26 = arith.constant 0.000000e+00 : f32
    %53 = vector.broadcast %cst_26 : f32 to vector<8x128xf32>
    %54 = vector.shape_cast %21 : vector<8x1xi1> to vector<8x1xi1>
    %55 = vector.broadcast %54 : vector<8x1xi1> to vector<8x128xi1>
    %56 = arith.select %55, %46, %53 : vector<8x128xi1>, vector<8x128xf32>
    %c7 = arith.constant 7 : index
    %c0_27 = arith.constant 0 : index
    %c0_28 = arith.constant 0 : index
    %57 = vector.load %arg3[%c7, %c0_27, %c0_28] : memref<8x8x512xbf16, #tpu.memory_space<vmem>>, vector<1x8x512xbf16>
    %58 = vector.shape_cast %57 : vector<1x8x512xbf16> to vector<8x512xbf16>
    %59 = arith.extf %58 : vector<8x512xbf16> to vector<8x512xf32>
    %60 = arith.truncf %13 : vector<8x128xf32> to vector<8x128xbf16>
    %cst_29 = arith.constant dense<0.000000e+00> : vector<8x512xf32>
    %61 = tpu.matmul %60, %6, %cst_29 {dimension_numbers = #tpu.dot_dimension_numbers<[1], [0], [0], [1], [0, 0, 1, 1], [], []>} : vector<8x128xbf16>, vector<128x512xbf16>, vector<8x512xf32> -> vector<8x512xf32>
    %62 = arith.addf %59, %61 : vector<8x512xf32>
    %63 = vector.extract_strided_slice %62 {offsets = [0, 0], sizes = [8, 384], strides = [1, 1]} : vector<8x512xf32> to vector<8x384xf32>
    %64 = arith.negf %63 : vector<8x384xf32>
    %65 = math.exp %64 : vector<8x384xf32>
    %cst_30 = arith.constant 1.000000e+00 : f32
    %66 = vector.broadcast %cst_30 : f32 to vector<8x384xf32>
    %67 = arith.addf %66, %65 : vector<8x384xf32>
    %68 = arith.divf %66, %67 : vector<8x384xf32>
    %69 = vector.extract_strided_slice %68 {offsets = [0, 0], sizes = [8, 128], strides = [1, 1]} : vector<8x384xf32> to vector<8x128xf32>
    %70 = vector.extract_strided_slice %68 {offsets = [0, 128], sizes = [8, 128], strides = [1, 1]} : vector<8x384xf32> to vector<8x128xf32>
    %71 = vector.extract_strided_slice %68 {offsets = [0, 256], sizes = [8, 128], strides = [1, 1]} : vector<8x384xf32> to vector<8x128xf32>
    %72 = vector.extract_strided_slice %62 {offsets = [0, 384], sizes = [8, 128], strides = [1, 1]} : vector<8x512xf32> to vector<8x128xf32>
    %73 = math.tanh %72 : vector<8x128xf32>
    %74 = arith.mulf %70, %15 : vector<8x128xf32>
    %75 = arith.mulf %69, %73 : vector<8x128xf32>
    %76 = arith.addf %74, %75 : vector<8x128xf32>
    %77 = math.tanh %76 : vector<8x128xf32>
    %78 = arith.mulf %71, %77 : vector<8x128xf32>
    %79 = vector.shape_cast %24 : vector<8x1xi1> to vector<8x1xi1>
    %80 = vector.broadcast %79 : vector<8x1xi1> to vector<8x128xi1>
    %81 = arith.select %80, %78, %13 : vector<8x128xi1>, vector<8x128xf32>
    %82 = vector.shape_cast %24 : vector<8x1xi1> to vector<8x1xi1>
    %83 = vector.broadcast %82 : vector<8x1xi1> to vector<8x128xi1>
    %84 = arith.select %83, %76, %15 : vector<8x128xi1>, vector<8x128xf32>
    %cst_31 = arith.constant 0.000000e+00 : f32
    %85 = vector.broadcast %cst_31 : f32 to vector<8x128xf32>
    %86 = vector.shape_cast %24 : vector<8x1xi1> to vector<8x1xi1>
    %87 = vector.broadcast %86 : vector<8x1xi1> to vector<8x128xi1>
    %88 = arith.select %87, %78, %85 : vector<8x128xi1>, vector<8x128xf32>
    %89 = arith.truncf %56 : vector<8x128xf32> to vector<8x128xbf16>
    %c0_32 = arith.constant 0 : index
    %c0_33 = arith.constant 0 : index
    %c0_34 = arith.constant 0 : index
    %90 = vector.load %arg5[%c0_32, %c0_33, %c0_34] : memref<8x8x128xbf16, #tpu.memory_space<vmem>>, vector<1x8x128xbf16>
    %91 = vector.shape_cast %90 : vector<1x8x128xbf16> to vector<8x128xbf16>
    %92 = vector.shape_cast %89 : vector<8x128xbf16> to vector<1x8x128xbf16>
    tpu.vector_store %arg5[%c0_32, %c0_33, %c0_34], %92 {strides = array<i32>} : memref<8x8x128xbf16, #tpu.memory_space<vmem>>, vector<1x8x128xbf16>,
    %93 = arith.truncf %88 : vector<8x128xf32> to vector<8x128xbf16>
    %c7_35 = arith.constant 7 : index
    %c0_36 = arith.constant 0 : index
    %c0_37 = arith.constant 0 : index
    %94 = vector.load %arg6[%c7_35, %c0_36, %c0_37] : memref<8x8x128xbf16, #tpu.memory_space<vmem>>, vector<1x8x128xbf16>
    %95 = vector.shape_cast %94 : vector<1x8x128xbf16> to vector<8x128xbf16>
    %96 = vector.shape_cast %93 : vector<8x128xbf16> to vector<1x8x128xbf16>
    tpu.vector_store %arg6[%c7_35, %c0_36, %c0_37], %96 {strides = array<i32>} : memref<8x8x128xbf16, #tpu.memory_space<vmem>>, vector<1x8x128xbf16>,
    %c1_i32 = arith.constant 1 : i32
    %97 = arith.addi %16, %c1_i32 : i32
    %98 = vector.broadcast %97 : i32 to vector<8x1xi32>
    %99 = arith.cmpi sgt, %7, %98 : vector<8x1xi32>
    %c6_i32 = arith.constant 6 : i32
    %100 = arith.addi %18, %c6_i32 : i32
    %101 = vector.broadcast %100 : i32 to vector<8x1xi32>
    %102 = arith.cmpi sgt, %7, %101 : vector<8x1xi32>
    %c1_38 = arith.constant 1 : index
    %c0_39 = arith.constant 0 : index
    %c0_40 = arith.constant 0 : index
    %103 = vector.load %arg2[%c1_38, %c0_39, %c0_40] : memref<8x8x512xbf16, #tpu.memory_space<vmem>>, vector<1x8x512xbf16>
    %104 = vector.shape_cast %103 : vector<1x8x512xbf16> to vector<8x512xbf16>
    %105 = arith.extf %104 : vector<8x512xbf16> to vector<8x512xf32>
    %106 = arith.truncf %49 : vector<8x128xf32> to vector<8x128xbf16>
    %cst_41 = arith.constant dense<0.000000e+00> : vector<8x512xf32>
    %107 = tpu.matmul %106, %4, %cst_41 {dimension_numbers = #tpu.dot_dimension_numbers<[1], [0], [0], [1], [0, 0, 1, 1], [], []>} : vector<8x128xbf16>, vector<128x512xbf16>, vector<8x512xf32> -> vector<8x512xf32>
    %108 = arith.addf %105, %107 : vector<8x512xf32>
    %109 = vector.extract_strided_slice %108 {offsets = [0, 0], sizes = [8, 384], strides = [1, 1]} : vector<8x512xf32> to vector<8x384xf32>
    %110 = arith.negf %109 : vector<8x384xf32>
    %111 = math.exp %110 : vector<8x384xf32>
    %cst_42 = arith.constant 1.000000e+00 : f32
    %112 = vector.broadcast %cst_42 : f32 to vector<8x384xf32>
    %113 = arith.addf %112, %111 : vector<8x384xf32>
    %114 = arith.divf %112, %113 : vector<8x384xf32>
    %115 = vector.extract_strided_slice %114 {offsets = [0, 0], sizes = [8, 128], strides = [1, 1]} : vector<8x384xf32> to vector<8x128xf32>
    %116 = vector.extract_strided_slice %114 {offsets = [0, 128], sizes = [8, 128], strides = [1, 1]} : vector<8x384xf32> to vector<8x128xf32>
    %117 = vector.extract_strided_slice %114 {offsets = [0, 256], sizes = [8, 128], strides = [1, 1]} : vector<8x384xf32> to vector<8x128xf32>
    %118 = vector.extract_strided_slice %108 {offsets = [0, 384], sizes = [8, 128], strides = [1, 1]} : vector<8x512xf32> to vector<8x128xf32>
    %119 = math.tanh %118 : vector<8x128xf32>
    %120 = arith.mulf %116, %52 : vector<8x128xf32>
    %121 = arith.mulf %115, %119 : vector<8x128xf32>
    %122 = arith.addf %120, %121 : vector<8x128xf32>
    %123 = math.tanh %122 : vector<8x128xf32>
    %124 = arith.mulf %117, %123 : vector<8x128xf32>
    %125 = vector.shape_cast %99 : vector<8x1xi1> to vector<8x1xi1>
    %126 = vector.broadcast %125 : vector<8x1xi1> to vector<8x128xi1>
    %127 = arith.select %126, %124, %49 : vector<8x128xi1>, vector<8x128xf32>
    %128 = vector.shape_cast %99 : vector<8x1xi1> to vector<8x1xi1>
    %129 = vector.broadcast %128 : vector<8x1xi1> to vector<8x128xi1>
    %130 = arith.select %129, %122, %52 : vector<8x128xi1>, vector<8x128xf32>
    %cst_43 = arith.constant 0.000000e+00 : f32
    %131 = vector.broadcast %cst_43 : f32 to vector<8x128xf32>
    %132 = vector.shape_cast %99 : vector<8x1xi1> to vector<8x1xi1>
    %133 = vector.broadcast %132 : vector<8x1xi1> to vector<8x128xi1>
    %134 = arith.select %133, %124, %131 : vector<8x128xi1>, vector<8x128xf32>
    %c6 = arith.constant 6 : index
    %c0_44 = arith.constant 0 : index
    %c0_45 = arith.constant 0 : index
    %135 = vector.load %arg3[%c6, %c0_44, %c0_45] : memref<8x8x512xbf16, #tpu.memory_space<vmem>>, vector<1x8x512xbf16>
    %136 = vector.shape_cast %135 : vector<1x8x512xbf16> to vector<8x512xbf16>
    %137 = arith.extf %136 : vector<8x512xbf16> to vector<8x512xf32>
    %138 = arith.truncf %81 : vector<8x128xf32> to vector<8x128xbf16>
    %cst_46 = arith.constant dense<0.000000e+00> : vector<8x512xf32>
    %139 = tpu.matmul %138, %6, %cst_46 {dimension_numbers = #tpu.dot_dimension_numbers<[1], [0], [0], [1], [0, 0, 1, 1], [], []>} : vector<8x128xbf16>, vector<128x512xbf16>, vector<8x512xf32> -> vector<8x512xf32>
    %140 = arith.addf %137, %139 : vector<8x512xf32>
    %141 = vector.extract_strided_slice %140 {offsets = [0, 0], sizes = [8, 384], strides = [1, 1]} : vector<8x512xf32> to vector<8x384xf32>
    %142 = arith.negf %141 : vector<8x384xf32>
    %143 = math.exp %142 : vector<8x384xf32>
    %cst_47 = arith.constant 1.000000e+00 : f32
    %144 = vector.broadcast %cst_47 : f32 to vector<8x384xf32>
    %145 = arith.addf %144, %143 : vector<8x384xf32>
    %146 = arith.divf %144, %145 : vector<8x384xf32>
    %147 = vector.extract_strided_slice %146 {offsets = [0, 0], sizes = [8, 128], strides = [1, 1]} : vector<8x384xf32> to vector<8x128xf32>
    %148 = vector.extract_strided_slice %146 {offsets = [0, 128], sizes = [8, 128], strides = [1, 1]} : vector<8x384xf32> to vector<8x128xf32>
    %149 = vector.extract_strided_slice %146 {offsets = [0, 256], sizes = [8, 128], strides = [1, 1]} : vector<8x384xf32> to vector<8x128xf32>
    %150 = vector.extract_strided_slice %140 {offsets = [0, 384], sizes = [8, 128], strides = [1, 1]} : vector<8x512xf32> to vector<8x128xf32>
    %151 = math.tanh %150 : vector<8x128xf32>
    %152 = arith.mulf %148, %84 : vector<8x128xf32>
    %153 = arith.mulf %147, %151 : vector<8x128xf32>
    %154 = arith.addf %152, %153 : vector<8x128xf32>
    %155 = math.tanh %154 : vector<8x128xf32>
    %156 = arith.mulf %149, %155 : vector<8x128xf32>
    %157 = vector.shape_cast %102 : vector<8x1xi1> to vector<8x1xi1>
    %158 = vector.broadcast %157 : vector<8x1xi1> to vector<8x128xi1>
    %159 = arith.select %158, %156, %81 : vector<8x128xi1>, vector<8x128xf32>
    %160 = vector.shape_cast %102 : vector<8x1xi1> to vector<8x1xi1>
    %161 = vector.broadcast %160 : vector<8x1xi1> to vector<8x128xi1>
    %162 = arith.select %161, %154, %84 : vector<8x128xi1>, vector<8x128xf32>
    %cst_48 = arith.constant 0.000000e+00 : f32
    %163 = vector.broadcast %cst_48 : f32 to vector<8x128xf32>
    %164 = vector.shape_cast %102 : vector<8x1xi1> to vector<8x1xi1>
    %165 = vector.broadcast %164 : vector<8x1xi1> to vector<8x128xi1>
    %166 = arith.select %165, %156, %163 : vector<8x128xi1>, vector<8x128xf32>
    %167 = arith.truncf %134 : vector<8x128xf32> to vector<8x128xbf16>
    %c1_49 = arith.constant 1 : index
    %c0_50 = arith.constant 0 : index
    %c0_51 = arith.constant 0 : index
    %168 = vector.load %arg5[%c1_49, %c0_50, %c0_51] : memref<8x8x128xbf16, #tpu.memory_space<vmem>>, vector<1x8x128xbf16>
    %169 = vector.shape_cast %168 : vector<1x8x128xbf16> to vector<8x128xbf16>
    %170 = vector.shape_cast %167 : vector<8x128xbf16> to vector<1x8x128xbf16>
    tpu.vector_store %arg5[%c1_49, %c0_50, %c0_51], %170 {strides = array<i32>} : memref<8x8x128xbf16, #tpu.memory_space<vmem>>, vector<1x8x128xbf16>,
    %171 = arith.truncf %166 : vector<8x128xf32> to vector<8x128xbf16>
    %c6_52 = arith.constant 6 : index
    %c0_53 = arith.constant 0 : index
    %c0_54 = arith.constant 0 : index
    %172 = vector.load %arg6[%c6_52, %c0_53, %c0_54] : memref<8x8x128xbf16, #tpu.memory_space<vmem>>, vector<1x8x128xbf16>
    %173 = vector.shape_cast %172 : vector<1x8x128xbf16> to vector<8x128xbf16>
    %174 = vector.shape_cast %171 : vector<8x128xbf16> to vector<1x8x128xbf16>
    tpu.vector_store %arg6[%c6_52, %c0_53, %c0_54], %174 {strides = array<i32>} : memref<8x8x128xbf16, #tpu.memory_space<vmem>>, vector<1x8x128xbf16>,
    %c2_i32 = arith.constant 2 : i32
    %175 = arith.addi %16, %c2_i32 : i32
    %176 = vector.broadcast %175 : i32 to vector<8x1xi32>
    %177 = arith.cmpi sgt, %7, %176 : vector<8x1xi32>
    %c5_i32 = arith.constant 5 : i32
    %178 = arith.addi %18, %c5_i32 : i32
    %179 = vector.broadcast %178 : i32 to vector<8x1xi32>
    %180 = arith.cmpi sgt, %7, %179 : vector<8x1xi32>
    %c2 = arith.constant 2 : index
    %c0_55 = arith.constant 0 : index
    %c0_56 = arith.constant 0 : index
    %181 = vector.load %arg2[%c2, %c0_55, %c0_56] : memref<8x8x512xbf16, #tpu.memory_space<vmem>>, vector<1x8x512xbf16>
    %182 = vector.shape_cast %181 : vector<1x8x512xbf16> to vector<8x512xbf16>
    %183 = arith.extf %182 : vector<8x512xbf16> to vector<8x512xf32>
    %184 = arith.truncf %127 : vector<8x128xf32> to vector<8x128xbf16>
    %cst_57 = arith.constant dense<0.000000e+00> : vector<8x512xf32>
    %185 = tpu.matmul %184, %4, %cst_57 {dimension_numbers = #tpu.dot_dimension_numbers<[1], [0], [0], [1], [0, 0, 1, 1], [], []>} : vector<8x128xbf16>, vector<128x512xbf16>, vector<8x512xf32> -> vector<8x512xf32>
    %186 = arith.addf %183, %185 : vector<8x512xf32>
    %187 = vector.extract_strided_slice %186 {offsets = [0, 0], sizes = [8, 384], strides = [1, 1]} : vector<8x512xf32> to vector<8x384xf32>
    %188 = arith.negf %187 : vector<8x384xf32>
    %189 = math.exp %188 : vector<8x384xf32>
    %cst_58 = arith.constant 1.000000e+00 : f32
    %190 = vector.broadcast %cst_58 : f32 to vector<8x384xf32>
    %191 = arith.addf %190, %189 : vector<8x384xf32>
    %192 = arith.divf %190, %191 : vector<8x384xf32>
    %193 = vector.extract_strided_slice %192 {offsets = [0, 0], sizes = [8, 128], strides = [1, 1]} : vector<8x384xf32> to vector<8x128xf32>
    %194 = vector.extract_strided_slice %192 {offsets = [0, 128], sizes = [8, 128], strides = [1, 1]} : vector<8x384xf32> to vector<8x128xf32>
    %195 = vector.extract_strided_slice %192 {offsets = [0, 256], sizes = [8, 128], strides = [1, 1]} : vector<8x384xf32> to vector<8x128xf32>
    %196 = vector.extract_strided_slice %186 {offsets = [0, 384], sizes = [8, 128], strides = [1, 1]} : vector<8x512xf32> to vector<8x128xf32>
    %197 = math.tanh %196 : vector<8x128xf32>
    %198 = arith.mulf %194, %130 : vector<8x128xf32>
    %199 = arith.mulf %193, %197 : vector<8x128xf32>
    %200 = arith.addf %198, %199 : vector<8x128xf32>
    %201 = math.tanh %200 : vector<8x128xf32>
    %202 = arith.mulf %195, %201 : vector<8x128xf32>
    %203 = vector.shape_cast %177 : vector<8x1xi1> to vector<8x1xi1>
    %204 = vector.broadcast %203 : vector<8x1xi1> to vector<8x128xi1>
    %205 = arith.select %204, %202, %127 : vector<8x128xi1>, vector<8x128xf32>
    %206 = vector.shape_cast %177 : vector<8x1xi1> to vector<8x1xi1>
    %207 = vector.broadcast %206 : vector<8x1xi1> to vector<8x128xi1>
    %208 = arith.select %207, %200, %130 : vector<8x128xi1>, vector<8x128xf32>
    %cst_59 = arith.constant 0.000000e+00 : f32
    %209 = vector.broadcast %cst_59 : f32 to vector<8x128xf32>
    %210 = vector.shape_cast %177 : vector<8x1xi1> to vector<8x1xi1>
    %211 = vector.broadcast %210 : vector<8x1xi1> to vector<8x128xi1>
    %212 = arith.select %211, %202, %209 : vector<8x128xi1>, vector<8x128xf32>
    %c5 = arith.constant 5 : index
    %c0_60 = arith.constant 0 : index
    %c0_61 = arith.constant 0 : index
    %213 = vector.load %arg3[%c5, %c0_60, %c0_61] : memref<8x8x512xbf16, #tpu.memory_space<vmem>>, vector<1x8x512xbf16>
    %214 = vector.shape_cast %213 : vector<1x8x512xbf16> to vector<8x512xbf16>
    %215 = arith.extf %214 : vector<8x512xbf16> to vector<8x512xf32>
    %216 = arith.truncf %159 : vector<8x128xf32> to vector<8x128xbf16>
    %cst_62 = arith.constant dense<0.000000e+00> : vector<8x512xf32>
    %217 = tpu.matmul %216, %6, %cst_62 {dimension_numbers = #tpu.dot_dimension_numbers<[1], [0], [0], [1], [0, 0, 1, 1], [], []>} : vector<8x128xbf16>, vector<128x512xbf16>, vector<8x512xf32> -> vector<8x512xf32>
    %218 = arith.addf %215, %217 : vector<8x512xf32>
    %219 = vector.extract_strided_slice %218 {offsets = [0, 0], sizes = [8, 384], strides = [1, 1]} : vector<8x512xf32> to vector<8x384xf32>
    %220 = arith.negf %219 : vector<8x384xf32>
    %221 = math.exp %220 : vector<8x384xf32>
    %cst_63 = arith.constant 1.000000e+00 : f32
    %222 = vector.broadcast %cst_63 : f32 to vector<8x384xf32>
    %223 = arith.addf %222, %221 : vector<8x384xf32>
    %224 = arith.divf %222, %223 : vector<8x384xf32>
    %225 = vector.extract_strided_slice %224 {offsets = [0, 0], sizes = [8, 128], strides = [1, 1]} : vector<8x384xf32> to vector<8x128xf32>
    %226 = vector.extract_strided_slice %224 {offsets = [0, 128], sizes = [8, 128], strides = [1, 1]} : vector<8x384xf32> to vector<8x128xf32>
    %227 = vector.extract_strided_slice %224 {offsets = [0, 256], sizes = [8, 128], strides = [1, 1]} : vector<8x384xf32> to vector<8x128xf32>
    %228 = vector.extract_strided_slice %218 {offsets = [0, 384], sizes = [8, 128], strides = [1, 1]} : vector<8x512xf32> to vector<8x128xf32>
    %229 = math.tanh %228 : vector<8x128xf32>
    %230 = arith.mulf %226, %162 : vector<8x128xf32>
    %231 = arith.mulf %225, %229 : vector<8x128xf32>
    %232 = arith.addf %230, %231 : vector<8x128xf32>
    %233 = math.tanh %232 : vector<8x128xf32>
    %234 = arith.mulf %227, %233 : vector<8x128xf32>
    %235 = vector.shape_cast %180 : vector<8x1xi1> to vector<8x1xi1>
    %236 = vector.broadcast %235 : vector<8x1xi1> to vector<8x128xi1>
    %237 = arith.select %236, %234, %159 : vector<8x128xi1>, vector<8x128xf32>
    %238 = vector.shape_cast %180 : vector<8x1xi1> to vector<8x1xi1>
    %239 = vector.broadcast %238 : vector<8x1xi1> to vector<8x128xi1>
    %240 = arith.select %239, %232, %162 : vector<8x128xi1>, vector<8x128xf32>
    %cst_64 = arith.constant 0.000000e+00 : f32
    %241 = vector.broadcast %cst_64 : f32 to vector<8x128xf32>
    %242 = vector.shape_cast %180 : vector<8x1xi1> to vector<8x1xi1>
    %243 = vector.broadcast %242 : vector<8x1xi1> to vector<8x128xi1>
    %244 = arith.select %243, %234, %241 : vector<8x128xi1>, vector<8x128xf32>
    %245 = arith.truncf %212 : vector<8x128xf32> to vector<8x128xbf16>
    %c2_65 = arith.constant 2 : index
    %c0_66 = arith.constant 0 : index
    %c0_67 = arith.constant 0 : index
    %246 = vector.load %arg5[%c2_65, %c0_66, %c0_67] : memref<8x8x128xbf16, #tpu.memory_space<vmem>>, vector<1x8x128xbf16>
    %247 = vector.shape_cast %246 : vector<1x8x128xbf16> to vector<8x128xbf16>
    %248 = vector.shape_cast %245 : vector<8x128xbf16> to vector<1x8x128xbf16>
    tpu.vector_store %arg5[%c2_65, %c0_66, %c0_67], %248 {strides = array<i32>} : memref<8x8x128xbf16, #tpu.memory_space<vmem>>, vector<1x8x128xbf16>,
    %249 = arith.truncf %244 : vector<8x128xf32> to vector<8x128xbf16>
    %c5_68 = arith.constant 5 : index
    %c0_69 = arith.constant 0 : index
    %c0_70 = arith.constant 0 : index
    %250 = vector.load %arg6[%c5_68, %c0_69, %c0_70] : memref<8x8x128xbf16, #tpu.memory_space<vmem>>, vector<1x8x128xbf16>
    %251 = vector.shape_cast %250 : vector<1x8x128xbf16> to vector<8x128xbf16>
    %252 = vector.shape_cast %249 : vector<8x128xbf16> to vector<1x8x128xbf16>
    tpu.vector_store %arg6[%c5_68, %c0_69, %c0_70], %252 {strides = array<i32>} : memref<8x8x128xbf16, #tpu.memory_space<vmem>>, vector<1x8x128xbf16>,
    %c3_i32 = arith.constant 3 : i32
    %253 = arith.addi %16, %c3_i32 : i32
    %254 = vector.broadcast %253 : i32 to vector<8x1xi32>
    %255 = arith.cmpi sgt, %7, %254 : vector<8x1xi32>
    %c4_i32 = arith.constant 4 : i32
    %256 = arith.addi %18, %c4_i32 : i32
    %257 = vector.broadcast %256 : i32 to vector<8x1xi32>
    %258 = arith.cmpi sgt, %7, %257 : vector<8x1xi32>
    %c3 = arith.constant 3 : index
    %c0_71 = arith.constant 0 : index
    %c0_72 = arith.constant 0 : index
    %259 = vector.load %arg2[%c3, %c0_71, %c0_72] : memref<8x8x512xbf16, #tpu.memory_space<vmem>>, vector<1x8x512xbf16>
    %260 = vector.shape_cast %259 : vector<1x8x512xbf16> to vector<8x512xbf16>
    %261 = arith.extf %260 : vector<8x512xbf16> to vector<8x512xf32>
    %262 = arith.truncf %205 : vector<8x128xf32> to vector<8x128xbf16>
    %cst_73 = arith.constant dense<0.000000e+00> : vector<8x512xf32>
    %263 = tpu.matmul %262, %4, %cst_73 {dimension_numbers = #tpu.dot_dimension_numbers<[1], [0], [0], [1], [0, 0, 1, 1], [], []>} : vector<8x128xbf16>, vector<128x512xbf16>, vector<8x512xf32> -> vector<8x512xf32>
    %264 = arith.addf %261, %263 : vector<8x512xf32>
    %265 = vector.extract_strided_slice %264 {offsets = [0, 0], sizes = [8, 384], strides = [1, 1]} : vector<8x512xf32> to vector<8x384xf32>
    %266 = arith.negf %265 : vector<8x384xf32>
    %267 = math.exp %266 : vector<8x384xf32>
    %cst_74 = arith.constant 1.000000e+00 : f32
    %268 = vector.broadcast %cst_74 : f32 to vector<8x384xf32>
    %269 = arith.addf %268, %267 : vector<8x384xf32>
    %270 = arith.divf %268, %269 : vector<8x384xf32>
    %271 = vector.extract_strided_slice %270 {offsets = [0, 0], sizes = [8, 128], strides = [1, 1]} : vector<8x384xf32> to vector<8x128xf32>
    %272 = vector.extract_strided_slice %270 {offsets = [0, 128], sizes = [8, 128], strides = [1, 1]} : vector<8x384xf32> to vector<8x128xf32>
    %273 = vector.extract_strided_slice %270 {offsets = [0, 256], sizes = [8, 128], strides = [1, 1]} : vector<8x384xf32> to vector<8x128xf32>
    %274 = vector.extract_strided_slice %264 {offsets = [0, 384], sizes = [8, 128], strides = [1, 1]} : vector<8x512xf32> to vector<8x128xf32>
    %275 = math.tanh %274 : vector<8x128xf32>
    %276 = arith.mulf %272, %208 : vector<8x128xf32>
    %277 = arith.mulf %271, %275 : vector<8x128xf32>
    %278 = arith.addf %276, %277 : vector<8x128xf32>
    %279 = math.tanh %278 : vector<8x128xf32>
    %280 = arith.mulf %273, %279 : vector<8x128xf32>
    %281 = vector.shape_cast %255 : vector<8x1xi1> to vector<8x1xi1>
    %282 = vector.broadcast %281 : vector<8x1xi1> to vector<8x128xi1>
    %283 = arith.select %282, %280, %205 : vector<8x128xi1>, vector<8x128xf32>
    %284 = vector.shape_cast %255 : vector<8x1xi1> to vector<8x1xi1>
    %285 = vector.broadcast %284 : vector<8x1xi1> to vector<8x128xi1>
    %286 = arith.select %285, %278, %208 : vector<8x128xi1>, vector<8x128xf32>
    %cst_75 = arith.constant 0.000000e+00 : f32
    %287 = vector.broadcast %cst_75 : f32 to vector<8x128xf32>
    %288 = vector.shape_cast %255 : vector<8x1xi1> to vector<8x1xi1>
    %289 = vector.broadcast %288 : vector<8x1xi1> to vector<8x128xi1>
    %290 = arith.select %289, %280, %287 : vector<8x128xi1>, vector<8x128xf32>
    %c4 = arith.constant 4 : index
    %c0_76 = arith.constant 0 : index
    %c0_77 = arith.constant 0 : index
    %291 = vector.load %arg3[%c4, %c0_76, %c0_77] : memref<8x8x512xbf16, #tpu.memory_space<vmem>>, vector<1x8x512xbf16>
    %292 = vector.shape_cast %291 : vector<1x8x512xbf16> to vector<8x512xbf16>
    %293 = arith.extf %292 : vector<8x512xbf16> to vector<8x512xf32>
    %294 = arith.truncf %237 : vector<8x128xf32> to vector<8x128xbf16>
    %cst_78 = arith.constant dense<0.000000e+00> : vector<8x512xf32>
    %295 = tpu.matmul %294, %6, %cst_78 {dimension_numbers = #tpu.dot_dimension_numbers<[1], [0], [0], [1], [0, 0, 1, 1], [], []>} : vector<8x128xbf16>, vector<128x512xbf16>, vector<8x512xf32> -> vector<8x512xf32>
    %296 = arith.addf %293, %295 : vector<8x512xf32>
    %297 = vector.extract_strided_slice %296 {offsets = [0, 0], sizes = [8, 384], strides = [1, 1]} : vector<8x512xf32> to vector<8x384xf32>
    %298 = arith.negf %297 : vector<8x384xf32>
    %299 = math.exp %298 : vector<8x384xf32>
    %cst_79 = arith.constant 1.000000e+00 : f32
    %300 = vector.broadcast %cst_79 : f32 to vector<8x384xf32>
    %301 = arith.addf %300, %299 : vector<8x384xf32>
    %302 = arith.divf %300, %301 : vector<8x384xf32>
    %303 = vector.extract_strided_slice %302 {offsets = [0, 0], sizes = [8, 128], strides = [1, 1]} : vector<8x384xf32> to vector<8x128xf32>
    %304 = vector.extract_strided_slice %302 {offsets = [0, 128], sizes = [8, 128], strides = [1, 1]} : vector<8x384xf32> to vector<8x128xf32>
    %305 = vector.extract_strided_slice %302 {offsets = [0, 256], sizes = [8, 128], strides = [1, 1]} : vector<8x384xf32> to vector<8x128xf32>
    %306 = vector.extract_strided_slice %296 {offsets = [0, 384], sizes = [8, 128], strides = [1, 1]} : vector<8x512xf32> to vector<8x128xf32>
    %307 = math.tanh %306 : vector<8x128xf32>
    %308 = arith.mulf %304, %240 : vector<8x128xf32>
    %309 = arith.mulf %303, %307 : vector<8x128xf32>
    %310 = arith.addf %308, %309 : vector<8x128xf32>
    %311 = math.tanh %310 : vector<8x128xf32>
    %312 = arith.mulf %305, %311 : vector<8x128xf32>
    %313 = vector.shape_cast %258 : vector<8x1xi1> to vector<8x1xi1>
    %314 = vector.broadcast %313 : vector<8x1xi1> to vector<8x128xi1>
    %315 = arith.select %314, %312, %237 : vector<8x128xi1>, vector<8x128xf32>
    %316 = vector.shape_cast %258 : vector<8x1xi1> to vector<8x1xi1>
    %317 = vector.broadcast %316 : vector<8x1xi1> to vector<8x128xi1>
    %318 = arith.select %317, %310, %240 : vector<8x128xi1>, vector<8x128xf32>
    %cst_80 = arith.constant 0.000000e+00 : f32
    %319 = vector.broadcast %cst_80 : f32 to vector<8x128xf32>
    %320 = vector.shape_cast %258 : vector<8x1xi1> to vector<8x1xi1>
    %321 = vector.broadcast %320 : vector<8x1xi1> to vector<8x128xi1>
    %322 = arith.select %321, %312, %319 : vector<8x128xi1>, vector<8x128xf32>
    %323 = arith.truncf %290 : vector<8x128xf32> to vector<8x128xbf16>
    %c3_81 = arith.constant 3 : index
    %c0_82 = arith.constant 0 : index
    %c0_83 = arith.constant 0 : index
    %324 = vector.load %arg5[%c3_81, %c0_82, %c0_83] : memref<8x8x128xbf16, #tpu.memory_space<vmem>>, vector<1x8x128xbf16>
    %325 = vector.shape_cast %324 : vector<1x8x128xbf16> to vector<8x128xbf16>
    %326 = vector.shape_cast %323 : vector<8x128xbf16> to vector<1x8x128xbf16>
    tpu.vector_store %arg5[%c3_81, %c0_82, %c0_83], %326 {strides = array<i32>} : memref<8x8x128xbf16, #tpu.memory_space<vmem>>, vector<1x8x128xbf16>,
    %327 = arith.truncf %322 : vector<8x128xf32> to vector<8x128xbf16>
    %c4_84 = arith.constant 4 : index
    %c0_85 = arith.constant 0 : index
    %c0_86 = arith.constant 0 : index
    %328 = vector.load %arg6[%c4_84, %c0_85, %c0_86] : memref<8x8x128xbf16, #tpu.memory_space<vmem>>, vector<1x8x128xbf16>
    %329 = vector.shape_cast %328 : vector<1x8x128xbf16> to vector<8x128xbf16>
    %330 = vector.shape_cast %327 : vector<8x128xbf16> to vector<1x8x128xbf16>
    tpu.vector_store %arg6[%c4_84, %c0_85, %c0_86], %330 {strides = array<i32>} : memref<8x8x128xbf16, #tpu.memory_space<vmem>>, vector<1x8x128xbf16>,
    %c4_i32_87 = arith.constant 4 : i32
    %331 = arith.addi %16, %c4_i32_87 : i32
    %332 = vector.broadcast %331 : i32 to vector<8x1xi32>
    %333 = arith.cmpi sgt, %7, %332 : vector<8x1xi32>
    %c3_i32_88 = arith.constant 3 : i32
    %334 = arith.addi %18, %c3_i32_88 : i32
    %335 = vector.broadcast %334 : i32 to vector<8x1xi32>
    %336 = arith.cmpi sgt, %7, %335 : vector<8x1xi32>
    %c4_89 = arith.constant 4 : index
    %c0_90 = arith.constant 0 : index
    %c0_91 = arith.constant 0 : index
    %337 = vector.load %arg2[%c4_89, %c0_90, %c0_91] : memref<8x8x512xbf16, #tpu.memory_space<vmem>>, vector<1x8x512xbf16>
    %338 = vector.shape_cast %337 : vector<1x8x512xbf16> to vector<8x512xbf16>
    %339 = arith.extf %338 : vector<8x512xbf16> to vector<8x512xf32>
    %340 = arith.truncf %283 : vector<8x128xf32> to vector<8x128xbf16>
    %cst_92 = arith.constant dense<0.000000e+00> : vector<8x512xf32>
    %341 = tpu.matmul %340, %4, %cst_92 {dimension_numbers = #tpu.dot_dimension_numbers<[1], [0], [0], [1], [0, 0, 1, 1], [], []>} : vector<8x128xbf16>, vector<128x512xbf16>, vector<8x512xf32> -> vector<8x512xf32>
    %342 = arith.addf %339, %341 : vector<8x512xf32>
    %343 = vector.extract_strided_slice %342 {offsets = [0, 0], sizes = [8, 384], strides = [1, 1]} : vector<8x512xf32> to vector<8x384xf32>
    %344 = arith.negf %343 : vector<8x384xf32>
    %345 = math.exp %344 : vector<8x384xf32>
    %cst_93 = arith.constant 1.000000e+00 : f32
    %346 = vector.broadcast %cst_93 : f32 to vector<8x384xf32>
    %347 = arith.addf %346, %345 : vector<8x384xf32>
    %348 = arith.divf %346, %347 : vector<8x384xf32>
    %349 = vector.extract_strided_slice %348 {offsets = [0, 0], sizes = [8, 128], strides = [1, 1]} : vector<8x384xf32> to vector<8x128xf32>
    %350 = vector.extract_strided_slice %348 {offsets = [0, 128], sizes = [8, 128], strides = [1, 1]} : vector<8x384xf32> to vector<8x128xf32>
    %351 = vector.extract_strided_slice %348 {offsets = [0, 256], sizes = [8, 128], strides = [1, 1]} : vector<8x384xf32> to vector<8x128xf32>
    %352 = vector.extract_strided_slice %342 {offsets = [0, 384], sizes = [8, 128], strides = [1, 1]} : vector<8x512xf32> to vector<8x128xf32>
    %353 = math.tanh %352 : vector<8x128xf32>
    %354 = arith.mulf %350, %286 : vector<8x128xf32>
    %355 = arith.mulf %349, %353 : vector<8x128xf32>
    %356 = arith.addf %354, %355 : vector<8x128xf32>
    %357 = math.tanh %356 : vector<8x128xf32>
    %358 = arith.mulf %351, %357 : vector<8x128xf32>
    %359 = vector.shape_cast %333 : vector<8x1xi1> to vector<8x1xi1>
    %360 = vector.broadcast %359 : vector<8x1xi1> to vector<8x128xi1>
    %361 = arith.select %360, %358, %283 : vector<8x128xi1>, vector<8x128xf32>
    %362 = vector.shape_cast %333 : vector<8x1xi1> to vector<8x1xi1>
    %363 = vector.broadcast %362 : vector<8x1xi1> to vector<8x128xi1>
    %364 = arith.select %363, %356, %286 : vector<8x128xi1>, vector<8x128xf32>
    %cst_94 = arith.constant 0.000000e+00 : f32
    %365 = vector.broadcast %cst_94 : f32 to vector<8x128xf32>
    %366 = vector.shape_cast %333 : vector<8x1xi1> to vector<8x1xi1>
    %367 = vector.broadcast %366 : vector<8x1xi1> to vector<8x128xi1>
    %368 = arith.select %367, %358, %365 : vector<8x128xi1>, vector<8x128xf32>
    %c3_95 = arith.constant 3 : index
    %c0_96 = arith.constant 0 : index
    %c0_97 = arith.constant 0 : index
    %369 = vector.load %arg3[%c3_95, %c0_96, %c0_97] : memref<8x8x512xbf16, #tpu.memory_space<vmem>>, vector<1x8x512xbf16>
    %370 = vector.shape_cast %369 : vector<1x8x512xbf16> to vector<8x512xbf16>
    %371 = arith.extf %370 : vector<8x512xbf16> to vector<8x512xf32>
    %372 = arith.truncf %315 : vector<8x128xf32> to vector<8x128xbf16>
    %cst_98 = arith.constant dense<0.000000e+00> : vector<8x512xf32>
    %373 = tpu.matmul %372, %6, %cst_98 {dimension_numbers = #tpu.dot_dimension_numbers<[1], [0], [0], [1], [0, 0, 1, 1], [], []>} : vector<8x128xbf16>, vector<128x512xbf16>, vector<8x512xf32> -> vector<8x512xf32>
    %374 = arith.addf %371, %373 : vector<8x512xf32>
    %375 = vector.extract_strided_slice %374 {offsets = [0, 0], sizes = [8, 384], strides = [1, 1]} : vector<8x512xf32> to vector<8x384xf32>
    %376 = arith.negf %375 : vector<8x384xf32>
    %377 = math.exp %376 : vector<8x384xf32>
    %cst_99 = arith.constant 1.000000e+00 : f32
    %378 = vector.broadcast %cst_99 : f32 to vector<8x384xf32>
    %379 = arith.addf %378, %377 : vector<8x384xf32>
    %380 = arith.divf %378, %379 : vector<8x384xf32>
    %381 = vector.extract_strided_slice %380 {offsets = [0, 0], sizes = [8, 128], strides = [1, 1]} : vector<8x384xf32> to vector<8x128xf32>
    %382 = vector.extract_strided_slice %380 {offsets = [0, 128], sizes = [8, 128], strides = [1, 1]} : vector<8x384xf32> to vector<8x128xf32>
    %383 = vector.extract_strided_slice %380 {offsets = [0, 256], sizes = [8, 128], strides = [1, 1]} : vector<8x384xf32> to vector<8x128xf32>
    %384 = vector.extract_strided_slice %374 {offsets = [0, 384], sizes = [8, 128], strides = [1, 1]} : vector<8x512xf32> to vector<8x128xf32>
    %385 = math.tanh %384 : vector<8x128xf32>
    %386 = arith.mulf %382, %318 : vector<8x128xf32>
    %387 = arith.mulf %381, %385 : vector<8x128xf32>
    %388 = arith.addf %386, %387 : vector<8x128xf32>
    %389 = math.tanh %388 : vector<8x128xf32>
    %390 = arith.mulf %383, %389 : vector<8x128xf32>
    %391 = vector.shape_cast %336 : vector<8x1xi1> to vector<8x1xi1>
    %392 = vector.broadcast %391 : vector<8x1xi1> to vector<8x128xi1>
    %393 = arith.select %392, %390, %315 : vector<8x128xi1>, vector<8x128xf32>
    %394 = vector.shape_cast %336 : vector<8x1xi1> to vector<8x1xi1>
    %395 = vector.broadcast %394 : vector<8x1xi1> to vector<8x128xi1>
    %396 = arith.select %395, %388, %318 : vector<8x128xi1>, vector<8x128xf32>
    %cst_100 = arith.constant 0.000000e+00 : f32
    %397 = vector.broadcast %cst_100 : f32 to vector<8x128xf32>
    %398 = vector.shape_cast %336 : vector<8x1xi1> to vector<8x1xi1>
    %399 = vector.broadcast %398 : vector<8x1xi1> to vector<8x128xi1>
    %400 = arith.select %399, %390, %397 : vector<8x128xi1>, vector<8x128xf32>
    %401 = arith.truncf %368 : vector<8x128xf32> to vector<8x128xbf16>
    %c4_101 = arith.constant 4 : index
    %c0_102 = arith.constant 0 : index
    %c0_103 = arith.constant 0 : index
    %402 = vector.load %arg5[%c4_101, %c0_102, %c0_103] : memref<8x8x128xbf16, #tpu.memory_space<vmem>>, vector<1x8x128xbf16>
    %403 = vector.shape_cast %402 : vector<1x8x128xbf16> to vector<8x128xbf16>
    %404 = vector.shape_cast %401 : vector<8x128xbf16> to vector<1x8x128xbf16>
    tpu.vector_store %arg5[%c4_101, %c0_102, %c0_103], %404 {strides = array<i32>} : memref<8x8x128xbf16, #tpu.memory_space<vmem>>, vector<1x8x128xbf16>,
    %405 = arith.truncf %400 : vector<8x128xf32> to vector<8x128xbf16>
    %c3_104 = arith.constant 3 : index
    %c0_105 = arith.constant 0 : index
    %c0_106 = arith.constant 0 : index
    %406 = vector.load %arg6[%c3_104, %c0_105, %c0_106] : memref<8x8x128xbf16, #tpu.memory_space<vmem>>, vector<1x8x128xbf16>
    %407 = vector.shape_cast %406 : vector<1x8x128xbf16> to vector<8x128xbf16>
    %408 = vector.shape_cast %405 : vector<8x128xbf16> to vector<1x8x128xbf16>
    tpu.vector_store %arg6[%c3_104, %c0_105, %c0_106], %408 {strides = array<i32>} : memref<8x8x128xbf16, #tpu.memory_space<vmem>>, vector<1x8x128xbf16>,
    %c5_i32_107 = arith.constant 5 : i32
    %409 = arith.addi %16, %c5_i32_107 : i32
    %410 = vector.broadcast %409 : i32 to vector<8x1xi32>
    %411 = arith.cmpi sgt, %7, %410 : vector<8x1xi32>
    %c2_i32_108 = arith.constant 2 : i32
    %412 = arith.addi %18, %c2_i32_108 : i32
    %413 = vector.broadcast %412 : i32 to vector<8x1xi32>
    %414 = arith.cmpi sgt, %7, %413 : vector<8x1xi32>
    %c5_109 = arith.constant 5 : index
    %c0_110 = arith.constant 0 : index
    %c0_111 = arith.constant 0 : index
    %415 = vector.load %arg2[%c5_109, %c0_110, %c0_111] : memref<8x8x512xbf16, #tpu.memory_space<vmem>>, vector<1x8x512xbf16>
    %416 = vector.shape_cast %415 : vector<1x8x512xbf16> to vector<8x512xbf16>
    %417 = arith.extf %416 : vector<8x512xbf16> to vector<8x512xf32>
    %418 = arith.truncf %361 : vector<8x128xf32> to vector<8x128xbf16>
    %cst_112 = arith.constant dense<0.000000e+00> : vector<8x512xf32>
    %419 = tpu.matmul %418, %4, %cst_112 {dimension_numbers = #tpu.dot_dimension_numbers<[1], [0], [0], [1], [0, 0, 1, 1], [], []>} : vector<8x128xbf16>, vector<128x512xbf16>, vector<8x512xf32> -> vector<8x512xf32>
    %420 = arith.addf %417, %419 : vector<8x512xf32>
    %421 = vector.extract_strided_slice %420 {offsets = [0, 0], sizes = [8, 384], strides = [1, 1]} : vector<8x512xf32> to vector<8x384xf32>
    %422 = arith.negf %421 : vector<8x384xf32>
    %423 = math.exp %422 : vector<8x384xf32>
    %cst_113 = arith.constant 1.000000e+00 : f32
    %424 = vector.broadcast %cst_113 : f32 to vector<8x384xf32>
    %425 = arith.addf %424, %423 : vector<8x384xf32>
    %426 = arith.divf %424, %425 : vector<8x384xf32>
    %427 = vector.extract_strided_slice %426 {offsets = [0, 0], sizes = [8, 128], strides = [1, 1]} : vector<8x384xf32> to vector<8x128xf32>
    %428 = vector.extract_strided_slice %426 {offsets = [0, 128], sizes = [8, 128], strides = [1, 1]} : vector<8x384xf32> to vector<8x128xf32>
    %429 = vector.extract_strided_slice %426 {offsets = [0, 256], sizes = [8, 128], strides = [1, 1]} : vector<8x384xf32> to vector<8x128xf32>
    %430 = vector.extract_strided_slice %420 {offsets = [0, 384], sizes = [8, 128], strides = [1, 1]} : vector<8x512xf32> to vector<8x128xf32>
    %431 = math.tanh %430 : vector<8x128xf32>
    %432 = arith.mulf %428, %364 : vector<8x128xf32>
    %433 = arith.mulf %427, %431 : vector<8x128xf32>
    %434 = arith.addf %432, %433 : vector<8x128xf32>
    %435 = math.tanh %434 : vector<8x128xf32>
    %436 = arith.mulf %429, %435 : vector<8x128xf32>
    %437 = vector.shape_cast %411 : vector<8x1xi1> to vector<8x1xi1>
    %438 = vector.broadcast %437 : vector<8x1xi1> to vector<8x128xi1>
    %439 = arith.select %438, %436, %361 : vector<8x128xi1>, vector<8x128xf32>
    %440 = vector.shape_cast %411 : vector<8x1xi1> to vector<8x1xi1>
    %441 = vector.broadcast %440 : vector<8x1xi1> to vector<8x128xi1>
    %442 = arith.select %441, %434, %364 : vector<8x128xi1>, vector<8x128xf32>
    %cst_114 = arith.constant 0.000000e+00 : f32
    %443 = vector.broadcast %cst_114 : f32 to vector<8x128xf32>
    %444 = vector.shape_cast %411 : vector<8x1xi1> to vector<8x1xi1>
    %445 = vector.broadcast %444 : vector<8x1xi1> to vector<8x128xi1>
    %446 = arith.select %445, %436, %443 : vector<8x128xi1>, vector<8x128xf32>
    %c2_115 = arith.constant 2 : index
    %c0_116 = arith.constant 0 : index
    %c0_117 = arith.constant 0 : index
    %447 = vector.load %arg3[%c2_115, %c0_116, %c0_117] : memref<8x8x512xbf16, #tpu.memory_space<vmem>>, vector<1x8x512xbf16>
    %448 = vector.shape_cast %447 : vector<1x8x512xbf16> to vector<8x512xbf16>
    %449 = arith.extf %448 : vector<8x512xbf16> to vector<8x512xf32>
    %450 = arith.truncf %393 : vector<8x128xf32> to vector<8x128xbf16>
    %cst_118 = arith.constant dense<0.000000e+00> : vector<8x512xf32>
    %451 = tpu.matmul %450, %6, %cst_118 {dimension_numbers = #tpu.dot_dimension_numbers<[1], [0], [0], [1], [0, 0, 1, 1], [], []>} : vector<8x128xbf16>, vector<128x512xbf16>, vector<8x512xf32> -> vector<8x512xf32>
    %452 = arith.addf %449, %451 : vector<8x512xf32>
    %453 = vector.extract_strided_slice %452 {offsets = [0, 0], sizes = [8, 384], strides = [1, 1]} : vector<8x512xf32> to vector<8x384xf32>
    %454 = arith.negf %453 : vector<8x384xf32>
    %455 = math.exp %454 : vector<8x384xf32>
    %cst_119 = arith.constant 1.000000e+00 : f32
    %456 = vector.broadcast %cst_119 : f32 to vector<8x384xf32>
    %457 = arith.addf %456, %455 : vector<8x384xf32>
    %458 = arith.divf %456, %457 : vector<8x384xf32>
    %459 = vector.extract_strided_slice %458 {offsets = [0, 0], sizes = [8, 128], strides = [1, 1]} : vector<8x384xf32> to vector<8x128xf32>
    %460 = vector.extract_strided_slice %458 {offsets = [0, 128], sizes = [8, 128], strides = [1, 1]} : vector<8x384xf32> to vector<8x128xf32>
    %461 = vector.extract_strided_slice %458 {offsets = [0, 256], sizes = [8, 128], strides = [1, 1]} : vector<8x384xf32> to vector<8x128xf32>
    %462 = vector.extract_strided_slice %452 {offsets = [0, 384], sizes = [8, 128], strides = [1, 1]} : vector<8x512xf32> to vector<8x128xf32>
    %463 = math.tanh %462 : vector<8x128xf32>
    %464 = arith.mulf %460, %396 : vector<8x128xf32>
    %465 = arith.mulf %459, %463 : vector<8x128xf32>
    %466 = arith.addf %464, %465 : vector<8x128xf32>
    %467 = math.tanh %466 : vector<8x128xf32>
    %468 = arith.mulf %461, %467 : vector<8x128xf32>
    %469 = vector.shape_cast %414 : vector<8x1xi1> to vector<8x1xi1>
    %470 = vector.broadcast %469 : vector<8x1xi1> to vector<8x128xi1>
    %471 = arith.select %470, %468, %393 : vector<8x128xi1>, vector<8x128xf32>
    %472 = vector.shape_cast %414 : vector<8x1xi1> to vector<8x1xi1>
    %473 = vector.broadcast %472 : vector<8x1xi1> to vector<8x128xi1>
    %474 = arith.select %473, %466, %396 : vector<8x128xi1>, vector<8x128xf32>
    %cst_120 = arith.constant 0.000000e+00 : f32
    %475 = vector.broadcast %cst_120 : f32 to vector<8x128xf32>
    %476 = vector.shape_cast %414 : vector<8x1xi1> to vector<8x1xi1>
    %477 = vector.broadcast %476 : vector<8x1xi1> to vector<8x128xi1>
    %478 = arith.select %477, %468, %475 : vector<8x128xi1>, vector<8x128xf32>
    %479 = arith.truncf %446 : vector<8x128xf32> to vector<8x128xbf16>
    %c5_121 = arith.constant 5 : index
    %c0_122 = arith.constant 0 : index
    %c0_123 = arith.constant 0 : index
    %480 = vector.load %arg5[%c5_121, %c0_122, %c0_123] : memref<8x8x128xbf16, #tpu.memory_space<vmem>>, vector<1x8x128xbf16>
    %481 = vector.shape_cast %480 : vector<1x8x128xbf16> to vector<8x128xbf16>
    %482 = vector.shape_cast %479 : vector<8x128xbf16> to vector<1x8x128xbf16>
    tpu.vector_store %arg5[%c5_121, %c0_122, %c0_123], %482 {strides = array<i32>} : memref<8x8x128xbf16, #tpu.memory_space<vmem>>, vector<1x8x128xbf16>,
    %483 = arith.truncf %478 : vector<8x128xf32> to vector<8x128xbf16>
    %c2_124 = arith.constant 2 : index
    %c0_125 = arith.constant 0 : index
    %c0_126 = arith.constant 0 : index
    %484 = vector.load %arg6[%c2_124, %c0_125, %c0_126] : memref<8x8x128xbf16, #tpu.memory_space<vmem>>, vector<1x8x128xbf16>
    %485 = vector.shape_cast %484 : vector<1x8x128xbf16> to vector<8x128xbf16>
    %486 = vector.shape_cast %483 : vector<8x128xbf16> to vector<1x8x128xbf16>
    tpu.vector_store %arg6[%c2_124, %c0_125, %c0_126], %486 {strides = array<i32>} : memref<8x8x128xbf16, #tpu.memory_space<vmem>>, vector<1x8x128xbf16>,
    %c6_i32_127 = arith.constant 6 : i32
    %487 = arith.addi %16, %c6_i32_127 : i32
    %488 = vector.broadcast %487 : i32 to vector<8x1xi32>
    %489 = arith.cmpi sgt, %7, %488 : vector<8x1xi32>
    %c1_i32_128 = arith.constant 1 : i32
    %490 = arith.addi %18, %c1_i32_128 : i32
    %491 = vector.broadcast %490 : i32 to vector<8x1xi32>
    %492 = arith.cmpi sgt, %7, %491 : vector<8x1xi32>
    %c6_129 = arith.constant 6 : index
    %c0_130 = arith.constant 0 : index
    %c0_131 = arith.constant 0 : index
    %493 = vector.load %arg2[%c6_129, %c0_130, %c0_131] : memref<8x8x512xbf16, #tpu.memory_space<vmem>>, vector<1x8x512xbf16>
    %494 = vector.shape_cast %493 : vector<1x8x512xbf16> to vector<8x512xbf16>
    %495 = arith.extf %494 : vector<8x512xbf16> to vector<8x512xf32>
    %496 = arith.truncf %439 : vector<8x128xf32> to vector<8x128xbf16>
    %cst_132 = arith.constant dense<0.000000e+00> : vector<8x512xf32>
    %497 = tpu.matmul %496, %4, %cst_132 {dimension_numbers = #tpu.dot_dimension_numbers<[1], [0], [0], [1], [0, 0, 1, 1], [], []>} : vector<8x128xbf16>, vector<128x512xbf16>, vector<8x512xf32> -> vector<8x512xf32>
    %498 = arith.addf %495, %497 : vector<8x512xf32>
    %499 = vector.extract_strided_slice %498 {offsets = [0, 0], sizes = [8, 384], strides = [1, 1]} : vector<8x512xf32> to vector<8x384xf32>
    %500 = arith.negf %499 : vector<8x384xf32>
    %501 = math.exp %500 : vector<8x384xf32>
    %cst_133 = arith.constant 1.000000e+00 : f32
    %502 = vector.broadcast %cst_133 : f32 to vector<8x384xf32>
    %503 = arith.addf %502, %501 : vector<8x384xf32>
    %504 = arith.divf %502, %503 : vector<8x384xf32>
    %505 = vector.extract_strided_slice %504 {offsets = [0, 0], sizes = [8, 128], strides = [1, 1]} : vector<8x384xf32> to vector<8x128xf32>
    %506 = vector.extract_strided_slice %504 {offsets = [0, 128], sizes = [8, 128], strides = [1, 1]} : vector<8x384xf32> to vector<8x128xf32>
    %507 = vector.extract_strided_slice %504 {offsets = [0, 256], sizes = [8, 128], strides = [1, 1]} : vector<8x384xf32> to vector<8x128xf32>
    %508 = vector.extract_strided_slice %498 {offsets = [0, 384], sizes = [8, 128], strides = [1, 1]} : vector<8x512xf32> to vector<8x128xf32>
    %509 = math.tanh %508 : vector<8x128xf32>
    %510 = arith.mulf %506, %442 : vector<8x128xf32>
    %511 = arith.mulf %505, %509 : vector<8x128xf32>
    %512 = arith.addf %510, %511 : vector<8x128xf32>
    %513 = math.tanh %512 : vector<8x128xf32>
    %514 = arith.mulf %507, %513 : vector<8x128xf32>
    %515 = vector.shape_cast %489 : vector<8x1xi1> to vector<8x1xi1>
    %516 = vector.broadcast %515 : vector<8x1xi1> to vector<8x128xi1>
    %517 = arith.select %516, %514, %439 : vector<8x128xi1>, vector<8x128xf32>
    %518 = vector.shape_cast %489 : vector<8x1xi1> to vector<8x1xi1>
    %519 = vector.broadcast %518 : vector<8x1xi1> to vector<8x128xi1>
    %520 = arith.select %519, %512, %442 : vector<8x128xi1>, vector<8x128xf32>
    %cst_134 = arith.constant 0.000000e+00 : f32
    %521 = vector.broadcast %cst_134 : f32 to vector<8x128xf32>
    %522 = vector.shape_cast %489 : vector<8x1xi1> to vector<8x1xi1>
    %523 = vector.broadcast %522 : vector<8x1xi1> to vector<8x128xi1>
    %524 = arith.select %523, %514, %521 : vector<8x128xi1>, vector<8x128xf32>
    %c1_135 = arith.constant 1 : index
    %c0_136 = arith.constant 0 : index
    %c0_137 = arith.constant 0 : index
    %525 = vector.load %arg3[%c1_135, %c0_136, %c0_137] : memref<8x8x512xbf16, #tpu.memory_space<vmem>>, vector<1x8x512xbf16>
    %526 = vector.shape_cast %525 : vector<1x8x512xbf16> to vector<8x512xbf16>
    %527 = arith.extf %526 : vector<8x512xbf16> to vector<8x512xf32>
    %528 = arith.truncf %471 : vector<8x128xf32> to vector<8x128xbf16>
    %cst_138 = arith.constant dense<0.000000e+00> : vector<8x512xf32>
    %529 = tpu.matmul %528, %6, %cst_138 {dimension_numbers = #tpu.dot_dimension_numbers<[1], [0], [0], [1], [0, 0, 1, 1], [], []>} : vector<8x128xbf16>, vector<128x512xbf16>, vector<8x512xf32> -> vector<8x512xf32>
    %530 = arith.addf %527, %529 : vector<8x512xf32>
    %531 = vector.extract_strided_slice %530 {offsets = [0, 0], sizes = [8, 384], strides = [1, 1]} : vector<8x512xf32> to vector<8x384xf32>
    %532 = arith.negf %531 : vector<8x384xf32>
    %533 = math.exp %532 : vector<8x384xf32>
    %cst_139 = arith.constant 1.000000e+00 : f32
    %534 = vector.broadcast %cst_139 : f32 to vector<8x384xf32>
    %535 = arith.addf %534, %533 : vector<8x384xf32>
    %536 = arith.divf %534, %535 : vector<8x384xf32>
    %537 = vector.extract_strided_slice %536 {offsets = [0, 0], sizes = [8, 128], strides = [1, 1]} : vector<8x384xf32> to vector<8x128xf32>
    %538 = vector.extract_strided_slice %536 {offsets = [0, 128], sizes = [8, 128], strides = [1, 1]} : vector<8x384xf32> to vector<8x128xf32>
    %539 = vector.extract_strided_slice %536 {offsets = [0, 256], sizes = [8, 128], strides = [1, 1]} : vector<8x384xf32> to vector<8x128xf32>
    %540 = vector.extract_strided_slice %530 {offsets = [0, 384], sizes = [8, 128], strides = [1, 1]} : vector<8x512xf32> to vector<8x128xf32>
    %541 = math.tanh %540 : vector<8x128xf32>
    %542 = arith.mulf %538, %474 : vector<8x128xf32>
    %543 = arith.mulf %537, %541 : vector<8x128xf32>
    %544 = arith.addf %542, %543 : vector<8x128xf32>
    %545 = math.tanh %544 : vector<8x128xf32>
    %546 = arith.mulf %539, %545 : vector<8x128xf32>
    %547 = vector.shape_cast %492 : vector<8x1xi1> to vector<8x1xi1>
    %548 = vector.broadcast %547 : vector<8x1xi1> to vector<8x128xi1>
    %549 = arith.select %548, %546, %471 : vector<8x128xi1>, vector<8x128xf32>
    %550 = vector.shape_cast %492 : vector<8x1xi1> to vector<8x1xi1>
    %551 = vector.broadcast %550 : vector<8x1xi1> to vector<8x128xi1>
    %552 = arith.select %551, %544, %474 : vector<8x128xi1>, vector<8x128xf32>
    %cst_140 = arith.constant 0.000000e+00 : f32
    %553 = vector.broadcast %cst_140 : f32 to vector<8x128xf32>
    %554 = vector.shape_cast %492 : vector<8x1xi1> to vector<8x1xi1>
    %555 = vector.broadcast %554 : vector<8x1xi1> to vector<8x128xi1>
    %556 = arith.select %555, %546, %553 : vector<8x128xi1>, vector<8x128xf32>
    %557 = arith.truncf %524 : vector<8x128xf32> to vector<8x128xbf16>
    %c6_141 = arith.constant 6 : index
    %c0_142 = arith.constant 0 : index
    %c0_143 = arith.constant 0 : index
    %558 = vector.load %arg5[%c6_141, %c0_142, %c0_143] : memref<8x8x128xbf16, #tpu.memory_space<vmem>>, vector<1x8x128xbf16>
    %559 = vector.shape_cast %558 : vector<1x8x128xbf16> to vector<8x128xbf16>
    %560 = vector.shape_cast %557 : vector<8x128xbf16> to vector<1x8x128xbf16>
    tpu.vector_store %arg5[%c6_141, %c0_142, %c0_143], %560 {strides = array<i32>} : memref<8x8x128xbf16, #tpu.memory_space<vmem>>, vector<1x8x128xbf16>,
    %561 = arith.truncf %556 : vector<8x128xf32> to vector<8x128xbf16>
    %c1_144 = arith.constant 1 : index
    %c0_145 = arith.constant 0 : index
    %c0_146 = arith.constant 0 : index
    %562 = vector.load %arg6[%c1_144, %c0_145, %c0_146] : memref<8x8x128xbf16, #tpu.memory_space<vmem>>, vector<1x8x128xbf16>
    %563 = vector.shape_cast %562 : vector<1x8x128xbf16> to vector<8x128xbf16>
    %564 = vector.shape_cast %561 : vector<8x128xbf16> to vector<1x8x128xbf16>
    tpu.vector_store %arg6[%c1_144, %c0_145, %c0_146], %564 {strides = array<i32>} : memref<8x8x128xbf16, #tpu.memory_space<vmem>>, vector<1x8x128xbf16>,
    %c7_i32_147 = arith.constant 7 : i32
    %565 = arith.addi %16, %c7_i32_147 : i32
    %566 = vector.broadcast %565 : i32 to vector<8x1xi32>
    %567 = arith.cmpi sgt, %7, %566 : vector<8x1xi32>
    %c0_i32_148 = arith.constant 0 : i32
    %568 = arith.addi %18, %c0_i32_148 : i32
    %569 = vector.broadcast %568 : i32 to vector<8x1xi32>
    %570 = arith.cmpi sgt, %7, %569 : vector<8x1xi32>
    %c7_149 = arith.constant 7 : index
    %c0_150 = arith.constant 0 : index
    %c0_151 = arith.constant 0 : index
    %571 = vector.load %arg2[%c7_149, %c0_150, %c0_151] : memref<8x8x512xbf16, #tpu.memory_space<vmem>>, vector<1x8x512xbf16>
    %572 = vector.shape_cast %571 : vector<1x8x512xbf16> to vector<8x512xbf16>
    %573 = arith.extf %572 : vector<8x512xbf16> to vector<8x512xf32>
    %574 = arith.truncf %517 : vector<8x128xf32> to vector<8x128xbf16>
    %cst_152 = arith.constant dense<0.000000e+00> : vector<8x512xf32>
    %575 = tpu.matmul %574, %4, %cst_152 {dimension_numbers = #tpu.dot_dimension_numbers<[1], [0], [0], [1], [0, 0, 1, 1], [], []>} : vector<8x128xbf16>, vector<128x512xbf16>, vector<8x512xf32> -> vector<8x512xf32>
    %576 = arith.addf %573, %575 : vector<8x512xf32>
    %577 = vector.extract_strided_slice %576 {offsets = [0, 0], sizes = [8, 384], strides = [1, 1]} : vector<8x512xf32> to vector<8x384xf32>
    %578 = arith.negf %577 : vector<8x384xf32>
    %579 = math.exp %578 : vector<8x384xf32>
    %cst_153 = arith.constant 1.000000e+00 : f32
    %580 = vector.broadcast %cst_153 : f32 to vector<8x384xf32>
    %581 = arith.addf %580, %579 : vector<8x384xf32>
    %582 = arith.divf %580, %581 : vector<8x384xf32>
    %583 = vector.extract_strided_slice %582 {offsets = [0, 0], sizes = [8, 128], strides = [1, 1]} : vector<8x384xf32> to vector<8x128xf32>
    %584 = vector.extract_strided_slice %582 {offsets = [0, 128], sizes = [8, 128], strides = [1, 1]} : vector<8x384xf32> to vector<8x128xf32>
    %585 = vector.extract_strided_slice %582 {offsets = [0, 256], sizes = [8, 128], strides = [1, 1]} : vector<8x384xf32> to vector<8x128xf32>
    %586 = vector.extract_strided_slice %576 {offsets = [0, 384], sizes = [8, 128], strides = [1, 1]} : vector<8x512xf32> to vector<8x128xf32>
    %587 = math.tanh %586 : vector<8x128xf32>
    %588 = arith.mulf %584, %520 : vector<8x128xf32>
    %589 = arith.mulf %583, %587 : vector<8x128xf32>
    %590 = arith.addf %588, %589 : vector<8x128xf32>
    %591 = math.tanh %590 : vector<8x128xf32>
    %592 = arith.mulf %585, %591 : vector<8x128xf32>
    %593 = vector.shape_cast %567 : vector<8x1xi1> to vector<8x1xi1>
    %594 = vector.broadcast %593 : vector<8x1xi1> to vector<8x128xi1>
    %595 = arith.select %594, %592, %517 : vector<8x128xi1>, vector<8x128xf32>
    %596 = vector.shape_cast %567 : vector<8x1xi1> to vector<8x1xi1>
    %597 = vector.broadcast %596 : vector<8x1xi1> to vector<8x128xi1>
    %598 = arith.select %597, %590, %520 : vector<8x128xi1>, vector<8x128xf32>
    %cst_154 = arith.constant 0.000000e+00 : f32
    %599 = vector.broadcast %cst_154 : f32 to vector<8x128xf32>
    %600 = vector.shape_cast %567 : vector<8x1xi1> to vector<8x1xi1>
    %601 = vector.broadcast %600 : vector<8x1xi1> to vector<8x128xi1>
    %602 = arith.select %601, %592, %599 : vector<8x128xi1>, vector<8x128xf32>
    %c0_155 = arith.constant 0 : index
    %c0_156 = arith.constant 0 : index
    %c0_157 = arith.constant 0 : index
    %603 = vector.load %arg3[%c0_155, %c0_156, %c0_157] : memref<8x8x512xbf16, #tpu.memory_space<vmem>>, vector<1x8x512xbf16>
    %604 = vector.shape_cast %603 : vector<1x8x512xbf16> to vector<8x512xbf16>
    %605 = arith.extf %604 : vector<8x512xbf16> to vector<8x512xf32>
    %606 = arith.truncf %549 : vector<8x128xf32> to vector<8x128xbf16>
    %cst_158 = arith.constant dense<0.000000e+00> : vector<8x512xf32>
    %607 = tpu.matmul %606, %6, %cst_158 {dimension_numbers = #tpu.dot_dimension_numbers<[1], [0], [0], [1], [0, 0, 1, 1], [], []>} : vector<8x128xbf16>, vector<128x512xbf16>, vector<8x512xf32> -> vector<8x512xf32>
    %608 = arith.addf %605, %607 : vector<8x512xf32>
    %609 = vector.extract_strided_slice %608 {offsets = [0, 0], sizes = [8, 384], strides = [1, 1]} : vector<8x512xf32> to vector<8x384xf32>
    %610 = arith.negf %609 : vector<8x384xf32>
    %611 = math.exp %610 : vector<8x384xf32>
    %cst_159 = arith.constant 1.000000e+00 : f32
    %612 = vector.broadcast %cst_159 : f32 to vector<8x384xf32>
    %613 = arith.addf %612, %611 : vector<8x384xf32>
    %614 = arith.divf %612, %613 : vector<8x384xf32>
    %615 = vector.extract_strided_slice %614 {offsets = [0, 0], sizes = [8, 128], strides = [1, 1]} : vector<8x384xf32> to vector<8x128xf32>
    %616 = vector.extract_strided_slice %614 {offsets = [0, 128], sizes = [8, 128], strides = [1, 1]} : vector<8x384xf32> to vector<8x128xf32>
    %617 = vector.extract_strided_slice %614 {offsets = [0, 256], sizes = [8, 128], strides = [1, 1]} : vector<8x384xf32> to vector<8x128xf32>
    %618 = vector.extract_strided_slice %608 {offsets = [0, 384], sizes = [8, 128], strides = [1, 1]} : vector<8x512xf32> to vector<8x128xf32>
    %619 = math.tanh %618 : vector<8x128xf32>
    %620 = arith.mulf %616, %552 : vector<8x128xf32>
    %621 = arith.mulf %615, %619 : vector<8x128xf32>
    %622 = arith.addf %620, %621 : vector<8x128xf32>
    %623 = math.tanh %622 : vector<8x128xf32>
    %624 = arith.mulf %617, %623 : vector<8x128xf32>
    %625 = vector.shape_cast %570 : vector<8x1xi1> to vector<8x1xi1>
    %626 = vector.broadcast %625 : vector<8x1xi1> to vector<8x128xi1>
    %627 = arith.select %626, %624, %549 : vector<8x128xi1>, vector<8x128xf32>
    %628 = vector.shape_cast %570 : vector<8x1xi1> to vector<8x1xi1>
    %629 = vector.broadcast %628 : vector<8x1xi1> to vector<8x128xi1>
    %630 = arith.select %629, %622, %552 : vector<8x128xi1>, vector<8x128xf32>
    %cst_160 = arith.constant 0.000000e+00 : f32
    %631 = vector.broadcast %cst_160 : f32 to vector<8x128xf32>
    %632 = vector.shape_cast %570 : vector<8x1xi1> to vector<8x1xi1>
    %633 = vector.broadcast %632 : vector<8x1xi1> to vector<8x128xi1>
    %634 = arith.select %633, %624, %631 : vector<8x128xi1>, vector<8x128xf32>
    %635 = arith.truncf %602 : vector<8x128xf32> to vector<8x128xbf16>
    %c7_161 = arith.constant 7 : index
    %c0_162 = arith.constant 0 : index
    %c0_163 = arith.constant 0 : index
    %636 = vector.load %arg5[%c7_161, %c0_162, %c0_163] : memref<8x8x128xbf16, #tpu.memory_space<vmem>>, vector<1x8x128xbf16>
    %637 = vector.shape_cast %636 : vector<1x8x128xbf16> to vector<8x128xbf16>
    %638 = vector.shape_cast %635 : vector<8x128xbf16> to vector<1x8x128xbf16>
    tpu.vector_store %arg5[%c7_161, %c0_162, %c0_163], %638 {strides = array<i32>} : memref<8x8x128xbf16, #tpu.memory_space<vmem>>, vector<1x8x128xbf16>,
    %639 = arith.truncf %634 : vector<8x128xf32> to vector<8x128xbf16>
    %c0_164 = arith.constant 0 : index
    %c0_165 = arith.constant 0 : index
    %c0_166 = arith.constant 0 : index
    %640 = vector.load %arg6[%c0_164, %c0_165, %c0_166] : memref<8x8x128xbf16, #tpu.memory_space<vmem>>, vector<1x8x128xbf16>
    %641 = vector.shape_cast %640 : vector<1x8x128xbf16> to vector<8x128xbf16>
    %642 = vector.shape_cast %639 : vector<8x128xbf16> to vector<1x8x128xbf16>
    tpu.vector_store %arg6[%c0_164, %c0_165, %c0_166], %642 {strides = array<i32>} : memref<8x8x128xbf16, #tpu.memory_space<vmem>>, vector<1x8x128xbf16>,
    %c0_167 = arith.constant 0 : index
    %c0_168 = arith.constant 0 : index
    %c0_169 = arith.constant 0 : index
    %643 = vector.load %arg7[%c0_167, %c0_168, %c0_169] : memref<2x8x128xf32, #tpu.memory_space<vmem>>, vector<1x8x128xf32>
    %644 = vector.shape_cast %643 : vector<1x8x128xf32> to vector<8x128xf32>
    %645 = vector.shape_cast %595 : vector<8x128xf32> to vector<1x8x128xf32>
    tpu.vector_store %arg7[%c0_167, %c0_168, %c0_169], %645 {strides = array<i32>} : memref<2x8x128xf32, #tpu.memory_space<vmem>>, vector<1x8x128xf32>,
    %c0_170 = arith.constant 0 : index
    %c0_171 = arith.constant 0 : index
    %c0_172 = arith.constant 0 : index
    %646 = vector.load %arg8[%c0_170, %c0_171, %c0_172] : memref<2x8x128xf32, #tpu.memory_space<vmem>>, vector<1x8x128xf32>
    %647 = vector.shape_cast %646 : vector<1x8x128xf32> to vector<8x128xf32>
    %648 = vector.shape_cast %598 : vector<8x128xf32> to vector<1x8x128xf32>
    tpu.vector_store %arg8[%c0_170, %c0_171, %c0_172], %648 {strides = array<i32>} : memref<2x8x128xf32, #tpu.memory_space<vmem>>, vector<1x8x128xf32>,
    %c1_173 = arith.constant 1 : index
    %c0_174 = arith.constant 0 : index
    %c0_175 = arith.constant 0 : index
    %649 = vector.load %arg7[%c1_173, %c0_174, %c0_175] : memref<2x8x128xf32, #tpu.memory_space<vmem>>, vector<1x8x128xf32>
    %650 = vector.shape_cast %649 : vector<1x8x128xf32> to vector<8x128xf32>
    %651 = vector.shape_cast %627 : vector<8x128xf32> to vector<1x8x128xf32>
    tpu.vector_store %arg7[%c1_173, %c0_174, %c0_175], %651 {strides = array<i32>} : memref<2x8x128xf32, #tpu.memory_space<vmem>>, vector<1x8x128xf32>,
    %c1_176 = arith.constant 1 : index
    %c0_177 = arith.constant 0 : index
    %c0_178 = arith.constant 0 : index
    %652 = vector.load %arg8[%c1_176, %c0_177, %c0_178] : memref<2x8x128xf32, #tpu.memory_space<vmem>>, vector<1x8x128xf32>
    %653 = vector.shape_cast %652 : vector<1x8x128xf32> to vector<8x128xf32>
    %654 = vector.shape_cast %630 : vector<8x128xf32> to vector<1x8x128xf32>
    tpu.vector_store %arg8[%c1_176, %c0_177, %c0_178], %654 {strides = array<i32>} : memref<2x8x128xf32, #tpu.memory_space<vmem>>, vector<1x8x128xf32>,
    return
  }
  func.func @transform_0(%arg0: i32) -> (i32, i32) {
    %c0_i32 = arith.constant 0 : i32
    %c0_i32_0 = arith.constant 0 : i32
    %c0_i32_1 = arith.constant 0 : i32
    return %c0_i32, %c0_i32_0 : i32, i32
  }
  func.func @transform_1(%arg0: i32) -> (i32, i32, i32) {
    %c0_i32 = arith.constant 0 : i32
    %c0_i32_0 = arith.constant 0 : i32
    %c0_i32_1 = arith.constant 0 : i32
    return %arg0, %c0_i32, %c0_i32_0 : i32, i32, i32
  }
  func.func @transform_2(%arg0: i32) -> (i32, i32, i32) {
    %c0_i32 = arith.constant 0 : i32
    %0 = arith.subi %c0_i32, %arg0 : i32
    %c0_i32_0 = arith.constant 0 : i32
    %c1_i32 = arith.constant 1 : i32
    %c0_i32_1 = arith.constant 0 : i32
    return %0, %c0_i32_0, %c1_i32 : i32, i32, i32
  }
  func.func @transform_3(%arg0: i32) -> (i32, i32, i32) {
    %c0_i32 = arith.constant 0 : i32
    %c0_i32_0 = arith.constant 0 : i32
    %c0_i32_1 = arith.constant 0 : i32
    %c0_i32_2 = arith.constant 0 : i32
    return %c0_i32, %c0_i32_0, %c0_i32_1 : i32, i32, i32
  }
  func.func @transform_4(%arg0: i32) -> (i32, i32, i32) {
    %c0_i32 = arith.constant 0 : i32
    %c0_i32_0 = arith.constant 0 : i32
    %c0_i32_1 = arith.constant 0 : i32
    return %arg0, %c0_i32, %c0_i32_0 : i32, i32, i32
  }
  func.func @transform_5(%arg0: i32) -> (i32, i32, i32) {
    %c0_i32 = arith.constant 0 : i32
    %0 = arith.subi %c0_i32, %arg0 : i32
    %c0_i32_0 = arith.constant 0 : i32
    %c0_i32_1 = arith.constant 0 : i32
    %c0_i32_2 = arith.constant 0 : i32
    return %0, %c0_i32_0, %c0_i32_1 : i32, i32, i32
  }
  func.func @transform_6(%arg0: i32) -> (i32, i32, i32) {
    %c0_i32 = arith.constant 0 : i32
    %c0_i32_0 = arith.constant 0 : i32
    %c0_i32_1 = arith.constant 0 : i32
    %c0_i32_2 = arith.constant 0 : i32
    return %c0_i32, %c0_i32_0, %c0_i32_1 : i32, i32, i32
  }
  func.func @transform_7(%arg0: i32) -> (i32, i32, i32) {
    %c0_i32 = arith.constant 0 : i32
    %c0_i32_0 = arith.constant 0 : i32
    %c0_i32_1 = arith.constant 0 : i32
    %c0_i32_2 = arith.constant 0 : i32
    return %c0_i32, %c0_i32_0, %c0_i32_1 : i32, i32, i32
  }
}

module attributes {stable_mosaic.version = 11 : i64} {
  func.func @dual_matmul_bias_kernel(%arg0: i32, %arg1: memref<64x128xbf16, #tpu.memory_space<vmem>>, %arg2: memref<64x128xbf16, #tpu.memory_space<vmem>>, %arg3: memref<128x128xbf16, #tpu.memory_space<vmem>>, %arg4: memref<128x128xbf16, #tpu.memory_space<vmem>>, %arg5: memref<1x128xf32, #tpu.memory_space<vmem>>, %arg6: memref<64x128xf32, #tpu.memory_space<vmem>>) attributes {dimension_semantics = [#tpu.dimension_semantics<parallel>], iteration_bounds = array<i64: 1>, scalar_prefetch = 0 : i64, scratch_operands = 0 : i64, tpu.core_type = #tpu.core_type<tc>, window_params = [{transform_indices = @transform_0, window_bounds = array<i64: 64, 128>}, {transform_indices = @transform_1, window_bounds = array<i64: 64, 128>}, {pipeline_mode = #tpu.pipeline_mode<synchronous>, transform_indices = @transform_2, window_bounds = array<i64: 128, 128>}, {pipeline_mode = #tpu.pipeline_mode<synchronous>, transform_indices = @transform_3, window_bounds = array<i64: 128, 128>}, {pipeline_mode = #tpu.pipeline_mode<synchronous>, transform_indices = @transform_4, window_bounds = array<i64: 1, 128>}, {transform_indices = @transform_5, window_bounds = array<i64: 64, 128>}]} {
    %c0 = arith.constant 0 : index
    %c0_0 = arith.constant 0 : index
    %0 = vector.load %arg1[%c0, %c0_0] : memref<64x128xbf16, #tpu.memory_space<vmem>>, vector<64x128xbf16>
    %c0_1 = arith.constant 0 : index
    %c0_2 = arith.constant 0 : index
    %1 = vector.load %arg3[%c0_1, %c0_2] : memref<128x128xbf16, #tpu.memory_space<vmem>>, vector<128x128xbf16>
    %cst = arith.constant dense<0.000000e+00> : vector<64x128xf32>
    %2 = tpu.matmul %0, %1, %cst {dimension_numbers = #tpu.dot_dimension_numbers<[1], [0], [0], [1], [0, 0, 1, 1], [], []>} : vector<64x128xbf16>, vector<128x128xbf16>, vector<64x128xf32> -> vector<64x128xf32>
    %c0_3 = arith.constant 0 : index
    %c0_4 = arith.constant 0 : index
    %3 = vector.load %arg2[%c0_3, %c0_4] : memref<64x128xbf16, #tpu.memory_space<vmem>>, vector<64x128xbf16>
    %c0_5 = arith.constant 0 : index
    %c0_6 = arith.constant 0 : index
    %4 = vector.load %arg4[%c0_5, %c0_6] : memref<128x128xbf16, #tpu.memory_space<vmem>>, vector<128x128xbf16>
    %cst_7 = arith.constant dense<0.000000e+00> : vector<64x128xf32>
    %5 = tpu.matmul %3, %4, %cst_7 {dimension_numbers = #tpu.dot_dimension_numbers<[1], [0], [0], [1], [0, 0, 1, 1], [], []>} : vector<64x128xbf16>, vector<128x128xbf16>, vector<64x128xf32> -> vector<64x128xf32>
    %6 = arith.addf %2, %5 : vector<64x128xf32>
    %c0_8 = arith.constant 0 : index
    %c0_9 = arith.constant 0 : index
    %7 = vector.load %arg5[%c0_8, %c0_9] : memref<1x128xf32, #tpu.memory_space<vmem>>, vector<1x128xf32>
    %8 = vector.broadcast %7 : vector<1x128xf32> to vector<64x128xf32>
    %9 = arith.addf %6, %8 : vector<64x128xf32>
    %c0_10 = arith.constant 0 : index
    %c0_11 = arith.constant 0 : index
    %10 = vector.load %arg6[%c0_10, %c0_11] : memref<64x128xf32, #tpu.memory_space<vmem>>, vector<64x128xf32>
    tpu.vector_store %arg6[%c0_10, %c0_11], %9 {strides = array<i32>} : memref<64x128xf32, #tpu.memory_space<vmem>>, vector<64x128xf32>,
    return
  }
  func.func @transform_0(%arg0: i32) -> (i32, i32) {
    %c0_i32 = arith.constant 0 : i32
    %c0_i32_0 = arith.constant 0 : i32
    return %arg0, %c0_i32 : i32, i32
  }
  func.func @transform_1(%arg0: i32) -> (i32, i32) {
    %c0_i32 = arith.constant 0 : i32
    %c0_i32_0 = arith.constant 0 : i32
    return %arg0, %c0_i32 : i32, i32
  }
  func.func @transform_2(%arg0: i32) -> (i32, i32) {
    %c0_i32 = arith.constant 0 : i32
    %c0_i32_0 = arith.constant 0 : i32
    %c0_i32_1 = arith.constant 0 : i32
    return %c0_i32, %c0_i32_0 : i32, i32
  }
  func.func @transform_3(%arg0: i32) -> (i32, i32) {
    %c0_i32 = arith.constant 0 : i32
    %c0_i32_0 = arith.constant 0 : i32
    %c0_i32_1 = arith.constant 0 : i32
    return %c0_i32, %c0_i32_0 : i32, i32
  }
  func.func @transform_4(%arg0: i32) -> (i32, i32) {
    %c0_i32 = arith.constant 0 : i32
    %c0_i32_0 = arith.constant 0 : i32
    %c0_i32_1 = arith.constant 0 : i32
    return %c0_i32, %c0_i32_0 : i32, i32
  }
  func.func @transform_5(%arg0: i32) -> (i32, i32) {
    %c0_i32 = arith.constant 0 : i32
    %c0_i32_0 = arith.constant 0 : i32
    return %arg0, %c0_i32 : i32, i32
  }
}

</mosaic_0001>

<bundles_post_ra>
// kernel: base_encoder_forward.9
= control target key start
LH: loop header
LB: loop body
LE: loop exit
PB: predicated region body
PF: predicated region fallthrough
CT: control target
= control target key end

     0   :  { %s620_s3 = inlined_call_operand.vmem [shape: bf16[128,128], index: 3, kind: input, shape index: {}]   ;;  %s621_s2 = inlined_call_operand.vmem [shape: bf16[128,128], index: 2, kind: input, shape index: {}]   ;;  %s622_s1 = inlined_call_operand.vmem [shape: bf16[64,128], index: 1, kind: input, shape index: {}]   ;;  %s623_s0 = inlined_call_operand.vmem [shape: bf16[64,128], index: 0, kind: input, shape index: {}]   ;;  %s624_s4 = inlined_call_operand.vmem [shape: f32[1,128], index: 4, kind: input, shape index: {}]   ;;  %s625_s5 = inlined_call_operand.vmem [shape: f32[64,128], index: 5, kind: output, shape index: {}]  }
   0x1   :  { %v467_v0 = vld [vmem:[%s620_s3 + $0x38] sm:$0xff]   ;;  %v469_v2 = vld [vmem:[%s620_s3 + $0x30] sm:$0xff]   ;;  %v471_v4 = vld [vmem:[%s620_s3 + $0x28] sm:$0xff]  }
   0x2   :  { %v468_v1 = vld [vmem:[%s621_s2 + $0x38] sm:$0xff]   ;;  %419 = vmatprep.subr.bf16.mxu0 %v467_v0  ;;  %v470_v3 = vld [vmem:[%s621_s2 + $0x30] sm:$0xff]   ;;  %v472_v5 = vld [vmem:[%s621_s2 + $0x28] sm:$0xff]  }
   0x3   :  { %443 = vmatprep.subr.bf16.mxu1 %v468_v1  ;;  %420 = vmatpush3.bf16.msra.mxu0 %v467_v0  ;;  %v473_v6 = vld [vmem:[%s620_s3 + $0x20] sm:$0xff]   ;;  %v475_v8 = vld [vmem:[%s620_s3 + $0x18] sm:$0xff]   ;;  %v477_v10 = vld [vmem:[%s620_s3 + $0x10] sm:$0xff]  }
   0x4   :  { %444 = vmatpush3.bf16.msra.mxu1 %v468_v1  ;;  %421 = vmatprep.subr.bf16.mxu0 %v469_v2  ;;  %v474_v7 = vld [vmem:[%s621_s2 + $0x20] sm:$0xff]   ;;  %v476_v9 = vld [vmem:[%s621_s2 + $0x18] sm:$0xff]   ;;  %v478_v11 = vld [vmem:[%s621_s2 + $0x10] sm:$0xff]  }
   0x5   :  { %445 = vmatprep.subr.bf16.mxu1 %v470_v3  ;;  %v483_v12 = vld [vmem:[%s622_s1] sm:$0xff]   ;;  %v479_v14 = vld [vmem:[%s620_s3 + $0x8] sm:$0xff]   ;;  %v487_v20 = vld [vmem:[%s622_s1 + $0x10] sm:$0xff]  }
   0x6   :  { %v484_v13 = vld [vmem:[%s623_s0] sm:$0xff]   ;;  %435 = vmatprep.mubr.bf16.mxu0 %v483_v12  ;;  %v480_v15 = vld [vmem:[%s621_s2 + $0x8] sm:$0xff]   ;;  %v488_v21 = vld [vmem:[%s623_s0 + $0x10] sm:$0xff]  }
   0x7   :  { %422 = vmatpush3.bf16.msra.mxu0 %v469_v2  ;;  %459 = vmatprep.mubr.bf16.mxu1 %v484_v13  ;;  %v481_v16 = vld [vmem:[%s620_s3] sm:$0xff]   ;;  %v485_v18 = vld [vmem:[%s622_s1 + $0x8] sm:$0xff]   ;;  %v489_v22 = vld [vmem:[%s622_s1 + $0x18] sm:$0xff]  }
   0x8   :  { %446 = vmatpush3.bf16.msra.mxu1 %v470_v3  ;;  %423 = vmatprep.subr.bf16.mxu0 %v471_v4  ;;  %v482_v17 = vld [vmem:[%s621_s2] sm:$0xff]   ;;  %v486_v19 = vld [vmem:[%s623_s0 + $0x8] sm:$0xff]   ;;  %v490_v23 = vld [vmem:[%s623_s0 + $0x18] sm:$0xff]  }
   0x9   :  { %447 = vmatprep.subr.bf16.mxu1 %v472_v5  ;;  %v394_v26 = vld [vmem:[%s624_s4] ss:$0 sm:$0xff] }
   0xb   :  { %424 = vmatpush3.bf16.msra.mxu0 %v471_v4 }
   0xc   :  { %448 = vmatpush3.bf16.msra.mxu1 %v472_v5  ;;  %425 = vmatprep.subr.bf16.mxu0 %v473_v6 }
   0xd   :  { %449 = vmatprep.subr.bf16.mxu1 %v474_v7 }
   0xf   :  { %426 = vmatpush3.bf16.msra.mxu0 %v473_v6 }
  0x10   :  { %450 = vmatpush3.bf16.msra.mxu1 %v474_v7  ;;  %427 = vmatprep.subr.bf16.mxu0 %v475_v8 }
  0x11   :  { %451 = vmatprep.subr.bf16.mxu1 %v476_v9 }
  0x13   :  { %428 = vmatpush3.bf16.msra.mxu0 %v475_v8 }
  0x14   :  { %452 = vmatpush3.bf16.msra.mxu1 %v476_v9  ;;  %429 = vmatprep.subr.bf16.mxu0 %v477_v10 }
  0x15   :  { %453 = vmatprep.subr.bf16.mxu1 %v478_v11 }
  0x17   :  { %430 = vmatpush3.bf16.msra.mxu0 %v477_v10 }
  0x18   :  { %454 = vmatpush3.bf16.msra.mxu1 %v478_v11  ;;  %431 = vmatprep.subr.bf16.mxu0 %v479_v14 }
  0x19   :  { %455 = vmatprep.subr.bf16.mxu1 %v480_v15 }
  0x1b   :  { %432 = vmatpush3.bf16.msra.mxu0 %v479_v14 }
  0x1c   :  { %456 = vmatpush3.bf16.msra.mxu1 %v480_v15  ;;  %433 = vmatprep.subr.bf16.mxu0 %v481_v16 }
  0x1d   :  { %457 = vmatprep.subr.bf16.mxu1 %v482_v17 }
  0x1f   :  { %434 = vmatpush3.bf16.msra.mxu0 %v481_v16 }
  0x20   :  { %458 = vmatpush3.bf16.msra.mxu1 %v482_v17 }
  0x22   :  { %436 = vmatmul.mubr.bf16.vlgmr.msra.gmra.mxu0 %v485_v18 }
  0x23   :  { %460 = vmatmul.mubr.bf16.vlgmr.msra.gmra.mxu1 %v486_v19  ;;  %439 = vmatprep.mubr.bf16.mxu0 %v487_v20 }
  0x24   :  { %463 = vmatprep.mubr.bf16.mxu1 %v488_v21 }
  0x2a   :  { %440 = vmatmul.mubr.bf16.gmra.mxu0 %v489_v22 }
  0x2b   :  { %464 = vmatmul.mubr.bf16.gmra.mxu1 %v490_v23 }
  0xe2   :  { %v437_v24 = vpop.f32.mrf.mxu0 }
  0xe3   :  { %v461_v25 = vpop.f32.mrf.mxu1 }
  0xe4   :  { %v321_v27 = vadd.f32 %v461_v25, %v437_v24  ;;  %v175_v28 = vpop.f32.mrf.mxu0 }
  0xe5   :  { %v312_v29 = vpop.f32.mrf.mxu1 }
  0xe6   :  { %v352_v30 = vadd.f32 %v394_v26, %v321_v27  ;;  %v313_v31 = vadd.f32 %v312_v29, %v175_v28  ;;  %v438_v32 = vpop.f32.mrf.mxu0 }
  0xe7   :  { %v462_v33 = vpop.f32.mrf.mxu1 }
  0xe8   :  { %360 = vst [vmem:[%s625_s5 + $0x10] sm:$0xff] %v352_v30  ;;  %v350_v34 = vadd.f32 %v394_v26, %v313_v31  ;;  %v324_v35 = vadd.f32 %v462_v33, %v438_v32  ;;  %v178_v36 = vpop.f32.mrf.mxu0 }
  0xe9   :  { %v315_v37 = vpop.f32.mrf.mxu1 }
  0xea   :  { %358 = vst [vmem:[%s625_s5] sm:$0xff] %v350_v34  ;;  %v353_v38 = vadd.f32 %v394_v26, %v324_v35  ;;  %v316_v39 = vadd.f32 %v315_v37, %v178_v36  ;;  %v441_v40 = vpop.f32.mrf.mxu0 }
  0xeb   :  { %v465_v41 = vpop.f32.mrf.mxu1 }
  0xec   :  { %361 = vst [vmem:[%s625_s5 + $0x18] sm:$0xff] %v353_v38  ;;  %v351_v42 = vadd.f32 %v394_v26, %v316_v39  ;;  %v337_v43 = vadd.f32 %v465_v41, %v441_v40  ;;  %v191_v44 = vpop.f32.mrf.mxu0 }
  0xed   :  { %v328_v45 = vpop.f32.mrf.mxu1 }
  0xee   :  { %359 = vst [vmem:[%s625_s5 + $0x8] sm:$0xff] %v351_v42  ;;  %v356_v46 = vadd.f32 %v394_v26, %v337_v43  ;;  %v329_v47 = vadd.f32 %v328_v45, %v191_v44  ;;  %v442_v48 = vpop.f32.mrf.mxu0 }
  0xef   :  { %v466_v49 = vpop.f32.mrf.mxu1 }
  0xf0   :  { %364 = vst [vmem:[%s625_s5 + $0x30] sm:$0xff] %v356_v46  ;;  %v354_v50 = vadd.f32 %v394_v26, %v329_v47  ;;  %v340_v51 = vadd.f32 %v466_v49, %v442_v48  ;;  %v194_v52 = vpop.f32.mrf.mxu0 }
  0xf1   :  { %v331_v53 = vpop.f32.mrf.mxu1 }
  0xf2   :  { %362 = vst [vmem:[%s625_s5 + $0x20] sm:$0xff] %v354_v50  ;;  %v357_v54 = vadd.f32 %v394_v26, %v340_v51  ;;  %v332_v55 = vadd.f32 %v331_v53, %v194_v52 }
  0xf4   :  { %365 = vst [vmem:[%s625_s5 + $0x38] sm:$0xff] %v357_v54  ;;  %v355_v56 = vadd.f32 %v394_v26, %v332_v55 }
  0xf6   :  { %363 = vst [vmem:[%s625_s5 + $0x28] sm:$0xff] %v355_v56 }

// kernel: base_encoder_forward.5
= control target key start
LH: loop header
LB: loop body
LE: loop exit
PB: predicated region body
PF: predicated region fallthrough
CT: control target
= control target key end

     0   :  { %8 = vsyncpa [#allocation3], 0  ;;  %s1473_s0 = inlined_call_operand.vmem [shape: bf16[64,128], index: 0, kind: input, shape index: {}]   ;;  %s1474_s1 = inlined_call_operand.hbm [shape: bf16[128,1024], index: 1, kind: input, shape index: {}]   ;;  %s1475_s2 = inlined_call_operand.hbm [shape: f32[1,1024], index: 2, kind: input, shape index: {}]   ;;  %s1476_s3 = inlined_call_operand.vmem [shape: bf16[64,1024], index: 3, kind: output, shape index: {}]  }
   0x1   :  { %9 = vsyncpa [#allocation5], 0  ;;  %s1206_s12 = smov [#allocation2]  }
   0x2   :  { %s17_s13 = sshll.u32 %s1206_s12, 4  ;;  %s18_s13 = int_to_ptr.vmem [resolvable:$true] %s17_s13 }
   0x3   :  { %s1170_s14 = scalar_lea.vmem %s18_s13, 8192  ;;  %p1175_p1 = scmp.lt.s32.totalorder %s18_s13, %s18_s13 }
   0x4   :  { %p1171_p0 = scmp.ne.s32.totalorder %s18_s13, %s1170_s14  ;;  %p1176_p2 = scmp.lt.s32.totalorder %s1170_s14, %s1170_s14 }
   0x6   :  { %p1177_p3 = por %p1176_p2, %p1175_p1 }
   0x8   :  { %p1178_p4 = pnand %p1177_p3, %p1171_p0 }
   0xa   :  { %1181 = shalt.err (!%p1178_p4)
}
   0xb   :  { %s1207_s15 = smov 512   ;;  %s1208_s16 = smov 32  }
   0xc   :  { %23 = dma.hbm_to_vmem [thread:$0]  %s1474_s1, 8192, %s18_s13, [#allocation3], %s1207_s15, %s1207_s15, %s1208_s16  }
   0xd   :  { %s1209_s19 = smov [#allocation4]  }
   0xe   :  { %s30_s20 = sshll.u32 %s1209_s19, 4  ;;  %s31_s20 = int_to_ptr.vmem [resolvable:$true] %s30_s20 }
   0xf   :  { %s1190_s21 = scalar_lea.vmem %s31_s20, 128  ;;  %p1195_p6 = scmp.lt.s32.totalorder %s31_s20, %s31_s20 }
  0x10   :  { %p1191_p5 = scmp.ne.s32.totalorder %s31_s20, %s1190_s21  ;;  %p1196_p7 = scmp.lt.s32.totalorder %s1190_s21, %s1190_s21 }
  0x12   :  { %p1197_p8 = por %p1196_p7, %p1195_p6 }
  0x14   :  { %p1198_p9 = pnand %p1197_p8, %p1191_p5 }
  0x16   :  { %1201 = shalt.err (!%p1198_p9)
}
  0x17   :  { %33 = dma.hbm_to_vmem [thread:$0]  %s1475_s2, 128, %s31_s20, [#allocation5]  }
  0x18   :  { %1202 = dma.done.wait [#allocation3], 8192  }
  0x19   :  { %1203 = vsyncadd [#allocation3], 4294959104 }
  0x1a   :  { %1204 = dma.done.wait [#allocation5], 128  }
  0x1b   :  { %1205 = vsyncadd [#allocation5], 4294967168  ;;  %v1210_v0 = vmov 0   ;;  %v105_v1 = vld [vmem:[#allocation2 + $0x1c0] sm:$0xff]  ;;  %v106_v3 = vld [vmem:[#allocation2 + $0x1c8] sm:$0xff] }
  0x1c   :  { %531 = vmatprep.mubr.bf16.mxu0 %v1210_v0  ;;  %604 = vmatprep.mubr.bf16.mxu1 %v1210_v0  ;;  %v109_v2 = vld [vmem:[#allocation2 + $0x1e0] sm:$0xff]  ;;  %v110_v5 = vld [vmem:[#allocation2 + $0x1e8] sm:$0xff]  ;;  %v107_v63 = vld [vmem:[#allocation2 + $0x1d0] sm:$0xff] }
  0x1d   :  { %v1082_v4 = vcombine.high %v105_v1, %v109_v2  ;;  %v1081_v6 = vcombine.low %v105_v1, %v109_v2  ;;  %v97_v7 = vld [vmem:[#allocation2 + $0x180] sm:$0xff]  ;;  %v1084_v9 = vcombine.high %v106_v3, %v110_v5  ;;  %v1083_v10 = vcombine.low %v106_v3, %v110_v5  ;;  %v98_v12 = vld [vmem:[#allocation2 + $0x188] sm:$0xff]  ;;  %v111_v1 = vld [vmem:[#allocation2 + $0x1f0] sm:$0xff] }
  0x1e   :  { %v101_v8 = vld [vmem:[#allocation2 + $0x1a0] sm:$0xff]  ;;  %v102_v13 = vld [vmem:[#allocation2 + $0x1a8] sm:$0xff]  ;;  %v108_v2 = vld [vmem:[#allocation2 + $0x1d8] sm:$0xff] }
  0x1f   :  { %v1074_v11 = vcombine.high %v97_v7, %v101_v8  ;;  %v89_v14 = vld [vmem:[#allocation2 + $0x140] sm:$0xff]  ;;  %499 = vmatprep.subr.bf16.mxu0 %v1082_v4  ;;  %v1076_v15 = vcombine.high %v98_v12, %v102_v13  ;;  %v90_v17 = vld [vmem:[#allocation2 + $0x148] sm:$0xff]  ;;  %572 = vmatprep.subr.bf16.mxu1 %v1084_v9  ;;  %v1073_v19 = vcombine.low %v97_v7, %v101_v8  ;;  %v112_v3 = vld [vmem:[#allocation2 + $0x1f8] sm:$0xff] }
  0x20   :  { %v93_v16 = vld [vmem:[#allocation2 + $0x160] sm:$0xff]  ;;  %v94_v18 = vld [vmem:[#allocation2 + $0x168] sm:$0xff]  ;;  %500 = vmatpush1.bf16.msra.mxu0 %v1081_v6  ;;  %573 = vmatpush1.bf16.msra.mxu1 %v1083_v10  ;;  %v1075_v20 = vcombine.low %v98_v12, %v102_v13  ;;  %v1086_v6 = vcombine.high %v107_v63, %v111_v1  ;;  %v1088_v7 = vcombine.high %v108_v2, %v112_v3  ;;  %v99_v8 = vld [vmem:[#allocation2 + $0x190] sm:$0xff] }
  0x21   :  { %501 = vmatprep.subr.bf16.mxu0 %v1074_v11  ;;  %v1066_v21 = vcombine.high %v89_v14, %v93_v16  ;;  %574 = vmatprep.subr.bf16.mxu1 %v1076_v15  ;;  %v1068_v22 = vcombine.high %v90_v17, %v94_v18  ;;  %v81_v23 = vld [vmem:[#allocation2 + $0x100] sm:$0xff]  ;;  %v82_v25 = vld [vmem:[#allocation2 + $0x108] sm:$0xff]  ;;  %v1065_v27 = vcombine.low %v89_v14, %v93_v16  ;;  %v103_v9 = vld [vmem:[#allocation2 + $0x1b0] sm:$0xff] }
  0x22   :  { %v85_v24 = vld [vmem:[#allocation2 + $0x120] sm:$0xff]  ;;  %v86_v26 = vld [vmem:[#allocation2 + $0x128] sm:$0xff]  ;;  %v1067_v28 = vcombine.low %v90_v17, %v94_v18  ;;  %v100_v11 = vld [vmem:[#allocation2 + $0x198] sm:$0xff]  ;;  %v1085_v13 = vcombine.low %v107_v63, %v111_v1  ;;  %v1087_v14 = vcombine.low %v108_v2, %v112_v3  ;;  %v1078_v15 = vcombine.high %v99_v8, %v103_v9 }
  0x23   :  { %v1058_v29 = vcombine.high %v81_v23, %v85_v24  ;;  %v1060_v30 = vcombine.high %v82_v25, %v86_v26  ;;  %v73_v31 = vld [vmem:[#allocation2 + $0xc0] sm:$0xff]  ;;  %v74_v33 = vld [vmem:[#allocation2 + $0xc8] sm:$0xff]  ;;  %v1057_v35 = vcombine.low %v81_v23, %v85_v24  ;;  %v1059_v36 = vcombine.low %v82_v25, %v86_v26  ;;  %v104_v12 = vld [vmem:[#allocation2 + $0x1b8] sm:$0xff] }
  0x24   :  { %502 = vmatpush1.bf16.msra.mxu0 %v1073_v19  ;;  %575 = vmatpush1.bf16.msra.mxu1 %v1075_v20  ;;  %v77_v32 = vld [vmem:[#allocation2 + $0xe0] sm:$0xff]  ;;  %v78_v34 = vld [vmem:[#allocation2 + $0xe8] sm:$0xff]  ;;  %v1080_v16 = vcombine.high %v100_v11, %v104_v12  ;;  %v91_v17 = vld [vmem:[#allocation2 + $0x150] sm:$0xff] }
  0x25   :  { %503 = vmatprep.subr.bf16.mxu0 %v1066_v21  ;;  %576 = vmatprep.subr.bf16.mxu1 %v1068_v22  ;;  %v1050_v37 = vcombine.high %v73_v31, %v77_v32  ;;  %v65_v38 = vld [vmem:[#allocation2 + $0x80] sm:$0xff]  ;;  %v1052_v39 = vcombine.high %v74_v33, %v78_v34  ;;  %v66_v41 = vld [vmem:[#allocation2 + $0x88] sm:$0xff]  ;;  %v1049_v43 = vcombine.low %v73_v31, %v77_v32  ;;  %v95_v18 = vld [vmem:[#allocation2 + $0x170] sm:$0xff] }
  0x26   :  { %v69_v40 = vld [vmem:[#allocation2 + $0xa0] sm:$0xff]  ;;  %v70_v42 = vld [vmem:[#allocation2 + $0xa8] sm:$0xff]  ;;  %v1051_v44 = vcombine.low %v74_v33, %v78_v34  ;;  %v92_v19 = vld [vmem:[#allocation2 + $0x158] sm:$0xff]  ;;  %v1077_v21 = vcombine.low %v99_v8, %v103_v9  ;;  %v1079_v22 = vcombine.low %v100_v11, %v104_v12  ;;  %v1070_v23 = vcombine.high %v91_v17, %v95_v18 }
  0x27   :  { %v1042_v45 = vcombine.high %v65_v38, %v69_v40  ;;  %v57_v46 = vld [vmem:[#allocation2 + $0x40] sm:$0xff]  ;;  %v1044_v47 = vcombine.high %v66_v41, %v70_v42  ;;  %v58_v49 = vld [vmem:[#allocation2 + $0x48] sm:$0xff]  ;;  %v1041_v51 = vcombine.low %v65_v38, %v69_v40  ;;  %v1043_v52 = vcombine.low %v66_v41, %v70_v42  ;;  %v96_v20 = vld [vmem:[#allocation2 + $0x178] sm:$0xff] }
  0x28   :  { %504 = vmatpush1.bf16.msra.mxu0 %v1065_v27  ;;  %577 = vmatpush1.bf16.msra.mxu1 %v1067_v28  ;;  %v61_v48 = vld [vmem:[#allocation2 + $0x60] sm:$0xff]  ;;  %v62_v50 = vld [vmem:[#allocation2 + $0x68] sm:$0xff]  ;;  %v1072_v24 = vcombine.high %v92_v19, %v96_v20  ;;  %v83_v25 = vld [vmem:[#allocation2 + $0x110] sm:$0xff]  ;;  %v1071_v31 = vcombine.low %v92_v19, %v96_v20 }
  0x29   :  { %505 = vmatprep.subr.bf16.mxu0 %v1058_v29  ;;  %578 = vmatprep.subr.bf16.mxu1 %v1060_v30  ;;  %v1034_v53 = vcombine.high %v57_v46, %v61_v48  ;;  %v1036_v54 = vcombine.high %v58_v49, %v62_v50  ;;  %v49_v55 = vld [vmem:[#allocation2] sm:$0xff]  ;;  %v50_v57 = vld [vmem:[#allocation2 + $0x8] sm:$0xff]  ;;  %v1033_v59 = vcombine.low %v57_v46, %v61_v48  ;;  %v87_v26 = vld [vmem:[#allocation2 + $0x130] sm:$0xff] }
  0x2a   :  { %v53_v56 = vld [vmem:[#allocation2 + $0x20] sm:$0xff]  ;;  %v54_v58 = vld [vmem:[#allocation2 + $0x28] sm:$0xff]  ;;  %v1035_v60 = vcombine.low %v58_v49, %v62_v50  ;;  %v84_v28 = vld [vmem:[#allocation2 + $0x118] sm:$0xff]  ;;  %v1069_v30 = vcombine.low %v91_v17, %v95_v18  ;;  %v1062_v32 = vcombine.high %v83_v25, %v87_v26  ;;  %v1061_v38 = vcombine.low %v83_v25, %v87_v26 }
  0x2b   :  { %v1026_v61 = vcombine.high %v49_v55, %v53_v56  ;;  %v1028_v62 = vcombine.high %v50_v57, %v54_v58  ;;  %v1025_v4 = vcombine.low %v49_v55, %v53_v56  ;;  %v1027_v5 = vcombine.low %v50_v57, %v54_v58  ;;  %v1242_v10 = vld [vmem:[%s1473_s0] sm:$0xff]   ;;  %v1251_v27 = vld [vmem:[%s1473_s0 + $0x8] sm:$0xff]   ;;  %v88_v29 = vld [vmem:[#allocation2 + $0x138] sm:$0xff] }
  0x2c   :  { %506 = vmatpush1.bf16.msra.mxu0 %v1057_v35  ;;  %579 = vmatpush1.bf16.msra.mxu1 %v1059_v36  ;;  %v1064_v33 = vcombine.high %v84_v28, %v88_v29  ;;  %v75_v34 = vld [vmem:[#allocation2 + $0xd0] sm:$0xff]  ;;  %v76_v36 = vld [vmem:[#allocation2 + $0xd8] sm:$0xff]  ;;  %v1281_v11 = vld [vmem:[#allocation4] sm:$0xff] }
  0x2d   :  { %507 = vmatprep.subr.bf16.mxu0 %v1050_v37  ;;  %580 = vmatprep.subr.bf16.mxu1 %v1052_v39  ;;  %v79_v35 = vld [vmem:[#allocation2 + $0xf0] sm:$0xff]  ;;  %v80_v37 = vld [vmem:[#allocation2 + $0xf8] sm:$0xff]  ;;  %v1063_v39 = vcombine.low %v84_v28, %v88_v29 }
  0x2e   :  { %v1054_v40 = vcombine.high %v75_v34, %v79_v35  ;;  %v1056_v41 = vcombine.high %v76_v36, %v80_v37  ;;  %v67_v42 = vld [vmem:[#allocation2 + $0x90] sm:$0xff]  ;;  %v72_v46 = vld [vmem:[#allocation2 + $0xb8] sm:$0xff]  ;;  %v1055_v48 = vcombine.low %v76_v36, %v80_v37 }
  0x2f   :  { %v56_v63 = vld [vmem:[#allocation2 + $0x38] sm:$0xff] }
  0x30   :  { %508 = vmatpush1.bf16.msra.mxu0 %v1049_v43  ;;  %581 = vmatpush1.bf16.msra.mxu1 %v1051_v44  ;;  %v71_v43 = vld [vmem:[#allocation2 + $0xb0] sm:$0xff] }
  0x31   :  { %509 = vmatprep.subr.bf16.mxu0 %v1042_v45  ;;  %582 = vmatprep.subr.bf16.mxu1 %v1044_v47  ;;  %v1160_v44 = vld [vmem:[%s1473_s0 + $0x10] sm:$0xff]   ;;  %v68_v45 = vld [vmem:[#allocation2 + $0x98] sm:$0xff]  ;;  %v1053_v47 = vcombine.low %v75_v34, %v79_v35  ;;  %v1046_v49 = vcombine.high %v67_v42, %v71_v43  ;;  %v1045_v55 = vcombine.low %v67_v42, %v71_v43 }
  0x32   :  { %v1048_v50 = vcombine.high %v68_v45, %v72_v46  ;;  %v1047_v56 = vcombine.low %v68_v45, %v72_v46 }
  0x34   :  { %510 = vmatpush1.bf16.msra.mxu0 %v1041_v51  ;;  %583 = vmatpush1.bf16.msra.mxu1 %v1043_v52  ;;  %v59_v51 = vld [vmem:[#allocation2 + $0x50] sm:$0xff] }
  0x35   :  { %511 = vmatprep.subr.bf16.mxu0 %v1034_v53  ;;  %584 = vmatprep.subr.bf16.mxu1 %v1036_v54  ;;  %v63_v52 = vld [vmem:[#allocation2 + $0x70] sm:$0xff]  ;;  %v60_v53 = vld [vmem:[#allocation2 + $0x58] sm:$0xff] }
  0x36   :  { %v64_v54 = vld [vmem:[#allocation2 + $0x78] sm:$0xff]  ;;  %v1038_v57 = vcombine.high %v59_v51, %v63_v52  ;;  %v1037_v1 = vcombine.low %v59_v51, %v63_v52 }
  0x37   :  { %v1040_v58 = vcombine.high %v60_v53, %v64_v54  ;;  %v1039_v2 = vcombine.low %v60_v53, %v64_v54 }
  0x38   :  { %512 = vmatpush1.bf16.msra.mxu0 %v1033_v59  ;;  %585 = vmatpush1.bf16.msra.mxu1 %v1035_v60  ;;  %v51_v59 = vld [vmem:[#allocation2 + $0x10] sm:$0xff] }
  0x39   :  { %513 = vmatprep.subr.bf16.mxu0 %v1026_v61  ;;  %586 = vmatprep.subr.bf16.mxu1 %v1028_v62  ;;  %v55_v60 = vld [vmem:[#allocation2 + $0x30] sm:$0xff]  ;;  %v1161_v61 = vld [vmem:[%s1473_s0 + $0x18] sm:$0xff]  }
  0x3a   :  { %v52_v62 = vld [vmem:[#allocation2 + $0x18] sm:$0xff]  ;;  %v1030_v3 = vcombine.high %v51_v59, %v55_v60 }
  0x3c   :  { %514 = vmatpush1.bf16.msra.mxu0 %v1025_v4  ;;  %587 = vmatpush1.bf16.msra.mxu1 %v1027_v5  ;;  %v1032_v4 = vcombine.high %v52_v62, %v56_v63  ;;  %v1029_v5 = vcombine.low %v51_v59, %v55_v60 }
  0x3d   :  { %645 = vmatprep.subr.bf16.mxu0 %v1086_v6  ;;  %718 = vmatprep.subr.bf16.mxu1 %v1088_v7  ;;  %v1031_v6 = vcombine.low %v52_v62, %v56_v63  ;;  %v115_v7 = vlaneseq }
  0x3f   :  { %532 = vmatmul.mubr.bf16.vlgmr.msra.gmra.mxu0 %v1242_v10  ;;  %605 = vmatmul.mubr.bf16.vlgmr.msra.gmra.mxu1 %v1242_v10  ;;  %v1277_v8 = vshrl.u32 %v115_v7, 7 }
  0x40   :  { %646 = vmatpush1.bf16.msra.mxu0 %v1085_v13  ;;  %719 = vmatpush1.bf16.msra.mxu1 %v1087_v14 }
  0x41   :  { %647 = vmatprep.subr.bf16.mxu0 %v1078_v15  ;;  %720 = vmatprep.subr.bf16.mxu1 %v1080_v16  ;;  %v117_v9 = vsub.s32 0, %v1277_v8  ;;  %v125_v12 = vsub.s32 2, %v1277_v8  ;;  %v129_v13 = vsub.s32 3, %v1277_v8 }
  0x42   :  { %541 = vmatprep.mubr.bf16.mxu0 %v1210_v0  ;;  %614 = vmatprep.mubr.bf16.mxu1 %v1210_v0 }
  0x43   :  { %v1286_v14 = vrot.slane %v1281_v11, %v117_v9  ;;  %v1292_v16 = vrot.slane %v1281_v11, %v125_v12  ;;  %v1295_v17 = vrot.slane %v1281_v11, %v129_v13 }
  0x44   :  { %648 = vmatpush1.bf16.msra.mxu0 %v1077_v21  ;;  %721 = vmatpush1.bf16.msra.mxu1 %v1079_v22 }
  0x45   :  { %649 = vmatprep.subr.bf16.mxu0 %v1070_v23  ;;  %722 = vmatprep.subr.bf16.mxu1 %v1072_v24 }
  0x47   :  { %542 = vmatmul.mubr.bf16.gmra.mxu0 %v1251_v27  ;;  %615 = vmatmul.mubr.bf16.gmra.mxu1 %v1251_v27 }
  0x48   :  { %650 = vmatpush1.bf16.msra.mxu0 %v1069_v30  ;;  %723 = vmatpush1.bf16.msra.mxu1 %v1071_v31 }
  0x49   :  { %651 = vmatprep.subr.bf16.mxu0 %v1062_v32  ;;  %724 = vmatprep.subr.bf16.mxu1 %v1064_v33 }
  0x4a   :  { %551 = vmatprep.mubr.bf16.mxu0 %v1210_v0  ;;  %624 = vmatprep.mubr.bf16.mxu1 %v1210_v0 }
  0x4c   :  { %652 = vmatpush1.bf16.msra.mxu0 %v1061_v38  ;;  %725 = vmatpush1.bf16.msra.mxu1 %v1063_v39 }
  0x4d   :  { %653 = vmatprep.subr.bf16.mxu0 %v1054_v40  ;;  %726 = vmatprep.subr.bf16.mxu1 %v1056_v41 }
  0x4f   :  { %552 = vmatmul.mubr.bf16.gmra.mxu0 %v1160_v44  ;;  %625 = vmatmul.mubr.bf16.gmra.mxu1 %v1160_v44 }
  0x50   :  { %654 = vmatpush1.bf16.msra.mxu0 %v1053_v47  ;;  %727 = vmatpush1.bf16.msra.mxu1 %v1055_v48 }
  0x51   :  { %655 = vmatprep.subr.bf16.mxu0 %v1046_v49  ;;  %728 = vmatprep.subr.bf16.mxu1 %v1048_v50 }
  0x52   :  { %561 = vmatprep.mubr.bf16.mxu0 %v1210_v0  ;;  %634 = vmatprep.mubr.bf16.mxu1 %v1210_v0 }
  0x54   :  { %656 = vmatpush1.bf16.msra.mxu0 %v1045_v55  ;;  %729 = vmatpush1.bf16.msra.mxu1 %v1047_v56 }
  0x55   :  { %657 = vmatprep.subr.bf16.mxu0 %v1038_v57  ;;  %730 = vmatprep.subr.bf16.mxu1 %v1040_v58 }
  0x57   :  { %562 = vmatmul.mubr.bf16.gmra.mxu0 %v1161_v61  ;;  %635 = vmatmul.mubr.bf16.gmra.mxu1 %v1161_v61 }
  0x58   :  { %658 = vmatpush1.bf16.msra.mxu0 %v1037_v1  ;;  %731 = vmatpush1.bf16.msra.mxu1 %v1039_v2 }
  0x59   :  { %659 = vmatprep.subr.bf16.mxu0 %v1030_v3  ;;  %732 = vmatprep.subr.bf16.mxu1 %v1032_v4 }
  0x5a   :  { %677 = vmatprep.mubr.bf16.mxu0 %v1210_v0  ;;  %750 = vmatprep.mubr.bf16.mxu1 %v1210_v0 }
  0x5c   :  { %660 = vmatpush1.bf16.msra.mxu0 %v1029_v5  ;;  %733 = vmatpush1.bf16.msra.mxu1 %v1031_v6 }
  0x5f   :  { %678 = vmatmul.mubr.bf16.vlgmr.msra.gmra.mxu0 %v1242_v10  ;;  %751 = vmatmul.mubr.bf16.vlgmr.msra.gmra.mxu1 %v1242_v10  ;;  %v121_v10 = vsub.s32 1, %v1277_v8 }
  0x60   :  { %687 = vmatprep.mubr.bf16.mxu0 %v1210_v0  ;;  %760 = vmatprep.mubr.bf16.mxu1 %v1210_v0 }
  0x67   :  { %688 = vmatmul.mubr.bf16.gmra.mxu0 %v1251_v27  ;;  %761 = vmatmul.mubr.bf16.gmra.mxu1 %v1251_v27 }
  0x68   :  { %697 = vmatprep.mubr.bf16.mxu0 %v1210_v0  ;;  %770 = vmatprep.mubr.bf16.mxu1 %v1210_v0 }
  0x6f   :  { %698 = vmatmul.mubr.bf16.gmra.mxu0 %v1160_v44  ;;  %771 = vmatmul.mubr.bf16.gmra.mxu1 %v1160_v44 }
  0x70   :  { %707 = vmatprep.mubr.bf16.mxu0 %v1210_v0  ;;  %780 = vmatprep.mubr.bf16.mxu1 %v1210_v0  ;;  %v1289_v0 = vrot.slane %v1281_v11, %v121_v10 }
  0x77   :  { %708 = vmatmul.mubr.bf16.gmra.mxu0 %v1161_v61  ;;  %781 = vmatmul.mubr.bf16.gmra.mxu1 %v1161_v61 }
  0xff   :  { %v533_v15 = vpop.f32.mrf.mxu0  ;;  %v606_v18 = vpop.f32.mrf.mxu1 }
 0x100   :  { %v534_v20 = vadd.f32 %v533_v15, %v1286_v14  ;;  %v607_v23 = vadd.f32 %v606_v18, %v1292_v16 }
 0x101   :  { %v535_v19 = vpop.f32.mrf.mxu0  ;;  %v608_v22 = vpop.f32.mrf.mxu1 }
 0x102   :  { %v536_v21 = vadd.f32 %v535_v19, %v1289_v0  ;;  %v609_v24 = vadd.f32 %v608_v22, %v1295_v17 }
 0x103   :  { %v537_v25 = vpop.f32.mrf.mxu0  ;;  %v610_v27 = vpop.f32.mrf.mxu1 }
 0x104   :  { %v1121_v26 = vpack.c.bf16 %v536_v21, %v534_v20  ;;  %v1122_v28 = vpack.c.bf16 %v609_v24, %v607_v23  ;;  %v538_v30 = vadd.f32 %v537_v25, %v1286_v14  ;;  %v611_v33 = vadd.f32 %v610_v27, %v1292_v16 }
 0x105   :  { %v539_v29 = vpop.f32.mrf.mxu0  ;;  %v612_v32 = vpop.f32.mrf.mxu1  ;;  %v133_v25 = vsub.s32 4, %v1277_v8 }
 0x106   :  { %983 = vst [vmem:[%s1476_s3] sm:$0xff] %v1121_v26  ;;  %v540_v31 = vadd.f32 %v539_v29, %v1289_v0  ;;  %984 = vst [vmem:[%s1476_s3 + $0x8] sm:$0xff] %v1122_v28  ;;  %v613_v34 = vadd.f32 %v612_v32, %v1295_v17  ;;  %v137_v26 = vsub.s32 5, %v1277_v8 }
 0x107   :  { %v543_v35 = vpop.f32.mrf.mxu0  ;;  %v616_v37 = vpop.f32.mrf.mxu1 }
 0x108   :  { %v1125_v36 = vpack.c.bf16 %v540_v31, %v538_v30  ;;  %v1126_v38 = vpack.c.bf16 %v613_v34, %v611_v33  ;;  %v544_v40 = vadd.f32 %v543_v35, %v1286_v14  ;;  %v617_v43 = vadd.f32 %v616_v37, %v1292_v16 }
 0x109   :  { %v545_v39 = vpop.f32.mrf.mxu0  ;;  %v618_v42 = vpop.f32.mrf.mxu1  ;;  %v141_v30 = vsub.s32 6, %v1277_v8  ;;  %v145_v31 = vsub.s32 7, %v1277_v8 }
 0x10a   :  { %987 = vst [vmem:[%s1476_s3 + $0x20] sm:$0xff] %v1125_v36  ;;  %v546_v41 = vadd.f32 %v545_v39, %v1289_v0  ;;  %988 = vst [vmem:[%s1476_s3 + $0x28] sm:$0xff] %v1126_v38  ;;  %v619_v44 = vadd.f32 %v618_v42, %v1295_v17  ;;  %v1371_v39 = vrot.slane %v1281_v11, %v133_v25 }
 0x10b   :  { %v547_v45 = vpop.f32.mrf.mxu0  ;;  %v620_v47 = vpop.f32.mrf.mxu1 }
 0x10c   :  { %v1129_v46 = vpack.c.bf16 %v546_v41, %v544_v40  ;;  %v1130_v48 = vpack.c.bf16 %v619_v44, %v617_v43  ;;  %v548_v50 = vadd.f32 %v547_v45, %v1286_v14  ;;  %v621_v53 = vadd.f32 %v620_v47, %v1292_v16 }
 0x10d   :  { %v549_v49 = vpop.f32.mrf.mxu0  ;;  %v622_v52 = vpop.f32.mrf.mxu1  ;;  %v1374_v40 = vrot.slane %v1281_v11, %v137_v26 }
 0x10e   :  { %991 = vst [vmem:[%s1476_s3 + $0x40] sm:$0xff] %v1129_v46  ;;  %v550_v51 = vadd.f32 %v549_v49, %v1289_v0  ;;  %992 = vst [vmem:[%s1476_s3 + $0x48] sm:$0xff] %v1130_v48  ;;  %v623_v54 = vadd.f32 %v622_v52, %v1295_v17 }
 0x10f   :  { %v553_v55 = vpop.f32.mrf.mxu0  ;;  %v626_v57 = vpop.f32.mrf.mxu1 }
 0x110   :  { %v1133_v56 = vpack.c.bf16 %v550_v51, %v548_v50  ;;  %v1134_v58 = vpack.c.bf16 %v623_v54, %v621_v53  ;;  %v554_v60 = vadd.f32 %v553_v55, %v1286_v14  ;;  %v627_v63 = vadd.f32 %v626_v57, %v1292_v16 }
 0x111   :  { %v555_v59 = vpop.f32.mrf.mxu0  ;;  %v628_v62 = vpop.f32.mrf.mxu1 }
 0x112   :  { %995 = vst [vmem:[%s1476_s3 + $0x60] sm:$0xff] %v1133_v56  ;;  %v556_v61 = vadd.f32 %v555_v59, %v1289_v0  ;;  %996 = vst [vmem:[%s1476_s3 + $0x68] sm:$0xff] %v1134_v58  ;;  %v629_v1 = vadd.f32 %v628_v62, %v1295_v17 }
 0x113   :  { %v557_v2 = vpop.f32.mrf.mxu0  ;;  %v630_v4 = vpop.f32.mrf.mxu1 }
 0x114   :  { %v1137_v3 = vpack.c.bf16 %v556_v61, %v554_v60  ;;  %v1138_v5 = vpack.c.bf16 %v629_v1, %v627_v63  ;;  %v558_v7 = vadd.f32 %v557_v2, %v1286_v14  ;;  %v631_v12 = vadd.f32 %v630_v4, %v1292_v16 }
 0x115   :  { %v559_v6 = vpop.f32.mrf.mxu0  ;;  %v632_v10 = vpop.f32.mrf.mxu1 }
 0x116   :  { %999 = vst [vmem:[%s1476_s3 + $0x80] sm:$0xff] %v1137_v3  ;;  %v560_v9 = vadd.f32 %v559_v6, %v1289_v0  ;;  %1000 = vst [vmem:[%s1476_s3 + $0x88] sm:$0xff] %v1138_v5  ;;  %v633_v13 = vadd.f32 %v632_v10, %v1295_v17 }
 0x117   :  { %v563_v15 = vpop.f32.mrf.mxu0  ;;  %v636_v19 = vpop.f32.mrf.mxu1 }
 0x118   :  { %v1141_v18 = vpack.c.bf16 %v560_v9, %v558_v7  ;;  %v1142_v20 = vpack.c.bf16 %v633_v13, %v631_v12  ;;  %v564_v22 = vadd.f32 %v563_v15, %v1286_v14  ;;  %v637_v27 = vadd.f32 %v636_v19, %v1292_v16 }
 0x119   :  { %v565_v21 = vpop.f32.mrf.mxu0  ;;  %v638_v24 = vpop.f32.mrf.mxu1 }
 0x11a   :  { %1003 = vst [vmem:[%s1476_s3 + $0xa0] sm:$0xff] %v1141_v18  ;;  %v566_v23 = vadd.f32 %v565_v21, %v1289_v0  ;;  %1004 = vst [vmem:[%s1476_s3 + $0xa8] sm:$0xff] %v1142_v20  ;;  %v639_v28 = vadd.f32 %v638_v24, %v1295_v17 }
 0x11b   :  { %v567_v29 = vpop.f32.mrf.mxu0  ;;  %v640_v33 = vpop.f32.mrf.mxu1 }
 0x11c   :  { %v1145_v32 = vpack.c.bf16 %v566_v23, %v564_v22  ;;  %v1146_v34 = vpack.c.bf16 %v639_v28, %v637_v27  ;;  %v568_v36 = vadd.f32 %v567_v29, %v1286_v14  ;;  %v641_v8 = vadd.f32 %v640_v33, %v1292_v16 }
 0x11d   :  { %v569_v35 = vpop.f32.mrf.mxu0  ;;  %v642_v38 = vpop.f32.mrf.mxu1  ;;  %v1382_v14 = vrot.slane %v1281_v11, %v141_v30 }
 0x11e   :  { %1007 = vst [vmem:[%s1476_s3 + $0xc0] sm:$0xff] %v1145_v32  ;;  %v570_v37 = vadd.f32 %v569_v35, %v1289_v0  ;;  %1008 = vst [vmem:[%s1476_s3 + $0xc8] sm:$0xff] %v1146_v34  ;;  %v643_v41 = vadd.f32 %v642_v38, %v1295_v17  ;;  %v1385_v0 = vrot.slane %v1281_v11, %v145_v31 }
 0x11f   :  { %v679_v42 = vpop.f32.mrf.mxu0  ;;  %v752_v44 = vpop.f32.mrf.mxu1 }
 0x120   :  { %v1149_v43 = vpack.c.bf16 %v570_v37, %v568_v36  ;;  %v1150_v45 = vpack.c.bf16 %v643_v41, %v641_v8  ;;  %v680_v47 = vadd.f32 %v679_v42, %v1371_v39  ;;  %v753_v11 = vadd.f32 %v752_v44, %v1382_v14 }
 0x121   :  { %v681_v46 = vpop.f32.mrf.mxu0  ;;  %v754_v17 = vpop.f32.mrf.mxu1 }
 0x122   :  { %1011 = vst [vmem:[%s1476_s3 + $0xe0] sm:$0xff] %v1149_v43  ;;  %v682_v16 = vadd.f32 %v681_v46, %v1374_v40  ;;  %1012 = vst [vmem:[%s1476_s3 + $0xe8] sm:$0xff] %v1150_v45  ;;  %v755_v48 = vadd.f32 %v754_v17, %v1385_v0 }
 0x123   :  { %v683_v49 = vpop.f32.mrf.mxu0  ;;  %v756_v51 = vpop.f32.mrf.mxu1 }
 0x124   :  { %v1123_v50 = vpack.c.bf16 %v682_v16, %v680_v47  ;;  %v1124_v52 = vpack.c.bf16 %v755_v48, %v753_v11  ;;  %v684_v54 = vadd.f32 %v683_v49, %v1371_v39  ;;  %v757_v57 = vadd.f32 %v756_v51, %v1382_v14 }
 0x125   :  { %v685_v53 = vpop.f32.mrf.mxu0  ;;  %v758_v56 = vpop.f32.mrf.mxu1 }
 0x126   :  { %985 = vst [vmem:[%s1476_s3 + $0x10] sm:$0xff] %v1123_v50  ;;  %v686_v55 = vadd.f32 %v685_v53, %v1374_v40  ;;  %986 = vst [vmem:[%s1476_s3 + $0x18] sm:$0xff] %v1124_v52  ;;  %v759_v58 = vadd.f32 %v758_v56, %v1385_v0 }
 0x127   :  { %v689_v59 = vpop.f32.mrf.mxu0  ;;  %v762_v61 = vpop.f32.mrf.mxu1 }
 0x128   :  { %v1127_v60 = vpack.c.bf16 %v686_v55, %v684_v54  ;;  %v1128_v62 = vpack.c.bf16 %v759_v58, %v757_v57  ;;  %v690_v1 = vadd.f32 %v689_v59, %v1371_v39  ;;  %v763_v4 = vadd.f32 %v762_v61, %v1382_v14 }
 0x129   :  { %v691_v63 = vpop.f32.mrf.mxu0  ;;  %v764_v3 = vpop.f32.mrf.mxu1 }
 0x12a   :  { %989 = vst [vmem:[%s1476_s3 + $0x30] sm:$0xff] %v1127_v60  ;;  %v692_v2 = vadd.f32 %v691_v63, %v1374_v40  ;;  %990 = vst [vmem:[%s1476_s3 + $0x38] sm:$0xff] %v1128_v62  ;;  %v765_v5 = vadd.f32 %v764_v3, %v1385_v0 }
 0x12b   :  { %v693_v6 = vpop.f32.mrf.mxu0  ;;  %v766_v9 = vpop.f32.mrf.mxu1 }
 0x12c   :  { %v1131_v7 = vpack.c.bf16 %v692_v2, %v690_v1  ;;  %v1132_v10 = vpack.c.bf16 %v765_v5, %v763_v4  ;;  %v694_v13 = vadd.f32 %v693_v6, %v1371_v39  ;;  %v767_v19 = vadd.f32 %v766_v9, %v1382_v14 }
 0x12d   :  { %v695_v12 = vpop.f32.mrf.mxu0  ;;  %v768_v18 = vpop.f32.mrf.mxu1 }
 0x12e   :  { %993 = vst [vmem:[%s1476_s3 + $0x50] sm:$0xff] %v1131_v7  ;;  %v696_v15 = vadd.f32 %v695_v12, %v1374_v40  ;;  %994 = vst [vmem:[%s1476_s3 + $0x58] sm:$0xff] %v1132_v10  ;;  %v769_v20 = vadd.f32 %v768_v18, %v1385_v0 }
 0x12f   :  { %v699_v21 = vpop.f32.mrf.mxu0  ;;  %v772_v23 = vpop.f32.mrf.mxu1 }
 0x130   :  { %v1135_v22 = vpack.c.bf16 %v696_v15, %v694_v13  ;;  %v1136_v24 = vpack.c.bf16 %v769_v20, %v767_v19  ;;  %v700_v26 = vadd.f32 %v699_v21, %v1371_v39  ;;  %v773_v29 = vadd.f32 %v772_v23, %v1382_v14 }
 0x131   :  { %v701_v25 = vpop.f32.mrf.mxu0  ;;  %v774_v28 = vpop.f32.mrf.mxu1 }
 0x132   :  { %997 = vst [vmem:[%s1476_s3 + $0x70] sm:$0xff] %v1135_v22  ;;  %v702_v27 = vadd.f32 %v701_v25, %v1374_v40  ;;  %998 = vst [vmem:[%s1476_s3 + $0x78] sm:$0xff] %v1136_v24  ;;  %v775_v30 = vadd.f32 %v774_v28, %v1385_v0 }
 0x133   :  { %v703_v31 = vpop.f32.mrf.mxu0  ;;  %v776_v33 = vpop.f32.mrf.mxu1 }
 0x134   :  { %v1139_v32 = vpack.c.bf16 %v702_v27, %v700_v26  ;;  %v1140_v34 = vpack.c.bf16 %v775_v30, %v773_v29  ;;  %v704_v36 = vadd.f32 %v703_v31, %v1371_v39  ;;  %v777_v8 = vadd.f32 %v776_v33, %v1382_v14 }
 0x135   :  { %v705_v35 = vpop.f32.mrf.mxu0  ;;  %v778_v38 = vpop.f32.mrf.mxu1 }
 0x136   :  { %1001 = vst [vmem:[%s1476_s3 + $0x90] sm:$0xff] %v1139_v32  ;;  %v706_v37 = vadd.f32 %v705_v35, %v1374_v40  ;;  %1002 = vst [vmem:[%s1476_s3 + $0x98] sm:$0xff] %v1140_v34  ;;  %v779_v41 = vadd.f32 %v778_v38, %v1385_v0 }
 0x137   :  { %v709_v42 = vpop.f32.mrf.mxu0  ;;  %v782_v44 = vpop.f32.mrf.mxu1 }
 0x138   :  { %v1143_v43 = vpack.c.bf16 %v706_v37, %v704_v36  ;;  %v1144_v45 = vpack.c.bf16 %v779_v41, %v777_v8  ;;  %v710_v47 = vadd.f32 %v709_v42, %v1371_v39  ;;  %v783_v11 = vadd.f32 %v782_v44, %v1382_v14 }
 0x139   :  { %v711_v46 = vpop.f32.mrf.mxu0  ;;  %v784_v17 = vpop.f32.mrf.mxu1 }
 0x13a   :  { %1005 = vst [vmem:[%s1476_s3 + $0xb0] sm:$0xff] %v1143_v43  ;;  %v712_v16 = vadd.f32 %v711_v46, %v1374_v40  ;;  %1006 = vst [vmem:[%s1476_s3 + $0xb8] sm:$0xff] %v1144_v45  ;;  %v785_v48 = vadd.f32 %v784_v17, %v1385_v0 }
 0x13b   :  { %v713_v49 = vpop.f32.mrf.mxu0  ;;  %v786_v51 = vpop.f32.mrf.mxu1 }
 0x13c   :  { %v1147_v50 = vpack.c.bf16 %v712_v16, %v710_v47  ;;  %v1148_v52 = vpack.c.bf16 %v785_v48, %v783_v11  ;;  %v714_v54 = vadd.f32 %v713_v49, %v1371_v39  ;;  %v787_v57 = vadd.f32 %v786_v51, %v1382_v14 }
 0x13d   :  { %v715_v53 = vpop.f32.mrf.mxu0  ;;  %v788_v56 = vpop.f32.mrf.mxu1 }
 0x13e   :  { %1009 = vst [vmem:[%s1476_s3 + $0xd0] sm:$0xff] %v1147_v50  ;;  %v716_v55 = vadd.f32 %v715_v53, %v1374_v40  ;;  %1010 = vst [vmem:[%s1476_s3 + $0xd8] sm:$0xff] %v1148_v52  ;;  %v789_v58 = vadd.f32 %v788_v56, %v1385_v0 }
 0x140   :  { %v1151_v59 = vpack.c.bf16 %v716_v55, %v714_v54  ;;  %v1152_v60 = vpack.c.bf16 %v789_v58, %v787_v57 }
 0x142   :  { %1013 = vst [vmem:[%s1476_s3 + $0xf0] sm:$0xff] %v1151_v59  ;;  %1014 = vst [vmem:[%s1476_s3 + $0xf8] sm:$0xff] %v1152_v60 }
 0x143   :  { %1019 = vsyncpa [#allocation3], 1 }
 0x144   :  { %1020 = vsyncpa [#allocation5], 1 }

// kernel: base_encoder_forward.7
= control target key start
LH: loop header
LB: loop body
LE: loop exit
PB: predicated region body
PF: predicated region fallthrough
CT: control target
= control target key end

     0   :  { %v1980_v3 = vmov 0   ;;  %s2878_s3 = inlined_call_operand.vmem [shape: bf16[128,1024], index: 3, kind: input, shape index: {}]   ;;  %s2879_s1 = inlined_call_operand.vmem [shape: bf16[64,128], index: 1, kind: input, shape index: {}]   ;;  %s2880_s0 = inlined_call_operand.vmem [shape: bf16[64,128], index: 0, kind: input, shape index: {}]   ;;  %s2881_s2 = inlined_call_operand.vmem [shape: bf16[128,1024], index: 2, kind: input, shape index: {}]   ;;  %s2882_s4 = inlined_call_operand.vmem [shape: f32[1,1024], index: 4, kind: input, shape index: {}]   ;;  %s2883_s5 = inlined_call_operand.vmem [shape: bf16[64,1024], index: 5, kind: output, shape index: {}]  }
   0x1   :  { %v157_v0 = vld [vmem:[%s2878_s3 + $0x1c0] sm:$0xff]  ;;  %v158_v2 = vld [vmem:[%s2878_s3 + $0x1c8] sm:$0xff]  ;;  %541 = vmatprep.mubr.bf16.mxu0 %v1980_v3  ;;  %614 = vmatprep.mubr.bf16.mxu1 %v1980_v3  ;;  %v159_v63 = vld [vmem:[%s2878_s3 + $0x1d0] sm:$0xff] }
   0x2   :  { %v161_v1 = vld [vmem:[%s2878_s3 + $0x1e0] sm:$0xff]  ;;  %v162_v5 = vld [vmem:[%s2878_s3 + $0x1e8] sm:$0xff] }
   0x3   :  { %v1832_v4 = vcombine.high %v157_v0, %v161_v1  ;;  %v1831_v6 = vcombine.low %v157_v0, %v161_v1  ;;  %v149_v7 = vld [vmem:[%s2878_s3 + $0x180] sm:$0xff]  ;;  %v1834_v9 = vcombine.high %v158_v2, %v162_v5  ;;  %v1833_v10 = vcombine.low %v158_v2, %v162_v5  ;;  %v150_v12 = vld [vmem:[%s2878_s3 + $0x188] sm:$0xff]  ;;  %v163_v0 = vld [vmem:[%s2878_s3 + $0x1f0] sm:$0xff] }
   0x4   :  { %v153_v8 = vld [vmem:[%s2878_s3 + $0x1a0] sm:$0xff]  ;;  %v154_v13 = vld [vmem:[%s2878_s3 + $0x1a8] sm:$0xff]  ;;  %v160_v1 = vld [vmem:[%s2878_s3 + $0x1d8] sm:$0xff] }
   0x5   :  { %v1824_v11 = vcombine.high %v149_v7, %v153_v8  ;;  %v141_v14 = vld [vmem:[%s2878_s3 + $0x140] sm:$0xff]  ;;  %509 = vmatprep.subr.bf16.mxu0 %v1832_v4  ;;  %v1826_v15 = vcombine.high %v150_v12, %v154_v13  ;;  %v142_v17 = vld [vmem:[%s2878_s3 + $0x148] sm:$0xff]  ;;  %582 = vmatprep.subr.bf16.mxu1 %v1834_v9  ;;  %v1823_v19 = vcombine.low %v149_v7, %v153_v8  ;;  %v164_v2 = vld [vmem:[%s2878_s3 + $0x1f8] sm:$0xff] }
   0x6   :  { %v145_v16 = vld [vmem:[%s2878_s3 + $0x160] sm:$0xff]  ;;  %v146_v18 = vld [vmem:[%s2878_s3 + $0x168] sm:$0xff]  ;;  %510 = vmatpush1.bf16.msra.mxu0 %v1831_v6  ;;  %583 = vmatpush1.bf16.msra.mxu1 %v1833_v10  ;;  %v1825_v20 = vcombine.low %v150_v12, %v154_v13  ;;  %v1836_v6 = vcombine.high %v159_v63, %v163_v0  ;;  %v1838_v7 = vcombine.high %v160_v1, %v164_v2  ;;  %v151_v8 = vld [vmem:[%s2878_s3 + $0x190] sm:$0xff] }
   0x7   :  { %511 = vmatprep.subr.bf16.mxu0 %v1824_v11  ;;  %v1816_v21 = vcombine.high %v141_v14, %v145_v16  ;;  %584 = vmatprep.subr.bf16.mxu1 %v1826_v15  ;;  %v1818_v22 = vcombine.high %v142_v17, %v146_v18  ;;  %v133_v23 = vld [vmem:[%s2878_s3 + $0x100] sm:$0xff]  ;;  %v134_v25 = vld [vmem:[%s2878_s3 + $0x108] sm:$0xff]  ;;  %v1815_v27 = vcombine.low %v141_v14, %v145_v16  ;;  %v155_v9 = vld [vmem:[%s2878_s3 + $0x1b0] sm:$0xff] }
   0x8   :  { %v137_v24 = vld [vmem:[%s2878_s3 + $0x120] sm:$0xff]  ;;  %v138_v26 = vld [vmem:[%s2878_s3 + $0x128] sm:$0xff]  ;;  %v1817_v28 = vcombine.low %v142_v17, %v146_v18  ;;  %v152_v11 = vld [vmem:[%s2878_s3 + $0x198] sm:$0xff]  ;;  %v1835_v13 = vcombine.low %v159_v63, %v163_v0  ;;  %v1837_v14 = vcombine.low %v160_v1, %v164_v2  ;;  %v1828_v15 = vcombine.high %v151_v8, %v155_v9 }
   0x9   :  { %v1808_v29 = vcombine.high %v133_v23, %v137_v24  ;;  %v1810_v30 = vcombine.high %v134_v25, %v138_v26  ;;  %v125_v31 = vld [vmem:[%s2878_s3 + $0xc0] sm:$0xff]  ;;  %v126_v33 = vld [vmem:[%s2878_s3 + $0xc8] sm:$0xff]  ;;  %v1807_v35 = vcombine.low %v133_v23, %v137_v24  ;;  %v1809_v36 = vcombine.low %v134_v25, %v138_v26  ;;  %v156_v12 = vld [vmem:[%s2878_s3 + $0x1b8] sm:$0xff] }
   0xa   :  { %512 = vmatpush1.bf16.msra.mxu0 %v1823_v19  ;;  %585 = vmatpush1.bf16.msra.mxu1 %v1825_v20  ;;  %v129_v32 = vld [vmem:[%s2878_s3 + $0xe0] sm:$0xff]  ;;  %v130_v34 = vld [vmem:[%s2878_s3 + $0xe8] sm:$0xff]  ;;  %v1830_v16 = vcombine.high %v152_v11, %v156_v12  ;;  %v143_v17 = vld [vmem:[%s2878_s3 + $0x150] sm:$0xff] }
   0xb   :  { %513 = vmatprep.subr.bf16.mxu0 %v1816_v21  ;;  %586 = vmatprep.subr.bf16.mxu1 %v1818_v22  ;;  %v1800_v37 = vcombine.high %v125_v31, %v129_v32  ;;  %v117_v38 = vld [vmem:[%s2878_s3 + $0x80] sm:$0xff]  ;;  %v1802_v39 = vcombine.high %v126_v33, %v130_v34  ;;  %v118_v41 = vld [vmem:[%s2878_s3 + $0x88] sm:$0xff]  ;;  %v1799_v43 = vcombine.low %v125_v31, %v129_v32  ;;  %v147_v18 = vld [vmem:[%s2878_s3 + $0x170] sm:$0xff] }
   0xc   :  { %v121_v40 = vld [vmem:[%s2878_s3 + $0xa0] sm:$0xff]  ;;  %v122_v42 = vld [vmem:[%s2878_s3 + $0xa8] sm:$0xff]  ;;  %v1801_v44 = vcombine.low %v126_v33, %v130_v34  ;;  %v144_v19 = vld [vmem:[%s2878_s3 + $0x158] sm:$0xff]  ;;  %v1827_v21 = vcombine.low %v151_v8, %v155_v9  ;;  %v1829_v22 = vcombine.low %v152_v11, %v156_v12  ;;  %v1820_v23 = vcombine.high %v143_v17, %v147_v18 }
   0xd   :  { %v1792_v45 = vcombine.high %v117_v38, %v121_v40  ;;  %v109_v46 = vld [vmem:[%s2878_s3 + $0x40] sm:$0xff]  ;;  %v1794_v47 = vcombine.high %v118_v41, %v122_v42  ;;  %v110_v49 = vld [vmem:[%s2878_s3 + $0x48] sm:$0xff]  ;;  %v1791_v51 = vcombine.low %v117_v38, %v121_v40  ;;  %v1793_v52 = vcombine.low %v118_v41, %v122_v42  ;;  %v148_v20 = vld [vmem:[%s2878_s3 + $0x178] sm:$0xff] }
   0xe   :  { %514 = vmatpush1.bf16.msra.mxu0 %v1815_v27  ;;  %587 = vmatpush1.bf16.msra.mxu1 %v1817_v28  ;;  %v113_v48 = vld [vmem:[%s2878_s3 + $0x60] sm:$0xff]  ;;  %v114_v50 = vld [vmem:[%s2878_s3 + $0x68] sm:$0xff]  ;;  %v1822_v25 = vcombine.high %v144_v19, %v148_v20  ;;  %v135_v26 = vld [vmem:[%s2878_s3 + $0x110] sm:$0xff]  ;;  %v1821_v31 = vcombine.low %v144_v19, %v148_v20 }
   0xf   :  { %515 = vmatprep.subr.bf16.mxu0 %v1808_v29  ;;  %588 = vmatprep.subr.bf16.mxu1 %v1810_v30  ;;  %v1784_v53 = vcombine.high %v109_v46, %v113_v48  ;;  %v1786_v54 = vcombine.high %v110_v49, %v114_v50  ;;  %v101_v55 = vld [vmem:[%s2878_s3] sm:$0xff]  ;;  %v102_v57 = vld [vmem:[%s2878_s3 + $0x8] sm:$0xff]  ;;  %v1783_v59 = vcombine.low %v109_v46, %v113_v48  ;;  %v139_v27 = vld [vmem:[%s2878_s3 + $0x130] sm:$0xff] }
  0x10   :  { %v105_v56 = vld [vmem:[%s2878_s3 + $0x20] sm:$0xff]  ;;  %v106_v58 = vld [vmem:[%s2878_s3 + $0x28] sm:$0xff]  ;;  %v1785_v60 = vcombine.low %v110_v49, %v114_v50  ;;  %v136_v28 = vld [vmem:[%s2878_s3 + $0x118] sm:$0xff]  ;;  %v1819_v30 = vcombine.low %v143_v17, %v147_v18  ;;  %v1812_v32 = vcombine.high %v135_v26, %v139_v27  ;;  %v1811_v38 = vcombine.low %v135_v26, %v139_v27 }
  0x11   :  { %v1776_v61 = vcombine.high %v101_v55, %v105_v56  ;;  %v1778_v62 = vcombine.high %v102_v57, %v106_v58  ;;  %v1775_v4 = vcombine.low %v101_v55, %v105_v56  ;;  %v1777_v5 = vcombine.low %v102_v57, %v106_v58  ;;  %v2130_v10 = vld [vmem:[%s2879_s1] sm:$0xff]   ;;  %v2156_v24 = vld [vmem:[%s2879_s1 + $0x8] sm:$0xff]   ;;  %v140_v29 = vld [vmem:[%s2878_s3 + $0x138] sm:$0xff] }
  0x12   :  { %516 = vmatpush1.bf16.msra.mxu0 %v1807_v35  ;;  %589 = vmatpush1.bf16.msra.mxu1 %v1809_v36  ;;  %v1814_v33 = vcombine.high %v136_v28, %v140_v29  ;;  %v127_v34 = vld [vmem:[%s2878_s3 + $0xd0] sm:$0xff]  ;;  %v128_v36 = vld [vmem:[%s2878_s3 + $0xd8] sm:$0xff]  ;;  %v90_v8 = vld [vmem:[%s2881_s2 + $0x1e8] sm:$0xff] }
  0x13   :  { %517 = vmatprep.subr.bf16.mxu0 %v1800_v37  ;;  %590 = vmatprep.subr.bf16.mxu1 %v1802_v39  ;;  %v131_v35 = vld [vmem:[%s2878_s3 + $0xf0] sm:$0xff]  ;;  %v132_v37 = vld [vmem:[%s2878_s3 + $0xf8] sm:$0xff]  ;;  %v1813_v39 = vcombine.low %v136_v28, %v140_v29  ;;  %v82_v17 = vld [vmem:[%s2881_s2 + $0x1a8] sm:$0xff] }
  0x14   :  { %v2188_v40 = vld [vmem:[%s2879_s1 + $0x10] sm:$0xff]   ;;  %v1804_v41 = vcombine.high %v127_v34, %v131_v35  ;;  %v1806_v42 = vcombine.high %v128_v36, %v132_v37  ;;  %v124_v46 = vld [vmem:[%s2878_s3 + $0xb8] sm:$0xff]  ;;  %v1805_v48 = vcombine.low %v128_v36, %v132_v37  ;;  %v74_v26 = vld [vmem:[%s2881_s2 + $0x168] sm:$0xff] }
  0x15   :  { %v108_v63 = vld [vmem:[%s2878_s3 + $0x38] sm:$0xff] }
  0x16   :  { %518 = vmatpush1.bf16.msra.mxu0 %v1799_v43  ;;  %591 = vmatpush1.bf16.msra.mxu1 %v1801_v44  ;;  %v119_v43 = vld [vmem:[%s2878_s3 + $0x90] sm:$0xff] }
  0x17   :  { %519 = vmatprep.subr.bf16.mxu0 %v1792_v45  ;;  %592 = vmatprep.subr.bf16.mxu1 %v1794_v47  ;;  %v123_v44 = vld [vmem:[%s2878_s3 + $0xb0] sm:$0xff]  ;;  %v120_v45 = vld [vmem:[%s2878_s3 + $0x98] sm:$0xff]  ;;  %v1803_v47 = vcombine.low %v127_v34, %v131_v35 }
  0x18   :  { %v1796_v49 = vcombine.high %v119_v43, %v123_v44  ;;  %v1798_v50 = vcombine.high %v120_v45, %v124_v46  ;;  %v1795_v55 = vcombine.low %v119_v43, %v123_v44  ;;  %v1797_v56 = vcombine.low %v120_v45, %v124_v46 }
  0x1a   :  { %520 = vmatpush1.bf16.msra.mxu0 %v1791_v51  ;;  %593 = vmatpush1.bf16.msra.mxu1 %v1793_v52  ;;  %v111_v51 = vld [vmem:[%s2878_s3 + $0x50] sm:$0xff] }
  0x1b   :  { %521 = vmatprep.subr.bf16.mxu0 %v1784_v53  ;;  %594 = vmatprep.subr.bf16.mxu1 %v1786_v54  ;;  %v115_v52 = vld [vmem:[%s2878_s3 + $0x70] sm:$0xff]  ;;  %v112_v53 = vld [vmem:[%s2878_s3 + $0x58] sm:$0xff] }
  0x1c   :  { %v116_v54 = vld [vmem:[%s2878_s3 + $0x78] sm:$0xff]  ;;  %v1788_v57 = vcombine.high %v111_v51, %v115_v52  ;;  %v1787_v0 = vcombine.low %v111_v51, %v115_v52 }
  0x1d   :  { %v1790_v58 = vcombine.high %v112_v53, %v116_v54  ;;  %v1789_v1 = vcombine.low %v112_v53, %v116_v54  ;;  %v37_v54 = vld [vmem:[%s2881_s2 + $0x40] sm:$0xff] }
  0x1e   :  { %522 = vmatpush1.bf16.msra.mxu0 %v1783_v59  ;;  %595 = vmatpush1.bf16.msra.mxu1 %v1785_v60  ;;  %v103_v59 = vld [vmem:[%s2878_s3 + $0x10] sm:$0xff] }
  0x1f   :  { %523 = vmatprep.subr.bf16.mxu0 %v1776_v61  ;;  %596 = vmatprep.subr.bf16.mxu1 %v1778_v62  ;;  %v107_v60 = vld [vmem:[%s2878_s3 + $0x30] sm:$0xff]  ;;  %v2229_v61 = vld [vmem:[%s2879_s1 + $0x18] sm:$0xff]  }
  0x20   :  { %v104_v62 = vld [vmem:[%s2878_s3 + $0x18] sm:$0xff]  ;;  %v1780_v2 = vcombine.high %v103_v59, %v107_v60  ;;  %v1779_v9 = vcombine.low %v103_v59, %v107_v60 }
  0x21   :  { %v1781_v11 = vcombine.low %v104_v62, %v108_v63 }
  0x22   :  { %524 = vmatpush1.bf16.msra.mxu0 %v1775_v4  ;;  %597 = vmatpush1.bf16.msra.mxu1 %v1777_v5  ;;  %v1782_v4 = vcombine.high %v104_v62, %v108_v63  ;;  %v85_v5 = vld [vmem:[%s2881_s2 + $0x1c0] sm:$0xff] }
  0x23   :  { %655 = vmatprep.subr.bf16.mxu0 %v1836_v6  ;;  %728 = vmatprep.subr.bf16.mxu1 %v1838_v7  ;;  %v89_v6 = vld [vmem:[%s2881_s2 + $0x1e0] sm:$0xff]  ;;  %v86_v7 = vld [vmem:[%s2881_s2 + $0x1c8] sm:$0xff] }
  0x24   :  { %v1900_v12 = vcombine.high %v85_v5, %v89_v6  ;;  %v1899_v18 = vcombine.low %v85_v5, %v89_v6  ;;  %v1901_v19 = vcombine.low %v86_v7, %v90_v8  ;;  %v29_v63 = vld [vmem:[%s2881_s2] sm:$0xff] }
  0x25   :  { %542 = vmatmul.mubr.bf16.vlgmr.msra.gmra.mxu0 %v2130_v10  ;;  %615 = vmatmul.mubr.bf16.vlgmr.msra.gmra.mxu1 %v2130_v10 }
  0x26   :  { %656 = vmatpush1.bf16.msra.mxu0 %v1835_v13  ;;  %729 = vmatpush1.bf16.msra.mxu1 %v1837_v14  ;;  %v1902_v13 = vcombine.high %v86_v7, %v90_v8  ;;  %v77_v14 = vld [vmem:[%s2881_s2 + $0x180] sm:$0xff]  ;;  %v87_v7 = vld [vmem:[%s2881_s2 + $0x1d0] sm:$0xff] }
  0x27   :  { %657 = vmatprep.subr.bf16.mxu0 %v1828_v15  ;;  %730 = vmatprep.subr.bf16.mxu1 %v1830_v16  ;;  %v81_v15 = vld [vmem:[%s2881_s2 + $0x1a0] sm:$0xff]  ;;  %v78_v16 = vld [vmem:[%s2881_s2 + $0x188] sm:$0xff]  ;;  %v91_v8 = vld [vmem:[%s2881_s2 + $0x1f0] sm:$0xff] }
  0x28   :  { %551 = vmatprep.mubr.bf16.mxu0 %v1980_v3  ;;  %624 = vmatprep.mubr.bf16.mxu1 %v1980_v3  ;;  %v1892_v20 = vcombine.high %v77_v14, %v81_v15  ;;  %v1891_v27 = vcombine.low %v77_v14, %v81_v15  ;;  %v1893_v28 = vcombine.low %v78_v16, %v82_v17 }
  0x29   :  { %v1904_v14 = vcombine.high %v87_v7, %v91_v8 }
  0x2a   :  { %658 = vmatpush1.bf16.msra.mxu0 %v1827_v21  ;;  %731 = vmatpush1.bf16.msra.mxu1 %v1829_v22  ;;  %v1894_v21 = vcombine.high %v78_v16, %v82_v17  ;;  %v69_v22 = vld [vmem:[%s2881_s2 + $0x140] sm:$0xff]  ;;  %v79_v16 = vld [vmem:[%s2881_s2 + $0x190] sm:$0xff] }
  0x2b   :  { %659 = vmatprep.subr.bf16.mxu0 %v1820_v23  ;;  %732 = vmatprep.subr.bf16.mxu1 %v1822_v25  ;;  %v73_v23 = vld [vmem:[%s2881_s2 + $0x160] sm:$0xff]  ;;  %v70_v25 = vld [vmem:[%s2881_s2 + $0x148] sm:$0xff]  ;;  %v83_v17 = vld [vmem:[%s2881_s2 + $0x1b0] sm:$0xff] }
  0x2c   :  { %v1884_v29 = vcombine.high %v69_v22, %v73_v23  ;;  %v1883_v34 = vcombine.low %v69_v22, %v73_v23  ;;  %v1885_v35 = vcombine.low %v70_v25, %v74_v26  ;;  %v1896_v22 = vcombine.high %v79_v16, %v83_v17 }
  0x2d   :  { %552 = vmatmul.mubr.bf16.gmra.mxu0 %v2156_v24  ;;  %625 = vmatmul.mubr.bf16.gmra.mxu1 %v2156_v24 }
  0x2e   :  { %660 = vmatpush1.bf16.msra.mxu0 %v1819_v30  ;;  %733 = vmatpush1.bf16.msra.mxu1 %v1821_v31  ;;  %v1886_v30 = vcombine.high %v70_v25, %v74_v26  ;;  %v61_v31 = vld [vmem:[%s2881_s2 + $0x100] sm:$0xff]  ;;  %v71_v25 = vld [vmem:[%s2881_s2 + $0x150] sm:$0xff] }
  0x2f   :  { %661 = vmatprep.subr.bf16.mxu0 %v1812_v32  ;;  %734 = vmatprep.subr.bf16.mxu1 %v1814_v33  ;;  %v65_v32 = vld [vmem:[%s2881_s2 + $0x120] sm:$0xff]  ;;  %v66_v33 = vld [vmem:[%s2881_s2 + $0x128] sm:$0xff]  ;;  %v75_v26 = vld [vmem:[%s2881_s2 + $0x170] sm:$0xff] }
  0x30   :  { %561 = vmatprep.mubr.bf16.mxu0 %v1980_v3  ;;  %634 = vmatprep.mubr.bf16.mxu1 %v1980_v3  ;;  %v1876_v36 = vcombine.high %v61_v31, %v65_v32  ;;  %v1875_v43 = vcombine.low %v61_v31, %v65_v32  ;;  %v1888_v31 = vcombine.high %v71_v25, %v75_v26 }
  0x32   :  { %662 = vmatpush1.bf16.msra.mxu0 %v1811_v38  ;;  %735 = vmatpush1.bf16.msra.mxu1 %v1813_v39  ;;  %v53_v38 = vld [vmem:[%s2881_s2 + $0xc0] sm:$0xff] }
  0x33   :  { %663 = vmatprep.subr.bf16.mxu0 %v1804_v41  ;;  %736 = vmatprep.subr.bf16.mxu1 %v1806_v42  ;;  %v57_v39 = vld [vmem:[%s2881_s2 + $0xe0] sm:$0xff]  ;;  %v54_v41 = vld [vmem:[%s2881_s2 + $0xc8] sm:$0xff] }
  0x34   :  { %v58_v42 = vld [vmem:[%s2881_s2 + $0xe8] sm:$0xff]  ;;  %v1868_v45 = vcombine.high %v53_v38, %v57_v39 }
  0x35   :  { %562 = vmatmul.mubr.bf16.gmra.mxu0 %v2188_v40  ;;  %635 = vmatmul.mubr.bf16.gmra.mxu1 %v2188_v40  ;;  %v1870_v46 = vcombine.high %v54_v41, %v58_v42  ;;  %v1869_v51 = vcombine.low %v54_v41, %v58_v42  ;;  %v55_v42 = vld [vmem:[%s2881_s2 + $0xd0] sm:$0xff] }
  0x36   :  { %664 = vmatpush1.bf16.msra.mxu0 %v1803_v47  ;;  %737 = vmatpush1.bf16.msra.mxu1 %v1805_v48  ;;  %v45_v47 = vld [vmem:[%s2881_s2 + $0x80] sm:$0xff] }
  0x37   :  { %665 = vmatprep.subr.bf16.mxu0 %v1796_v49  ;;  %738 = vmatprep.subr.bf16.mxu1 %v1798_v50  ;;  %v49_v48 = vld [vmem:[%s2881_s2 + $0xa0] sm:$0xff]  ;;  %v50_v49 = vld [vmem:[%s2881_s2 + $0xa8] sm:$0xff]  ;;  %v1867_v50 = vcombine.low %v53_v38, %v57_v39 }
  0x38   :  { %571 = vmatprep.mubr.bf16.mxu0 %v1980_v3  ;;  %644 = vmatprep.mubr.bf16.mxu1 %v1980_v3  ;;  %v1860_v52 = vcombine.high %v45_v47, %v49_v48 }
  0x3a   :  { %666 = vmatpush1.bf16.msra.mxu0 %v1795_v55  ;;  %739 = vmatpush1.bf16.msra.mxu1 %v1797_v56  ;;  %v41_v55 = vld [vmem:[%s2881_s2 + $0x60] sm:$0xff]  ;;  %v38_v56 = vld [vmem:[%s2881_s2 + $0x48] sm:$0xff] }
  0x3b   :  { %667 = vmatprep.subr.bf16.mxu0 %v1788_v57  ;;  %740 = vmatprep.subr.bf16.mxu1 %v1790_v58  ;;  %v42_v57 = vld [vmem:[%s2881_s2 + $0x68] sm:$0xff]  ;;  %v1859_v58 = vcombine.low %v45_v47, %v49_v48  ;;  %v1852_v60 = vcombine.high %v37_v54, %v41_v55 }
  0x3c   :  { %v1854_v62 = vcombine.high %v38_v56, %v42_v57 }
  0x3d   :  { %572 = vmatmul.mubr.bf16.gmra.mxu0 %v2229_v61  ;;  %645 = vmatmul.mubr.bf16.gmra.mxu1 %v2229_v61 }
  0x3e   :  { %668 = vmatpush1.bf16.msra.mxu0 %v1787_v0  ;;  %741 = vmatpush1.bf16.msra.mxu1 %v1789_v1  ;;  %v33_v0 = vld [vmem:[%s2881_s2 + $0x20] sm:$0xff]  ;;  %v34_v1 = vld [vmem:[%s2881_s2 + $0x28] sm:$0xff] }
  0x3f   :  { %669 = vmatprep.subr.bf16.mxu0 %v1780_v2  ;;  %742 = vmatprep.subr.bf16.mxu1 %v1782_v4  ;;  %v1851_v2 = vcombine.low %v37_v54, %v41_v55  ;;  %v1853_v4 = vcombine.low %v38_v56, %v42_v57  ;;  %v1844_v5 = vcombine.high %v29_v63, %v33_v0 }
  0x40   :  { %687 = vmatprep.mubr.bf16.mxu0 %v1980_v3  ;;  %760 = vmatprep.mubr.bf16.mxu1 %v1980_v3 }
  0x42   :  { %670 = vmatpush1.bf16.msra.mxu0 %v1779_v9  ;;  %743 = vmatpush1.bf16.msra.mxu1 %v1781_v11  ;;  %v88_v9 = vld [vmem:[%s2881_s2 + $0x1d8] sm:$0xff] }
  0x43   :  { %1145 = vmatprep.subr.bf16.mxu0 %v1900_v12  ;;  %1218 = vmatprep.subr.bf16.mxu1 %v1902_v13  ;;  %v92_v11 = vld [vmem:[%s2881_s2 + $0x1f8] sm:$0xff]  ;;  %v1843_v12 = vcombine.low %v29_v63, %v33_v0 }
  0x44   :  { %v1906_v15 = vcombine.high %v88_v9, %v92_v11 }
  0x45   :  { %688 = vmatmul.mubr.bf16.vlgmr.msra.gmra.mxu0 %v2130_v10  ;;  %761 = vmatmul.mubr.bf16.vlgmr.msra.gmra.mxu1 %v2130_v10  ;;  %v62_v10 = vld [vmem:[%s2881_s2 + $0x108] sm:$0xff] }
  0x46   :  { %1146 = vmatpush1.bf16.msra.mxu0 %v1899_v18  ;;  %1219 = vmatpush1.bf16.msra.mxu1 %v1901_v19  ;;  %v1878_v37 = vcombine.high %v62_v10, %v66_v33  ;;  %v1877_v44 = vcombine.low %v62_v10, %v66_v33  ;;  %v80_v18 = vld [vmem:[%s2881_s2 + $0x198] sm:$0xff]  ;;  %v63_v10 = vld [vmem:[%s2881_s2 + $0x110] sm:$0xff] }
  0x47   :  { %1147 = vmatprep.subr.bf16.mxu0 %v1892_v20  ;;  %1220 = vmatprep.subr.bf16.mxu1 %v1894_v21  ;;  %v84_v19 = vld [vmem:[%s2881_s2 + $0x1b8] sm:$0xff]  ;;  %v1903_v20 = vcombine.low %v87_v7, %v91_v8  ;;  %v1905_v21 = vcombine.low %v88_v9, %v92_v11  ;;  %v67_v33 = vld [vmem:[%s2881_s2 + $0x130] sm:$0xff] }
  0x48   :  { %697 = vmatprep.mubr.bf16.mxu0 %v1980_v3  ;;  %770 = vmatprep.mubr.bf16.mxu1 %v1980_v3  ;;  %v1898_v23 = vcombine.high %v80_v18, %v84_v19  ;;  %v1880_v39 = vcombine.high %v63_v10, %v67_v33  ;;  %v36_v7 = vld [vmem:[%s2881_s2 + $0x38] sm:$0xff] }
  0x4a   :  { %1148 = vmatpush1.bf16.msra.mxu0 %v1891_v27  ;;  %1221 = vmatpush1.bf16.msra.mxu1 %v1893_v28  ;;  %v72_v27 = vld [vmem:[%s2881_s2 + $0x158] sm:$0xff] }
  0x4b   :  { %1149 = vmatprep.subr.bf16.mxu0 %v1884_v29  ;;  %1222 = vmatprep.subr.bf16.mxu1 %v1886_v30  ;;  %v76_v28 = vld [vmem:[%s2881_s2 + $0x178] sm:$0xff]  ;;  %v1895_v29 = vcombine.low %v79_v16, %v83_v17  ;;  %v1897_v30 = vcombine.low %v80_v18, %v84_v19 }
  0x4c   :  { %v1890_v32 = vcombine.high %v72_v27, %v76_v28  ;;  %v1889_v38 = vcombine.low %v72_v27, %v76_v28 }
  0x4d   :  { %698 = vmatmul.mubr.bf16.gmra.mxu0 %v2156_v24  ;;  %771 = vmatmul.mubr.bf16.gmra.mxu1 %v2156_v24  ;;  %v46_v24 = vld [vmem:[%s2881_s2 + $0x88] sm:$0xff] }
  0x4e   :  { %1150 = vmatpush1.bf16.msra.mxu0 %v1883_v34  ;;  %1223 = vmatpush1.bf16.msra.mxu1 %v1885_v35  ;;  %v1862_v53 = vcombine.high %v46_v24, %v50_v49  ;;  %v1861_v59 = vcombine.low %v46_v24, %v50_v49  ;;  %v2407_v34 = vld [vmem:[%s2880_s0 + $0x8] sm:$0xff]   ;;  %v64_v35 = vld [vmem:[%s2881_s2 + $0x118] sm:$0xff]  ;;  %v47_v49 = vld [vmem:[%s2881_s2 + $0x90] sm:$0xff] }
  0x4f   :  { %1151 = vmatprep.subr.bf16.mxu0 %v1876_v36  ;;  %1224 = vmatprep.subr.bf16.mxu1 %v1878_v37  ;;  %v68_v36 = vld [vmem:[%s2881_s2 + $0x138] sm:$0xff]  ;;  %v1887_v37 = vcombine.low %v71_v25, %v75_v26 }
  0x50   :  { %707 = vmatprep.mubr.bf16.mxu0 %v1980_v3  ;;  %780 = vmatprep.mubr.bf16.mxu1 %v1980_v3  ;;  %v1882_v41 = vcombine.high %v64_v35, %v68_v36  ;;  %v1881_v47 = vcombine.low %v64_v35, %v68_v36 }
  0x52   :  { %1152 = vmatpush1.bf16.msra.mxu0 %v1875_v43  ;;  %1225 = vmatpush1.bf16.msra.mxu1 %v1877_v44  ;;  %v59_v43 = vld [vmem:[%s2881_s2 + $0xf0] sm:$0xff]  ;;  %v56_v44 = vld [vmem:[%s2881_s2 + $0xd8] sm:$0xff] }
  0x53   :  { %1153 = vmatprep.subr.bf16.mxu0 %v1868_v45  ;;  %1226 = vmatprep.subr.bf16.mxu1 %v1870_v46  ;;  %v60_v45 = vld [vmem:[%s2881_s2 + $0xf8] sm:$0xff]  ;;  %v1879_v46 = vcombine.low %v63_v10, %v67_v33  ;;  %v1872_v48 = vcombine.high %v55_v42, %v59_v43  ;;  %v1871_v54 = vcombine.low %v55_v42, %v59_v43 }
  0x54   :  { %v1874_v24 = vcombine.high %v56_v44, %v60_v45  ;;  %v1873_v55 = vcombine.low %v56_v44, %v60_v45 }
  0x55   :  { %708 = vmatmul.mubr.bf16.gmra.mxu0 %v2188_v40  ;;  %781 = vmatmul.mubr.bf16.gmra.mxu1 %v2188_v40  ;;  %v30_v40 = vld [vmem:[%s2881_s2 + $0x8] sm:$0xff] }
  0x56   :  { %1154 = vmatpush1.bf16.msra.mxu0 %v1867_v50  ;;  %1227 = vmatpush1.bf16.msra.mxu1 %v1869_v51  ;;  %v1846_v6 = vcombine.high %v30_v40, %v34_v1  ;;  %v1845_v13 = vcombine.low %v30_v40, %v34_v1  ;;  %v51_v50 = vld [vmem:[%s2881_s2 + $0xb0] sm:$0xff] }
  0x57   :  { %1155 = vmatprep.subr.bf16.mxu0 %v1860_v52  ;;  %1228 = vmatprep.subr.bf16.mxu1 %v1862_v53  ;;  %v1978_v51 = vld [vmem:[%s2880_s0 + $0x10] sm:$0xff]   ;;  %v48_v52 = vld [vmem:[%s2881_s2 + $0x98] sm:$0xff]  ;;  %v1864_v56 = vcombine.high %v47_v49, %v51_v50  ;;  %v1863_v63 = vcombine.low %v47_v49, %v51_v50 }
  0x58   :  { %717 = vmatprep.mubr.bf16.mxu0 %v1980_v3  ;;  %790 = vmatprep.mubr.bf16.mxu1 %v1980_v3  ;;  %v52_v53 = vld [vmem:[%s2881_s2 + $0xb8] sm:$0xff] }
  0x59   :  { %v1866_v57 = vcombine.high %v48_v52, %v52_v53  ;;  %v1865_v0 = vcombine.low %v48_v52, %v52_v53 }
  0x5a   :  { %1156 = vmatpush1.bf16.msra.mxu0 %v1859_v58  ;;  %1229 = vmatpush1.bf16.msra.mxu1 %v1861_v59  ;;  %v39_v58 = vld [vmem:[%s2881_s2 + $0x50] sm:$0xff] }
  0x5b   :  { %1157 = vmatprep.subr.bf16.mxu0 %v1852_v60  ;;  %1230 = vmatprep.subr.bf16.mxu1 %v1854_v62  ;;  %v43_v59 = vld [vmem:[%s2881_s2 + $0x70] sm:$0xff]  ;;  %v40_v60 = vld [vmem:[%s2881_s2 + $0x58] sm:$0xff] }
  0x5c   :  { %v44_v62 = vld [vmem:[%s2881_s2 + $0x78] sm:$0xff]  ;;  %v1856_v40 = vcombine.high %v39_v58, %v43_v59  ;;  %v1855_v8 = vcombine.low %v39_v58, %v43_v59 }
  0x5d   :  { %718 = vmatmul.mubr.bf16.gmra.mxu0 %v2229_v61  ;;  %791 = vmatmul.mubr.bf16.gmra.mxu1 %v2229_v61  ;;  %v2374_v61 = vld [vmem:[%s2880_s0] sm:$0xff]   ;;  %v1858_v1 = vcombine.high %v40_v60, %v44_v62  ;;  %v1857_v9 = vcombine.low %v40_v60, %v44_v62 }
  0x5e   :  { %1158 = vmatpush1.bf16.msra.mxu0 %v1851_v2  ;;  %1231 = vmatpush1.bf16.msra.mxu1 %v1853_v4  ;;  %v31_v2 = vld [vmem:[%s2881_s2 + $0x10] sm:$0xff] }
  0x5f   :  { %1159 = vmatprep.subr.bf16.mxu0 %v1844_v5  ;;  %1232 = vmatprep.subr.bf16.mxu1 %v1846_v6  ;;  %v35_v4 = vld [vmem:[%s2881_s2 + $0x30] sm:$0xff]  ;;  %v1979_v5 = vld [vmem:[%s2880_s0 + $0x18] sm:$0xff]  }
  0x60   :  { %1177 = vmatprep.mubr.bf16.mxu0 %v1980_v3  ;;  %1250 = vmatprep.mubr.bf16.mxu1 %v1980_v3  ;;  %v32_v6 = vld [vmem:[%s2881_s2 + $0x18] sm:$0xff]  ;;  %v1848_v11 = vcombine.high %v31_v2, %v35_v4 }
  0x62   :  { %1160 = vmatpush1.bf16.msra.mxu0 %v1843_v12  ;;  %1233 = vmatpush1.bf16.msra.mxu1 %v1845_v13  ;;  %v1850_v12 = vcombine.high %v32_v6, %v36_v7  ;;  %v1847_v13 = vcombine.low %v31_v2, %v35_v4  ;;  %v1439_v4 = vlaneseq }
  0x63   :  { %1291 = vmatprep.subr.bf16.mxu0 %v1904_v14  ;;  %1364 = vmatprep.subr.bf16.mxu1 %v1906_v15  ;;  %v1849_v14 = vcombine.low %v32_v6, %v36_v7 }
  0x65   :  { %1178 = vmatmul.mubr.bf16.vlgmr.msra.gmra.mxu0 %v2374_v61  ;;  %1251 = vmatmul.mubr.bf16.vlgmr.msra.gmra.mxu1 %v2374_v61 }
  0x66   :  { %1292 = vmatpush1.bf16.msra.mxu0 %v1903_v20  ;;  %1365 = vmatpush1.bf16.msra.mxu1 %v1905_v21 }
  0x67   :  { %1293 = vmatprep.subr.bf16.mxu0 %v1896_v22  ;;  %1366 = vmatprep.subr.bf16.mxu1 %v1898_v23 }
  0x68   :  { %1187 = vmatprep.mubr.bf16.mxu0 %v1980_v3  ;;  %1260 = vmatprep.mubr.bf16.mxu1 %v1980_v3 }
  0x6a   :  { %1294 = vmatpush1.bf16.msra.mxu0 %v1895_v29  ;;  %1367 = vmatpush1.bf16.msra.mxu1 %v1897_v30 }
  0x6b   :  { %1295 = vmatprep.subr.bf16.mxu0 %v1888_v31  ;;  %1368 = vmatprep.subr.bf16.mxu1 %v1890_v32 }
  0x6d   :  { %1188 = vmatmul.mubr.bf16.gmra.mxu0 %v2407_v34  ;;  %1261 = vmatmul.mubr.bf16.gmra.mxu1 %v2407_v34 }
  0x6e   :  { %1296 = vmatpush1.bf16.msra.mxu0 %v1887_v37  ;;  %1369 = vmatpush1.bf16.msra.mxu1 %v1889_v38 }
  0x6f   :  { %1297 = vmatprep.subr.bf16.mxu0 %v1880_v39  ;;  %1370 = vmatprep.subr.bf16.mxu1 %v1882_v41 }
  0x70   :  { %1197 = vmatprep.mubr.bf16.mxu0 %v1980_v3  ;;  %1270 = vmatprep.mubr.bf16.mxu1 %v1980_v3 }
  0x72   :  { %1298 = vmatpush1.bf16.msra.mxu0 %v1879_v46  ;;  %1371 = vmatpush1.bf16.msra.mxu1 %v1881_v47 }
  0x73   :  { %1299 = vmatprep.subr.bf16.mxu0 %v1872_v48  ;;  %1372 = vmatprep.subr.bf16.mxu1 %v1874_v24 }
  0x75   :  { %1198 = vmatmul.mubr.bf16.gmra.mxu0 %v1978_v51  ;;  %1271 = vmatmul.mubr.bf16.gmra.mxu1 %v1978_v51 }
  0x76   :  { %1300 = vmatpush1.bf16.msra.mxu0 %v1871_v54  ;;  %1373 = vmatpush1.bf16.msra.mxu1 %v1873_v55 }
  0x77   :  { %1301 = vmatprep.subr.bf16.mxu0 %v1864_v56  ;;  %1374 = vmatprep.subr.bf16.mxu1 %v1866_v57 }
  0x78   :  { %1207 = vmatprep.mubr.bf16.mxu0 %v1980_v3  ;;  %1280 = vmatprep.mubr.bf16.mxu1 %v1980_v3 }
  0x7a   :  { %1302 = vmatpush1.bf16.msra.mxu0 %v1863_v63  ;;  %1375 = vmatpush1.bf16.msra.mxu1 %v1865_v0 }
  0x7b   :  { %1303 = vmatprep.subr.bf16.mxu0 %v1856_v40  ;;  %1376 = vmatprep.subr.bf16.mxu1 %v1858_v1 }
  0x7d   :  { %1208 = vmatmul.mubr.bf16.gmra.mxu0 %v1979_v5  ;;  %1281 = vmatmul.mubr.bf16.gmra.mxu1 %v1979_v5 }
  0x7e   :  { %1304 = vmatpush1.bf16.msra.mxu0 %v1855_v8  ;;  %1377 = vmatpush1.bf16.msra.mxu1 %v1857_v9  ;;  %v2603_v9 = vshrl.u32 %v1439_v4, 7 }
  0x7f   :  { %1305 = vmatprep.subr.bf16.mxu0 %v1848_v11  ;;  %1378 = vmatprep.subr.bf16.mxu1 %v1850_v12 }
  0x80   :  { %1323 = vmatprep.mubr.bf16.mxu0 %v1980_v3  ;;  %1396 = vmatprep.mubr.bf16.mxu1 %v1980_v3  ;;  %v1449_v4 = vsub.s32 2, %v2603_v9 }
  0x82   :  { %1306 = vmatpush1.bf16.msra.mxu0 %v1847_v13  ;;  %1379 = vmatpush1.bf16.msra.mxu1 %v1849_v14 }
  0x85   :  { %1324 = vmatmul.mubr.bf16.vlgmr.msra.gmra.mxu0 %v2374_v61  ;;  %1397 = vmatmul.mubr.bf16.vlgmr.msra.gmra.mxu1 %v2374_v61 }
  0x86   :  { %1333 = vmatprep.mubr.bf16.mxu0 %v1980_v3  ;;  %1406 = vmatprep.mubr.bf16.mxu1 %v1980_v3 }
  0x8d   :  { %1334 = vmatmul.mubr.bf16.gmra.mxu0 %v2407_v34  ;;  %1407 = vmatmul.mubr.bf16.gmra.mxu1 %v2407_v34 }
  0x8e   :  { %1343 = vmatprep.mubr.bf16.mxu0 %v1980_v3  ;;  %1416 = vmatprep.mubr.bf16.mxu1 %v1980_v3 }
  0x95   :  { %1344 = vmatmul.mubr.bf16.gmra.mxu0 %v1978_v51  ;;  %1417 = vmatmul.mubr.bf16.gmra.mxu1 %v1978_v51 }
  0x96   :  { %1353 = vmatprep.mubr.bf16.mxu0 %v1980_v3  ;;  %1426 = vmatprep.mubr.bf16.mxu1 %v1980_v3 }
  0x9d   :  { %1354 = vmatmul.mubr.bf16.gmra.mxu0 %v1979_v5  ;;  %1427 = vmatmul.mubr.bf16.gmra.mxu1 %v1979_v5 }
  0xe5   :  { %v2487_v15 = vpop.f32.mrf.mxu0  ;;  %v2489_v16 = vpop.f32.mrf.mxu1 }
  0xe7   :  { %v2491_v17 = vpop.f32.mrf.mxu0  ;;  %v2493_v61 = vpop.f32.mrf.mxu1 }
  0xe9   :  { %v2495_v18 = vpop.f32.mrf.mxu0  ;;  %v2497_v19 = vpop.f32.mrf.mxu1 }
  0xeb   :  { %v2499_v20 = vpop.f32.mrf.mxu0  ;;  %v2501_v21 = vpop.f32.mrf.mxu1 }
  0xed   :  { %v2503_v22 = vpop.f32.mrf.mxu0  ;;  %v2505_v3 = vpop.f32.mrf.mxu1 }
  0xef   :  { %v2507_v23 = vpop.f32.mrf.mxu0  ;;  %v2509_v25 = vpop.f32.mrf.mxu1 }
  0xf1   :  { %v2511_v26 = vpop.f32.mrf.mxu0  ;;  %v2513_v27 = vpop.f32.mrf.mxu1 }
  0xf3   :  { %v2515_v28 = vpop.f32.mrf.mxu0  ;;  %v2517_v29 = vpop.f32.mrf.mxu1 }
  0xf5   :  { %v2519_v30 = vpop.f32.mrf.mxu0  ;;  %v2521_v31 = vpop.f32.mrf.mxu1 }
  0xf7   :  { %v2523_v32 = vpop.f32.mrf.mxu0  ;;  %v2525_v10 = vpop.f32.mrf.mxu1 }
  0xf9   :  { %v2527_v33 = vpop.f32.mrf.mxu0  ;;  %v2529_v34 = vpop.f32.mrf.mxu1 }
  0xfb   :  { %v2531_v35 = vpop.f32.mrf.mxu0  ;;  %v2533_v36 = vpop.f32.mrf.mxu1 }
  0xfd   :  { %v2535_v37 = vpop.f32.mrf.mxu0  ;;  %v2537_v38 = vpop.f32.mrf.mxu1 }
  0xff   :  { %v2539_v39 = vpop.f32.mrf.mxu0  ;;  %v2541_v41 = vpop.f32.mrf.mxu1 }
 0x101   :  { %v2543_v42 = vpop.f32.mrf.mxu0  ;;  %v2545_v43 = vpop.f32.mrf.mxu1 }
 0x103   :  { %v2547_v44 = vpop.f32.mrf.mxu0  ;;  %v2549_v45 = vpop.f32.mrf.mxu1 }
 0x105   :  { %v2551_v46 = vpop.f32.mrf.mxu0  ;;  %v2553_v47 = vpop.f32.mrf.mxu1 }
 0x107   :  { %v2555_v48 = vpop.f32.mrf.mxu0  ;;  %v2557_v24 = vpop.f32.mrf.mxu1 }
 0x109   :  { %v2559_v49 = vpop.f32.mrf.mxu0  ;;  %v2561_v50 = vpop.f32.mrf.mxu1 }
 0x10b   :  { %v2563_v51 = vpop.f32.mrf.mxu0  ;;  %v2565_v52 = vpop.f32.mrf.mxu1 }
 0x10d   :  { %v2567_v53 = vpop.f32.mrf.mxu0  ;;  %v2569_v54 = vpop.f32.mrf.mxu1 }
 0x10f   :  { %v2571_v55 = vpop.f32.mrf.mxu0  ;;  %v2573_v56 = vpop.f32.mrf.mxu1 }
 0x111   :  { %v2575_v57 = vpop.f32.mrf.mxu0  ;;  %v2577_v58 = vpop.f32.mrf.mxu1 }
 0x112   :  { %2884 = vst [vmem:[#allocation2_spill] sm:$0xff] %v2575_v57  ;;  %2885 = vst [vmem:[#allocation3_spill] sm:$0xff] %v2577_v58 }
 0x113   :  { %v2579_v59 = vpop.f32.mrf.mxu0  ;;  %v2581_v60 = vpop.f32.mrf.mxu1 }
 0x114   :  { %2886 = vst [vmem:[#allocation4_spill] sm:$0xff] %v2579_v59  ;;  %2887 = vst [vmem:[#allocation5_spill] sm:$0xff] %v2581_v60 }
 0x115   :  { %v2583_v62 = vpop.f32.mrf.mxu0  ;;  %v2585_v63 = vpop.f32.mrf.mxu1 }
 0x116   :  { %2888 = vst [vmem:[#allocation6_spill] sm:$0xff] %v2583_v62  ;;  %2889 = vst [vmem:[#allocation7_spill] sm:$0xff] %v2585_v63 }
 0x117   :  { %v2587_v0 = vpop.f32.mrf.mxu0  ;;  %v2589_v40 = vpop.f32.mrf.mxu1 }
 0x118   :  { %2890 = vst [vmem:[#allocation8_spill] sm:$0xff] %v2587_v0  ;;  %2891 = vst [vmem:[#allocation9_spill] sm:$0xff] %v2589_v40 }
 0x119   :  { %v2591_v1 = vpop.f32.mrf.mxu0  ;;  %v2593_v2 = vpop.f32.mrf.mxu1 }
 0x11a   :  { %2892 = vst [vmem:[#allocation10_spill] sm:$0xff] %v2591_v1  ;;  %2893 = vst [vmem:[#allocation11_spill] sm:$0xff] %v2593_v2  ;;  %v1441_v2 = vsub.s32 0, %v2603_v9 }
 0x11b   :  { %v2595_v5 = vpop.f32.mrf.mxu0  ;;  %v2597_v6 = vpop.f32.mrf.mxu1 }
 0x11c   :  { %2894 = vst [vmem:[#allocation12_spill] sm:$0xff] %v2595_v5  ;;  %2895 = vst [vmem:[#allocation13_spill] sm:$0xff] %v2597_v6  ;;  %v1445_v5 = vsub.s32 1, %v2603_v9 }
 0x11d   :  { %v2599_v7 = vpop.f32.mrf.mxu0  ;;  %v2601_v8 = vpop.f32.mrf.mxu1 }
 0x11e   :  { %2896 = vst [vmem:[#allocation14_spill] sm:$0xff] %v2599_v7  ;;  %2897 = vst [vmem:[#allocation15_spill] sm:$0xff] %v2601_v8  ;;  %v2620_v8 = vld [vmem:[%s2882_s4] sm:$0xff] }
 0x11f   :  { %v2605_v11 = vpop.f32.mrf.mxu0  ;;  %v2607_v12 = vpop.f32.mrf.mxu1  ;;  %v2628_v7 = vrot.slane %v2620_v8, %v1441_v2  ;;  %v2635_v0 = vrot.slane %v2620_v8, %v1449_v4 }
 0x120   :  { %2898 = vst [vmem:[#allocation16_spill] sm:$0xff] %v2605_v11  ;;  %2899 = vst [vmem:[#allocation17_spill] sm:$0xff] %v2607_v12  ;;  %v1453_v11 = vsub.s32 3, %v2603_v9 }
 0x121   :  { %v2609_v13 = vpop.f32.mrf.mxu0  ;;  %v2611_v14 = vpop.f32.mrf.mxu1 }
 0x122   :  { %2900 = vst [vmem:[#allocation18_spill] sm:$0xff] %v2609_v13  ;;  %2901 = vst [vmem:[#allocation19_spill] sm:$0xff] %v2611_v14  ;;  %v2638_v62 = vrot.slane %v2620_v8, %v1453_v11 }
 0x123   :  { %v2615_v1 = vpop.f32.mrf.mxu0  ;;  %v2624_v12 = vpop.f32.mrf.mxu1 }
 0x124   :  { %2902 = vst [vmem:[#allocation20_spill] sm:$0xff] %v2615_v1  ;;  %2903 = vst [vmem:[#allocation21_spill] sm:$0xff] %v2624_v12  ;;  %v2631_v1 = vrot.slane %v2620_v8, %v1445_v5 }
 0x125   :  { %v1179_v13 = vpop.f32.mrf.mxu0  ;;  %v1252_v6 = vpop.f32.mrf.mxu1 }
 0x126   :  { %v1180_v14 = vadd.f32 %v1179_v13, %v2487_v15  ;;  %v1253_v40 = vadd.f32 %v1252_v6, %v2489_v16 }
 0x127   :  { %v1181_v63 = vpop.f32.mrf.mxu0  ;;  %v1254_v60 = vpop.f32.mrf.mxu1 }
 0x128   :  { %v1182_v12 = vadd.f32 %v1181_v63, %v2491_v17  ;;  %v1255_v15 = vadd.f32 %v1254_v60, %v2493_v61  ;;  %v1479_v13 = vadd.f32 %v2628_v7, %v1180_v14  ;;  %v1481_v6 = vadd.f32 %v2635_v0, %v1253_v40 }
 0x129   :  { %v1183_v2 = vpop.f32.mrf.mxu0  ;;  %v1256_v16 = vpop.f32.mrf.mxu1 }
 0x12a   :  { %v1480_v5 = vadd.f32 %v2631_v1, %v1182_v12  ;;  %v1184_v59 = vadd.f32 %v1183_v2, %v2495_v18  ;;  %v1482_v4 = vadd.f32 %v2638_v62, %v1255_v15  ;;  %v1257_v11 = vadd.f32 %v1256_v16, %v2497_v19 }
 0x12b   :  { %v1185_v58 = vpop.f32.mrf.mxu0  ;;  %v1258_v63 = vpop.f32.mrf.mxu1 }
 0x12c   :  { %v1939_v57 = vpack.c.bf16 %v1480_v5, %v1479_v13  ;;  %v1186_v17 = vadd.f32 %v1185_v58, %v2499_v20  ;;  %v1940_v61 = vpack.c.bf16 %v1482_v4, %v1481_v6  ;;  %v1259_v60 = vadd.f32 %v1258_v63, %v2501_v21 }
 0x12d   :  { %v1189_v14 = vpop.f32.mrf.mxu0  ;;  %v1487_v18 = vadd.f32 %v2628_v7, %v1184_v59  ;;  %v1262_v19 = vpop.f32.mrf.mxu1  ;;  %v1489_v20 = vadd.f32 %v2635_v0, %v1257_v11 }
 0x12e   :  { %1735 = vst [vmem:[%s2883_s5] sm:$0xff] %v1939_v57  ;;  %v1488_v40 = vadd.f32 %v2631_v1, %v1186_v17  ;;  %v1190_v12 = vadd.f32 %v1189_v14, %v2503_v22  ;;  %1736 = vst [vmem:[%s2883_s5 + $0x8] sm:$0xff] %v1940_v61  ;;  %v1490_v21 = vadd.f32 %v2638_v62, %v1259_v60 }
 0x12f   :  { %v1263_v58 = vadd.f32 %v1262_v19, %v2505_v3  ;;  %v1191_v15 = vpop.f32.mrf.mxu0  ;;  %v1264_v59 = vpop.f32.mrf.mxu1 }
 0x130   :  { %v1943_v2 = vpack.c.bf16 %v1488_v40, %v1487_v18  ;;  %v1192_v57 = vadd.f32 %v1191_v15, %v2507_v23  ;;  %v1944_v13 = vpack.c.bf16 %v1490_v21, %v1489_v20  ;;  %v1265_v5 = vadd.f32 %v1264_v59, %v2509_v25 }
 0x131   :  { %v1193_v22 = vpop.f32.mrf.mxu0  ;;  %v1495_v16 = vadd.f32 %v2628_v7, %v1190_v12  ;;  %v1266_v3 = vpop.f32.mrf.mxu1  ;;  %v1497_v23 = vadd.f32 %v2635_v0, %v1263_v58 }
 0x132   :  { %1739 = vst [vmem:[%s2883_s5 + $0x20] sm:$0xff] %v1943_v2  ;;  %v1496_v6 = vadd.f32 %v2631_v1, %v1192_v57  ;;  %v1194_v4 = vadd.f32 %v1193_v22, %v2511_v26  ;;  %1740 = vst [vmem:[%s2883_s5 + $0x28] sm:$0xff] %v1944_v13  ;;  %v1498_v25 = vadd.f32 %v2638_v62, %v1265_v5 }
 0x133   :  { %v1267_v11 = vadd.f32 %v1266_v3, %v2513_v27  ;;  %v1195_v17 = vpop.f32.mrf.mxu0  ;;  %v1268_v60 = vpop.f32.mrf.mxu1 }
 0x134   :  { %v1947_v63 = vpack.c.bf16 %v1496_v6, %v1495_v16  ;;  %v1196_v61 = vadd.f32 %v1195_v17, %v2515_v28  ;;  %v1948_v14 = vpack.c.bf16 %v1498_v25, %v1497_v23  ;;  %v1269_v18 = vadd.f32 %v1268_v60, %v2517_v29 }
 0x135   :  { %v1199_v26 = vpop.f32.mrf.mxu0  ;;  %v1503_v40 = vadd.f32 %v2628_v7, %v1194_v4  ;;  %v1272_v27 = vpop.f32.mrf.mxu1  ;;  %v1505_v28 = vadd.f32 %v2635_v0, %v1267_v11 }
 0x136   :  { %1743 = vst [vmem:[%s2883_s5 + $0x40] sm:$0xff] %v1947_v63  ;;  %v1504_v12 = vadd.f32 %v2631_v1, %v1196_v61  ;;  %v1200_v19 = vadd.f32 %v1199_v26, %v2519_v30  ;;  %1744 = vst [vmem:[%s2883_s5 + $0x48] sm:$0xff] %v1948_v14  ;;  %v1506_v29 = vadd.f32 %v2638_v62, %v1269_v18 }
 0x137   :  { %v1273_v20 = vadd.f32 %v1272_v27, %v2521_v31  ;;  %v1201_v21 = vpop.f32.mrf.mxu0  ;;  %v1274_v2 = vpop.f32.mrf.mxu1  ;;  %v1457_v27 = vsub.s32 4, %v2603_v9 }
 0x138   :  { %v1951_v58 = vpack.c.bf16 %v1504_v12, %v1503_v40  ;;  %v1202_v15 = vadd.f32 %v1201_v21, %v2523_v32  ;;  %v1952_v57 = vpack.c.bf16 %v1506_v29, %v1505_v28  ;;  %v1275_v59 = vadd.f32 %v1274_v2, %v2525_v10 }
 0x139   :  { %v1203_v30 = vpop.f32.mrf.mxu0  ;;  %v1511_v13 = vadd.f32 %v2628_v7, %v1200_v19  ;;  %v1276_v31 = vpop.f32.mrf.mxu1  ;;  %v1513_v32 = vadd.f32 %v2635_v0, %v1273_v20  ;;  %v1465_v28 = vsub.s32 6, %v2603_v9  ;;  %v1461_v21 = vsub.s32 5, %v2603_v9 }
 0x13a   :  { %1747 = vst [vmem:[%s2883_s5 + $0x60] sm:$0xff] %v1951_v58  ;;  %v1512_v5 = vadd.f32 %v2631_v1, %v1202_v15  ;;  %v1204_v22 = vadd.f32 %v1203_v30, %v2527_v33  ;;  %1748 = vst [vmem:[%s2883_s5 + $0x68] sm:$0xff] %v1952_v57  ;;  %v1514_v10 = vadd.f32 %v2638_v62, %v1275_v59  ;;  %v1469_v57 = vsub.s32 7, %v2603_v9 }
 0x13b   :  { %v1277_v16 = vadd.f32 %v1276_v31, %v2529_v34  ;;  %v1205_v6 = vpop.f32.mrf.mxu0  ;;  %v1278_v23 = vpop.f32.mrf.mxu1  ;;  %v2739_v31 = vrot.slane %v2620_v8, %v1457_v27 }
 0x13c   :  { %v1955_v4 = vpack.c.bf16 %v1512_v5, %v1511_v13  ;;  %v1206_v3 = vadd.f32 %v1205_v6, %v2531_v35  ;;  %v1956_v25 = vpack.c.bf16 %v1514_v10, %v1513_v32  ;;  %v1279_v11 = vadd.f32 %v1278_v23, %v2533_v36 }
 0x13d   :  { %v1209_v33 = vpop.f32.mrf.mxu0  ;;  %v1519_v17 = vadd.f32 %v2628_v7, %v1204_v22  ;;  %v1282_v34 = vpop.f32.mrf.mxu1  ;;  %v1521_v35 = vadd.f32 %v2635_v0, %v1277_v16  ;;  %v2742_v32 = vrot.slane %v2620_v8, %v1465_v28 }
 0x13e   :  { %1751 = vst [vmem:[%s2883_s5 + $0x80] sm:$0xff] %v1955_v4  ;;  %v1520_v63 = vadd.f32 %v2631_v1, %v1206_v3  ;;  %v1210_v61 = vadd.f32 %v1209_v33, %v2535_v37  ;;  %1752 = vst [vmem:[%s2883_s5 + $0x88] sm:$0xff] %v1956_v25  ;;  %v1522_v36 = vadd.f32 %v2638_v62, %v1279_v11 }
 0x13f   :  { %v1283_v60 = vadd.f32 %v1282_v34, %v2537_v38  ;;  %v1211_v14 = vpop.f32.mrf.mxu0  ;;  %v1284_v40 = vpop.f32.mrf.mxu1 }
 0x140   :  { %v1959_v18 = vpack.c.bf16 %v1520_v63, %v1519_v17  ;;  %v1212_v26 = vadd.f32 %v1211_v14, %v2539_v39  ;;  %v1960_v12 = vpack.c.bf16 %v1522_v36, %v1521_v35  ;;  %v1285_v19 = vadd.f32 %v1284_v40, %v2541_v41 }
 0x141   :  { %v1213_v37 = vpop.f32.mrf.mxu0  ;;  %v1527_v29 = vadd.f32 %v2628_v7, %v1210_v61  ;;  %v1286_v39 = vpop.f32.mrf.mxu1  ;;  %v1529_v41 = vadd.f32 %v2635_v0, %v1283_v60 }
 0x142   :  { %1755 = vst [vmem:[%s2883_s5 + $0xa0] sm:$0xff] %v1959_v18  ;;  %v1528_v38 = vadd.f32 %v2631_v1, %v1212_v26  ;;  %v1214_v20 = vadd.f32 %v1213_v37, %v2543_v42  ;;  %1756 = vst [vmem:[%s2883_s5 + $0xa8] sm:$0xff] %v1960_v12  ;;  %v1530_v58 = vadd.f32 %v2638_v62, %v1285_v19 }
 0x143   :  { %v1287_v15 = vadd.f32 %v1286_v39, %v2545_v43  ;;  %v1215_v2 = vpop.f32.mrf.mxu0  ;;  %v1288_v42 = vpop.f32.mrf.mxu1  ;;  %v2904_v39 = vld [vmem:[#allocation2_spill] sm:$0xff] }
 0x144   :  { %v1963_v59 = vpack.c.bf16 %v1528_v38, %v1527_v29  ;;  %v1216_v30 = vadd.f32 %v1215_v2, %v2547_v44  ;;  %v1964_v13 = vpack.c.bf16 %v1530_v58, %v1529_v41  ;;  %v1289_v5 = vadd.f32 %v1288_v42, %v2549_v45  ;;  %v2905_v41 = vld [vmem:[#allocation3_spill] sm:$0xff] }
 0x145   :  { %v1325_v22 = vpop.f32.mrf.mxu0  ;;  %v1535_v43 = vadd.f32 %v2628_v7, %v1214_v20  ;;  %v1398_v10 = vpop.f32.mrf.mxu1  ;;  %v2751_v45 = vrot.slane %v2620_v8, %v1461_v21  ;;  %v1537_v16 = vadd.f32 %v2635_v0, %v1287_v15  ;;  %v2760_v7 = vrot.slane %v2620_v8, %v1469_v57  ;;  %v2906_v57 = vld [vmem:[#allocation4_spill] sm:$0xff] }
 0x146   :  { %1759 = vst [vmem:[%s2883_s5 + $0xc0] sm:$0xff] %v1963_v59  ;;  %v1536_v9 = vadd.f32 %v2631_v1, %v1216_v30  ;;  %v1326_v44 = vadd.f32 %v1325_v22, %v2551_v46  ;;  %1760 = vst [vmem:[%s2883_s5 + $0xc8] sm:$0xff] %v1964_v13  ;;  %v1538_v6 = vadd.f32 %v2638_v62, %v1289_v5  ;;  %v2907_v13 = vld [vmem:[#allocation5_spill] sm:$0xff] }
 0x147   :  { %v1399_v4 = vadd.f32 %v1398_v10, %v2553_v47  ;;  %v1327_v3 = vpop.f32.mrf.mxu0  ;;  %v1400_v23 = vpop.f32.mrf.mxu1 }
 0x148   :  { %v1967_v1 = vpack.c.bf16 %v1536_v9, %v1535_v43  ;;  %v1328_v46 = vadd.f32 %v1327_v3, %v2555_v48  ;;  %v1968_v25 = vpack.c.bf16 %v1538_v6, %v1537_v16  ;;  %v1401_v11 = vadd.f32 %v1400_v23, %v2557_v24  ;;  %v2909_v3 = vld [vmem:[#allocation7_spill] sm:$0xff] }
 0x149   :  { %v1329_v33 = vpop.f32.mrf.mxu0  ;;  %v1483_v62 = vadd.f32 %v2739_v31, %v1326_v44  ;;  %v1402_v8 = vpop.f32.mrf.mxu1  ;;  %v1485_v48 = vadd.f32 %v2742_v32, %v1399_v4  ;;  %v2908_v44 = vld [vmem:[#allocation6_spill] sm:$0xff] }
 0x14a   :  { %1763 = vst [vmem:[%s2883_s5 + $0xe0] sm:$0xff] %v1967_v1  ;;  %v1484_v47 = vadd.f32 %v2751_v45, %v1328_v46  ;;  %v1330_v0 = vadd.f32 %v1329_v33, %v2559_v49  ;;  %1764 = vst [vmem:[%s2883_s5 + $0xe8] sm:$0xff] %v1968_v25  ;;  %v1486_v24 = vadd.f32 %v2760_v7, %v1401_v11  ;;  %v2910_v25 = vld [vmem:[#allocation8_spill] sm:$0xff] }
 0x14b   :  { %v1403_v17 = vadd.f32 %v1402_v8, %v2561_v50  ;;  %v1331_v63 = vpop.f32.mrf.mxu0  ;;  %v1404_v35 = vpop.f32.mrf.mxu1 }
 0x14c   :  { %v1941_v61 = vpack.c.bf16 %v1484_v47, %v1483_v62  ;;  %v1332_v34 = vadd.f32 %v1331_v63, %v2563_v51  ;;  %v1942_v36 = vpack.c.bf16 %v1486_v24, %v1485_v48  ;;  %v1405_v60 = vadd.f32 %v1404_v35, %v2565_v52  ;;  %v2911_v47 = vld [vmem:[#allocation9_spill] sm:$0xff] }
 0x14d   :  { %v1335_v49 = vpop.f32.mrf.mxu0  ;;  %v1491_v14 = vadd.f32 %v2739_v31, %v1330_v0  ;;  %v1408_v50 = vpop.f32.mrf.mxu1  ;;  %v1493_v51 = vadd.f32 %v2742_v32, %v1403_v17  ;;  %v2912_v17 = vld [vmem:[#allocation10_spill] sm:$0xff] }
 0x14e   :  { %1737 = vst [vmem:[%s2883_s5 + $0x10] sm:$0xff] %v1941_v61  ;;  %v1492_v18 = vadd.f32 %v2751_v45, %v1332_v34  ;;  %v1336_v26 = vadd.f32 %v1335_v49, %v2567_v53  ;;  %1738 = vst [vmem:[%s2883_s5 + $0x18] sm:$0xff] %v1942_v36  ;;  %v1494_v52 = vadd.f32 %v2760_v7, %v1405_v60  ;;  %v2913_v36 = vld [vmem:[#allocation11_spill] sm:$0xff] }
 0x14f   :  { %v1409_v40 = vadd.f32 %v1408_v50, %v2569_v54  ;;  %v1337_v12 = vpop.f32.mrf.mxu0  ;;  %v1410_v27 = vpop.f32.mrf.mxu1 }
 0x150   :  { %v1945_v19 = vpack.c.bf16 %v1492_v18, %v1491_v14  ;;  %v1338_v37 = vadd.f32 %v1337_v12, %v2571_v55  ;;  %v1946_v28 = vpack.c.bf16 %v1494_v52, %v1493_v51  ;;  %v1411_v29 = vadd.f32 %v1410_v27, %v2573_v56  ;;  %v2914_v18 = vld [vmem:[#allocation12_spill] sm:$0xff]  ;;  %v2915_v52 = vld [vmem:[#allocation13_spill] sm:$0xff]  ;;  %v2916_v27 = vld [vmem:[#allocation14_spill] sm:$0xff] }
 0x151   :  { %v1339_v53 = vpop.f32.mrf.mxu0  ;;  %v1499_v38 = vadd.f32 %v2739_v31, %v1336_v26  ;;  %v1412_v54 = vpop.f32.mrf.mxu1  ;;  %v1501_v55 = vadd.f32 %v2742_v32, %v1409_v40 }
 0x152   :  { %1741 = vst [vmem:[%s2883_s5 + $0x30] sm:$0xff] %v1945_v19  ;;  %v1500_v20 = vadd.f32 %v2751_v45, %v1338_v37  ;;  %v1340_v21 = vadd.f32 %v1339_v53, %v2904_v39  ;;  %1742 = vst [vmem:[%s2883_s5 + $0x38] sm:$0xff] %v1946_v28  ;;  %v1502_v56 = vadd.f32 %v2760_v7, %v1411_v29 }
 0x153   :  { %v1413_v58 = vadd.f32 %v1412_v54, %v2905_v41  ;;  %v1341_v15 = vpop.f32.mrf.mxu0  ;;  %v1414_v30 = vpop.f32.mrf.mxu1 }
 0x154   :  { %v1949_v2 = vpack.c.bf16 %v1500_v20, %v1499_v38  ;;  %v1342_v59 = vadd.f32 %v1341_v15, %v2906_v57  ;;  %v1950_v42 = vpack.c.bf16 %v1502_v56, %v1501_v55  ;;  %v1415_v5 = vadd.f32 %v1414_v30, %v2907_v13  ;;  %v2917_v20 = vld [vmem:[#allocation15_spill] sm:$0xff]  ;;  %v2918_v55 = vld [vmem:[#allocation16_spill] sm:$0xff]  ;;  %v2919_v15 = vld [vmem:[#allocation17_spill] sm:$0xff] }
 0x155   :  { %v1345_v22 = vpop.f32.mrf.mxu0  ;;  %v1507_v43 = vadd.f32 %v2739_v31, %v1340_v21  ;;  %v1418_v16 = vpop.f32.mrf.mxu1  ;;  %v1509_v6 = vadd.f32 %v2742_v32, %v1413_v58 }
 0x156   :  { %1745 = vst [vmem:[%s2883_s5 + $0x50] sm:$0xff] %v1949_v2  ;;  %v1508_v9 = vadd.f32 %v2751_v45, %v1342_v59  ;;  %v1346_v10 = vadd.f32 %v1345_v22, %v2908_v44  ;;  %1746 = vst [vmem:[%s2883_s5 + $0x58] sm:$0xff] %v1950_v42  ;;  %v1510_v4 = vadd.f32 %v2760_v7, %v1415_v5  ;;  %v2920_v42 = vld [vmem:[#allocation18_spill] sm:$0xff] }
 0x157   :  { %v1419_v1 = vadd.f32 %v1418_v16, %v2909_v3  ;;  %v1347_v46 = vpop.f32.mrf.mxu0  ;;  %v1420_v33 = vpop.f32.mrf.mxu1 }
 0x158   :  { %v1953_v23 = vpack.c.bf16 %v1508_v9, %v1507_v43  ;;  %v1348_v11 = vadd.f32 %v1347_v46, %v2910_v25  ;;  %v1954_v62 = vpack.c.bf16 %v1510_v4, %v1509_v6  ;;  %v1421_v0 = vadd.f32 %v1420_v33, %v2911_v47  ;;  %v2921_v9 = vld [vmem:[#allocation19_spill] sm:$0xff]  ;;  %v2922_v6 = vld [vmem:[#allocation20_spill] sm:$0xff]  ;;  %v2923_v46 = vld [vmem:[#allocation21_spill] sm:$0xff] }
 0x159   :  { %v1349_v8 = vpop.f32.mrf.mxu0  ;;  %v1515_v48 = vadd.f32 %v2739_v31, %v1346_v10  ;;  %v1422_v61 = vpop.f32.mrf.mxu1  ;;  %v1517_v34 = vadd.f32 %v2742_v32, %v1419_v1 }
 0x15a   :  { %1749 = vst [vmem:[%s2883_s5 + $0x70] sm:$0xff] %v1953_v23  ;;  %v1516_v24 = vadd.f32 %v2751_v45, %v1348_v11  ;;  %v1350_v63 = vadd.f32 %v1349_v8, %v2912_v17  ;;  %1750 = vst [vmem:[%s2883_s5 + $0x78] sm:$0xff] %v1954_v62  ;;  %v1518_v35 = vadd.f32 %v2760_v7, %v1421_v0 }
 0x15b   :  { %v1423_v60 = vadd.f32 %v1422_v61, %v2913_v36  ;;  %v1351_v49 = vpop.f32.mrf.mxu0  ;;  %v1424_v50 = vpop.f32.mrf.mxu1 }
 0x15c   :  { %v1957_v14 = vpack.c.bf16 %v1516_v24, %v1515_v48  ;;  %v1352_v26 = vadd.f32 %v1351_v49, %v2914_v18  ;;  %v1958_v51 = vpack.c.bf16 %v1518_v35, %v1517_v34  ;;  %v1425_v40 = vadd.f32 %v1424_v50, %v2915_v52 }
 0x15d   :  { %v1355_v12 = vpop.f32.mrf.mxu0  ;;  %v1523_v19 = vadd.f32 %v2739_v31, %v1350_v63  ;;  %v1428_v29 = vpop.f32.mrf.mxu1  ;;  %v1525_v53 = vadd.f32 %v2742_v32, %v1423_v60 }
 0x15e   :  { %1753 = vst [vmem:[%s2883_s5 + $0x90] sm:$0xff] %v1957_v14  ;;  %v1524_v37 = vadd.f32 %v2751_v45, %v1352_v26  ;;  %v1356_v28 = vadd.f32 %v1355_v12, %v2916_v27  ;;  %1754 = vst [vmem:[%s2883_s5 + $0x98] sm:$0xff] %v1958_v51  ;;  %v1526_v38 = vadd.f32 %v2760_v7, %v1425_v40 }
 0x15f   :  { %v1429_v39 = vadd.f32 %v1428_v29, %v2917_v20  ;;  %v1357_v21 = vpop.f32.mrf.mxu0  ;;  %v1430_v41 = vpop.f32.mrf.mxu1 }
 0x160   :  { %v1961_v54 = vpack.c.bf16 %v1524_v37, %v1523_v19  ;;  %v1358_v56 = vadd.f32 %v1357_v21, %v2918_v55  ;;  %v1962_v58 = vpack.c.bf16 %v1526_v38, %v1525_v53  ;;  %v1431_v2 = vadd.f32 %v1430_v41, %v2919_v15 }
 0x161   :  { %v1359_v57 = vpop.f32.mrf.mxu0  ;;  %v1531_v59 = vadd.f32 %v2739_v31, %v1356_v28  ;;  %v1432_v5 = vpop.f32.mrf.mxu1  ;;  %v1533_v22 = vadd.f32 %v2742_v32, %v1429_v39 }
 0x162   :  { %1757 = vst [vmem:[%s2883_s5 + $0xb0] sm:$0xff] %v1961_v54  ;;  %v1532_v30 = vadd.f32 %v2751_v45, %v1358_v56  ;;  %v1360_v13 = vadd.f32 %v1359_v57, %v2920_v42  ;;  %1758 = vst [vmem:[%s2883_s5 + $0xb8] sm:$0xff] %v1962_v58  ;;  %v1534_v43 = vadd.f32 %v2760_v7, %v1431_v2 }
 0x163   :  { %v1433_v44 = vadd.f32 %v1432_v5, %v2921_v9  ;;  %v1361_v10 = vpop.f32.mrf.mxu0  ;;  %v1434_v3 = vpop.f32.mrf.mxu1 }
 0x164   :  { %v1965_v16 = vpack.c.bf16 %v1532_v30, %v1531_v59  ;;  %v1362_v4 = vadd.f32 %v1361_v10, %v2922_v6  ;;  %v1966_v1 = vpack.c.bf16 %v1534_v43, %v1533_v22  ;;  %v1435_v23 = vadd.f32 %v1434_v3, %v2923_v46 }
 0x165   :  { %v1539_v25 = vadd.f32 %v2739_v31, %v1360_v13  ;;  %v1541_v33 = vadd.f32 %v2742_v32, %v1433_v44 }
 0x166   :  { %1761 = vst [vmem:[%s2883_s5 + $0xd0] sm:$0xff] %v1965_v16  ;;  %v1540_v11 = vadd.f32 %v2751_v45, %v1362_v4  ;;  %1762 = vst [vmem:[%s2883_s5 + $0xd8] sm:$0xff] %v1966_v1  ;;  %v1542_v62 = vadd.f32 %v2760_v7, %v1435_v23 }
 0x168   :  { %v1969_v47 = vpack.c.bf16 %v1540_v11, %v1539_v25  ;;  %v1970_v0 = vpack.c.bf16 %v1542_v62, %v1541_v33 }
 0x16a   :  { %1765 = vst [vmem:[%s2883_s5 + $0xf0] sm:$0xff] %v1969_v47  ;;  %1766 = vst [vmem:[%s2883_s5 + $0xf8] sm:$0xff] %v1970_v0 }

// kernel: base_encoder_forward.6
= control target key start
LH: loop header
LB: loop body
LE: loop exit
PB: predicated region body
PF: predicated region fallthrough
CT: control target
= control target key end

     0   :  { %v5301_v2 = vmov 0   ;;  %v5299_v37 = vmov 0.0|0.0   ;;  %s5291_s0 = inlined_call_operand.vmem [shape: s32[8,1], index: 0, kind: input, shape index: {}]   ;;  %s5292_s1 = inlined_call_operand.vmem [shape: bf16[8,8,1024], index: 1, kind: input, shape index: {}, may-alias: {1,2}]   ;;  %s5293_s2 = inlined_call_operand.vmem [shape: bf16[8,8,1024], index: 2, kind: input, shape index: {}, may-alias: {1,2}]   ;;  %s5294_s3 = inlined_call_operand.vmem [shape: bf16[2,128,512], index: 3, kind: input, shape index: {}]   ;;  %s5295_s4 = inlined_call_operand.vmem [shape: bf16[8,8,128], index: 4, kind: output, shape index: {0}]   ;;  %s5296_s5 = inlined_call_operand.vmem [shape: bf16[8,8,128], index: 5, kind: output, shape index: {1}]   ;;  %s5297_s6 = inlined_call_operand.vmem [shape: f32[2,8,128], index: 6, kind: output, shape index: {2}]   ;;  %s5298_s7 = inlined_call_operand.vmem [shape: f32[2,8,128], index: 7, kind: output, shape index: {3}]  }
   0x1   :  { %v3424_v0 = vld [vmem:[%s5294_s3 + $0xe4] ss:$16 sps:$4 sm:$0xff]   ;;  %v3429_v1 = vld [vmem:[%s5294_s3 + $0xe0] ss:$16 sps:$4 sm:$0xff]   ;;  %429 = vmatprep.mubr.bf16.mxu0 %v5301_v2  ;;  %470 = vmatprep.mubr.bf16.mxu1 %v5301_v2  ;;  %v3456_v6 = vld [vmem:[%s5294_s3 + $0xec] ss:$16 sps:$4 sm:$0xff]  }
   0x2   :  { %397 = vmatprep.subr.bf16.mxu0 %v3424_v0  ;;  %v3437_v3 = vld [vmem:[%s5294_s3 + $0xc4] ss:$16 sps:$4 sm:$0xff]   ;;  %2885 = vset.pattern.permute.xlu0 %v5301_v2  ;;  %v3444_v4 = vld [vmem:[%s5294_s3 + $0xc0] ss:$16 sps:$4 sm:$0xff]   ;;  %v3461_v7 = vld [vmem:[%s5294_s3 + $0xe8] ss:$16 sps:$4 sm:$0xff]  }
   0x3   :  { %398 = vmatpush1.bf16.msra.mxu0 %v3429_v1  ;;  %2886 = vset.pattern.permute.xlu1 %v5301_v2  ;;  %v3451_v5 = vld [vmem:[%s5294_s3 + $0xa4] ss:$16 sps:$4 sm:$0xff]   ;;  %v3467_v8 = vld [vmem:[%s5294_s3 + $0xa0] ss:$16 sps:$4 sm:$0xff]   ;;  %v3480_v10 = vld [vmem:[%s5294_s3 + $0xcc] ss:$16 sps:$4 sm:$0xff]  }
   0x4   :  { %399 = vmatprep.subr.bf16.mxu0 %v3437_v3  ;;  %438 = vmatprep.subr.bf16.mxu1 %v3456_v6  ;;  %v3474_v9 = vld [vmem:[%s5294_s3 + $0x84] ss:$16 sps:$4 sm:$0xff]   ;;  %v3485_v11 = vld [vmem:[%s5294_s3 + $0xc8] ss:$16 sps:$4 sm:$0xff]   ;;  %v3492_v12 = vld [vmem:[%s5294_s3 + $0x80] ss:$16 sps:$4 sm:$0xff]  }
   0x5   :  { %439 = vmatpush1.bf16.msra.mxu1 %v3461_v7  ;;  %v3497_v13 = vld [vmem:[%s5294_s3 + $0x64] ss:$16 sps:$4 sm:$0xff]   ;;  %v3502_v14 = vld [vmem:[%s5294_s3 + $0xac] ss:$16 sps:$4 sm:$0xff]   ;;  %v3509_v15 = vld [vmem:[%s5294_s3 + $0xa8] ss:$16 sps:$4 sm:$0xff]  }
   0x6   :  { %440 = vmatprep.subr.bf16.mxu1 %v3480_v10  ;;  %v3515_v16 = vld [vmem:[%s5294_s3 + $0x8c] ss:$16 sps:$4 sm:$0xff]   ;;  %v3521_v17 = vld [vmem:[%s5294_s3 + $0x60] ss:$16 sps:$4 sm:$0xff]   ;;  %v3527_v18 = vld [vmem:[%s5294_s3 + $0x44] ss:$16 sps:$4 sm:$0xff]  }
   0x7   :  { %400 = vmatpush1.bf16.msra.mxu0 %v3444_v4  ;;  %v3533_v19 = vld [vmem:[%s5294_s3 + $0x88] ss:$16 sps:$4 sm:$0xff]   ;;  %v3539_v20 = vld [vmem:[%s5294_s3 + $0x6c] ss:$16 sps:$4 sm:$0xff]   ;;  %v3545_v21 = vld [vmem:[%s5294_s3 + $0x40] ss:$16 sps:$4 sm:$0xff]  }
   0x8   :  { %401 = vmatprep.subr.bf16.mxu0 %v3451_v5  ;;  %5384 = vst [vmem:[#allocation4_spill] sm:$0xff] %v3545_v21  ;;  %v3550_v22 = vld [vmem:[%s5294_s3 + $0x24] ss:$16 sps:$4 sm:$0xff]   ;;  %v3557_v23 = vld [vmem:[%s5294_s3 + $0x68] ss:$16 sps:$4 sm:$0xff]  }
   0x9   :  { %441 = vmatpush1.bf16.msra.mxu1 %v3485_v11  ;;  %5385 = vst [vmem:[#allocation5_spill] sm:$0xff] %v3550_v22  ;;  %v3563_v24 = vld [vmem:[%s5294_s3 + $0x4c] ss:$16 sps:$4 sm:$0xff]   ;;  %v3569_v25 = vld [vmem:[%s5294_s3 + $0x20] ss:$16 sps:$4 sm:$0xff]  }
   0xa   :  { %442 = vmatprep.subr.bf16.mxu1 %v3502_v14  ;;  %5386 = vst [vmem:[#allocation6_spill] sm:$0xff] %v3569_v25  ;;  %v3575_v26 = vld [vmem:[%s5294_s3 + $0x4] ss:$16 sps:$4 sm:$0xff]   ;;  %v3581_v27 = vld [vmem:[%s5294_s3 + $0x48] ss:$16 sps:$4 sm:$0xff]  }
   0xb   :  { %402 = vmatpush1.bf16.msra.mxu0 %v3467_v8  ;;  %5387 = vst [vmem:[#allocation7_spill] sm:$0xff] %v3575_v26  ;;  %5388 = vst [vmem:[#allocation8_spill] sm:$0xff] %v3581_v27  ;;  %v3587_v28 = vld [vmem:[%s5294_s3 + $0x2c] ss:$16 sps:$4 sm:$0xff]   ;;  %v3593_v29 = vld [vmem:[%s5294_s3] ss:$16 sps:$4 sm:$0xff]  }
   0xc   :  { %403 = vmatprep.subr.bf16.mxu0 %v3474_v9  ;;  %5389 = vst [vmem:[#allocation9_spill] sm:$0xff] %v3587_v28  ;;  %5390 = vst [vmem:[#allocation10_spill] sm:$0xff] %v3593_v29  ;;  %v3598_v30 = vld [vmem:[%s5294_s3 + $0x1e4] ss:$16 sps:$4 sm:$0xff]   ;;  %v3605_v31 = vld [vmem:[%s5294_s3 + $0x28] ss:$16 sps:$4 sm:$0xff]  }
   0xd   :  { %443 = vmatpush1.bf16.msra.mxu1 %v3509_v15  ;;  %5391 = vst [vmem:[#allocation11_spill] sm:$0xff] %v3598_v30  ;;  %5392 = vst [vmem:[#allocation12_spill] sm:$0xff] %v3605_v31  ;;  %v3611_v32 = vld [vmem:[%s5294_s3 + $0xc] ss:$16 sps:$4 sm:$0xff]   ;;  %v3617_v33 = vld [vmem:[%s5294_s3 + $0x1e0] ss:$16 sps:$4 sm:$0xff]  }
   0xe   :  { %444 = vmatprep.subr.bf16.mxu1 %v3515_v16  ;;  %5393 = vst [vmem:[#allocation13_spill] sm:$0xff] %v3611_v32  ;;  %v3623_v34 = vld [vmem:[%s5294_s3 + $0x1c4] ss:$16 sps:$4 sm:$0xff]   ;;  %v3629_v35 = vld [vmem:[%s5294_s3 + $0x8] ss:$16 sps:$4 sm:$0xff]  }
   0xf   :  { %404 = vmatpush1.bf16.msra.mxu0 %v3492_v12  ;;  %5394 = vst [vmem:[#allocation14_spill] sm:$0xff] %v3629_v35  ;;  %v3635_v36 = vld [vmem:[%s5294_s3 + $0x1ec] ss:$16 sps:$4 sm:$0xff]   ;;  %v3642_v38 = vld [vmem:[%s5294_s3 + $0x1c0] ss:$16 sps:$4 sm:$0xff]  }
  0x10   :  { %405 = vmatprep.subr.bf16.mxu0 %v3497_v13  ;;  %5395 = vst [vmem:[#allocation15_spill] sm:$0xff] %v3635_v36  ;;  %v3647_v39 = vld [vmem:[%s5294_s3 + $0x1a4] ss:$16 sps:$4 sm:$0xff]   ;;  %v3655_v40 = vld [vmem:[%s5294_s3 + $0x1e8] ss:$16 sps:$4 sm:$0xff]  }
  0x11   :  { %445 = vmatpush1.bf16.msra.mxu1 %v3533_v19  ;;  %v3661_v41 = vld [vmem:[%s5294_s3 + $0x1cc] ss:$16 sps:$4 sm:$0xff]   ;;  %v3667_v42 = vld [vmem:[%s5294_s3 + $0x1a0] ss:$16 sps:$4 sm:$0xff]   ;;  %v3672_v43 = vld [vmem:[%s5294_s3 + $0x184] ss:$16 sps:$4 sm:$0xff]  }
  0x12   :  { %446 = vmatprep.subr.bf16.mxu1 %v3539_v20  ;;  %v3680_v44 = vld [vmem:[%s5294_s3 + $0x1c8] ss:$16 sps:$4 sm:$0xff]   ;;  %v3686_v45 = vld [vmem:[%s5294_s3 + $0x1ac] ss:$16 sps:$4 sm:$0xff]   ;;  %v3692_v46 = vld [vmem:[%s5291_s0] sm:$0xff] }
  0x13   :  { %406 = vmatpush1.bf16.msra.mxu0 %v3521_v17  ;;  %v3698_v47 = vld [vmem:[%s5294_s3 + $0x180] ss:$16 sps:$4 sm:$0xff]   ;;  %vm226_vm0 = vcmp.gt.s32.totalorder %v3692_v46, 0  ;;  %vm229_vm1 = vcmp.gt.s32.totalorder %v3692_v46, 7  ;;  %v3706_v48 = vld [vmem:[%s5294_s3 + $0x164] ss:$16 sps:$4 sm:$0xff]  }
  0x14   :  { %407 = vmatprep.subr.bf16.mxu0 %v3527_v18  ;;  %v3712_v49 = vld [vmem:[%s5294_s3 + $0x1a8] ss:$16 sps:$4 sm:$0xff]   ;;  %v3715_v50 = vsel %vm226_vm0, 1, %v5301_v2  ;;  %v3721_v51 = vld [vmem:[%s5294_s3 + $0x18c] ss:$16 sps:$4 sm:$0xff]   ;;  %v793_v52 = vsel %vm229_vm1, 1, %v5301_v2 }
  0x15   :  { %447 = vmatpush1.bf16.msra.mxu1 %v3557_v23  ;;  %509 = vperm.xlu0 %2885, %v3715_v50   ;;  %v3729_v53 = vld [vmem:[%s5294_s3 + $0x160] ss:$16 sps:$4 sm:$0xff]   ;;  %vm1072_vm2 = vcmp.gt.s32.totalorder %v3692_v46, 2  ;;  %v3736_v54 = vld [vmem:[%s5294_s3 + $0x144] ss:$16 sps:$4 sm:$0xff]   ;;  %vm1336_vm3 = vcmp.gt.s32.totalorder %v3692_v46, 3 }
  0x16   :  { %448 = vmatprep.subr.bf16.mxu1 %v3563_v24  ;;  %5396 = vst [vmem:[#allocation16_spill] sm:$0xff] %v3729_v53  ;;  %5397 = vst [vmem:[#allocation17_spill] sm:$0xff] %v3736_v54  ;;  %v3742_v55 = vld [vmem:[%s5294_s3 + $0x188] ss:$16 sps:$4 sm:$0xff]   ;;  %v3748_v56 = vld [vmem:[%s5294_s3 + $0x16c] ss:$16 sps:$4 sm:$0xff]  }
  0x17   :  { %408 = vmatpush1.bf16.msra.mxu0 %v3545_v21  ;;  %v3751_v57 = vsel %vm1072_vm2, 1, %v5301_v2  ;;  %v3757_v58 = vld [vmem:[%s5294_s3 + $0x140] ss:$16 sps:$4 sm:$0xff]   ;;  %v3764_v59 = vld [vmem:[%s5294_s3 + $0x124] ss:$16 sps:$4 sm:$0xff]   ;;  %v3780_v62 = vsel %vm1336_vm3, 1, %v5301_v2 }
  0x18   :  { %409 = vmatprep.subr.bf16.mxu0 %v3550_v22  ;;  %5398 = vst [vmem:[#allocation18_spill] sm:$0xff] %v3757_v58  ;;  %5399 = vst [vmem:[#allocation19_spill] sm:$0xff] %v3764_v59  ;;  %v3770_v60 = vld [vmem:[%s5294_s3 + $0x168] ss:$16 sps:$4 sm:$0xff]   ;;  %v3776_v61 = vld [vmem:[%s5294_s3 + $0x14c] ss:$16 sps:$4 sm:$0xff]  }
  0x19   :  { %449 = vmatpush1.bf16.msra.mxu1 %v3581_v27  ;;  %795 = vperm.xlu0 %2885, %v793_v52   ;;  %5400 = vst [vmem:[#allocation20_spill] sm:$0xff] %v3770_v60  ;;  %5401 = vst [vmem:[#allocation21_spill] sm:$0xff] %v3776_v61  ;;  %v3786_v63 = vld [vmem:[%s5294_s3 + $0x120] ss:$16 sps:$4 sm:$0xff]   ;;  %vm1339_vm4 = vcmp.gt.s32.totalorder %v3692_v46, 4  ;;  %vm1075_vm5 = vcmp.gt.s32.totalorder %v3692_v46, 5 }
  0x1a   :  { %450 = vmatprep.subr.bf16.mxu1 %v3587_v28  ;;  %5402 = vst [vmem:[#allocation22_spill] sm:$0xff] %v3786_v63  ;;  %vm811_vm6 = vcmp.gt.s32.totalorder %v3692_v46, 6  ;;  %vm808_vm7 = vcmp.gt.s32.totalorder %v3692_v46, 1 }
  0x1b   :  { %410 = vmatpush1.bf16.msra.mxu0 %v3569_v25 }
  0x1c   :  { %411 = vmatprep.subr.bf16.mxu0 %v3575_v26 }
  0x1d   :  { %451 = vmatpush1.bf16.msra.mxu1 %v3605_v31  ;;  %1196 = vperm.xlu0 %2885, %v3751_v57  }
  0x1e   :  { %452 = vmatprep.subr.bf16.mxu1 %v3611_v32 }
  0x1f   :  { %412 = vmatpush1.bf16.msra.mxu0 %v3593_v29 }
  0x20   :  { %683 = vmatprep.subr.bf16.mxu0 %v3598_v30 }
  0x21   :  { %453 = vmatpush1.bf16.msra.mxu1 %v3629_v35  ;;  %1460 = vperm.xlu0 %2885, %v3780_v62  }
  0x22   :  { %430 = vmatmul.mubr.bf16.vlgmr.msra.gmra.mxu0 %v5299_v37  ;;  %724 = vmatprep.subr.bf16.mxu1 %v3635_v36 }
  0x23   :  { %684 = vmatpush1.bf16.msra.mxu0 %v3617_v33  ;;  %715 = vmatprep.mubr.bf16.mxu0 %v5301_v2 }
  0x24   :  { %685 = vmatprep.subr.bf16.mxu0 %v3623_v34  ;;  %471 = vmatmul.mubr.bf16.vlgmr.msra.gmra.mxu1 %v5299_v37  ;;  %v3793_v37 = vld [vmem:[%s5294_s3 + $0x104] ss:$16 sps:$4 sm:$0xff]  }
  0x25   :  { %725 = vmatpush1.bf16.msra.mxu1 %v3655_v40  ;;  %756 = vmatprep.mubr.bf16.mxu1 %v5301_v2  ;;  %5403 = vst [vmem:[#allocation23_spill] sm:$0xff] %v3793_v37  ;;  %v3799_v2 = vld [vmem:[%s5294_s3 + $0x148] ss:$16 sps:$4 sm:$0xff]  }
  0x26   :  { %726 = vmatprep.subr.bf16.mxu1 %v3661_v41  ;;  %5404 = vst [vmem:[#allocation24_spill] sm:$0xff] %v3799_v2 }
  0x27   :  { %686 = vmatpush1.bf16.msra.mxu0 %v3642_v38 }
  0x28   :  { %687 = vmatprep.subr.bf16.mxu0 %v3647_v39 }
  0x29   :  { %727 = vmatpush1.bf16.msra.mxu1 %v3680_v44 }
  0x2a   :  { %728 = vmatprep.subr.bf16.mxu1 %v3686_v45 }
  0x2b   :  { %688 = vmatpush1.bf16.msra.mxu0 %v3667_v42 }
  0x2c   :  { %689 = vmatprep.subr.bf16.mxu0 %v3672_v43 }
  0x2d   :  { %729 = vmatpush1.bf16.msra.mxu1 %v3712_v49 }
  0x2e   :  { %730 = vmatprep.subr.bf16.mxu1 %v3721_v51 }
  0x2f   :  { %690 = vmatpush1.bf16.msra.mxu0 %v3698_v47 }
  0x30   :  { %691 = vmatprep.subr.bf16.mxu0 %v3706_v48 }
  0x31   :  { %731 = vmatpush1.bf16.msra.mxu1 %v3742_v55 }
  0x32   :  { %732 = vmatprep.subr.bf16.mxu1 %v3748_v56 }
  0x33   :  { %692 = vmatpush1.bf16.msra.mxu0 %v3729_v53 }
  0x34   :  { %693 = vmatprep.subr.bf16.mxu0 %v3736_v54 }
  0x35   :  { %733 = vmatpush1.bf16.msra.mxu1 %v3770_v60  ;;  %v3815_v60 = vld [vmem:[%s5294_s3 + $0x100] ss:$16 sps:$4 sm:$0xff]  }
  0x36   :  { %734 = vmatprep.subr.bf16.mxu1 %v3776_v61  ;;  %v3823_v61 = vld [vmem:[%s5294_s3 + $0x128] ss:$16 sps:$4 sm:$0xff]  }
  0x37   :  { %694 = vmatpush1.bf16.msra.mxu0 %v3757_v58  ;;  %v3805_v58 = vld [vmem:[%s5294_s3 + $0x12c] ss:$16 sps:$4 sm:$0xff]  }
  0x38   :  { %695 = vmatprep.subr.bf16.mxu0 %v3764_v59  ;;  %5405 = vst [vmem:[#allocation25_spill] sm:$0xff] %v3805_v58  ;;  %v5406_v59 = vmov 0  }
  0x39   :  { %v3809_v54 = vsel %vm1339_vm4, 1, %v5406_v59  ;;  %735 = vmatpush1.bf16.msra.mxu1 %v3799_v2  ;;  %v1320_v53 = vsel %vm1075_vm5, 1, %v5406_v59  ;;  %v1056_v2 = vsel %vm811_vm6, 1, %v5406_v59 }
  0x3a   :  { %736 = vmatprep.subr.bf16.mxu1 %v3805_v58  ;;  %1724 = vperm.xlu0 %2885, %v3809_v54   ;;  %v5407_v58 = vmov 0.0|0.0  }
  0x3b   :  { %696 = vmatpush1.bf16.msra.mxu0 %v3786_v63  ;;  %v3829_v63 = vld [vmem:[%s5294_s3 + $0x10c] ss:$16 sps:$4 sm:$0xff]  }
  0x3c   :  { %697 = vmatprep.subr.bf16.mxu0 %v3793_v37  ;;  %v3839_v37 = vld [vmem:[%s5294_s3 + $0x108] ss:$16 sps:$4 sm:$0xff]  }
  0x3d   :  { %737 = vmatpush1.bf16.msra.mxu1 %v3823_v61 }
  0x3e   :  { %738 = vmatprep.subr.bf16.mxu1 %v3829_v63  ;;  %1988 = vperm.xlu0 %2885, %v1320_v53  }
  0x3f   :  { %698 = vmatpush1.bf16.msra.mxu0 %v3815_v60 }
  0x40   :  { %820 = vmatprep.subr.bf16.mxu0 %v3424_v0 }
  0x41   :  { %739 = vmatpush1.bf16.msra.mxu1 %v3839_v37 }
  0x42   :  { %716 = vmatmul.mubr.bf16.vlgmr.msra.gmra.mxu0 %v5407_v58  ;;  %2252 = vperm.xlu0 %2885, %v1056_v2  }
  0x43   :  { %821 = vmatpush1.bf16.msra.mxu0 %v3429_v1  ;;  %852 = vmatprep.mubr.bf16.mxu0 %v5406_v59 }
  0x44   :  { %822 = vmatprep.subr.bf16.mxu0 %v3437_v3  ;;  %861 = vmatprep.subr.bf16.mxu1 %v3456_v6 }
  0x45   :  { %757 = vmatmul.mubr.bf16.vlgmr.msra.gmra.mxu1 %v5407_v58  ;;  %v29_v58 = vld [vmem:[%s5292_s1] sm:$0xff] }
  0x46   :  { %862 = vmatpush1.bf16.msra.mxu1 %v3461_v7  ;;  %2515 = vperm.xlu0 %2885, %v793_v52   ;;  %v930_v52 = vsel %vm808_vm7, 1, %v5406_v59  ;;  %v233_v46 = vunpack.c.h.bf16 %v29_v58 }
  0x47   :  { %823 = vmatpush1.bf16.msra.mxu0 %v3444_v4  ;;  %863 = vmatprep.subr.bf16.mxu1 %v3480_v10 }
  0x48   :  { %824 = vmatprep.subr.bf16.mxu0 %v3451_v5  ;;  %893 = vmatprep.mubr.bf16.mxu1 %v5406_v59 }
  0x49   :  { %932 = vperm.xlu1 %2886, %v930_v52  }
  0x4a   :  { %864 = vmatpush1.bf16.msra.mxu1 %v3485_v11 }
  0x4b   :  { %825 = vmatpush1.bf16.msra.mxu0 %v3467_v8  ;;  %865 = vmatprep.subr.bf16.mxu1 %v3502_v14 }
  0x4c   :  { %826 = vmatprep.subr.bf16.mxu0 %v3474_v9 }
  0x4d   :  { %1058 = vperm.xlu1 %2886, %v1056_v2  }
  0x4e   :  { %866 = vmatpush1.bf16.msra.mxu1 %v3509_v15 }
  0x4f   :  { %827 = vmatpush1.bf16.msra.mxu0 %v3492_v12  ;;  %867 = vmatprep.subr.bf16.mxu1 %v3515_v16 }
  0x50   :  { %828 = vmatprep.subr.bf16.mxu0 %v3497_v13 }
  0x51   :  { %1322 = vperm.xlu1 %2886, %v1320_v53  }
  0x52   :  { %868 = vmatpush1.bf16.msra.mxu1 %v3533_v19 }
  0x53   :  { %829 = vmatpush1.bf16.msra.mxu0 %v3521_v17  ;;  %869 = vmatprep.subr.bf16.mxu1 %v3539_v20 }
  0x54   :  { %830 = vmatprep.subr.bf16.mxu0 %v3527_v18 }
  0x55   :  { %1586 = vperm.xlu1 %2886, %v3809_v54   ;;  %v31_v54 = vld [vmem:[%s5292_s1 + $0x8] sm:$0xff] }
  0x56   :  { %870 = vmatpush1.bf16.msra.mxu1 %v3557_v23 }
  0x57   :  { %831 = vmatpush1.bf16.msra.mxu0 %v3545_v21  ;;  %871 = vmatprep.subr.bf16.mxu1 %v3563_v24 }
  0x58   :  { %832 = vmatprep.subr.bf16.mxu0 %v3550_v22 }
  0x59   :  { %1850 = vperm.xlu1 %2886, %v3780_v62  }
  0x5a   :  { %872 = vmatpush1.bf16.msra.mxu1 %v3581_v27 }
  0x5b   :  { %833 = vmatpush1.bf16.msra.mxu0 %v3569_v25  ;;  %873 = vmatprep.subr.bf16.mxu1 %v3587_v28 }
  0x5c   :  { %834 = vmatprep.subr.bf16.mxu0 %v3575_v26  ;;  %v234_v26 = vunpack.c.l.bf16 %v31_v54 }
  0x5d   :  { %2114 = vperm.xlu1 %2886, %v3751_v57  }
  0x5e   :  { %874 = vmatpush1.bf16.msra.mxu1 %v3605_v31 }
  0x5f   :  { %835 = vmatpush1.bf16.msra.mxu0 %v3593_v29  ;;  %875 = vmatprep.subr.bf16.mxu1 %v3611_v32 }
  0x60   :  { %946 = vmatprep.subr.bf16.mxu0 %v3598_v30 }
  0x61   :  { %2378 = vperm.xlu1 %2886, %v930_v52  }
  0x62   :  { %876 = vmatpush1.bf16.msra.mxu1 %v3629_v35 }
  0x63   :  { %987 = vmatprep.subr.bf16.mxu1 %v3635_v36  ;;  %v232_v36 = vunpack.c.l.bf16 %v29_v58  ;;  %v235_v58 = vunpack.c.h.bf16 %v31_v54 }
  0x65   :  { %2640 = vperm.xlu1 %2886, %v3715_v50  }
  0xe2   :  { %v431_v30 = vpop.f32.mrf.mxu0 }
  0xe3   :  { %v479_v35 = vadd.f32 %v431_v30, %v232_v36 }
  0xe4   :  { %v433_v29 = vpop.f32.mrf.mxu0  ;;  %v472_v52 = vpop.f32.mrf.mxu1 }
  0xe5   :  { %v2787_v2 = vmul.f32 -1.442695, %v479_v35  ;;  %v480_v53 = vadd.f32 %v433_v29, %v233_v46  ;;  %v481_v25 = vadd.f32 %v472_v52, %v234_v26 }
  0xe6   :  { %v435_v62 = vpop.f32.mrf.mxu0  ;;  %v474_v31 = vpop.f32.mrf.mxu1 }
  0xe7   :  { %2983 = vpow2.f32 %v2787_v2  ;;  %v2788_v57 = vmul.f32 -1.442695, %v480_v53  ;;  %v2789_v30 = vmul.f32 -1.442695, %v481_v25  ;;  %v482_v36 = vadd.f32 %v474_v31, %v235_v58 }
  0xe8   :  { %v436_v32 = vpop.f32.mrf.mxu0  ;;  %v476_v50 = vpop.f32.mrf.mxu1 }
  0xe9   :  { %2985 = vpow2.f32 %v2788_v57  ;;  %v2719_v32 = vld [vmem:[%s5293_s2 + $0xf0] sm:$0xff] }
  0xea   :  { %v477_v28 = vpop.f32.mrf.mxu1  ;;  %2987 = vpow2.f32 %v2789_v30  ;;  %v518_v2 = vunpack.c.l.bf16 %v2719_v32  ;;  %v519_v57 = vunpack.c.h.bf16 %v2719_v32 }
  0xeb   :  { %2989 = vtanh.f32 %v482_v36 }
  0xf4   :  { %v2984_v35 = vpop.eup %2983 }
  0xf5   :  { %v492_v29 = vadd.f32 1.0, %v2984_v35 }
  0xf6   :  { %v2986_v46 = vpop.eup %2985 }
  0xf7   :  { %2991 = vrcp.f32 %v492_v29  ;;  %v493_v62 = vadd.f32 1.0, %v2986_v46  ;;  %v2988_v53 = vpop.eup %2987  ;;  %v2720_v29 = vld [vmem:[%s5293_s2 + $0xf8] sm:$0xff]  ;;  %v510_v46 = vpop.permute.xlu0 %509 }
  0xf8   :  { %v2990_v26 = vpop.eup %2989  ;;  %v494_v31 = vadd.f32 1.0, %v2988_v53  ;;  %vm511_vm8 = vcmp.eq.s32.totalorder %v510_v46, 1  ;;  %v520_v53 = vunpack.c.l.bf16 %v2720_v29 }
  0xf9   :  { %2993 = vrcp.f32 %v493_v62  ;;  %vm3367_vm9 = vmpackc.low %vm511_vm8, %vm511_vm8 }
 0x102   :  { %v717_v54 = vpop.f32.mrf.mxu0 }
 0x103   :  { %v765_v28 = vadd.f32 %v717_v54, %v518_v2 }
 0x104   :  { %v2992_v25 = vpop.eup %2991  ;;  %v719_v52 = vpop.f32.mrf.mxu0 }
 0x105   :  { %v503_v50 = vmul.f32 %v2992_v25, %v2990_v26  ;;  %v2822_v58 = vmul.f32 -1.442695, %v765_v28  ;;  %v766_v30 = vadd.f32 %v719_v52, %v519_v57  ;;  %v758_v32 = vpop.f32.mrf.mxu1 }
 0x106   :  { %v2994_v36 = vpop.eup %2993  ;;  %v721_v35 = vpop.f32.mrf.mxu0  ;;  %v767_v25 = vadd.f32 %v758_v32, %v520_v53 }
 0x107   :  { %v502_v62 = vmul.f32 0.0, %v2994_v36  ;;  %2995 = vpow2.f32 %v2822_v58  ;;  %v2823_v22 = vmul.f32 -1.442695, %v766_v30  ;;  %v760_v26 = vpop.f32.mrf.mxu1  ;;  %v521_v35 = vunpack.c.h.bf16 %v2720_v29 }
 0x108   :  { %2997 = vrcp.f32 %v494_v31  ;;  %v722_v2 = vpop.f32.mrf.mxu0  ;;  %v2824_v27 = vmul.f32 -1.442695, %v767_v25  ;;  %v796_v25 = vpop.permute.xlu0 %795 }
 0x109   :  { %v504_v54 = vadd.f32 %v503_v50, %v502_v62  ;;  %2999 = vpow2.f32 %v2823_v22  ;;  %v762_v28 = vpop.f32.mrf.mxu1  ;;  %v768_v36 = vadd.f32 %v760_v26, %v521_v35  ;;  %vm797_vm10 = vcmp.eq.s32.totalorder %v796_v25, 1 }
 0x10a   :  { %vm3373_vm11 = vmpackc.low %vm797_vm10, %vm797_vm10 }
 0x10b   :  { %3001 = vtanh.f32 %v504_v54  ;;  %v3901_v57 = vsel %vm511_vm8, %v504_v54, 0.0  ;;  %v763_v52 = vpop.f32.mrf.mxu1 }
 0x10c   :  { %3003 = vpow2.f32 %v2824_v27 }
 0x10d   :  { %3005 = vtanh.f32 %v768_v36  ;;  %v5408_v36 = vld [vmem:[#allocation16_spill] sm:$0xff] }
 0x114   :  { %v2996_v58 = vpop.eup %2995 }
 0x115   :  { %v2998_v30 = vpop.eup %2997  ;;  %v778_v21 = vadd.f32 1.0, %v2996_v58  ;;  %v5409_v58 = vld [vmem:[#allocation20_spill] sm:$0xff] }
 0x116   :  { %v3000_v31 = vpop.eup %2999 }
 0x117   :  { %3007 = vrcp.f32 %v778_v21  ;;  %v779_v22 = vadd.f32 1.0, %v3000_v31  ;;  %v5411_v31 = vld [vmem:[#allocation21_spill] sm:$0xff] }
 0x118   :  { %v3002_v50 = vpop.eup %3001 }
 0x119   :  { %v506_v62 = vmul.f32 %v3002_v50, %v2998_v30  ;;  %3009 = vrcp.f32 %v779_v22  ;;  %v3004_v21 = vpop.eup %3003  ;;  %v5410_v30 = vld [vmem:[#allocation17_spill] sm:$0xff]  ;;  %v5412_v22 = vld [vmem:[#allocation18_spill] sm:$0xff]  ;;  %v5413_v50 = vld [vmem:[#allocation24_spill] sm:$0xff] }
 0x11a   :  { %v3006_v29 = vpop.eup %3005  ;;  %v780_v53 = vadd.f32 1.0, %v3004_v21  ;;  %v5416_v21 = vld [vmem:[#allocation22_spill] sm:$0xff] }
 0x11b   :  { %v3904_v2 = vsel %vm511_vm8, %v506_v62, 0.0  ;;  %v3368_v27 = vpack.c.bf16 %v506_v62, %v506_v62  ;;  %v5414_v62 = vld [vmem:[#allocation19_spill] sm:$0xff] }
 0x11c   :  { %v801_v32 = vpack.c.bf16 %v3904_v2, %v3904_v2  ;;  %3011 = vrcp.f32 %v780_v53 }
 0x11d   :  { %3369 = vmatmul.mubr.msk.bf16.vlgmr.msra.gmra.mxu0 %vm3367_vm9, %v3368_v27  ;;  %3372 = vmatmul.mubr.msk.bf16.vlgmr.msra.gmra.mxu1 %vm3367_vm9, %v3368_v27 }
 0x11e   :  { %802 = vst [vmem:[%s5295_s4] sm:$0xf] %v801_v32  ;;  %947 = vmatpush1.bf16.msra.mxu0 %v3617_v33  ;;  %988 = vmatpush1.bf16.msra.mxu1 %v3655_v40  ;;  %v5415_v32 = vld [vmem:[#allocation25_spill] sm:$0xff] }
 0x11f   :  { %948 = vmatprep.subr.bf16.mxu0 %v3623_v34  ;;  %989 = vmatprep.subr.bf16.mxu1 %v3661_v41 }
 0x120   :  { %978 = vmatprep.mubr.bf16.mxu0 %v5406_v59  ;;  %1019 = vmatprep.mubr.bf16.mxu1 %v5406_v59 }
 0x122   :  { %949 = vmatpush1.bf16.msra.mxu0 %v3642_v38  ;;  %990 = vmatpush1.bf16.msra.mxu1 %v3680_v44 }
 0x123   :  { %950 = vmatprep.subr.bf16.mxu0 %v3647_v39  ;;  %991 = vmatprep.subr.bf16.mxu1 %v3686_v45 }
 0x124   :  { %v3008_v46 = vpop.eup %3007 }
 0x125   :  { %v789_v28 = vmul.f32 %v3008_v46, %v3006_v29  ;;  %v5417_v46 = vld [vmem:[#allocation23_spill] sm:$0xff] }
 0x126   :  { %v3010_v54 = vpop.eup %3009  ;;  %951 = vmatpush1.bf16.msra.mxu0 %v3667_v42  ;;  %992 = vmatpush1.bf16.msra.mxu1 %v3712_v49 }
 0x127   :  { %v788_v26 = vmul.f32 0.0, %v3010_v54  ;;  %952 = vmatprep.subr.bf16.mxu0 %v3672_v43  ;;  %993 = vmatprep.subr.bf16.mxu1 %v3721_v51 }
 0x129   :  { %v790_v52 = vadd.f32 %v789_v28, %v788_v26  ;;  %v3012_v27 = vpop.eup %3011 }
 0x12a   :  { %953 = vmatpush1.bf16.msra.mxu0 %v3698_v47  ;;  %994 = vmatpush1.bf16.msra.mxu1 %v3742_v55 }
 0x12b   :  { %3013 = vtanh.f32 %v790_v52  ;;  %v3930_v35 = vsel %vm797_vm10, %v790_v52, 0.0  ;;  %954 = vmatprep.subr.bf16.mxu0 %v3706_v48  ;;  %995 = vmatprep.subr.bf16.mxu1 %v3748_v56 }
 0x12e   :  { %955 = vmatpush1.bf16.msra.mxu0 %v5408_v36  ;;  %996 = vmatpush1.bf16.msra.mxu1 %v5409_v58 }
 0x12f   :  { %956 = vmatprep.subr.bf16.mxu0 %v5410_v30  ;;  %997 = vmatprep.subr.bf16.mxu1 %v5411_v31 }
 0x132   :  { %957 = vmatpush1.bf16.msra.mxu0 %v5412_v22  ;;  %998 = vmatpush1.bf16.msra.mxu1 %v5413_v50 }
 0x133   :  { %958 = vmatprep.subr.bf16.mxu0 %v5414_v62  ;;  %999 = vmatprep.subr.bf16.mxu1 %v5415_v32 }
 0x136   :  { %959 = vmatpush1.bf16.msra.mxu0 %v5416_v21  ;;  %1000 = vmatpush1.bf16.msra.mxu1 %v3823_v61 }
 0x137   :  { %960 = vmatprep.subr.bf16.mxu0 %v5417_v46  ;;  %1001 = vmatprep.subr.bf16.mxu1 %v3829_v63 }
 0x138   :  { %v3014_v29 = vpop.eup %3013 }
 0x139   :  { %v792_v54 = vmul.f32 %v3014_v29, %v3012_v27  ;;  %v35_v27 = vld [vmem:[%s5292_s1 + $0x28] sm:$0xff] }
 0x13a   :  { %961 = vmatpush1.bf16.msra.mxu0 %v3815_v60  ;;  %1002 = vmatpush1.bf16.msra.mxu1 %v3839_v37 }
 0x13b   :  { %v3949_v53 = vsel %vm797_vm10, %v792_v54, 0.0  ;;  %1084 = vmatprep.subr.bf16.mxu0 %v3424_v0  ;;  %1125 = vmatprep.subr.bf16.mxu1 %v3456_v6  ;;  %v3374_v28 = vpack.c.bf16 %v792_v54, %v792_v54  ;;  %v5418_v0 = vld [vmem:[#allocation4_spill] sm:$0xff] }
 0x13c   :  { %v803_v26 = vpack.c.bf16 %v3949_v53, %v3949_v53  ;;  %v5423_v6 = vld [vmem:[#allocation12_spill] sm:$0xff] }
 0x13d   :  { %3375 = vmatmul.mubr.msk.bf16.vlgmr.msra.gmra.mxu0 %vm3373_vm11, %v3374_v28  ;;  %3378 = vmatmul.mubr.msk.bf16.vlgmr.msra.gmra.mxu1 %vm3373_vm11, %v3374_v28  ;;  %v817_v28 = vunpack.c.l.bf16 %v35_v27 }
 0x13e   :  { %2825 = vst [vmem:[%s5296_s5 + $0x1c] sm:$0xf] %v803_v26  ;;  %1085 = vmatpush1.bf16.msra.mxu0 %v3429_v1  ;;  %1126 = vmatpush1.bf16.msra.mxu1 %v3461_v7  ;;  %v5419_v1 = vld [vmem:[#allocation8_spill] sm:$0xff]  ;;  %v5424_v7 = vld [vmem:[#allocation7_spill] sm:$0xff] }
 0x13f   :  { %1086 = vmatprep.subr.bf16.mxu0 %v3437_v3  ;;  %1127 = vmatprep.subr.bf16.mxu1 %v3480_v10  ;;  %v5420_v3 = vld [vmem:[#allocation5_spill] sm:$0xff]  ;;  %v5427_v10 = vld [vmem:[#allocation14_spill] sm:$0xff] }
 0x140   :  { %1116 = vmatprep.mubr.bf16.mxu0 %v5406_v59  ;;  %1157 = vmatprep.mubr.bf16.mxu1 %v5406_v59 }
 0x142   :  { %1087 = vmatpush1.bf16.msra.mxu0 %v3444_v4  ;;  %1128 = vmatpush1.bf16.msra.mxu1 %v3485_v11  ;;  %v5421_v4 = vld [vmem:[#allocation9_spill] sm:$0xff]  ;;  %v5428_v11 = vld [vmem:[#allocation11_spill] sm:$0xff] }
 0x143   :  { %1088 = vmatprep.subr.bf16.mxu0 %v3451_v5  ;;  %1129 = vmatprep.subr.bf16.mxu1 %v3502_v14  ;;  %v5422_v5 = vld [vmem:[#allocation6_spill] sm:$0xff] }
 0x146   :  { %1089 = vmatpush1.bf16.msra.mxu0 %v3467_v8  ;;  %1130 = vmatpush1.bf16.msra.mxu1 %v3509_v15  ;;  %v5425_v8 = vld [vmem:[#allocation13_spill] sm:$0xff] }
 0x147   :  { %1090 = vmatprep.subr.bf16.mxu0 %v3474_v9  ;;  %1131 = vmatprep.subr.bf16.mxu1 %v3515_v16  ;;  %v5426_v9 = vld [vmem:[#allocation10_spill] sm:$0xff] }
 0x14a   :  { %1091 = vmatpush1.bf16.msra.mxu0 %v3492_v12  ;;  %1132 = vmatpush1.bf16.msra.mxu1 %v3533_v19  ;;  %v5429_v12 = vld [vmem:[#allocation15_spill] sm:$0xff] }
 0x14b   :  { %1092 = vmatprep.subr.bf16.mxu0 %v3497_v13  ;;  %1133 = vmatprep.subr.bf16.mxu1 %v3539_v20  ;;  %v33_v13 = vld [vmem:[%s5292_s1 + $0x20] sm:$0xff] }
 0x14c   :  { %v815_v14 = vunpack.c.l.bf16 %v33_v13  ;;  %v816_v15 = vunpack.c.h.bf16 %v33_v13 }
 0x14e   :  { %1093 = vmatpush1.bf16.msra.mxu0 %v3521_v17  ;;  %1134 = vmatpush1.bf16.msra.mxu1 %v3557_v23 }
 0x14f   :  { %1094 = vmatprep.subr.bf16.mxu0 %v3527_v18  ;;  %1135 = vmatprep.subr.bf16.mxu1 %v3563_v24 }
 0x152   :  { %1095 = vmatpush1.bf16.msra.mxu0 %v5418_v0  ;;  %1136 = vmatpush1.bf16.msra.mxu1 %v5419_v1  ;;  %v818_v1 = vunpack.c.h.bf16 %v35_v27 }
 0x153   :  { %1096 = vmatprep.subr.bf16.mxu0 %v5420_v3  ;;  %1137 = vmatprep.subr.bf16.mxu1 %v5421_v4 }
 0x156   :  { %1097 = vmatpush1.bf16.msra.mxu0 %v5422_v5  ;;  %1138 = vmatpush1.bf16.msra.mxu1 %v5423_v6 }
 0x157   :  { %1098 = vmatprep.subr.bf16.mxu0 %v5424_v7  ;;  %1139 = vmatprep.subr.bf16.mxu1 %v5425_v8 }
 0x15a   :  { %1099 = vmatpush1.bf16.msra.mxu0 %v5426_v9  ;;  %1140 = vmatpush1.bf16.msra.mxu1 %v5427_v10  ;;  %v2717_v9 = vld [vmem:[%s5293_s2 + $0xd0] sm:$0xff] }
 0x15b   :  { %1210 = vmatprep.subr.bf16.mxu0 %v5428_v11  ;;  %1251 = vmatprep.subr.bf16.mxu1 %v5429_v12  ;;  %v941_v11 = vunpack.c.l.bf16 %v2717_v9  ;;  %v942_v13 = vunpack.c.h.bf16 %v2717_v9 }
 0x1dd   :  { %v854_v16 = vpop.f32.mrf.mxu0  ;;  %v895_v17 = vpop.f32.mrf.mxu1 }
 0x1de   :  { %v902_v18 = vadd.f32 %v854_v16, %v815_v14  ;;  %v904_v0 = vadd.f32 %v895_v17, %v817_v28 }
 0x1df   :  { %v856_v19 = vpop.f32.mrf.mxu0  ;;  %v897_v20 = vpop.f32.mrf.mxu1 }
 0x1e0   :  { %v2826_v23 = vmul.f32 -1.442695, %v902_v18  ;;  %v903_v24 = vadd.f32 %v856_v19, %v816_v15  ;;  %v2828_v3 = vmul.f32 -1.442695, %v904_v0  ;;  %v905_v5 = vadd.f32 %v897_v20, %v818_v1  ;;  %v2718_v1 = vld [vmem:[%s5293_s2 + $0xd8] sm:$0xff] }
 0x1e1   :  { %v858_v25 = vpop.f32.mrf.mxu0  ;;  %v899_v52 = vpop.f32.mrf.mxu1 }
 0x1e2   :  { %3015 = vpow2.f32 %v2826_v23  ;;  %v2827_v29 = vmul.f32 -1.442695, %v903_v24 }
 0x1e3   :  { %v859_v54 = vpop.f32.mrf.mxu0  ;;  %v900_v26 = vpop.f32.mrf.mxu1 }
 0x1e4   :  { %3017 = vpow2.f32 %v2827_v29  ;;  %v933_v26 = vpop.permute.xlu1 %932 }
 0x1e5   :  { %3019 = vpow2.f32 %v2828_v3  ;;  %vm934_vm12 = vcmp.eq.s32.totalorder %v933_v26, 1  ;;  %v4187_v26 = vld [vmem:[%s5294_s3 + $0x68] ss:$16 sps:$4 sm:$0xff]  }
 0x1e6   :  { %5433 = vst [vmem:[#allocation21_spill] sm:$0xff] %v4187_v26 }
 0x1ef   :  { %v3016_v4 = vpop.eup %3015 }
 0x1f0   :  { %v915_v6 = vadd.f32 1.0, %v3016_v4 }
 0x1f1   :  { %v3018_v7 = vpop.eup %3017 }
 0x1f2   :  { %3021 = vrcp.f32 %v915_v6  ;;  %v916_v8 = vadd.f32 1.0, %v3018_v7  ;;  %v3020_v16 = vpop.eup %3019  ;;  %v943_v7 = vunpack.c.l.bf16 %v2718_v1 }
 0x1f3   :  { %3023 = vtanh.f32 %v905_v5  ;;  %v917_v27 = vadd.f32 1.0, %v3020_v16 }
 0x1f4   :  { %3025 = vrcp.f32 %v916_v8 }
 0x1fd   :  { %v980_v14 = vpop.f32.mrf.mxu0  ;;  %v1021_v15 = vpop.f32.mrf.mxu1 }
 0x1fe   :  { %v1028_v17 = vadd.f32 %v980_v14, %v941_v11  ;;  %v1030_v9 = vadd.f32 %v1021_v15, %v943_v7  ;;  %v944_v11 = vunpack.c.h.bf16 %v2718_v1  ;;  %v4205_v1 = vld [vmem:[%s5294_s3 + $0x40] ss:$16 sps:$4 sm:$0xff]   ;;  %v4235_v7 = vld [vmem:[%s5294_s3 + $0x28] ss:$16 sps:$4 sm:$0xff]  }
 0x1ff   :  { %v3022_v18 = vpop.eup %3021  ;;  %v982_v19 = vpop.f32.mrf.mxu0  ;;  %5436 = vst [vmem:[#allocation19_spill] sm:$0xff] %v4205_v1  ;;  %5441 = vst [vmem:[#allocation8_spill] sm:$0xff] %v4235_v7 }
 0x200   :  { %v1023_v20 = vpop.f32.mrf.mxu1  ;;  %v3024_v23 = vpop.eup %3023  ;;  %v2829_v24 = vmul.f32 -1.442695, %v1028_v17  ;;  %v1029_v25 = vadd.f32 %v982_v19, %v942_v13  ;;  %v2831_v13 = vmul.f32 -1.442695, %v1030_v9  ;;  %v4241_v9 = vld [vmem:[%s5294_s3 + $0x4] ss:$16 sps:$4 sm:$0xff]  }
 0x201   :  { %v3026_v52 = vpop.eup %3025  ;;  %v984_v29 = vpop.f32.mrf.mxu0  ;;  %v926_v0 = vmul.f32 %v3024_v23, %v3022_v18  ;;  %v1031_v16 = vadd.f32 %v1023_v20, %v944_v11  ;;  %5442 = vst [vmem:[#allocation5_spill] sm:$0xff] %v4241_v9  ;;  %v4247_v11 = vld [vmem:[%s5294_s3 + $0xc] ss:$16 sps:$4 sm:$0xff]  }
 0x202   :  { %v1025_v54 = vpop.f32.mrf.mxu1  ;;  %v925_v28 = vmul.f32 %v3026_v52, %v3901_v57  ;;  %3027 = vpow2.f32 %v2829_v24  ;;  %v2830_v3 = vmul.f32 -1.442695, %v1029_v25  ;;  %5443 = vst [vmem:[#allocation9_spill] sm:$0xff] %v4247_v11 }
 0x203   :  { %v985_v4 = vpop.f32.mrf.mxu0  ;;  %v4181_v54 = vld [vmem:[%s5294_s3 + $0x60] ss:$16 sps:$4 sm:$0xff]  }
 0x204   :  { %v1026_v5 = vpop.f32.mrf.mxu1  ;;  %v927_v6 = vadd.f32 %v926_v0, %v925_v28  ;;  %3029 = vpow2.f32 %v2830_v3  ;;  %5432 = vst [vmem:[#allocation17_spill] sm:$0xff] %v4181_v54  ;;  %v4193_v28 = vld [vmem:[%s5294_s3 + $0x44] ss:$16 sps:$4 sm:$0xff]   ;;  %v4199_v0 = vld [vmem:[%s5294_s3 + $0x4c] ss:$16 sps:$4 sm:$0xff]  }
 0x205   :  { %3031 = vrcp.f32 %v917_v27  ;;  %5434 = vst [vmem:[#allocation18_spill] sm:$0xff] %v4193_v28  ;;  %5435 = vst [vmem:[#allocation24_spill] sm:$0xff] %v4199_v0  ;;  %v4211_v3 = vld [vmem:[%s5294_s3 + $0x48] ss:$16 sps:$4 sm:$0xff]   ;;  %v4217_v4 = vld [vmem:[%s5294_s3 + $0x24] ss:$16 sps:$4 sm:$0xff]  }
 0x206   :  { %3033 = vtanh.f32 %v927_v6  ;;  %v4009_v8 = vsel %vm934_vm12, %v927_v6, %v3901_v57  ;;  %5437 = vst [vmem:[#allocation25_spill] sm:$0xff] %v4211_v3  ;;  %5438 = vst [vmem:[#allocation22_spill] sm:$0xff] %v4217_v4  ;;  %v4223_v5 = vld [vmem:[%s5294_s3 + $0x2c] ss:$16 sps:$4 sm:$0xff]   ;;  %v4229_v6 = vld [vmem:[%s5294_s3 + $0x20] ss:$16 sps:$4 sm:$0xff]  }
 0x207   :  { %3035 = vpow2.f32 %v2831_v13  ;;  %5439 = vst [vmem:[#allocation23_spill] sm:$0xff] %v4223_v5  ;;  %5440 = vst [vmem:[#allocation4_spill] sm:$0xff] %v4229_v6  ;;  %v4253_v13 = vld [vmem:[%s5294_s3] ss:$16 sps:$4 sm:$0xff]  }
 0x208   :  { %5444 = vst [vmem:[#allocation6_spill] sm:$0xff] %v4253_v13 }
 0x20f   :  { %v3028_v14 = vpop.eup %3027 }
 0x210   :  { %v1041_v17 = vadd.f32 1.0, %v3028_v14  ;;  %v4260_v14 = vld [vmem:[%s5294_s3 + $0x1e4] ss:$16 sps:$4 sm:$0xff]  }
 0x211   :  { %v3030_v18 = vpop.eup %3029  ;;  %5445 = vst [vmem:[#allocation12_spill] sm:$0xff] %v4260_v14 }
 0x212   :  { %v3032_v19 = vpop.eup %3031  ;;  %3037 = vrcp.f32 %v1041_v17  ;;  %v1042_v23 = vadd.f32 1.0, %v3030_v18 }
 0x213   :  { %v3034_v24 = vpop.eup %3033  ;;  %3039 = vtanh.f32 %v1031_v16  ;;  %v37_v16 = vld [vmem:[%s5292_s1 + $0x40] sm:$0xff] }
 0x214   :  { %v929_v25 = vmul.f32 %v3034_v24, %v3032_v19  ;;  %3041 = vrcp.f32 %v1042_v23  ;;  %v1079_v17 = vunpack.c.l.bf16 %v37_v16  ;;  %v1080_v18 = vunpack.c.h.bf16 %v37_v16 }
 0x216   :  { %v4013_v52 = vsel %vm934_vm12, %v929_v25, %v3904_v2  ;;  %v937_v57 = vsel %vm934_vm12, %v929_v25, 0.0  ;;  %v3036_v2 = vpop.eup %3035 }
 0x217   :  { %v1064_v15 = vpack.c.bf16 %v937_v57, %v937_v57  ;;  %v1083_v20 = vpack.c.bf16 %v4013_v52, %v4013_v52  ;;  %v1043_v29 = vadd.f32 1.0, %v3036_v2 }
 0x219   :  { %2832 = vst [vmem:[%s5295_s4 + $0x4] sm:$0xf] %v1064_v15  ;;  %1117 = vmatmul.mubr.bf16.vlgmr.msra.gmra.mxu0 %v1083_v20  ;;  %1158 = vmatmul.mubr.bf16.vlgmr.msra.gmra.mxu1 %v1083_v20  ;;  %3043 = vrcp.f32 %v1043_v29 }
 0x21a   :  { %1211 = vmatpush1.bf16.msra.mxu0 %v3617_v33  ;;  %1252 = vmatpush1.bf16.msra.mxu1 %v3655_v40 }
 0x21b   :  { %1212 = vmatprep.subr.bf16.mxu0 %v3623_v34  ;;  %1253 = vmatprep.subr.bf16.mxu1 %v3661_v41 }
 0x21c   :  { %1242 = vmatprep.mubr.bf16.mxu0 %v5406_v59  ;;  %1283 = vmatprep.mubr.bf16.mxu1 %v5406_v59 }
 0x21e   :  { %1213 = vmatpush1.bf16.msra.mxu0 %v3642_v38  ;;  %1254 = vmatpush1.bf16.msra.mxu1 %v3680_v44  ;;  %v1059_v38 = vpop.permute.xlu1 %1058 }
 0x21f   :  { %v3038_v27 = vpop.eup %3037  ;;  %1214 = vmatprep.subr.bf16.mxu0 %v3647_v39  ;;  %1255 = vmatprep.subr.bf16.mxu1 %v3686_v45  ;;  %vm1060_vm13 = vcmp.eq.s32.totalorder %v1059_v38, 1 }
 0x220   :  { %v3040_v33 = vpop.eup %3039 }
 0x221   :  { %v3042_v40 = vpop.eup %3041  ;;  %v1052_v41 = vmul.f32 %v3040_v33, %v3038_v27 }
 0x222   :  { %v1051_v34 = vmul.f32 %v3042_v40, %v3930_v35  ;;  %1215 = vmatpush1.bf16.msra.mxu0 %v3667_v42  ;;  %1256 = vmatpush1.bf16.msra.mxu1 %v3712_v49 }
 0x223   :  { %1216 = vmatprep.subr.bf16.mxu0 %v3672_v43  ;;  %1257 = vmatprep.subr.bf16.mxu1 %v3721_v51 }
 0x224   :  { %v1053_v44 = vadd.f32 %v1052_v41, %v1051_v34 }
 0x226   :  { %3045 = vtanh.f32 %v1053_v44  ;;  %1217 = vmatpush1.bf16.msra.mxu0 %v3698_v47  ;;  %1258 = vmatpush1.bf16.msra.mxu1 %v3742_v55  ;;  %v4040_v39 = vsel %vm1060_vm13, %v1053_v44, %v3930_v35  ;;  %v3044_v42 = vpop.eup %3043  ;;  %v4068_v55 = vld [vmem:[%s5294_s3 + $0xe4] ss:$16 sps:$4 sm:$0xff]   ;;  %v4109_v35 = vld [vmem:[%s5294_s3 + $0xc0] ss:$16 sps:$4 sm:$0xff]  }
 0x227   :  { %1218 = vmatprep.subr.bf16.mxu0 %v3706_v48  ;;  %1259 = vmatprep.subr.bf16.mxu1 %v3748_v56  ;;  %v4083_v56 = vld [vmem:[%s5294_s3 + $0xe0] ss:$16 sps:$4 sm:$0xff]  }
 0x22a   :  { %1219 = vmatpush1.bf16.msra.mxu0 %v5408_v36  ;;  %1260 = vmatpush1.bf16.msra.mxu1 %v5409_v58  ;;  %v4115_v36 = vld [vmem:[%s5294_s3 + $0xc8] ss:$16 sps:$4 sm:$0xff]   ;;  %v4121_v58 = vld [vmem:[%s5294_s3 + $0xa4] ss:$16 sps:$4 sm:$0xff]  }
 0x22b   :  { %1220 = vmatprep.subr.bf16.mxu0 %v5410_v30  ;;  %1261 = vmatprep.subr.bf16.mxu1 %v5411_v31  ;;  %v4127_v30 = vld [vmem:[%s5294_s3 + $0xac] ss:$16 sps:$4 sm:$0xff]   ;;  %v4133_v31 = vld [vmem:[%s5294_s3 + $0xa0] ss:$16 sps:$4 sm:$0xff]  }
 0x22e   :  { %1221 = vmatpush1.bf16.msra.mxu0 %v5412_v22  ;;  %1262 = vmatpush1.bf16.msra.mxu1 %v5413_v50  ;;  %v4139_v22 = vld [vmem:[%s5294_s3 + $0xa8] ss:$16 sps:$4 sm:$0xff]   ;;  %v4145_v50 = vld [vmem:[%s5294_s3 + $0x84] ss:$16 sps:$4 sm:$0xff]  }
 0x22f   :  { %1222 = vmatprep.subr.bf16.mxu0 %v5414_v62  ;;  %1263 = vmatprep.subr.bf16.mxu1 %v5415_v32  ;;  %v4151_v62 = vld [vmem:[%s5294_s3 + $0x8c] ss:$16 sps:$4 sm:$0xff]   ;;  %v4157_v32 = vld [vmem:[%s5294_s3 + $0x80] ss:$16 sps:$4 sm:$0xff]  }
 0x232   :  { %1223 = vmatpush1.bf16.msra.mxu0 %v5416_v21  ;;  %1264 = vmatpush1.bf16.msra.mxu1 %v3823_v61  ;;  %v4095_v61 = vld [vmem:[%s5294_s3 + $0xc4] ss:$16 sps:$4 sm:$0xff]   ;;  %v4163_v21 = vld [vmem:[%s5294_s3 + $0x88] ss:$16 sps:$4 sm:$0xff]  }
 0x233   :  { %v3046_v43 = vpop.eup %3045  ;;  %1224 = vmatprep.subr.bf16.mxu0 %v5417_v46  ;;  %1265 = vmatprep.subr.bf16.mxu1 %v3829_v63  ;;  %v4101_v63 = vld [vmem:[%s5294_s3 + $0xcc] ss:$16 sps:$4 sm:$0xff]   ;;  %v4169_v46 = vld [vmem:[%s5294_s3 + $0x64] ss:$16 sps:$4 sm:$0xff]  }
 0x234   :  { %v1055_v45 = vmul.f32 %v3046_v43, %v3044_v42  ;;  %5430 = vst [vmem:[#allocation16_spill] sm:$0xff] %v4169_v46 }
 0x236   :  { %1225 = vmatpush1.bf16.msra.mxu0 %v3815_v60  ;;  %1266 = vmatpush1.bf16.msra.mxu1 %v3839_v37  ;;  %v4060_v47 = vsel %vm1060_vm13, %v1055_v45, %v3949_v53  ;;  %v1063_v48 = vsel %vm1060_vm13, %v1055_v45, 0.0  ;;  %v4074_v37 = vld [vmem:[%s5294_s3 + $0xec] ss:$16 sps:$4 sm:$0xff]   ;;  %v4089_v60 = vld [vmem:[%s5294_s3 + $0xe8] ss:$16 sps:$4 sm:$0xff]  }
 0x237   :  { %v1067_v49 = vpack.c.bf16 %v1063_v48, %v1063_v48  ;;  %v1209_v51 = vpack.c.bf16 %v4060_v47, %v4060_v47  ;;  %1348 = vmatprep.subr.bf16.mxu0 %v4068_v55  ;;  %1389 = vmatprep.subr.bf16.mxu1 %v4074_v37  ;;  %v4175_v53 = vld [vmem:[%s5294_s3 + $0x6c] ss:$16 sps:$4 sm:$0xff]  }
 0x238   :  { %5431 = vst [vmem:[#allocation20_spill] sm:$0xff] %v4175_v53 }
 0x239   :  { %2833 = vst [vmem:[%s5296_s5 + $0x18] sm:$0xf] %v1067_v49  ;;  %1243 = vmatmul.mubr.bf16.vlgmr.msra.gmra.mxu0 %v1209_v51  ;;  %1284 = vmatmul.mubr.bf16.vlgmr.msra.gmra.mxu1 %v1209_v51  ;;  %v2715_v49 = vld [vmem:[%s5293_s2 + $0xb0] sm:$0xff] }
 0x23a   :  { %1349 = vmatpush1.bf16.msra.mxu0 %v4083_v56  ;;  %1390 = vmatpush1.bf16.msra.mxu1 %v4089_v60  ;;  %v1205_v51 = vunpack.c.l.bf16 %v2715_v49  ;;  %v1206_v16 = vunpack.c.h.bf16 %v2715_v49 }
 0x23b   :  { %1350 = vmatprep.subr.bf16.mxu0 %v4095_v61  ;;  %1391 = vmatprep.subr.bf16.mxu1 %v4101_v63 }
 0x23c   :  { %1380 = vmatprep.mubr.bf16.mxu0 %v5406_v59  ;;  %1421 = vmatprep.mubr.bf16.mxu1 %v5406_v59 }
 0x23e   :  { %1351 = vmatpush1.bf16.msra.mxu0 %v4109_v35  ;;  %1392 = vmatpush1.bf16.msra.mxu1 %v4115_v36 }
 0x23f   :  { %1352 = vmatprep.subr.bf16.mxu0 %v4121_v58  ;;  %1393 = vmatprep.subr.bf16.mxu1 %v4127_v30 }
 0x242   :  { %1353 = vmatpush1.bf16.msra.mxu0 %v4133_v31  ;;  %1394 = vmatpush1.bf16.msra.mxu1 %v4139_v22 }
 0x243   :  { %1354 = vmatprep.subr.bf16.mxu0 %v4145_v50  ;;  %1395 = vmatprep.subr.bf16.mxu1 %v4151_v62 }
 0x246   :  { %1355 = vmatpush1.bf16.msra.mxu0 %v4157_v32  ;;  %1396 = vmatpush1.bf16.msra.mxu1 %v4163_v21 }
 0x247   :  { %1356 = vmatprep.subr.bf16.mxu0 %v4169_v46  ;;  %1397 = vmatprep.subr.bf16.mxu1 %v4175_v53 }
 0x24a   :  { %1357 = vmatpush1.bf16.msra.mxu0 %v4181_v54  ;;  %1398 = vmatpush1.bf16.msra.mxu1 %v4187_v26 }
 0x24b   :  { %1358 = vmatprep.subr.bf16.mxu0 %v4193_v28  ;;  %1399 = vmatprep.subr.bf16.mxu1 %v4199_v0 }
 0x24e   :  { %1359 = vmatpush1.bf16.msra.mxu0 %v4205_v1  ;;  %1400 = vmatpush1.bf16.msra.mxu1 %v4211_v3 }
 0x24f   :  { %1360 = vmatprep.subr.bf16.mxu0 %v4217_v4  ;;  %1401 = vmatprep.subr.bf16.mxu1 %v4223_v5 }
 0x252   :  { %1361 = vmatpush1.bf16.msra.mxu0 %v4229_v6  ;;  %1402 = vmatpush1.bf16.msra.mxu1 %v4235_v7 }
 0x253   :  { %1362 = vmatprep.subr.bf16.mxu0 %v4241_v9  ;;  %1403 = vmatprep.subr.bf16.mxu1 %v4247_v11 }
 0x256   :  { %1363 = vmatpush1.bf16.msra.mxu0 %v4253_v13  ;;  %1404 = vmatpush1.bf16.msra.mxu1 %v5427_v10 }
 0x257   :  { %1474 = vmatprep.subr.bf16.mxu0 %v4260_v14  ;;  %1515 = vmatprep.subr.bf16.mxu1 %v5429_v12  ;;  %v39_v12 = vld [vmem:[%s5292_s1 + $0x48] sm:$0xff] }
 0x258   :  { %v1081_v29 = vunpack.c.l.bf16 %v39_v12  ;;  %v1082_v41 = vunpack.c.h.bf16 %v39_v12 }
 0x2d9   :  { %v1118_v19 = vpop.f32.mrf.mxu0  ;;  %v1159_v23 = vpop.f32.mrf.mxu1 }
 0x2da   :  { %v1166_v24 = vadd.f32 %v1118_v19, %v1079_v17  ;;  %v1168_v34 = vadd.f32 %v1159_v23, %v1081_v29 }
 0x2db   :  { %v1120_v25 = vpop.f32.mrf.mxu0  ;;  %v1161_v10 = vpop.f32.mrf.mxu1 }
 0x2dc   :  { %v2834_v57 = vmul.f32 -1.442695, %v1166_v24  ;;  %v1167_v15 = vadd.f32 %v1120_v25, %v1080_v18  ;;  %v2836_v38 = vmul.f32 -1.442695, %v1168_v34  ;;  %v1169_v42 = vadd.f32 %v1161_v10, %v1082_v41  ;;  %v2716_v34 = vld [vmem:[%s5293_s2 + $0xb8] sm:$0xff] }
 0x2dd   :  { %v1122_v20 = vpop.f32.mrf.mxu0  ;;  %v1163_v2 = vpop.f32.mrf.mxu1 }
 0x2de   :  { %3047 = vpow2.f32 %v2834_v57  ;;  %v2835_v27 = vmul.f32 -1.442695, %v1167_v15 }
 0x2df   :  { %v1123_v33 = vpop.f32.mrf.mxu0  ;;  %v1164_v40 = vpop.f32.mrf.mxu1 }
 0x2e0   :  { %3049 = vpow2.f32 %v2835_v27 }
 0x2e1   :  { %3051 = vpow2.f32 %v2836_v38 }
 0x2eb   :  { %v3048_v44 = vpop.eup %3047 }
 0x2ec   :  { %v1179_v43 = vadd.f32 1.0, %v3048_v44 }
 0x2ed   :  { %v3050_v45 = vpop.eup %3049 }
 0x2ee   :  { %3053 = vrcp.f32 %v1179_v43  ;;  %v1180_v48 = vadd.f32 1.0, %v3050_v45  ;;  %v3052_v19 = vpop.eup %3051  ;;  %v1207_v45 = vunpack.c.l.bf16 %v2716_v34 }
 0x2ef   :  { %3055 = vtanh.f32 %v1169_v42  ;;  %v1181_v12 = vadd.f32 1.0, %v3052_v19  ;;  %v1197_v42 = vpop.permute.xlu0 %1196 }
 0x2f0   :  { %3057 = vrcp.f32 %v1180_v48  ;;  %vm1198_vm14 = vcmp.eq.s32.totalorder %v1197_v42, 1 }
 0x2f9   :  { %v1244_v17 = vpop.f32.mrf.mxu0  ;;  %v1285_v18 = vpop.f32.mrf.mxu1 }
 0x2fa   :  { %v1292_v23 = vadd.f32 %v1244_v17, %v1205_v51  ;;  %v1294_v49 = vadd.f32 %v1285_v18, %v1207_v45  ;;  %v1208_v51 = vunpack.c.h.bf16 %v2716_v34  ;;  %v4326_v34 = vld [vmem:[%s5294_s3 + $0x1c8] ss:$16 sps:$4 sm:$0xff]  }
 0x2fb   :  { %v3054_v24 = vpop.eup %3053  ;;  %v1246_v25 = vpop.f32.mrf.mxu0 }
 0x2fc   :  { %v1287_v10 = vpop.f32.mrf.mxu1  ;;  %v3056_v57 = vpop.eup %3055  ;;  %v2837_v15 = vmul.f32 -1.442695, %v1292_v23  ;;  %v1293_v20 = vadd.f32 %v1246_v25, %v1206_v16  ;;  %v2839_v16 = vmul.f32 -1.442695, %v1294_v49 }
 0x2fd   :  { %v3058_v2 = vpop.eup %3057  ;;  %v1248_v27 = vpop.f32.mrf.mxu0  ;;  %v1190_v29 = vmul.f32 %v3056_v57, %v3054_v24  ;;  %v1295_v19 = vadd.f32 %v1287_v10, %v1208_v51 }
 0x2fe   :  { %v1289_v33 = vpop.f32.mrf.mxu1  ;;  %v1189_v40 = vmul.f32 %v3058_v2, %v4009_v8  ;;  %3059 = vpow2.f32 %v2837_v15  ;;  %v2838_v41 = vmul.f32 -1.442695, %v1293_v20  ;;  %v4306_v27 = vld [vmem:[%s5294_s3 + $0x1c4] ss:$16 sps:$4 sm:$0xff]  }
 0x2ff   :  { %v1249_v38 = vpop.f32.mrf.mxu0  ;;  %v4312_v33 = vld [vmem:[%s5294_s3 + $0x1cc] ss:$16 sps:$4 sm:$0xff]  }
 0x300   :  { %v1290_v44 = vpop.f32.mrf.mxu1  ;;  %v1191_v43 = vadd.f32 %v1190_v29, %v1189_v40  ;;  %3061 = vpow2.f32 %v2838_v41  ;;  %v4320_v29 = vld [vmem:[%s5294_s3 + $0x1c0] ss:$16 sps:$4 sm:$0xff]   ;;  %v4332_v38 = vld [vmem:[%s5294_s3 + $0x1a4] ss:$16 sps:$4 sm:$0xff]  }
 0x301   :  { %3063 = vrcp.f32 %v1181_v12  ;;  %v4294_v12 = vld [vmem:[%s5294_s3 + $0x1e0] ss:$16 sps:$4 sm:$0xff]   ;;  %v4338_v44 = vld [vmem:[%s5294_s3 + $0x1ac] ss:$16 sps:$4 sm:$0xff]  }
 0x302   :  { %3065 = vtanh.f32 %v1191_v43  ;;  %v4279_v48 = vsel %vm1198_vm14, %v1191_v43, %v4009_v8 }
 0x303   :  { %3067 = vpow2.f32 %v2839_v16  ;;  %v4345_v16 = vld [vmem:[%s5294_s3 + $0x1a0] ss:$16 sps:$4 sm:$0xff]  }
 0x30b   :  { %v3060_v17 = vpop.eup %3059 }
 0x30c   :  { %v1305_v23 = vadd.f32 1.0, %v3060_v17  ;;  %v4351_v17 = vld [vmem:[%s5294_s3 + $0x1a8] ss:$16 sps:$4 sm:$0xff]  }
 0x30d   :  { %v3062_v24 = vpop.eup %3061 }
 0x30e   :  { %v3064_v25 = vpop.eup %3063  ;;  %3069 = vrcp.f32 %v1305_v23  ;;  %v1306_v57 = vadd.f32 1.0, %v3062_v24  ;;  %v4363_v23 = vld [vmem:[%s5294_s3 + $0x18c] ss:$16 sps:$4 sm:$0xff]   ;;  %v1323_v24 = vpop.permute.xlu1 %1322 }
 0x30f   :  { %v3066_v15 = vpop.eup %3065  ;;  %3071 = vtanh.f32 %v1295_v19  ;;  %v4357_v19 = vld [vmem:[%s5294_s3 + $0x184] ss:$16 sps:$4 sm:$0xff]   ;;  %vm1324_vm15 = vcmp.eq.s32.totalorder %v1323_v24, 1  ;;  %v4531_v24 = vld [vmem:[%s5294_s3 + $0x1ec] ss:$16 sps:$4 sm:$0xff]  }
 0x310   :  { %3073 = vrcp.f32 %v1306_v57  ;;  %v1193_v20 = vmul.f32 %v3066_v15, %v3064_v25  ;;  %v3068_v40 = vpop.eup %3067  ;;  %v4369_v57 = vld [vmem:[%s5294_s3 + $0x180] ss:$16 sps:$4 sm:$0xff]   ;;  %v4375_v15 = vld [vmem:[%s5294_s3 + $0x188] ss:$16 sps:$4 sm:$0xff]   ;;  %5456 = vst [vmem:[#allocation30_spill] sm:$0xff] %v4531_v24 }
 0x311   :  { %v1307_v45 = vadd.f32 1.0, %v3068_v40  ;;  %v4409_v40 = vld [vmem:[%s5294_s3 + $0x144] ss:$16 sps:$4 sm:$0xff]  }
 0x312   :  { %v4283_v2 = vsel %vm1198_vm14, %v1193_v20, %v4013_v52  ;;  %v1201_v8 = vsel %vm1198_vm14, %v1193_v20, 0.0  ;;  %v4300_v52 = vld [vmem:[%s5294_s3 + $0x1e8] ss:$16 sps:$4 sm:$0xff]  }
 0x313   :  { %v1328_v18 = vpack.c.bf16 %v1201_v8, %v1201_v8  ;;  %v1347_v10 = vpack.c.bf16 %v4283_v2, %v4283_v2  ;;  %3075 = vrcp.f32 %v1307_v45  ;;  %v4385_v8 = vld [vmem:[%s5294_s3 + $0x164] ss:$16 sps:$4 sm:$0xff]  }
 0x314   :  { %v4433_v45 = vld [vmem:[%s5294_s3 + $0x124] ss:$16 sps:$4 sm:$0xff]  }
 0x315   :  { %2840 = vst [vmem:[%s5295_s4 + $0x8] sm:$0xf] %v1328_v18  ;;  %1381 = vmatmul.mubr.bf16.vlgmr.msra.gmra.mxu0 %v1347_v10  ;;  %1422 = vmatmul.mubr.bf16.vlgmr.msra.gmra.mxu1 %v1347_v10  ;;  %v4391_v18 = vld [vmem:[%s5294_s3 + $0x16c] ss:$16 sps:$4 sm:$0xff]   ;;  %v4397_v10 = vld [vmem:[%s5294_s3 + $0x160] ss:$16 sps:$4 sm:$0xff]  }
 0x316   :  { %1475 = vmatpush1.bf16.msra.mxu0 %v4294_v12  ;;  %1516 = vmatpush1.bf16.msra.mxu1 %v4300_v52  ;;  %5449 = vst [vmem:[#allocation14_spill] sm:$0xff] %v4433_v45 }
 0x317   :  { %1476 = vmatprep.subr.bf16.mxu0 %v4306_v27  ;;  %1517 = vmatprep.subr.bf16.mxu1 %v4312_v33 }
 0x318   :  { %1506 = vmatprep.mubr.bf16.mxu0 %v5406_v59  ;;  %1547 = vmatprep.mubr.bf16.mxu1 %v5406_v59 }
 0x31a   :  { %1477 = vmatpush1.bf16.msra.mxu0 %v4320_v29  ;;  %1518 = vmatpush1.bf16.msra.mxu1 %v4326_v34 }
 0x31b   :  { %v3070_v41 = vpop.eup %3069  ;;  %1478 = vmatprep.subr.bf16.mxu0 %v4332_v38  ;;  %1519 = vmatprep.subr.bf16.mxu1 %v4338_v44 }
 0x31c   :  { %v3072_v42 = vpop.eup %3071 }
 0x31d   :  { %v3074_v43 = vpop.eup %3073  ;;  %v1316_v51 = vmul.f32 %v3072_v42, %v3070_v41  ;;  %v4415_v41 = vld [vmem:[%s5294_s3 + $0x14c] ss:$16 sps:$4 sm:$0xff]   ;;  %v4421_v42 = vld [vmem:[%s5294_s3 + $0x140] ss:$16 sps:$4 sm:$0xff]  }
 0x31e   :  { %v1315_v49 = vmul.f32 %v3074_v43, %v4040_v39  ;;  %1479 = vmatpush1.bf16.msra.mxu0 %v4345_v16  ;;  %1520 = vmatpush1.bf16.msra.mxu1 %v4351_v17  ;;  %5446 = vst [vmem:[#allocation7_spill] sm:$0xff] %v4415_v41  ;;  %5447 = vst [vmem:[#allocation13_spill] sm:$0xff] %v4421_v42  ;;  %v4427_v43 = vld [vmem:[%s5294_s3 + $0x148] ss:$16 sps:$4 sm:$0xff]  }
 0x31f   :  { %1480 = vmatprep.subr.bf16.mxu0 %v4357_v19  ;;  %1521 = vmatprep.subr.bf16.mxu1 %v4363_v23  ;;  %5448 = vst [vmem:[#allocation10_spill] sm:$0xff] %v4427_v43 }
 0x320   :  { %v1317_v25 = vadd.f32 %v1316_v51, %v1315_v49  ;;  %v4439_v49 = vld [vmem:[%s5294_s3 + $0x12c] ss:$16 sps:$4 sm:$0xff]   ;;  %v3076_v51 = vpop.eup %3075 }
 0x321   :  { %5450 = vst [vmem:[#allocation11_spill] sm:$0xff] %v4439_v49 }
 0x322   :  { %3077 = vtanh.f32 %v1317_v25  ;;  %1481 = vmatpush1.bf16.msra.mxu0 %v4369_v57  ;;  %1522 = vmatpush1.bf16.msra.mxu1 %v4375_v15  ;;  %v4380_v20 = vsel %vm1324_vm15, %v1317_v25, %v4040_v39  ;;  %v4403_v39 = vld [vmem:[%s5294_s3 + $0x168] ss:$16 sps:$4 sm:$0xff]   ;;  %v4445_v25 = vld [vmem:[%s5294_s3 + $0x120] ss:$16 sps:$4 sm:$0xff]  }
 0x323   :  { %1482 = vmatprep.subr.bf16.mxu0 %v4385_v8  ;;  %1523 = vmatprep.subr.bf16.mxu1 %v4391_v18  ;;  %5451 = vst [vmem:[#allocation15_spill] sm:$0xff] %v4445_v25 }
 0x326   :  { %1483 = vmatpush1.bf16.msra.mxu0 %v4397_v10  ;;  %1524 = vmatpush1.bf16.msra.mxu1 %v4403_v39 }
 0x327   :  { %1484 = vmatprep.subr.bf16.mxu0 %v4409_v40  ;;  %1525 = vmatprep.subr.bf16.mxu1 %v4415_v41  ;;  %v4475_v41 = vld [vmem:[%s5294_s3 + $0x108] ss:$16 sps:$4 sm:$0xff]  }
 0x32a   :  { %1485 = vmatpush1.bf16.msra.mxu0 %v4421_v42  ;;  %1526 = vmatpush1.bf16.msra.mxu1 %v4427_v43  ;;  %v4451_v43 = vld [vmem:[%s5294_s3 + $0x128] ss:$16 sps:$4 sm:$0xff]   ;;  %v4463_v42 = vld [vmem:[%s5294_s3 + $0x10c] ss:$16 sps:$4 sm:$0xff]  }
 0x32b   :  { %1486 = vmatprep.subr.bf16.mxu0 %v4433_v45  ;;  %1527 = vmatprep.subr.bf16.mxu1 %v4439_v49  ;;  %5452 = vst [vmem:[#allocation26_spill] sm:$0xff] %v4451_v43  ;;  %v4457_v49 = vld [vmem:[%s5294_s3 + $0x104] ss:$16 sps:$4 sm:$0xff]   ;;  %5454 = vst [vmem:[#allocation28_spill] sm:$0xff] %v4463_v42 }
 0x32c   :  { %5453 = vst [vmem:[#allocation27_spill] sm:$0xff] %v4457_v49 }
 0x32e   :  { %1487 = vmatpush1.bf16.msra.mxu0 %v4445_v25  ;;  %1528 = vmatpush1.bf16.msra.mxu1 %v4451_v43  ;;  %v4469_v43 = vld [vmem:[%s5294_s3 + $0x100] ss:$16 sps:$4 sm:$0xff]  }
 0x32f   :  { %v3078_v45 = vpop.eup %3077  ;;  %1488 = vmatprep.subr.bf16.mxu0 %v4457_v49  ;;  %1529 = vmatprep.subr.bf16.mxu1 %v4463_v42 }
 0x330   :  { %v1319_v25 = vmul.f32 %v3078_v45, %v3076_v51 }
 0x332   :  { %1489 = vmatpush1.bf16.msra.mxu0 %v4469_v43  ;;  %1530 = vmatpush1.bf16.msra.mxu1 %v4475_v41  ;;  %v4480_v49 = vsel %vm1324_vm15, %v1319_v25, %v4060_v47  ;;  %v1327_v45 = vsel %vm1324_vm15, %v1319_v25, 0.0  ;;  %v4524_v47 = vld [vmem:[%s5294_s3 + $0x8] ss:$16 sps:$4 sm:$0xff]  }
 0x333   :  { %v1331_v51 = vpack.c.bf16 %v1327_v45, %v1327_v45  ;;  %v1473_v42 = vpack.c.bf16 %v4480_v49, %v4480_v49  ;;  %1612 = vmatprep.subr.bf16.mxu0 %v4068_v55  ;;  %1653 = vmatprep.subr.bf16.mxu1 %v4074_v37  ;;  %5455 = vst [vmem:[#allocation29_spill] sm:$0xff] %v4524_v47 }
 0x335   :  { %2841 = vst [vmem:[%s5296_s5 + $0x14] sm:$0xf] %v1331_v51  ;;  %1507 = vmatmul.mubr.bf16.vlgmr.msra.gmra.mxu0 %v1473_v42  ;;  %1548 = vmatmul.mubr.bf16.vlgmr.msra.gmra.mxu1 %v1473_v42  ;;  %v41_v42 = vld [vmem:[%s5292_s1 + $0x60] sm:$0xff] }
 0x336   :  { %1613 = vmatpush1.bf16.msra.mxu0 %v4083_v56  ;;  %1654 = vmatpush1.bf16.msra.mxu1 %v4089_v60  ;;  %v1343_v25 = vunpack.c.l.bf16 %v41_v42  ;;  %v1344_v45 = vunpack.c.h.bf16 %v41_v42 }
 0x337   :  { %1614 = vmatprep.subr.bf16.mxu0 %v4095_v61  ;;  %1655 = vmatprep.subr.bf16.mxu1 %v4101_v63 }
 0x338   :  { %1644 = vmatprep.mubr.bf16.mxu0 %v5406_v59  ;;  %1685 = vmatprep.mubr.bf16.mxu1 %v5406_v59 }
 0x33a   :  { %1615 = vmatpush1.bf16.msra.mxu0 %v4109_v35  ;;  %1656 = vmatpush1.bf16.msra.mxu1 %v4115_v36 }
 0x33b   :  { %1616 = vmatprep.subr.bf16.mxu0 %v4121_v58  ;;  %1657 = vmatprep.subr.bf16.mxu1 %v4127_v30 }
 0x33e   :  { %1617 = vmatpush1.bf16.msra.mxu0 %v4133_v31  ;;  %1658 = vmatpush1.bf16.msra.mxu1 %v4139_v22 }
 0x33f   :  { %1618 = vmatprep.subr.bf16.mxu0 %v4145_v50  ;;  %1659 = vmatprep.subr.bf16.mxu1 %v4151_v62 }
 0x342   :  { %1619 = vmatpush1.bf16.msra.mxu0 %v4157_v32  ;;  %1660 = vmatpush1.bf16.msra.mxu1 %v4163_v21 }
 0x343   :  { %1620 = vmatprep.subr.bf16.mxu0 %v4169_v46  ;;  %1661 = vmatprep.subr.bf16.mxu1 %v4175_v53  ;;  %v1461_v53 = vpop.permute.xlu0 %1460 }
 0x344   :  { %vm1462_vm0 = vcmp.eq.s32.totalorder %v1461_v53, 1 }
 0x346   :  { %1621 = vmatpush1.bf16.msra.mxu0 %v4181_v54  ;;  %1662 = vmatpush1.bf16.msra.mxu1 %v4187_v26 }
 0x347   :  { %1622 = vmatprep.subr.bf16.mxu0 %v4193_v28  ;;  %1663 = vmatprep.subr.bf16.mxu1 %v4199_v0 }
 0x34a   :  { %1623 = vmatpush1.bf16.msra.mxu0 %v4205_v1  ;;  %1664 = vmatpush1.bf16.msra.mxu1 %v4211_v3 }
 0x34b   :  { %1624 = vmatprep.subr.bf16.mxu0 %v4217_v4  ;;  %1665 = vmatprep.subr.bf16.mxu1 %v4223_v5 }
 0x34e   :  { %1625 = vmatpush1.bf16.msra.mxu0 %v4229_v6  ;;  %1666 = vmatpush1.bf16.msra.mxu1 %v4235_v7 }
 0x34f   :  { %1626 = vmatprep.subr.bf16.mxu0 %v4241_v9  ;;  %1667 = vmatprep.subr.bf16.mxu1 %v4247_v11 }
 0x352   :  { %1627 = vmatpush1.bf16.msra.mxu0 %v4253_v13  ;;  %1668 = vmatpush1.bf16.msra.mxu1 %v4524_v47 }
 0x353   :  { %1738 = vmatprep.subr.bf16.mxu0 %v4260_v14  ;;  %1779 = vmatprep.subr.bf16.mxu1 %v4531_v24  ;;  %v43_v24 = vld [vmem:[%s5292_s1 + $0x68] sm:$0xff] }
 0x354   :  { %v1345_v0 = vunpack.c.l.bf16 %v43_v24  ;;  %v1346_v28 = vunpack.c.h.bf16 %v43_v24 }
 0x3d5   :  { %v1382_v51 = vpop.f32.mrf.mxu0  ;;  %v1423_v13 = vpop.f32.mrf.mxu1 }
 0x3d6   :  { %v1430_v11 = vadd.f32 %v1382_v51, %v1343_v25  ;;  %v1432_v42 = vadd.f32 %v1423_v13, %v1345_v0 }
 0x3d7   :  { %v1384_v9 = vpop.f32.mrf.mxu0  ;;  %v1425_v47 = vpop.f32.mrf.mxu1 }
 0x3d8   :  { %v2842_v7 = vmul.f32 -1.442695, %v1430_v11  ;;  %v1431_v14 = vadd.f32 %v1384_v9, %v1344_v45  ;;  %v2844_v26 = vmul.f32 -1.442695, %v1432_v42  ;;  %v1433_v51 = vadd.f32 %v1425_v47, %v1346_v28 }
 0x3d9   :  { %v1386_v6 = vpop.f32.mrf.mxu0  ;;  %v1427_v5 = vpop.f32.mrf.mxu1 }
 0x3da   :  { %3079 = vpow2.f32 %v2842_v7  ;;  %v2843_v4 = vmul.f32 -1.442695, %v1431_v14  ;;  %v2713_v6 = vld [vmem:[%s5293_s2 + $0x90] sm:$0xff] }
 0x3db   :  { %v1387_v3 = vpop.f32.mrf.mxu0  ;;  %v1428_v1 = vpop.f32.mrf.mxu1 }
 0x3dc   :  { %3081 = vpow2.f32 %v2843_v4  ;;  %v1469_v3 = vunpack.c.l.bf16 %v2713_v6  ;;  %v1470_v1 = vunpack.c.h.bf16 %v2713_v6 }
 0x3dd   :  { %3083 = vpow2.f32 %v2844_v26 }
 0x3e7   :  { %v3080_v25 = vpop.eup %3079 }
 0x3e8   :  { %v1443_v54 = vadd.f32 1.0, %v3080_v25 }
 0x3e9   :  { %v3082_v11 = vpop.eup %3081 }
 0x3ea   :  { %3085 = vrcp.f32 %v1443_v54  ;;  %v1444_v5 = vadd.f32 1.0, %v3082_v11  ;;  %v3084_v0 = vpop.eup %3083 }
 0x3eb   :  { %3087 = vtanh.f32 %v1433_v51  ;;  %v1445_v45 = vadd.f32 1.0, %v3084_v0 }
 0x3ec   :  { %3089 = vrcp.f32 %v1444_v5  ;;  %v2714_v5 = vld [vmem:[%s5293_s2 + $0x98] sm:$0xff] }
 0x3f5   :  { %v1508_v4 = vpop.f32.mrf.mxu0  ;;  %v1549_v7 = vpop.f32.mrf.mxu1 }
 0x3f6   :  { %v1556_v9 = vadd.f32 %v1508_v4, %v1469_v3 }
 0x3f7   :  { %v3086_v13 = vpop.eup %3085  ;;  %v1510_v14 = vpop.f32.mrf.mxu0 }
 0x3f8   :  { %v1551_v28 = vpop.f32.mrf.mxu1  ;;  %v3088_v47 = vpop.eup %3087  ;;  %v2845_v24 = vmul.f32 -1.442695, %v1556_v9  ;;  %v1557_v26 = vadd.f32 %v1510_v14, %v1470_v1  ;;  %v1471_v1 = vunpack.c.l.bf16 %v2714_v5 }
 0x3f9   :  { %v3090_v54 = vpop.eup %3089  ;;  %v1512_v42 = vpop.f32.mrf.mxu0  ;;  %v1454_v11 = vmul.f32 %v3088_v47, %v3086_v13  ;;  %v1472_v13 = vunpack.c.h.bf16 %v2714_v5 }
 0x3fa   :  { %v1553_v25 = vpop.f32.mrf.mxu1  ;;  %v1453_v51 = vmul.f32 %v3090_v54, %v4279_v48  ;;  %3091 = vpow2.f32 %v2845_v24  ;;  %v2846_v6 = vmul.f32 -1.442695, %v1557_v26  ;;  %v1558_v9 = vadd.f32 %v1549_v7, %v1471_v1  ;;  %v1587_v1 = vpop.permute.xlu1 %1586 }
 0x3fb   :  { %v1513_v3 = vpop.f32.mrf.mxu0  ;;  %v1559_v24 = vadd.f32 %v1551_v28, %v1472_v13  ;;  %vm1588_vm1 = vcmp.eq.s32.totalorder %v1587_v1, 1 }
 0x3fc   :  { %v1554_v4 = vpop.f32.mrf.mxu1  ;;  %v1455_v46 = vadd.f32 %v1454_v11, %v1453_v51  ;;  %3093 = vpow2.f32 %v2846_v6  ;;  %v2847_v14 = vmul.f32 -1.442695, %v1558_v9 }
 0x3fd   :  { %3095 = vrcp.f32 %v1445_v45 }
 0x3fe   :  { %3097 = vtanh.f32 %v1455_v46  ;;  %v4549_v0 = vsel %vm1462_vm0, %v1455_v46, %v4279_v48 }
 0x3ff   :  { %3099 = vpow2.f32 %v2847_v14  ;;  %v5457_v14 = vld [vmem:[#allocation7_spill] sm:$0xff] }
 0x407   :  { %v3092_v47 = vpop.eup %3091 }
 0x408   :  { %v1569_v54 = vadd.f32 1.0, %v3092_v47  ;;  %v5458_v47 = vld [vmem:[#allocation13_spill] sm:$0xff] }
 0x409   :  { %v3094_v26 = vpop.eup %3093 }
 0x40a   :  { %v3096_v42 = vpop.eup %3095  ;;  %3101 = vrcp.f32 %v1569_v54  ;;  %v1570_v25 = vadd.f32 1.0, %v3094_v26  ;;  %v5460_v54 = vld [vmem:[#allocation14_spill] sm:$0xff] }
 0x40b   :  { %v3098_v51 = vpop.eup %3097  ;;  %3103 = vtanh.f32 %v1559_v24  ;;  %v5459_v24 = vld [vmem:[#allocation10_spill] sm:$0xff] }
 0x40c   :  { %3105 = vrcp.f32 %v1570_v25  ;;  %v1457_v45 = vmul.f32 %v3098_v51, %v3096_v42  ;;  %v3100_v53 = vpop.eup %3099  ;;  %v5462_v42 = vld [vmem:[#allocation15_spill] sm:$0xff]  ;;  %v5463_v25 = vld [vmem:[#allocation26_spill] sm:$0xff] }
 0x40d   :  { %v1571_v6 = vadd.f32 1.0, %v3100_v53 }
 0x40e   :  { %v4553_v11 = vsel %vm1462_vm0, %v1457_v45, %v4283_v2  ;;  %v1465_v46 = vsel %vm1462_vm0, %v1457_v45, 0.0  ;;  %v5464_v45 = vld [vmem:[#allocation27_spill] sm:$0xff] }
 0x40f   :  { %v1592_v48 = vpack.c.bf16 %v1465_v46, %v1465_v46  ;;  %v1611_v7 = vpack.c.bf16 %v4553_v11, %v4553_v11  ;;  %3107 = vrcp.f32 %v1571_v6  ;;  %v5465_v46 = vld [vmem:[#allocation28_spill] sm:$0xff] }
 0x410   :  { %v45_v6 = vld [vmem:[%s5292_s1 + $0x80] sm:$0xff] }
 0x411   :  { %2848 = vst [vmem:[%s5295_s4 + $0xc] sm:$0xf] %v1592_v48  ;;  %1645 = vmatmul.mubr.bf16.vlgmr.msra.gmra.mxu0 %v1611_v7  ;;  %1686 = vmatmul.mubr.bf16.vlgmr.msra.gmra.mxu1 %v1611_v7 }
 0x412   :  { %1739 = vmatpush1.bf16.msra.mxu0 %v4294_v12  ;;  %1780 = vmatpush1.bf16.msra.mxu1 %v4300_v52 }
 0x413   :  { %1740 = vmatprep.subr.bf16.mxu0 %v4306_v27  ;;  %1781 = vmatprep.subr.bf16.mxu1 %v4312_v33 }
 0x414   :  { %1770 = vmatprep.mubr.bf16.mxu0 %v5406_v59  ;;  %1811 = vmatprep.mubr.bf16.mxu1 %v5406_v59 }
 0x416   :  { %1741 = vmatpush1.bf16.msra.mxu0 %v4320_v29  ;;  %1782 = vmatpush1.bf16.msra.mxu1 %v4326_v34 }
 0x417   :  { %v3102_v2 = vpop.eup %3101  ;;  %1742 = vmatprep.subr.bf16.mxu0 %v4332_v38  ;;  %1783 = vmatprep.subr.bf16.mxu1 %v4338_v44 }
 0x418   :  { %v3104_v28 = vpop.eup %3103 }
 0x419   :  { %v3106_v5 = vpop.eup %3105  ;;  %v1580_v4 = vmul.f32 %v3104_v28, %v3102_v2 }
 0x41a   :  { %v1579_v3 = vmul.f32 %v3106_v5, %v4380_v20  ;;  %1743 = vmatpush1.bf16.msra.mxu0 %v4345_v16  ;;  %1784 = vmatpush1.bf16.msra.mxu1 %v4351_v17  ;;  %v5483_v5 = vld [vmem:[#allocation30_spill] sm:$0xff] }
 0x41b   :  { %1744 = vmatprep.subr.bf16.mxu0 %v4357_v19  ;;  %1785 = vmatprep.subr.bf16.mxu1 %v4363_v23 }
 0x41c   :  { %v1581_v9 = vadd.f32 %v1580_v4, %v1579_v3  ;;  %v3108_v26 = vpop.eup %3107  ;;  %v1607_v3 = vunpack.c.l.bf16 %v45_v6  ;;  %v1608_v4 = vunpack.c.h.bf16 %v45_v6 }
 0x41e   :  { %3109 = vtanh.f32 %v1581_v9  ;;  %1745 = vmatpush1.bf16.msra.mxu0 %v4369_v57  ;;  %1786 = vmatpush1.bf16.msra.mxu1 %v4375_v15  ;;  %v4580_v13 = vsel %vm1588_vm1, %v1581_v9, %v4380_v20  ;;  %v5461_v20 = vld [vmem:[#allocation11_spill] sm:$0xff] }
 0x41f   :  { %1746 = vmatprep.subr.bf16.mxu0 %v4385_v8  ;;  %1787 = vmatprep.subr.bf16.mxu1 %v4391_v18 }
 0x422   :  { %1747 = vmatpush1.bf16.msra.mxu0 %v4397_v10  ;;  %1788 = vmatpush1.bf16.msra.mxu1 %v4403_v39 }
 0x423   :  { %1748 = vmatprep.subr.bf16.mxu0 %v4409_v40  ;;  %1789 = vmatprep.subr.bf16.mxu1 %v5457_v14 }
 0x426   :  { %1749 = vmatpush1.bf16.msra.mxu0 %v5458_v47  ;;  %1790 = vmatpush1.bf16.msra.mxu1 %v5459_v24 }
 0x427   :  { %1750 = vmatprep.subr.bf16.mxu0 %v5460_v54  ;;  %1791 = vmatprep.subr.bf16.mxu1 %v5461_v20 }
 0x42a   :  { %1751 = vmatpush1.bf16.msra.mxu0 %v5462_v42  ;;  %1792 = vmatpush1.bf16.msra.mxu1 %v5463_v25 }
 0x42b   :  { %v3110_v51 = vpop.eup %3109  ;;  %1752 = vmatprep.subr.bf16.mxu0 %v5464_v45  ;;  %1793 = vmatprep.subr.bf16.mxu1 %v5465_v46 }
 0x42c   :  { %v1583_v48 = vmul.f32 %v3110_v51, %v3108_v26 }
 0x42e   :  { %1753 = vmatpush1.bf16.msra.mxu0 %v4469_v43  ;;  %1794 = vmatpush1.bf16.msra.mxu1 %v4475_v41  ;;  %v4600_v7 = vsel %vm1588_vm1, %v1583_v48, %v4480_v49  ;;  %v1591_v53 = vsel %vm1588_vm1, %v1583_v48, 0.0  ;;  %v5482_v49 = vld [vmem:[#allocation12_spill] sm:$0xff] }
 0x42f   :  { %v1595_v2 = vpack.c.bf16 %v1591_v53, %v1591_v53  ;;  %v1737_v28 = vpack.c.bf16 %v4600_v7, %v4600_v7  ;;  %1876 = vmatprep.subr.bf16.mxu0 %v4068_v55  ;;  %1917 = vmatprep.subr.bf16.mxu1 %v4074_v37  ;;  %v5466_v55 = vld [vmem:[#allocation16_spill] sm:$0xff] }
 0x430   :  { %v5467_v37 = vld [vmem:[#allocation20_spill] sm:$0xff] }
 0x431   :  { %2849 = vst [vmem:[%s5296_s5 + $0x10] sm:$0xf] %v1595_v2  ;;  %1771 = vmatmul.mubr.bf16.vlgmr.msra.gmra.mxu0 %v1737_v28  ;;  %1812 = vmatmul.mubr.bf16.vlgmr.msra.gmra.mxu1 %v1737_v28 }
 0x432   :  { %1877 = vmatpush1.bf16.msra.mxu0 %v4083_v56  ;;  %1918 = vmatpush1.bf16.msra.mxu1 %v4089_v60  ;;  %v5468_v56 = vld [vmem:[#allocation17_spill] sm:$0xff] }
 0x433   :  { %1878 = vmatprep.subr.bf16.mxu0 %v4095_v61  ;;  %1919 = vmatprep.subr.bf16.mxu1 %v4101_v63  ;;  %v5469_v60 = vld [vmem:[#allocation21_spill] sm:$0xff]  ;;  %v5470_v61 = vld [vmem:[#allocation18_spill] sm:$0xff]  ;;  %v5471_v63 = vld [vmem:[#allocation24_spill] sm:$0xff] }
 0x434   :  { %1908 = vmatprep.mubr.bf16.mxu0 %v5406_v59  ;;  %1949 = vmatprep.mubr.bf16.mxu1 %v5406_v59 }
 0x436   :  { %1879 = vmatpush1.bf16.msra.mxu0 %v4109_v35  ;;  %1920 = vmatpush1.bf16.msra.mxu1 %v4115_v36  ;;  %v5472_v35 = vld [vmem:[#allocation19_spill] sm:$0xff]  ;;  %v5473_v36 = vld [vmem:[#allocation25_spill] sm:$0xff] }
 0x437   :  { %1880 = vmatprep.subr.bf16.mxu0 %v4121_v58  ;;  %1921 = vmatprep.subr.bf16.mxu1 %v4127_v30  ;;  %v5474_v58 = vld [vmem:[#allocation22_spill] sm:$0xff]  ;;  %v5475_v30 = vld [vmem:[#allocation23_spill] sm:$0xff] }
 0x43a   :  { %1881 = vmatpush1.bf16.msra.mxu0 %v4133_v31  ;;  %1922 = vmatpush1.bf16.msra.mxu1 %v4139_v22  ;;  %v5476_v31 = vld [vmem:[#allocation4_spill] sm:$0xff] }
 0x43b   :  { %1882 = vmatprep.subr.bf16.mxu0 %v4145_v50  ;;  %1923 = vmatprep.subr.bf16.mxu1 %v4151_v62  ;;  %v5477_v22 = vld [vmem:[#allocation8_spill] sm:$0xff]  ;;  %v5478_v50 = vld [vmem:[#allocation5_spill] sm:$0xff] }
 0x43c   :  { %v5479_v62 = vld [vmem:[#allocation9_spill] sm:$0xff] }
 0x43e   :  { %1883 = vmatpush1.bf16.msra.mxu0 %v4157_v32  ;;  %1924 = vmatpush1.bf16.msra.mxu1 %v4163_v21  ;;  %v5480_v32 = vld [vmem:[#allocation6_spill] sm:$0xff]  ;;  %v5481_v21 = vld [vmem:[#allocation29_spill] sm:$0xff] }
 0x43f   :  { %1884 = vmatprep.subr.bf16.mxu0 %v5466_v55  ;;  %1925 = vmatprep.subr.bf16.mxu1 %v5467_v37  ;;  %v47_v37 = vld [vmem:[%s5292_s1 + $0x88] sm:$0xff] }
 0x442   :  { %1885 = vmatpush1.bf16.msra.mxu0 %v5468_v56  ;;  %1926 = vmatpush1.bf16.msra.mxu1 %v5469_v60 }
 0x443   :  { %1886 = vmatprep.subr.bf16.mxu0 %v5470_v61  ;;  %1927 = vmatprep.subr.bf16.mxu1 %v5471_v63  ;;  %v1609_v63 = vunpack.c.l.bf16 %v47_v37 }
 0x446   :  { %1887 = vmatpush1.bf16.msra.mxu0 %v5472_v35  ;;  %1928 = vmatpush1.bf16.msra.mxu1 %v5473_v36  ;;  %v1610_v36 = vunpack.c.h.bf16 %v47_v37 }
 0x447   :  { %1888 = vmatprep.subr.bf16.mxu0 %v5474_v58  ;;  %1929 = vmatprep.subr.bf16.mxu1 %v5475_v30 }
 0x44a   :  { %1889 = vmatpush1.bf16.msra.mxu0 %v5476_v31  ;;  %1930 = vmatpush1.bf16.msra.mxu1 %v5477_v22 }
 0x44b   :  { %1890 = vmatprep.subr.bf16.mxu0 %v5478_v50  ;;  %1931 = vmatprep.subr.bf16.mxu1 %v5479_v62 }
 0x44e   :  { %1891 = vmatpush1.bf16.msra.mxu0 %v5480_v32  ;;  %1932 = vmatpush1.bf16.msra.mxu1 %v5481_v21  ;;  %v2711_v32 = vld [vmem:[%s5293_s2 + $0x70] sm:$0xff] }
 0x44f   :  { %2002 = vmatprep.subr.bf16.mxu0 %v5482_v49  ;;  %2043 = vmatprep.subr.bf16.mxu1 %v5483_v5  ;;  %v1733_v49 = vunpack.c.l.bf16 %v2711_v32  ;;  %v1734_v6 = vunpack.c.h.bf16 %v2711_v32 }
 0x4d1   :  { %v1646_v1 = vpop.f32.mrf.mxu0  ;;  %v1687_v9 = vpop.f32.mrf.mxu1 }
 0x4d2   :  { %v1694_v26 = vadd.f32 %v1646_v1, %v1607_v3  ;;  %v1696_v35 = vadd.f32 %v1687_v9, %v1609_v63 }
 0x4d3   :  { %v1648_v51 = vpop.f32.mrf.mxu0  ;;  %v1689_v48 = vpop.f32.mrf.mxu1 }
 0x4d4   :  { %v2850_v53 = vmul.f32 -1.442695, %v1694_v26  ;;  %v1695_v2 = vadd.f32 %v1648_v51, %v1608_v4  ;;  %v2852_v58 = vmul.f32 -1.442695, %v1696_v35  ;;  %v1697_v31 = vadd.f32 %v1689_v48, %v1610_v36  ;;  %v2712_v35 = vld [vmem:[%s5293_s2 + $0x78] sm:$0xff] }
 0x4d5   :  { %v1650_v28 = vpop.f32.mrf.mxu0  ;;  %v1691_v55 = vpop.f32.mrf.mxu1 }
 0x4d6   :  { %3111 = vpow2.f32 %v2850_v53  ;;  %v2851_v56 = vmul.f32 -1.442695, %v1695_v2 }
 0x4d7   :  { %v1651_v60 = vpop.f32.mrf.mxu0  ;;  %v1692_v61 = vpop.f32.mrf.mxu1 }
 0x4d8   :  { %3113 = vpow2.f32 %v2851_v56 }
 0x4d9   :  { %3115 = vpow2.f32 %v2852_v58 }
 0x4e3   :  { %v3112_v30 = vpop.eup %3111 }
 0x4e4   :  { %v1707_v22 = vadd.f32 1.0, %v3112_v30 }
 0x4e5   :  { %v3114_v50 = vpop.eup %3113 }
 0x4e6   :  { %3117 = vrcp.f32 %v1707_v22  ;;  %v1708_v62 = vadd.f32 1.0, %v3114_v50  ;;  %v3116_v1 = vpop.eup %3115  ;;  %v1735_v50 = vunpack.c.l.bf16 %v2712_v35 }
 0x4e7   :  { %3119 = vtanh.f32 %v1697_v31  ;;  %v1709_v37 = vadd.f32 1.0, %v3116_v1  ;;  %v1725_v31 = vpop.permute.xlu0 %1724 }
 0x4e8   :  { %3121 = vrcp.f32 %v1708_v62  ;;  %vm1726_vm2 = vcmp.eq.s32.totalorder %v1725_v31, 1  ;;  %v4873_v31 = vld [vmem:[%s5294_s3 + $0x2c] ss:$16 sps:$4 sm:$0xff]  }
 0x4f1   :  { %v1772_v3 = vpop.f32.mrf.mxu0  ;;  %v1813_v4 = vpop.f32.mrf.mxu1 }
 0x4f2   :  { %v1820_v9 = vadd.f32 %v1772_v3, %v1733_v49  ;;  %v1822_v32 = vadd.f32 %v1813_v4, %v1735_v50  ;;  %v1736_v49 = vunpack.c.h.bf16 %v2712_v35  ;;  %v4849_v35 = vld [vmem:[%s5294_s3 + $0x4c] ss:$16 sps:$4 sm:$0xff]   ;;  %v4885_v50 = vld [vmem:[%s5294_s3 + $0x28] ss:$16 sps:$4 sm:$0xff]  }
 0x4f3   :  { %v3118_v26 = vpop.eup %3117  ;;  %v1774_v51 = vpop.f32.mrf.mxu0 }
 0x4f4   :  { %v1815_v48 = vpop.f32.mrf.mxu1  ;;  %v3120_v53 = vpop.eup %3119  ;;  %v2853_v2 = vmul.f32 -1.442695, %v1820_v9  ;;  %v1821_v28 = vadd.f32 %v1774_v51, %v1734_v6  ;;  %v2855_v6 = vmul.f32 -1.442695, %v1822_v32  ;;  %v4891_v32 = vld [vmem:[%s5294_s3 + $0x4] ss:$16 sps:$4 sm:$0xff]  }
 0x4f5   :  { %v3122_v55 = vpop.eup %3121  ;;  %v1776_v56 = vpop.f32.mrf.mxu0  ;;  %v1718_v63 = vmul.f32 %v3120_v53, %v3118_v26  ;;  %v1823_v1 = vadd.f32 %v1815_v48, %v1736_v49  ;;  %v4897_v49 = vld [vmem:[%s5294_s3 + $0xc] ss:$16 sps:$4 sm:$0xff]  }
 0x4f6   :  { %v1817_v60 = vpop.f32.mrf.mxu1  ;;  %v1717_v61 = vmul.f32 %v3122_v55, %v4549_v0  ;;  %3123 = vpow2.f32 %v2853_v2  ;;  %v2854_v36 = vmul.f32 -1.442695, %v1821_v28 }
 0x4f7   :  { %v1777_v58 = vpop.f32.mrf.mxu0  ;;  %v4831_v60 = vld [vmem:[%s5294_s3 + $0x60] ss:$16 sps:$4 sm:$0xff]  }
 0x4f8   :  { %v1818_v30 = vpop.f32.mrf.mxu1  ;;  %v1719_v22 = vadd.f32 %v1718_v63, %v1717_v61  ;;  %3125 = vpow2.f32 %v2854_v36  ;;  %v4837_v61 = vld [vmem:[%s5294_s3 + $0x68] ss:$16 sps:$4 sm:$0xff]   ;;  %v4843_v63 = vld [vmem:[%s5294_s3 + $0x44] ss:$16 sps:$4 sm:$0xff]   ;;  %v4855_v36 = vld [vmem:[%s5294_s3 + $0x40] ss:$16 sps:$4 sm:$0xff]  }
 0x4f9   :  { %3127 = vrcp.f32 %v1709_v37  ;;  %v4861_v58 = vld [vmem:[%s5294_s3 + $0x48] ss:$16 sps:$4 sm:$0xff]   ;;  %v4867_v30 = vld [vmem:[%s5294_s3 + $0x24] ss:$16 sps:$4 sm:$0xff]  }
 0x4fa   :  { %3129 = vtanh.f32 %v1719_v22  ;;  %v4659_v62 = vsel %vm1726_vm2, %v1719_v22, %v4549_v0  ;;  %v4879_v22 = vld [vmem:[%s5294_s3 + $0x20] ss:$16 sps:$4 sm:$0xff]  }
 0x4fb   :  { %3131 = vpow2.f32 %v2855_v6  ;;  %v4903_v6 = vld [vmem:[%s5294_s3] ss:$16 sps:$4 sm:$0xff]  }
 0x503   :  { %v3124_v3 = vpop.eup %3123 }
 0x504   :  { %v1833_v9 = vadd.f32 1.0, %v3124_v3  ;;  %v4910_v3 = vld [vmem:[%s5294_s3 + $0x1e4] ss:$16 sps:$4 sm:$0xff]  }
 0x505   :  { %v3126_v26 = vpop.eup %3125 }
 0x506   :  { %v3128_v51 = vpop.eup %3127  ;;  %3133 = vrcp.f32 %v1833_v9  ;;  %v1834_v53 = vadd.f32 1.0, %v3126_v26 }
 0x507   :  { %v3130_v2 = vpop.eup %3129  ;;  %3135 = vtanh.f32 %v1823_v1  ;;  %v49_v1 = vld [vmem:[%s5292_s1 + $0xa0] sm:$0xff] }
 0x508   :  { %3137 = vrcp.f32 %v1834_v53  ;;  %v1721_v28 = vmul.f32 %v3130_v2, %v3128_v51  ;;  %v1871_v9 = vunpack.c.l.bf16 %v49_v1  ;;  %v1872_v26 = vunpack.c.h.bf16 %v49_v1 }
 0x50a   :  { %v4663_v55 = vsel %vm1726_vm2, %v1721_v28, %v4553_v11  ;;  %v1729_v0 = vsel %vm1726_vm2, %v1721_v28, 0.0  ;;  %v3132_v11 = vpop.eup %3131 }
 0x50b   :  { %v1856_v4 = vpack.c.bf16 %v1729_v0, %v1729_v0  ;;  %v1875_v48 = vpack.c.bf16 %v4663_v55, %v4663_v55  ;;  %v1835_v56 = vadd.f32 1.0, %v3132_v11 }
 0x50d   :  { %2856 = vst [vmem:[%s5295_s4 + $0x10] sm:$0xf] %v1856_v4  ;;  %1909 = vmatmul.mubr.bf16.vlgmr.msra.gmra.mxu0 %v1875_v48  ;;  %1950 = vmatmul.mubr.bf16.vlgmr.msra.gmra.mxu1 %v1875_v48  ;;  %3139 = vrcp.f32 %v1835_v56 }
 0x50e   :  { %2003 = vmatpush1.bf16.msra.mxu0 %v4294_v12  ;;  %2044 = vmatpush1.bf16.msra.mxu1 %v4300_v52 }
 0x50f   :  { %2004 = vmatprep.subr.bf16.mxu0 %v4306_v27  ;;  %2045 = vmatprep.subr.bf16.mxu1 %v4312_v33 }
 0x510   :  { %2034 = vmatprep.mubr.bf16.mxu0 %v5406_v59  ;;  %2075 = vmatprep.mubr.bf16.mxu1 %v5406_v59 }
 0x512   :  { %2005 = vmatpush1.bf16.msra.mxu0 %v4320_v29  ;;  %2046 = vmatpush1.bf16.msra.mxu1 %v4326_v34  ;;  %v1851_v29 = vpop.permute.xlu1 %1850 }
 0x513   :  { %v3134_v37 = vpop.eup %3133  ;;  %2006 = vmatprep.subr.bf16.mxu0 %v4332_v38  ;;  %2047 = vmatprep.subr.bf16.mxu1 %v4338_v44  ;;  %vm1852_vm3 = vcmp.eq.s32.totalorder %v1851_v29, 1 }
 0x514   :  { %v3136_v12 = vpop.eup %3135 }
 0x515   :  { %v3138_v52 = vpop.eup %3137  ;;  %v1844_v33 = vmul.f32 %v3136_v12, %v3134_v37 }
 0x516   :  { %v1843_v27 = vmul.f32 %v3138_v52, %v4580_v13  ;;  %2007 = vmatpush1.bf16.msra.mxu0 %v4345_v16  ;;  %2048 = vmatpush1.bf16.msra.mxu1 %v4351_v17 }
 0x517   :  { %2008 = vmatprep.subr.bf16.mxu0 %v4357_v19  ;;  %2049 = vmatprep.subr.bf16.mxu1 %v4363_v23 }
 0x518   :  { %v1845_v34 = vadd.f32 %v1844_v33, %v1843_v27 }
 0x51a   :  { %3141 = vtanh.f32 %v1845_v34  ;;  %2009 = vmatpush1.bf16.msra.mxu0 %v4369_v57  ;;  %2050 = vmatpush1.bf16.msra.mxu1 %v4375_v15  ;;  %v4690_v38 = vsel %vm1852_vm3, %v1845_v34, %v4580_v13  ;;  %v3140_v44 = vpop.eup %3139  ;;  %v4765_v13 = vld [vmem:[%s5294_s3 + $0xc8] ss:$16 sps:$4 sm:$0xff]  }
 0x51b   :  { %2010 = vmatprep.subr.bf16.mxu0 %v4385_v8  ;;  %2051 = vmatprep.subr.bf16.mxu1 %v4391_v18  ;;  %v4718_v8 = vld [vmem:[%s5294_s3 + $0xe4] ss:$16 sps:$4 sm:$0xff]   ;;  %v4724_v18 = vld [vmem:[%s5294_s3 + $0xec] ss:$16 sps:$4 sm:$0xff]  }
 0x51e   :  { %2011 = vmatpush1.bf16.msra.mxu0 %v4397_v10  ;;  %2052 = vmatpush1.bf16.msra.mxu1 %v4403_v39  ;;  %v4733_v10 = vld [vmem:[%s5294_s3 + $0xe0] ss:$16 sps:$4 sm:$0xff]   ;;  %v4739_v39 = vld [vmem:[%s5294_s3 + $0xe8] ss:$16 sps:$4 sm:$0xff]  }
 0x51f   :  { %2012 = vmatprep.subr.bf16.mxu0 %v4409_v40  ;;  %2053 = vmatprep.subr.bf16.mxu1 %v5457_v14  ;;  %v4745_v40 = vld [vmem:[%s5294_s3 + $0xc4] ss:$16 sps:$4 sm:$0xff]  }
 0x520   :  { %v4771_v14 = vld [vmem:[%s5294_s3 + $0xa4] ss:$16 sps:$4 sm:$0xff]  }
 0x522   :  { %2013 = vmatpush1.bf16.msra.mxu0 %v5458_v47  ;;  %2054 = vmatpush1.bf16.msra.mxu1 %v5459_v24  ;;  %v4777_v47 = vld [vmem:[%s5294_s3 + $0xac] ss:$16 sps:$4 sm:$0xff]   ;;  %v4783_v24 = vld [vmem:[%s5294_s3 + $0xa0] ss:$16 sps:$4 sm:$0xff]  }
 0x523   :  { %2014 = vmatprep.subr.bf16.mxu0 %v5460_v54  ;;  %2055 = vmatprep.subr.bf16.mxu1 %v5461_v20  ;;  %v4789_v54 = vld [vmem:[%s5294_s3 + $0xa8] ss:$16 sps:$4 sm:$0xff]   ;;  %v4795_v20 = vld [vmem:[%s5294_s3 + $0x84] ss:$16 sps:$4 sm:$0xff]  }
 0x526   :  { %2015 = vmatpush1.bf16.msra.mxu0 %v5462_v42  ;;  %2056 = vmatpush1.bf16.msra.mxu1 %v5463_v25  ;;  %v4801_v42 = vld [vmem:[%s5294_s3 + $0x8c] ss:$16 sps:$4 sm:$0xff]   ;;  %v4807_v25 = vld [vmem:[%s5294_s3 + $0x80] ss:$16 sps:$4 sm:$0xff]  }
 0x527   :  { %v3142_v16 = vpop.eup %3141  ;;  %2016 = vmatprep.subr.bf16.mxu0 %v5464_v45  ;;  %2057 = vmatprep.subr.bf16.mxu1 %v5465_v46  ;;  %v4813_v45 = vld [vmem:[%s5294_s3 + $0x88] ss:$16 sps:$4 sm:$0xff]   ;;  %v4819_v46 = vld [vmem:[%s5294_s3 + $0x64] ss:$16 sps:$4 sm:$0xff]  }
 0x528   :  { %v1847_v17 = vmul.f32 %v3142_v16, %v3140_v44 }
 0x52a   :  { %2017 = vmatpush1.bf16.msra.mxu0 %v4469_v43  ;;  %2058 = vmatpush1.bf16.msra.mxu1 %v4475_v41  ;;  %v4710_v19 = vsel %vm1852_vm3, %v1847_v17, %v4600_v7  ;;  %v1855_v23 = vsel %vm1852_vm3, %v1847_v17, 0.0  ;;  %v4751_v41 = vld [vmem:[%s5294_s3 + $0xcc] ss:$16 sps:$4 sm:$0xff]   ;;  %v4759_v43 = vld [vmem:[%s5294_s3 + $0xc0] ss:$16 sps:$4 sm:$0xff]  }
 0x52b   :  { %v1859_v57 = vpack.c.bf16 %v1855_v23, %v1855_v23  ;;  %v2001_v15 = vpack.c.bf16 %v4710_v19, %v4710_v19  ;;  %2140 = vmatprep.subr.bf16.mxu0 %v4718_v8  ;;  %2181 = vmatprep.subr.bf16.mxu1 %v4724_v18  ;;  %v4825_v7 = vld [vmem:[%s5294_s3 + $0x6c] ss:$16 sps:$4 sm:$0xff]  }
 0x52d   :  { %2857 = vst [vmem:[%s5296_s5 + $0xc] sm:$0xf] %v1859_v57  ;;  %2035 = vmatmul.mubr.bf16.vlgmr.msra.gmra.mxu0 %v2001_v15  ;;  %2076 = vmatmul.mubr.bf16.vlgmr.msra.gmra.mxu1 %v2001_v15  ;;  %v2709_v57 = vld [vmem:[%s5293_s2 + $0x50] sm:$0xff] }
 0x52e   :  { %2141 = vmatpush1.bf16.msra.mxu0 %v4733_v10  ;;  %2182 = vmatpush1.bf16.msra.mxu1 %v4739_v39  ;;  %v1997_v15 = vunpack.c.l.bf16 %v2709_v57  ;;  %v1998_v1 = vunpack.c.h.bf16 %v2709_v57 }
 0x52f   :  { %2142 = vmatprep.subr.bf16.mxu0 %v4745_v40  ;;  %2183 = vmatprep.subr.bf16.mxu1 %v4751_v41 }
 0x530   :  { %2172 = vmatprep.mubr.bf16.mxu0 %v5406_v59  ;;  %2213 = vmatprep.mubr.bf16.mxu1 %v5406_v59 }
 0x532   :  { %2143 = vmatpush1.bf16.msra.mxu0 %v4759_v43  ;;  %2184 = vmatpush1.bf16.msra.mxu1 %v4765_v13 }
 0x533   :  { %2144 = vmatprep.subr.bf16.mxu0 %v4771_v14  ;;  %2185 = vmatprep.subr.bf16.mxu1 %v4777_v47 }
 0x536   :  { %2145 = vmatpush1.bf16.msra.mxu0 %v4783_v24  ;;  %2186 = vmatpush1.bf16.msra.mxu1 %v4789_v54 }
 0x537   :  { %2146 = vmatprep.subr.bf16.mxu0 %v4795_v20  ;;  %2187 = vmatprep.subr.bf16.mxu1 %v4801_v42 }
 0x53a   :  { %2147 = vmatpush1.bf16.msra.mxu0 %v4807_v25  ;;  %2188 = vmatpush1.bf16.msra.mxu1 %v4813_v45 }
 0x53b   :  { %2148 = vmatprep.subr.bf16.mxu0 %v4819_v46  ;;  %2189 = vmatprep.subr.bf16.mxu1 %v4825_v7 }
 0x53e   :  { %2149 = vmatpush1.bf16.msra.mxu0 %v4831_v60  ;;  %2190 = vmatpush1.bf16.msra.mxu1 %v4837_v61 }
 0x53f   :  { %2150 = vmatprep.subr.bf16.mxu0 %v4843_v63  ;;  %2191 = vmatprep.subr.bf16.mxu1 %v4849_v35 }
 0x542   :  { %2151 = vmatpush1.bf16.msra.mxu0 %v4855_v36  ;;  %2192 = vmatpush1.bf16.msra.mxu1 %v4861_v58 }
 0x543   :  { %2152 = vmatprep.subr.bf16.mxu0 %v4867_v30  ;;  %2193 = vmatprep.subr.bf16.mxu1 %v4873_v31 }
 0x546   :  { %2153 = vmatpush1.bf16.msra.mxu0 %v4879_v22  ;;  %2194 = vmatpush1.bf16.msra.mxu1 %v4885_v50 }
 0x547   :  { %2154 = vmatprep.subr.bf16.mxu0 %v4891_v32  ;;  %2195 = vmatprep.subr.bf16.mxu1 %v4897_v49 }
 0x54a   :  { %2155 = vmatpush1.bf16.msra.mxu0 %v4903_v6  ;;  %2196 = vmatpush1.bf16.msra.mxu1 %v5481_v21 }
 0x54b   :  { %2266 = vmatprep.subr.bf16.mxu0 %v4910_v3  ;;  %2307 = vmatprep.subr.bf16.mxu1 %v5483_v5  ;;  %v51_v5 = vld [vmem:[%s5292_s1 + $0xa8] sm:$0xff] }
 0x54c   :  { %v1873_v56 = vunpack.c.l.bf16 %v51_v5  ;;  %v1874_v33 = vunpack.c.h.bf16 %v51_v5 }
 0x5cd   :  { %v1910_v51 = vpop.f32.mrf.mxu0  ;;  %v1951_v53 = vpop.f32.mrf.mxu1 }
 0x5ce   :  { %v1958_v2 = vadd.f32 %v1910_v51, %v1871_v9  ;;  %v1960_v27 = vadd.f32 %v1951_v53, %v1873_v56 }
 0x5cf   :  { %v1912_v28 = vpop.f32.mrf.mxu0  ;;  %v1953_v21 = vpop.f32.mrf.mxu1 }
 0x5d0   :  { %v2858_v0 = vmul.f32 -1.442695, %v1958_v2  ;;  %v1959_v4 = vadd.f32 %v1912_v28, %v1872_v26  ;;  %v2860_v29 = vmul.f32 -1.442695, %v1960_v27  ;;  %v1961_v44 = vadd.f32 %v1953_v21, %v1874_v33  ;;  %v2710_v27 = vld [vmem:[%s5293_s2 + $0x58] sm:$0xff] }
 0x5d1   :  { %v1914_v48 = vpop.f32.mrf.mxu0  ;;  %v1955_v11 = vpop.f32.mrf.mxu1 }
 0x5d2   :  { %3143 = vpow2.f32 %v2858_v0  ;;  %v2859_v37 = vmul.f32 -1.442695, %v1959_v4 }
 0x5d3   :  { %v1915_v12 = vpop.f32.mrf.mxu0  ;;  %v1956_v52 = vpop.f32.mrf.mxu1 }
 0x5d4   :  { %3145 = vpow2.f32 %v2859_v37 }
 0x5d5   :  { %3147 = vpow2.f32 %v2860_v29 }
 0x5df   :  { %v3144_v34 = vpop.eup %3143 }
 0x5e0   :  { %v1971_v16 = vadd.f32 1.0, %v3144_v34 }
 0x5e1   :  { %v3146_v17 = vpop.eup %3145 }
 0x5e2   :  { %3149 = vrcp.f32 %v1971_v16  ;;  %v1972_v23 = vadd.f32 1.0, %v3146_v17  ;;  %v3148_v51 = vpop.eup %3147  ;;  %v1999_v17 = vunpack.c.l.bf16 %v2710_v27 }
 0x5e3   :  { %3151 = vtanh.f32 %v1961_v44  ;;  %v1973_v5 = vadd.f32 1.0, %v3148_v51  ;;  %v1989_v44 = vpop.permute.xlu0 %1988 }
 0x5e4   :  { %3153 = vrcp.f32 %v1972_v23  ;;  %vm1990_vm4 = vcmp.eq.s32.totalorder %v1989_v44, 1 }
 0x5ed   :  { %v2036_v9 = vpop.f32.mrf.mxu0  ;;  %v2077_v26 = vpop.f32.mrf.mxu1 }
 0x5ee   :  { %v2084_v53 = vadd.f32 %v2036_v9, %v1997_v15  ;;  %v2086_v57 = vadd.f32 %v2077_v26, %v1999_v17  ;;  %v2000_v15 = vunpack.c.h.bf16 %v2710_v27  ;;  %v4976_v27 = vld [vmem:[%s5294_s3 + $0x1c8] ss:$16 sps:$4 sm:$0xff]  }
 0x5ef   :  { %v3150_v2 = vpop.eup %3149  ;;  %v2038_v28 = vpop.f32.mrf.mxu0 }
 0x5f0   :  { %v2079_v21 = vpop.f32.mrf.mxu1  ;;  %v3152_v0 = vpop.eup %3151  ;;  %v2861_v4 = vmul.f32 -1.442695, %v2084_v53  ;;  %v2085_v48 = vadd.f32 %v2038_v28, %v1998_v1  ;;  %v2863_v1 = vmul.f32 -1.442695, %v2086_v57 }
 0x5f1   :  { %v3154_v11 = vpop.eup %3153  ;;  %v2040_v37 = vpop.f32.mrf.mxu0  ;;  %v1982_v56 = vmul.f32 %v3152_v0, %v3150_v2  ;;  %v2087_v51 = vadd.f32 %v2079_v21, %v2000_v15 }
 0x5f2   :  { %v2081_v12 = vpop.f32.mrf.mxu1  ;;  %v1981_v52 = vmul.f32 %v3154_v11, %v4659_v62  ;;  %3155 = vpow2.f32 %v2861_v4  ;;  %v2862_v33 = vmul.f32 -1.442695, %v2085_v48  ;;  %v4956_v37 = vld [vmem:[%s5294_s3 + $0x1c4] ss:$16 sps:$4 sm:$0xff]  }
 0x5f3   :  { %v2041_v29 = vpop.f32.mrf.mxu0  ;;  %v4962_v12 = vld [vmem:[%s5294_s3 + $0x1cc] ss:$16 sps:$4 sm:$0xff]  }
 0x5f4   :  { %v2082_v34 = vpop.f32.mrf.mxu1  ;;  %v1983_v16 = vadd.f32 %v1982_v56, %v1981_v52  ;;  %3157 = vpow2.f32 %v2862_v33  ;;  %v4970_v56 = vld [vmem:[%s5294_s3 + $0x1c0] ss:$16 sps:$4 sm:$0xff]   ;;  %v4982_v29 = vld [vmem:[%s5294_s3 + $0x1a4] ss:$16 sps:$4 sm:$0xff]  }
 0x5f5   :  { %3159 = vrcp.f32 %v1973_v5  ;;  %v4944_v5 = vld [vmem:[%s5294_s3 + $0x1e0] ss:$16 sps:$4 sm:$0xff]   ;;  %v4988_v34 = vld [vmem:[%s5294_s3 + $0x1ac] ss:$16 sps:$4 sm:$0xff]  }
 0x5f6   :  { %3161 = vtanh.f32 %v1983_v16  ;;  %v4929_v23 = vsel %vm1990_vm4, %v1983_v16, %v4659_v62 }
 0x5f7   :  { %3163 = vpow2.f32 %v2863_v1  ;;  %v4995_v1 = vld [vmem:[%s5294_s3 + $0x1a0] ss:$16 sps:$4 sm:$0xff]  }
 0x5ff   :  { %v3156_v9 = vpop.eup %3155 }
 0x600   :  { %v2097_v53 = vadd.f32 1.0, %v3156_v9  ;;  %v5001_v9 = vld [vmem:[%s5294_s3 + $0x1a8] ss:$16 sps:$4 sm:$0xff]  }
 0x601   :  { %v3158_v2 = vpop.eup %3157 }
 0x602   :  { %v3160_v28 = vpop.eup %3159  ;;  %3165 = vrcp.f32 %v2097_v53  ;;  %v2098_v0 = vadd.f32 1.0, %v3158_v2  ;;  %v5013_v53 = vld [vmem:[%s5294_s3 + $0x18c] ss:$16 sps:$4 sm:$0xff]   ;;  %v2115_v2 = vpop.permute.xlu1 %2114 }
 0x603   :  { %v3162_v4 = vpop.eup %3161  ;;  %3167 = vtanh.f32 %v2087_v51  ;;  %v5007_v51 = vld [vmem:[%s5294_s3 + $0x184] ss:$16 sps:$4 sm:$0xff]   ;;  %vm2116_vm5 = vcmp.eq.s32.totalorder %v2115_v2, 1 }
 0x604   :  { %3169 = vrcp.f32 %v2098_v0  ;;  %v1985_v48 = vmul.f32 %v3162_v4, %v3160_v28  ;;  %v3164_v52 = vpop.eup %3163  ;;  %v5019_v0 = vld [vmem:[%s5294_s3 + $0x180] ss:$16 sps:$4 sm:$0xff]   ;;  %v5025_v4 = vld [vmem:[%s5294_s3 + $0x188] ss:$16 sps:$4 sm:$0xff]  }
 0x605   :  { %v2099_v17 = vadd.f32 1.0, %v3164_v52  ;;  %v5059_v52 = vld [vmem:[%s5294_s3 + $0x144] ss:$16 sps:$4 sm:$0xff]  }
 0x606   :  { %v4933_v11 = vsel %vm1990_vm4, %v1985_v48, %v4663_v55  ;;  %v1993_v62 = vsel %vm1990_vm4, %v1985_v48, 0.0  ;;  %v4950_v55 = vld [vmem:[%s5294_s3 + $0x1e8] ss:$16 sps:$4 sm:$0xff]  }
 0x607   :  { %v2120_v26 = vpack.c.bf16 %v1993_v62, %v1993_v62  ;;  %v2139_v21 = vpack.c.bf16 %v4933_v11, %v4933_v11  ;;  %3171 = vrcp.f32 %v2099_v17  ;;  %v5035_v62 = vld [vmem:[%s5294_s3 + $0x164] ss:$16 sps:$4 sm:$0xff]  }
 0x608   :  { %v5083_v17 = vld [vmem:[%s5294_s3 + $0x124] ss:$16 sps:$4 sm:$0xff]  }
 0x609   :  { %2864 = vst [vmem:[%s5295_s4 + $0x14] sm:$0xf] %v2120_v26  ;;  %2173 = vmatmul.mubr.bf16.vlgmr.msra.gmra.mxu0 %v2139_v21  ;;  %2214 = vmatmul.mubr.bf16.vlgmr.msra.gmra.mxu1 %v2139_v21  ;;  %v5041_v26 = vld [vmem:[%s5294_s3 + $0x16c] ss:$16 sps:$4 sm:$0xff]   ;;  %v5047_v21 = vld [vmem:[%s5294_s3 + $0x160] ss:$16 sps:$4 sm:$0xff]  }
 0x60a   :  { %2267 = vmatpush1.bf16.msra.mxu0 %v4944_v5  ;;  %2308 = vmatpush1.bf16.msra.mxu1 %v4950_v55  ;;  %5487 = vst [vmem:[#allocation14_spill] sm:$0xff] %v5083_v17 }
 0x60b   :  { %2268 = vmatprep.subr.bf16.mxu0 %v4956_v37  ;;  %2309 = vmatprep.subr.bf16.mxu1 %v4962_v12 }
 0x60c   :  { %2298 = vmatprep.mubr.bf16.mxu0 %v5406_v59  ;;  %2339 = vmatprep.mubr.bf16.mxu1 %v5406_v59 }
 0x60e   :  { %2269 = vmatpush1.bf16.msra.mxu0 %v4970_v56  ;;  %2310 = vmatpush1.bf16.msra.mxu1 %v4976_v27 }
 0x60f   :  { %v3166_v33 = vpop.eup %3165  ;;  %2270 = vmatprep.subr.bf16.mxu0 %v4982_v29  ;;  %2311 = vmatprep.subr.bf16.mxu1 %v4988_v34 }
 0x610   :  { %v3168_v44 = vpop.eup %3167 }
 0x611   :  { %v3170_v16 = vpop.eup %3169  ;;  %v2108_v15 = vmul.f32 %v3168_v44, %v3166_v33  ;;  %v5065_v33 = vld [vmem:[%s5294_s3 + $0x14c] ss:$16 sps:$4 sm:$0xff]   ;;  %v5071_v44 = vld [vmem:[%s5294_s3 + $0x140] ss:$16 sps:$4 sm:$0xff]  }
 0x612   :  { %v2107_v57 = vmul.f32 %v3170_v16, %v4690_v38  ;;  %2271 = vmatpush1.bf16.msra.mxu0 %v4995_v1  ;;  %2312 = vmatpush1.bf16.msra.mxu1 %v5001_v9  ;;  %5484 = vst [vmem:[#allocation7_spill] sm:$0xff] %v5065_v33  ;;  %5485 = vst [vmem:[#allocation13_spill] sm:$0xff] %v5071_v44  ;;  %v5077_v16 = vld [vmem:[%s5294_s3 + $0x148] ss:$16 sps:$4 sm:$0xff]  }
 0x613   :  { %2272 = vmatprep.subr.bf16.mxu0 %v5007_v51  ;;  %2313 = vmatprep.subr.bf16.mxu1 %v5013_v53  ;;  %5486 = vst [vmem:[#allocation10_spill] sm:$0xff] %v5077_v16 }
 0x614   :  { %v2109_v28 = vadd.f32 %v2108_v15, %v2107_v57  ;;  %v5089_v57 = vld [vmem:[%s5294_s3 + $0x12c] ss:$16 sps:$4 sm:$0xff]   ;;  %v3172_v15 = vpop.eup %3171 }
 0x615   :  { %5488 = vst [vmem:[#allocation11_spill] sm:$0xff] %v5089_v57 }
 0x616   :  { %3173 = vtanh.f32 %v2109_v28  ;;  %2273 = vmatpush1.bf16.msra.mxu0 %v5019_v0  ;;  %2314 = vmatpush1.bf16.msra.mxu1 %v5025_v4  ;;  %v5030_v48 = vsel %vm2116_vm5, %v2109_v28, %v4690_v38  ;;  %v5053_v38 = vld [vmem:[%s5294_s3 + $0x168] ss:$16 sps:$4 sm:$0xff]   ;;  %v5095_v28 = vld [vmem:[%s5294_s3 + $0x120] ss:$16 sps:$4 sm:$0xff]  }
 0x617   :  { %2274 = vmatprep.subr.bf16.mxu0 %v5035_v62  ;;  %2315 = vmatprep.subr.bf16.mxu1 %v5041_v26  ;;  %5489 = vst [vmem:[#allocation15_spill] sm:$0xff] %v5095_v28 }
 0x61a   :  { %2275 = vmatpush1.bf16.msra.mxu0 %v5047_v21  ;;  %2316 = vmatpush1.bf16.msra.mxu1 %v5053_v38 }
 0x61b   :  { %2276 = vmatprep.subr.bf16.mxu0 %v5059_v52  ;;  %2317 = vmatprep.subr.bf16.mxu1 %v5065_v33  ;;  %v5125_v33 = vld [vmem:[%s5294_s3 + $0x108] ss:$16 sps:$4 sm:$0xff]  }
 0x61e   :  { %2277 = vmatpush1.bf16.msra.mxu0 %v5071_v44  ;;  %2318 = vmatpush1.bf16.msra.mxu1 %v5077_v16  ;;  %v5101_v16 = vld [vmem:[%s5294_s3 + $0x128] ss:$16 sps:$4 sm:$0xff]   ;;  %v5113_v44 = vld [vmem:[%s5294_s3 + $0x10c] ss:$16 sps:$4 sm:$0xff]  }
 0x61f   :  { %2278 = vmatprep.subr.bf16.mxu0 %v5083_v17  ;;  %2319 = vmatprep.subr.bf16.mxu1 %v5089_v57  ;;  %5490 = vst [vmem:[#allocation26_spill] sm:$0xff] %v5101_v16  ;;  %v5107_v57 = vld [vmem:[%s5294_s3 + $0x104] ss:$16 sps:$4 sm:$0xff]   ;;  %5492 = vst [vmem:[#allocation28_spill] sm:$0xff] %v5113_v44 }
 0x620   :  { %5491 = vst [vmem:[#allocation27_spill] sm:$0xff] %v5107_v57 }
 0x622   :  { %2279 = vmatpush1.bf16.msra.mxu0 %v5095_v28  ;;  %2320 = vmatpush1.bf16.msra.mxu1 %v5101_v16  ;;  %v5119_v16 = vld [vmem:[%s5294_s3 + $0x100] ss:$16 sps:$4 sm:$0xff]  }
 0x623   :  { %v3174_v17 = vpop.eup %3173  ;;  %2280 = vmatprep.subr.bf16.mxu0 %v5107_v57  ;;  %2321 = vmatprep.subr.bf16.mxu1 %v5113_v44 }
 0x624   :  { %v2111_v28 = vmul.f32 %v3174_v17, %v3172_v15 }
 0x626   :  { %2281 = vmatpush1.bf16.msra.mxu0 %v5119_v16  ;;  %2322 = vmatpush1.bf16.msra.mxu1 %v5125_v33  ;;  %v5130_v57 = vsel %vm2116_vm5, %v2111_v28, %v4710_v19  ;;  %v2119_v17 = vsel %vm2116_vm5, %v2111_v28, 0.0  ;;  %v3365_v19 = vld [vmem:[%s5294_s3 + $0x8] ss:$16 sps:$4 sm:$0xff]  }
 0x627   :  { %v2123_v15 = vpack.c.bf16 %v2119_v17, %v2119_v17  ;;  %v2265_v44 = vpack.c.bf16 %v5130_v57, %v5130_v57  ;;  %2403 = vmatprep.subr.bf16.mxu0 %v4718_v8  ;;  %2444 = vmatprep.subr.bf16.mxu1 %v4724_v18  ;;  %v3366_v8 = vld [vmem:[%s5294_s3 + $0x1ec] ss:$16 sps:$4 sm:$0xff]   ;;  %v53_v18 = vld [vmem:[%s5292_s1 + $0xc0] sm:$0xff] }
 0x629   :  { %2865 = vst [vmem:[%s5296_s5 + $0x8] sm:$0xf] %v2123_v15  ;;  %2299 = vmatmul.mubr.bf16.vlgmr.msra.gmra.mxu0 %v2265_v44  ;;  %2340 = vmatmul.mubr.bf16.vlgmr.msra.gmra.mxu1 %v2265_v44 }
 0x62a   :  { %2404 = vmatpush1.bf16.msra.mxu0 %v4733_v10  ;;  %2445 = vmatpush1.bf16.msra.mxu1 %v4739_v39  ;;  %v2135_v10 = vunpack.c.l.bf16 %v53_v18  ;;  %v2136_v39 = vunpack.c.h.bf16 %v53_v18 }
 0x62b   :  { %2405 = vmatprep.subr.bf16.mxu0 %v4745_v40  ;;  %2446 = vmatprep.subr.bf16.mxu1 %v4751_v41 }
 0x62c   :  { %2435 = vmatprep.mubr.bf16.mxu0 %v5406_v59  ;;  %2476 = vmatprep.mubr.bf16.mxu1 %v5406_v59 }
 0x62e   :  { %2406 = vmatpush1.bf16.msra.mxu0 %v4759_v43  ;;  %2447 = vmatpush1.bf16.msra.mxu1 %v4765_v13 }
 0x62f   :  { %2407 = vmatprep.subr.bf16.mxu0 %v4771_v14  ;;  %2448 = vmatprep.subr.bf16.mxu1 %v4777_v47 }
 0x632   :  { %2408 = vmatpush1.bf16.msra.mxu0 %v4783_v24  ;;  %2449 = vmatpush1.bf16.msra.mxu1 %v4789_v54 }
 0x633   :  { %2409 = vmatprep.subr.bf16.mxu0 %v4795_v20  ;;  %2450 = vmatprep.subr.bf16.mxu1 %v4801_v42  ;;  %v55_v42 = vld [vmem:[%s5292_s1 + $0xc8] sm:$0xff] }
 0x636   :  { %2410 = vmatpush1.bf16.msra.mxu0 %v4807_v25  ;;  %2451 = vmatpush1.bf16.msra.mxu1 %v4813_v45 }
 0x637   :  { %2411 = vmatprep.subr.bf16.mxu0 %v4819_v46  ;;  %2452 = vmatprep.subr.bf16.mxu1 %v4825_v7  ;;  %v2137_v7 = vunpack.c.l.bf16 %v55_v42 }
 0x63a   :  { %2412 = vmatpush1.bf16.msra.mxu0 %v4831_v60  ;;  %2453 = vmatpush1.bf16.msra.mxu1 %v4837_v61  ;;  %v2138_v61 = vunpack.c.h.bf16 %v55_v42 }
 0x63b   :  { %2413 = vmatprep.subr.bf16.mxu0 %v4843_v63  ;;  %2454 = vmatprep.subr.bf16.mxu1 %v4849_v35 }
 0x63e   :  { %2414 = vmatpush1.bf16.msra.mxu0 %v4855_v36  ;;  %2455 = vmatpush1.bf16.msra.mxu1 %v4861_v58 }
 0x63f   :  { %2415 = vmatprep.subr.bf16.mxu0 %v4867_v30  ;;  %2456 = vmatprep.subr.bf16.mxu1 %v4873_v31 }
 0x642   :  { %2416 = vmatpush1.bf16.msra.mxu0 %v4879_v22  ;;  %2457 = vmatpush1.bf16.msra.mxu1 %v4885_v50  ;;  %v2707_v22 = vld [vmem:[%s5293_s2 + $0x30] sm:$0xff] }
 0x643   :  { %2417 = vmatprep.subr.bf16.mxu0 %v4891_v32  ;;  %2458 = vmatprep.subr.bf16.mxu1 %v4897_v49  ;;  %v2261_v50 = vunpack.c.l.bf16 %v2707_v22  ;;  %v2262_v32 = vunpack.c.h.bf16 %v2707_v22 }
 0x646   :  { %2418 = vmatpush1.bf16.msra.mxu0 %v4903_v6  ;;  %2459 = vmatpush1.bf16.msra.mxu1 %v3365_v19 }
 0x647   :  { %2528 = vmatprep.subr.bf16.mxu0 %v4910_v3  ;;  %2569 = vmatprep.subr.bf16.mxu1 %v3366_v8 }
 0x6c9   :  { %v2174_v40 = vpop.f32.mrf.mxu0  ;;  %v2215_v41 = vpop.f32.mrf.mxu1 }
 0x6ca   :  { %v2222_v43 = vadd.f32 %v2174_v40, %v2135_v10  ;;  %v2224_v60 = vadd.f32 %v2215_v41, %v2137_v7 }
 0x6cb   :  { %v2176_v13 = vpop.f32.mrf.mxu0  ;;  %v2217_v14 = vpop.f32.mrf.mxu1 }
 0x6cc   :  { %v2866_v47 = vmul.f32 -1.442695, %v2222_v43  ;;  %v2223_v24 = vadd.f32 %v2176_v13, %v2136_v39  ;;  %v2868_v63 = vmul.f32 -1.442695, %v2224_v60  ;;  %v2225_v36 = vadd.f32 %v2217_v14, %v2138_v61  ;;  %v2708_v13 = vld [vmem:[%s5293_s2 + $0x38] sm:$0xff] }
 0x6cd   :  { %v2178_v54 = vpop.f32.mrf.mxu0  ;;  %v2219_v20 = vpop.f32.mrf.mxu1  ;;  %v2263_v42 = vunpack.c.l.bf16 %v2708_v13 }
 0x6ce   :  { %3175 = vpow2.f32 %v2866_v47  ;;  %v2867_v25 = vmul.f32 -1.442695, %v2223_v24  ;;  %v2253_v54 = vpop.permute.xlu0 %2252 }
 0x6cf   :  { %v2179_v45 = vpop.f32.mrf.mxu0  ;;  %v2220_v46 = vpop.f32.mrf.mxu1  ;;  %vm2254_vm6 = vcmp.eq.s32.totalorder %v2253_v54, 1 }
 0x6d0   :  { %3177 = vpow2.f32 %v2867_v25  ;;  %v2264_v46 = vunpack.c.h.bf16 %v2708_v13 }
 0x6d1   :  { %3179 = vpow2.f32 %v2868_v63 }
 0x6db   :  { %v3176_v35 = vpop.eup %3175 }
 0x6dc   :  { %v2235_v58 = vadd.f32 1.0, %v3176_v35 }
 0x6dd   :  { %v3178_v30 = vpop.eup %3177 }
 0x6de   :  { %3181 = vrcp.f32 %v2235_v58  ;;  %v2236_v31 = vadd.f32 1.0, %v3178_v30  ;;  %v3180_v3 = vpop.eup %3179 }
 0x6df   :  { %3183 = vtanh.f32 %v2225_v36  ;;  %v2237_v10 = vadd.f32 1.0, %v3180_v3 }
 0x6e0   :  { %3185 = vrcp.f32 %v2236_v31 }
 0x6e9   :  { %v2300_v49 = vpop.f32.mrf.mxu0  ;;  %v2341_v6 = vpop.f32.mrf.mxu1 }
 0x6ea   :  { %v2348_v2 = vadd.f32 %v2300_v49, %v2261_v50  ;;  %v2350_v45 = vadd.f32 %v2341_v6, %v2263_v42 }
 0x6eb   :  { %v3182_v44 = vpop.eup %3181  ;;  %v2302_v28 = vpop.f32.mrf.mxu0 }
 0x6ec   :  { %v2343_v17 = vpop.f32.mrf.mxu1  ;;  %v3184_v15 = vpop.eup %3183  ;;  %v2869_v19 = vmul.f32 -1.442695, %v2348_v2  ;;  %v2349_v8 = vadd.f32 %v2302_v28, %v2262_v32  ;;  %v2871_v7 = vmul.f32 -1.442695, %v2350_v45 }
 0x6ed   :  { %v3186_v18 = vpop.eup %3185  ;;  %v2304_v39 = vpop.f32.mrf.mxu0  ;;  %v2246_v43 = vmul.f32 %v3184_v15, %v3182_v44  ;;  %v2351_v61 = vadd.f32 %v2343_v17, %v2264_v46 }
 0x6ee   :  { %v2345_v40 = vpop.f32.mrf.mxu1  ;;  %v2245_v41 = vmul.f32 %v3186_v18, %v4929_v23  ;;  %3187 = vpow2.f32 %v2869_v19  ;;  %v2870_v14 = vmul.f32 -1.442695, %v2349_v8 }
 0x6ef   :  { %v2305_v47 = vpop.f32.mrf.mxu0  ;;  %v59_v40 = vld [vmem:[%s5292_s1 + $0xe8] sm:$0xff] }
 0x6f0   :  { %v2346_v24 = vpop.f32.mrf.mxu1  ;;  %v2247_v20 = vadd.f32 %v2246_v43, %v2245_v41  ;;  %3189 = vpow2.f32 %v2870_v14  ;;  %v2400_v14 = vunpack.c.l.bf16 %v59_v40 }
 0x6f1   :  { %3191 = vrcp.f32 %v2237_v10  ;;  %v2401_v24 = vunpack.c.h.bf16 %v59_v40 }
 0x6f2   :  { %3193 = vtanh.f32 %v2247_v20  ;;  %v5193_v25 = vsel %vm2254_vm6, %v2247_v20, %v4929_v23 }
 0x6f3   :  { %3195 = vpow2.f32 %v2871_v7 }
 0x6fb   :  { %v3188_v60 = vpop.eup %3187 }
 0x6fc   :  { %v2361_v63 = vadd.f32 1.0, %v3188_v60  ;;  %v2705_v60 = vld [vmem:[%s5293_s2 + $0x10] sm:$0xff] }
 0x6fd   :  { %v3190_v35 = vpop.eup %3189 }
 0x6fe   :  { %v3192_v36 = vpop.eup %3191  ;;  %3197 = vrcp.f32 %v2361_v63  ;;  %v2362_v58 = vadd.f32 1.0, %v3190_v35  ;;  %v2524_v63 = vunpack.c.h.bf16 %v2705_v60 }
 0x6ff   :  { %v3194_v30 = vpop.eup %3193  ;;  %3199 = vtanh.f32 %v2351_v61  ;;  %v2523_v61 = vunpack.c.l.bf16 %v2705_v60 }
 0x700   :  { %3201 = vrcp.f32 %v2362_v58  ;;  %v2249_v31 = vmul.f32 %v3194_v30, %v3192_v36 }
 0x702   :  { %v5197_v22 = vsel %vm2254_vm6, %v2249_v31, %v4933_v11  ;;  %v2257_v23 = vsel %vm2254_vm6, %v2249_v31, 0.0  ;;  %v3196_v11 = vpop.eup %3195 }
 0x703   :  { %v2384_v50 = vpack.c.bf16 %v2257_v23, %v2257_v23  ;;  %v2402_v32 = vpack.c.bf16 %v5197_v22, %v5197_v22  ;;  %v2363_v6 = vadd.f32 1.0, %v3196_v11 }
 0x705   :  { %2872 = vst [vmem:[%s5295_s4 + $0x18] sm:$0xf] %v2384_v50  ;;  %2436 = vmatmul.mubr.bf16.vlgmr.msra.gmra.mxu0 %v2402_v32  ;;  %2477 = vmatmul.mubr.bf16.vlgmr.msra.gmra.mxu1 %v2402_v32  ;;  %3203 = vrcp.f32 %v2363_v6 }
 0x706   :  { %2529 = vmatpush1.bf16.msra.mxu0 %v4944_v5  ;;  %2570 = vmatpush1.bf16.msra.mxu1 %v4950_v55 }
 0x707   :  { %2530 = vmatprep.subr.bf16.mxu0 %v4956_v37  ;;  %2571 = vmatprep.subr.bf16.mxu1 %v4962_v12 }
 0x708   :  { %2560 = vmatprep.mubr.bf16.mxu0 %v5406_v59  ;;  %2601 = vmatprep.mubr.bf16.mxu1 %v5406_v59  ;;  %v2379_v59 = vpop.permute.xlu1 %2378 }
 0x709   :  { %vm2380_vm7 = vcmp.eq.s32.totalorder %v2379_v59, 1 }
 0x70a   :  { %2531 = vmatpush1.bf16.msra.mxu0 %v4970_v56  ;;  %2572 = vmatpush1.bf16.msra.mxu1 %v4976_v27 }
 0x70b   :  { %v3198_v49 = vpop.eup %3197  ;;  %2532 = vmatprep.subr.bf16.mxu0 %v4982_v29  ;;  %2573 = vmatprep.subr.bf16.mxu1 %v4988_v34  ;;  %v5493_v29 = vld [vmem:[#allocation7_spill] sm:$0xff]  ;;  %v5494_v34 = vld [vmem:[#allocation13_spill] sm:$0xff] }
 0x70c   :  { %v3200_v5 = vpop.eup %3199 }
 0x70d   :  { %v3202_v55 = vpop.eup %3201  ;;  %v2372_v12 = vmul.f32 %v3200_v5, %v3198_v49 }
 0x70e   :  { %v2371_v37 = vmul.f32 %v3202_v55, %v5030_v48  ;;  %2533 = vmatpush1.bf16.msra.mxu0 %v4995_v1  ;;  %2574 = vmatpush1.bf16.msra.mxu1 %v5001_v9  ;;  %v5495_v1 = vld [vmem:[#allocation10_spill] sm:$0xff] }
 0x70f   :  { %2534 = vmatprep.subr.bf16.mxu0 %v5007_v51  ;;  %2575 = vmatprep.subr.bf16.mxu1 %v5013_v53  ;;  %v5496_v9 = vld [vmem:[#allocation14_spill] sm:$0xff]  ;;  %v5497_v51 = vld [vmem:[#allocation11_spill] sm:$0xff] }
 0x710   :  { %v2373_v56 = vadd.f32 %v2372_v12, %v2371_v37  ;;  %v2516_v12 = vpop.permute.xlu0 %2515 }
 0x711   :  { %vm2517_vm8 = vcmp.eq.s32.totalorder %v2516_v12, 1 }
 0x712   :  { %3205 = vtanh.f32 %v2373_v56  ;;  %2535 = vmatpush1.bf16.msra.mxu0 %v5019_v0  ;;  %2576 = vmatpush1.bf16.msra.mxu1 %v5025_v4  ;;  %v5224_v27 = vsel %vm2380_vm7, %v2373_v56, %v5030_v48  ;;  %v3204_v53 = vpop.eup %3203  ;;  %v5498_v0 = vld [vmem:[#allocation15_spill] sm:$0xff]  ;;  %v5499_v4 = vld [vmem:[#allocation26_spill] sm:$0xff] }
 0x713   :  { %2536 = vmatprep.subr.bf16.mxu0 %v5035_v62  ;;  %2577 = vmatprep.subr.bf16.mxu1 %v5041_v26  ;;  %v5500_v62 = vld [vmem:[#allocation27_spill] sm:$0xff]  ;;  %v5501_v26 = vld [vmem:[#allocation28_spill] sm:$0xff] }
 0x716   :  { %2537 = vmatpush1.bf16.msra.mxu0 %v5047_v21  ;;  %2578 = vmatpush1.bf16.msra.mxu1 %v5053_v38 }
 0x717   :  { %2538 = vmatprep.subr.bf16.mxu0 %v5059_v52  ;;  %2579 = vmatprep.subr.bf16.mxu1 %v5493_v29  ;;  %v2706_v29 = vld [vmem:[%s5293_s2 + $0x18] sm:$0xff] }
 0x71a   :  { %2539 = vmatpush1.bf16.msra.mxu0 %v5494_v34  ;;  %2580 = vmatpush1.bf16.msra.mxu1 %v5495_v1 }
 0x71b   :  { %2540 = vmatprep.subr.bf16.mxu0 %v5496_v9  ;;  %2581 = vmatprep.subr.bf16.mxu1 %v5497_v51 }
 0x71e   :  { %2541 = vmatpush1.bf16.msra.mxu0 %v5498_v0  ;;  %2582 = vmatpush1.bf16.msra.mxu1 %v5499_v4 }
 0x71f   :  { %v3206_v48 = vpop.eup %3205  ;;  %2542 = vmatprep.subr.bf16.mxu0 %v5500_v62  ;;  %2583 = vmatprep.subr.bf16.mxu1 %v5501_v26 }
 0x720   :  { %v2375_v21 = vmul.f32 %v3206_v48, %v3204_v53  ;;  %v2525_v53 = vunpack.c.l.bf16 %v2706_v29  ;;  %v2526_v48 = vunpack.c.h.bf16 %v2706_v29 }
 0x722   :  { %2543 = vmatpush1.bf16.msra.mxu0 %v5119_v16  ;;  %2584 = vmatpush1.bf16.msra.mxu1 %v5125_v33  ;;  %v5244_v38 = vsel %vm2380_vm7, %v2375_v21, %v5130_v57  ;;  %v2383_v52 = vsel %vm2380_vm7, %v2375_v21, 0.0  ;;  %v57_v33 = vld [vmem:[%s5292_s1 + $0xe0] sm:$0xff] }
 0x723   :  { %v2387_v3 = vpack.c.bf16 %v2383_v52, %v2383_v52  ;;  %v2527_v2 = vpack.c.bf16 %v5244_v38, %v5244_v38  ;;  %v2398_v16 = vunpack.c.l.bf16 %v57_v33  ;;  %v2399_v44 = vunpack.c.h.bf16 %v57_v33 }
 0x725   :  { %2873 = vst [vmem:[%s5296_s5 + $0x4] sm:$0xf] %v2387_v3  ;;  %2561 = vmatmul.mubr.bf16.vlgmr.msra.gmra.mxu0 %v2527_v2  ;;  %2602 = vmatmul.mubr.bf16.vlgmr.msra.gmra.mxu1 %v2527_v2 }
 0x7c5   :  { %v2437_v57 = vpop.f32.mrf.mxu0  ;;  %v2478_v28 = vpop.f32.mrf.mxu1 }
 0x7c6   :  { %v2485_v17 = vadd.f32 %v2437_v57, %v2398_v16  ;;  %v2487_v47 = vadd.f32 %v2478_v28, %v2400_v14 }
 0x7c7   :  { %v2439_v15 = vpop.f32.mrf.mxu0  ;;  %v2480_v19 = vpop.f32.mrf.mxu1 }
 0x7c8   :  { %v2874_v8 = vmul.f32 -1.442695, %v2485_v17  ;;  %v2486_v18 = vadd.f32 %v2439_v15, %v2399_v44  ;;  %v2876_v54 = vmul.f32 -1.442695, %v2487_v47  ;;  %v2488_v42 = vadd.f32 %v2480_v19, %v2401_v24 }
 0x7c9   :  { %v2441_v10 = vpop.f32.mrf.mxu0  ;;  %v2482_v39 = vpop.f32.mrf.mxu1 }
 0x7ca   :  { %3207 = vpow2.f32 %v2874_v8  ;;  %v2875_v41 = vmul.f32 -1.442695, %v2486_v18  ;;  %v2641_v10 = vpop.permute.xlu1 %2640 }
 0x7cb   :  { %v2442_v43 = vpop.f32.mrf.mxu0  ;;  %v2483_v13 = vpop.f32.mrf.mxu1  ;;  %vm2642_vm9 = vcmp.eq.s32.totalorder %v2641_v10, 1 }
 0x7cc   :  { %3209 = vpow2.f32 %v2875_v41 }
 0x7cd   :  { %3211 = vpow2.f32 %v2876_v54 }
 0x7d7   :  { %v3208_v20 = vpop.eup %3207 }
 0x7d8   :  { %v2498_v45 = vadd.f32 1.0, %v3208_v20 }
 0x7d9   :  { %v3210_v46 = vpop.eup %3209 }
 0x7da   :  { %3213 = vrcp.f32 %v2498_v45  ;;  %v2499_v7 = vadd.f32 1.0, %v3210_v46  ;;  %v3212_v58 = vpop.eup %3211 }
 0x7db   :  { %3215 = vtanh.f32 %v2488_v42  ;;  %v2500_v55 = vadd.f32 1.0, %v3212_v58 }
 0x7dc   :  { %3217 = vrcp.f32 %v2499_v7 }
 0x7e5   :  { %v2562_v35 = vpop.f32.mrf.mxu0  ;;  %v2603_v36 = vpop.f32.mrf.mxu1 }
 0x7e6   :  { %v2610_v30 = vadd.f32 %v2562_v35, %v2523_v61  ;;  %v2612_v4 = vadd.f32 %v2603_v36, %v2525_v53 }
 0x7e7   :  { %v3214_v31 = vpop.eup %3213  ;;  %v2564_v23 = vpop.f32.mrf.mxu0 }
 0x7e8   :  { %v2605_v50 = vpop.f32.mrf.mxu1  ;;  %v3216_v32 = vpop.eup %3215  ;;  %v2877_v11 = vmul.f32 -1.442695, %v2610_v30  ;;  %v2611_v49 = vadd.f32 %v2564_v23, %v2524_v63  ;;  %v2879_v62 = vmul.f32 -1.442695, %v2612_v4 }
 0x7e9   :  { %v3218_v5 = vpop.eup %3217  ;;  %v2566_v6 = vpop.f32.mrf.mxu0  ;;  %v2509_v56 = vmul.f32 %v3216_v32, %v3214_v31  ;;  %v2613_v21 = vadd.f32 %v2605_v50, %v2526_v48 }
 0x7ea   :  { %v2607_v37 = vpop.f32.mrf.mxu1  ;;  %v2508_v59 = vmul.f32 %v3218_v5, %v5193_v25  ;;  %3219 = vpow2.f32 %v2877_v11  ;;  %v2878_v34 = vmul.f32 -1.442695, %v2611_v49 }
 0x7eb   :  { %v2567_v1 = vpop.f32.mrf.mxu0 }
 0x7ec   :  { %v2608_v9 = vpop.f32.mrf.mxu1  ;;  %v2510_v51 = vadd.f32 %v2509_v56, %v2508_v59  ;;  %3221 = vpow2.f32 %v2878_v34 }
 0x7ed   :  { %3223 = vrcp.f32 %v2500_v55 }
 0x7ee   :  { %3225 = vtanh.f32 %v2510_v51  ;;  %v2519_v0 = vsel %vm2517_vm8, %v2510_v51, %v5193_v25 }
 0x7ef   :  { %2652 = vst [vmem:[%s5298_s7] sm:$0xff] %v2519_v0  ;;  %3227 = vpow2.f32 %v2879_v62 }
 0x7f7   :  { %v3220_v26 = vpop.eup %3219 }
 0x7f8   :  { %v2623_v52 = vadd.f32 1.0, %v3220_v26 }
 0x7f9   :  { %v3222_v3 = vpop.eup %3221 }
 0x7fa   :  { %v3224_v2 = vpop.eup %3223  ;;  %3229 = vrcp.f32 %v2623_v52  ;;  %v2624_v33 = vadd.f32 1.0, %v3222_v3 }
 0x7fb   :  { %v3226_v16 = vpop.eup %3225  ;;  %3231 = vtanh.f32 %v2613_v21 }
 0x7fc   :  { %v2512_v44 = vmul.f32 %v3226_v16, %v3224_v2  ;;  %3233 = vrcp.f32 %v2624_v33  ;;  %v3228_v17 = vpop.eup %3227 }
 0x7fd   :  { %v2625_v18 = vadd.f32 1.0, %v3228_v17 }
 0x7fe   :  { %v2518_v25 = vsel %vm2517_vm8, %v2512_v44, %v5197_v22  ;;  %v2520_v57 = vsel %vm2517_vm8, %v2512_v44, 0.0 }
 0x7ff   :  { %v2646_v28 = vpack.c.bf16 %v2520_v57, %v2520_v57  ;;  %2651 = vst [vmem:[%s5297_s6] sm:$0xff] %v2518_v25  ;;  %3235 = vrcp.f32 %v2625_v18 }
 0x801   :  { %2880 = vst [vmem:[%s5295_s4 + $0x1c] sm:$0xf] %v2646_v28 }
 0x807   :  { %v3230_v15 = vpop.eup %3229 }
 0x808   :  { %v3232_v19 = vpop.eup %3231 }
 0x809   :  { %v3234_v8 = vpop.eup %3233  ;;  %v2634_v22 = vmul.f32 %v3232_v19, %v3230_v15 }
 0x80a   :  { %v2633_v39 = vmul.f32 %v3234_v8, %v5224_v27 }
 0x80c   :  { %v2635_v40 = vadd.f32 %v2634_v22, %v2633_v39  ;;  %v3236_v43 = vpop.eup %3235 }
 0x80e   :  { %3237 = vtanh.f32 %v2635_v40  ;;  %v2644_v41 = vsel %vm2642_vm9, %v2635_v40, %v5224_v27 }
 0x80f   :  { %2882 = vst [vmem:[%s5298_s7 + $0x8] sm:$0xff] %v2644_v41 }
 0x81b   :  { %v3238_v13 = vpop.eup %3237 }
 0x81c   :  { %v2637_v14 = vmul.f32 %v3238_v13, %v3236_v43 }
 0x81e   :  { %v2643_v47 = vsel %vm2642_vm9, %v2637_v14, %v5244_v38  ;;  %v2645_v24 = vsel %vm2642_vm9, %v2637_v14, 0.0 }
 0x81f   :  { %v2649_v54 = vpack.c.bf16 %v2645_v24, %v2645_v24  ;;  %2881 = vst [vmem:[%s5297_s6 + $0x8] sm:$0xff] %v2643_v47 }
 0x821   :  { %2650 = vst [vmem:[%s5296_s5] sm:$0xf] %v2649_v54 }

</bundles_post_ra>
